<compile_context>
chip_gen: v5e
topology: v5e:2x2
jax: 0.10.0
libtpu: 0.0.40
codegen_flags: <defaults>
</compile_context>

<pallas_src>
import math
from functools import partial

import jax
import jax.numpy as jnp
from jax.experimental import pallas as pl
from jax.experimental.pallas import tpu as pltpu

LN_EPS = 1e-5


# ----------------------------- in-kernel helpers ---------------------------

def _ln(x, g, b):
    """LayerNorm over the last dim in f32 (PyTorch default eps=1e-5)."""
    mu = jnp.mean(x, axis=-1, keepdims=True)
    var = jnp.mean(jnp.square(x - mu), axis=-1, keepdims=True)
    return (x - mu) * jax.lax.rsqrt(var + LN_EPS) * g + b


def _mha(q, k, v, wo, bo, *, n_heads, scale):
    """softmax(q k^T * scale) v fused with the output projection.

    q, k, v: (S, D) already projected; wo: (D, D); bo: (1, D).
    Per-head output is immediately contracted with the matching rows of wo and
    accumulated, so neither a K transpose nor a head-concatenate is built.
    """
    d = q.shape[-1]
    dh = d // n_heads
    acc = None
    for h in range(n_heads):
        sl = slice(h * dh, (h + 1) * dh)
        s = jax.lax.dot_general(q[:, sl], k[:, sl],
                                (((1,), (1,)), ((), ())),
                                preferred_element_type=jnp.float32) * scale
        s = s - jnp.max(s, axis=-1, keepdims=True)
        p = jnp.exp(s)
        p = p * pl.reciprocal(jnp.sum(p, axis=-1, keepdims=True), approx=True)
        o_h = jnp.dot(p, v[:, sl], preferred_element_type=jnp.float32)
        contrib = jnp.dot(o_h, wo[sl, :], preferred_element_type=jnp.float32)
        acc = contrib if acc is None else acc + contrib
    return acc + bo


# ----------------------------- Pallas kernels ------------------------------

def _embed_kernel(x_ref, w_ref, b_ref, add_ref, start_ref, x0_ref):
    # start = input_projection(x); x0 = PE(start) + pos_emb + start
    #                                 = 2*start + pe + pos_emb   (dropout = id)
    start = (jnp.dot(x_ref[...], w_ref[...], preferred_element_type=jnp.float32)
             + b_ref[...])
    start_ref[...] = start.astype(start_ref.dtype)
    x0_ref[...] = (2.0 * start + add_ref[...]).astype(x0_ref.dtype)


def _enc_layer_kernel(x_ref,
                      wqkv_ref, bqkv_ref, wo_ref, bo_ref, ln1g_ref, ln1b_ref,
                      w1_ref, b1_ref, w2_ref, b2_ref, ln2g_ref, ln2b_ref,
                      o_ref, *, n_heads, scale):
    x = x_ref[...].astype(jnp.float32)
    d = x.shape[-1]

    # --- self attention (fused QKV + out-proj) + add & norm ---
    qkv = (jnp.dot(x, wqkv_ref[...], preferred_element_type=jnp.float32)
           + bqkv_ref[...])
    sa = _mha(qkv[:, 0:d], qkv[:, d:2 * d], qkv[:, 2 * d:3 * d],
              wo_ref[...], bo_ref[...], n_heads=n_heads, scale=scale)
    x = _ln(x + sa, ln1g_ref[...], ln1b_ref[...])

    # --- FFN + add & norm ---
    h = jnp.maximum(jnp.dot(x, w1_ref[...], preferred_element_type=jnp.float32)
                    + b1_ref[...], 0.0)
    f = jnp.dot(h, w2_ref[...], preferred_element_type=jnp.float32) + b2_ref[...]
    o_ref[...] = _ln(x + f, ln2g_ref[...], ln2b_ref[...]).astype(o_ref.dtype)


def _dec_layer_kernel(x_ref, mem_ref,
                      wqkv_ref, bqkv_ref, wo1_ref, bo1_ref, ln1g_ref, ln1b_ref,
                      wq2_ref, bq2_ref, wkv2_ref, bkv2_ref, wo2_ref, bo2_ref,
                      ln2g_ref, ln2b_ref,
                      w1_ref, b1_ref, w2_ref, b2_ref, ln3g_ref, ln3b_ref,
                      o_ref, *, n_heads, scale):
    x = x_ref[...].astype(jnp.float32)
    mem = mem_ref[...].astype(jnp.float32)
    d = x.shape[-1]

    # --- self attention + add & norm (tgt_mask=None in the reference) ---
    qkv = (jnp.dot(x, wqkv_ref[...], preferred_element_type=jnp.float32)
           + bqkv_ref[...])
    sa = _mha(qkv[:, 0:d], qkv[:, d:2 * d], qkv[:, 2 * d:3 * d],
              wo1_ref[...], bo1_ref[...], n_heads=n_heads, scale=scale)
    x = _ln(x + sa, ln1g_ref[...], ln1b_ref[...])

    # --- cross attention (q from x, k/v from memory) + add & norm ---
    q = jnp.dot(x, wq2_ref[...], preferred_element_type=jnp.float32) + bq2_ref[...]
    kv = (jnp.dot(mem, wkv2_ref[...], preferred_element_type=jnp.float32)
          + bkv2_ref[...])
    ca = _mha(q, kv[:, 0:d], kv[:, d:2 * d],
              wo2_ref[...], bo2_ref[...], n_heads=n_heads, scale=scale)
    x = _ln(x + ca, ln2g_ref[...], ln2b_ref[...])

    # --- FFN + add & norm ---
    h = jnp.maximum(jnp.dot(x, w1_ref[...], preferred_element_type=jnp.float32)
                    + b1_ref[...], 0.0)
    f = jnp.dot(h, w2_ref[...], preferred_element_type=jnp.float32) + b2_ref[...]
    o_ref[...] = _ln(x + f, ln3g_ref[...], ln3b_ref[...]).astype(o_ref.dtype)


# ----------------------------- kernel wrappers ------------------------------

def _const_spec(arr):
    # full-array block, same block every grid step -> DMA'd once
    return pl.BlockSpec(arr.shape, lambda b: (0, 0))


def embed(x2d, w, bias, add, *, batch, seq):
    """x2d: (B*S, n_in) -> (start, x0), both (B*S, D)."""
    n_in = x2d.shape[-1]
    d = w.shape[-1]
    row_in = pl.BlockSpec((seq, n_in), lambda b: (b, 0))
    row_out = pl.BlockSpec((seq, d), lambda b: (b, 0))
    out_sds = jax.ShapeDtypeStruct((batch * seq, d), x2d.dtype)
    return pl.pallas_call(
        _embed_kernel,
        out_shape=(out_sds, out_sds),
        grid=(batch,),
        in_specs=[row_in, _const_spec(w), _const_spec(bias), _const_spec(add)],
        out_specs=(row_out, row_out),
        compiler_params=pltpu.CompilerParams(dimension_semantics=("parallel",)),
    )(x2d, w, bias, add)


def encoder_layer(x2d, p, *, n_heads, batch, seq):
    d = x2d.shape[-1]
    scale = 1.0 / math.sqrt(d // n_heads)
    w = [p['wqkv'], p['bqkv'], p['wo'], p['bo'], p['ln1_g'], p['ln1_b'],
         p['w1'], p['b1'], p['w2'], p['b2'], p['ln2_g'], p['ln2_b']]
    row = pl.BlockSpec((seq, d), lambda b: (b, 0))
    return pl.pallas_call(
        partial(_enc_layer_kernel, n_heads=n_heads, scale=scale),
        out_shape=jax.ShapeDtypeStruct(x2d.shape, x2d.dtype),
        grid=(batch,),
        in_specs=[row] + [_const_spec(a) for a in w],
        out_specs=row,
        compiler_params=pltpu.CompilerParams(dimension_semantics=("parallel",)),
    )(x2d, *w)


def decoder_layer(x2d, mem2d, p, *, n_heads, batch, seq):
    d = x2d.shape[-1]
    scale = 1.0 / math.sqrt(d // n_heads)
    w = [p['wqkv'], p['bqkv'], p['wo1'], p['bo1'], p['ln1_g'], p['ln1_b'],
         p['wq2'], p['bq2'], p['wkv2'], p['bkv2'], p['wo2'], p['bo2'],
         p['ln2_g'], p['ln2_b'],
         p['w1'], p['b1'], p['w2'], p['b2'], p['ln3_g'], p['ln3_b']]
    row = pl.BlockSpec((seq, d), lambda b: (b, 0))
    return pl.pallas_call(
        partial(_dec_layer_kernel, n_heads=n_heads, scale=scale),
        out_shape=jax.ShapeDtypeStruct(x2d.shape, x2d.dtype),
        grid=(batch,),
        in_specs=[row, row] + [_const_spec(a) for a in w],
        out_specs=row,
        compiler_params=pltpu.CompilerParams(dimension_semantics=("parallel",)),
    )(x2d, mem2d, *w)


# ----------------------------- forward pass ---------------------------------

def transformer_forward(params, src, target_in, n_heads=4):
    b, s, n_enc = src.shape
    pe = params['pe'][:s]                                    # (S, D)

    # ----- encode_in -----
    add_enc = pe + params['input_pos_emb'][:s]               # (S, D)
    src_start, x = embed(src.reshape(b * s, n_enc),
                         params['in_proj_w'], params['in_proj_b'],
                         add_enc, batch=b, seq=s)
    for lp in params['enc_layers']:
        x = encoder_layer(x, lp, n_heads=n_heads, batch=b, seq=s)
    memory = x + src_start                                   # (B*S, D)

    # ----- decode_out -----
    n_dec = target_in.shape[2]
    add_dec = pe + params['target_pos_emb'][:s]
    tgt_start, y = embed(target_in.reshape(b * s, n_dec),
                         params['out_proj_w'], params['out_proj_b'],
                         add_dec, batch=b, seq=s)
    # tgt_mask is built in the PyTorch reference but passed as None -> no mask
    for lp in params['dec_layers']:
        y = decoder_layer(y, memory, lp, n_heads=n_heads, batch=b, seq=s)
    out = y + tgt_start                                      # (B*S, D)

    # final (D->1) and (S->1) projections: too tiny for Pallas, plain jnp
    z = (out @ params['lin_w'] + params['lin_b']).reshape(b, s)   # squeeze(2)
    return z @ params['ziji_w'] + params['ziji_b']                # (B, 1)


# ----------------------------- parameter init ------------------------------

def _make_pe(seq_len, d_model):
    position = jnp.arange(seq_len, dtype=jnp.float32)[:, None]
    div_term = jnp.exp(jnp.arange(0, d_model, 2, dtype=jnp.float32)
                       * (-math.log(10000.0) / d_model))
    pe = jnp.zeros((seq_len, d_model), dtype=jnp.float32)
    pe = pe.at[:, 0::2].set(jnp.sin(position * div_term))
    pe = pe.at[:, 1::2].set(jnp.cos(position * div_term))
    return pe                                                # (S, D)


def _rnd(key, shape, scale=0.05):
    return (scale * jax.random.normal(key, shape)).astype(jnp.float32)


def _enc_layer_params(key, d, d_ff):
    k = jax.random.split(key, 8)
    return dict(
        wqkv=_rnd(k[0], (d, 3 * d)), bqkv=_rnd(k[1], (1, 3 * d)),
        wo=_rnd(k[2], (d, d)), bo=_rnd(k[3], (1, d)),
        ln1_g=jnp.ones((1, d), jnp.float32), ln1_b=jnp.zeros((1, d), jnp.float32),
        w1=_rnd(k[4], (d, d_ff)), b1=_rnd(k[5], (1, d_ff)),
        w2=_rnd(k[6], (d_ff, d)), b2=_rnd(k[7], (1, d)),
        ln2_g=jnp.ones((1, d), jnp.float32), ln2_b=jnp.zeros((1, d), jnp.float32))


def _dec_layer_params(key, d, d_ff):
    k = jax.random.split(key, 14)
    return dict(
        wqkv=_rnd(k[0], (d, 3 * d)), bqkv=_rnd(k[1], (1, 3 * d)),
        wo1=_rnd(k[2], (d, d)), bo1=_rnd(k[3], (1, d)),
        ln1_g=jnp.ones((1, d), jnp.float32), ln1_b=jnp.zeros((1, d), jnp.float32),
        wq2=_rnd(k[4], (d, d)), bq2=_rnd(k[5], (1, d)),
        wkv2=_rnd(k[6], (d, 2 * d)), bkv2=_rnd(k[7], (1, 2 * d)),
        wo2=_rnd(k[8], (d, d)), bo2=_rnd(k[9], (1, d)),
        ln2_g=jnp.ones((1, d), jnp.float32), ln2_b=jnp.zeros((1, d), jnp.float32),
        w1=_rnd(k[10], (d, d_ff)), b1=_rnd(k[11], (1, d_ff)),
        w2=_rnd(k[12], (d_ff, d)), b2=_rnd(k[13], (1, d)),
        ln3_g=jnp.ones((1, d), jnp.float32), ln3_b=jnp.zeros((1, d), jnp.float32))


def init_params(key, n_enc_in, n_dec_in, seq_len, d_model, d_ff,
                n_enc_layers=4, n_dec_layers=4, emb_rows=5000):
    keys = iter(jax.random.split(key, 16 + n_enc_layers + n_dec_layers))
    return dict(
        in_proj_w=_rnd(next(keys), (n_enc_in, d_model)),
        in_proj_b=_rnd(next(keys), (1, d_model)),
        out_proj_w=_rnd(next(keys), (n_dec_in, d_model)),
        out_proj_b=_rnd(next(keys), (1, d_model)),
        lin_w=_rnd(next(keys), (d_model, 1)),
        lin_b=_rnd(next(keys), (1,)),
        ziji_w=_rnd(next(keys), (seq_len, 1)),
        ziji_b=_rnd(next(keys), (1,)),
        input_pos_emb=_rnd(next(keys), (emb_rows, d_model)),
        target_pos_emb=_rnd(next(keys), (emb_rows, d_model)),
        pe=_make_pe(seq_len, d_model),
        enc_layers=[_enc_layer_params(next(keys), d_model, d_ff)
                    for _ in range(n_enc_layers)],
        dec_layers=[_dec_layer_params(next(keys), d_model, d_ff)
                    for _ in range(n_dec_layers)],
    )


# --------------------------------- main -------------------------------------

if __name__ == "__main__":
    B, S = 2, 8
    n_encoder_inputs, n_decoder_inputs = 4, 4
    d_model, n_heads = 32, 4
    d_ff = 5 * d_model

    key = jax.random.PRNGKey(0)
    k_param, k_src, k_tgt = jax.random.split(key, 3)
    params = init_params(k_param, n_encoder_inputs, n_decoder_inputs,
                         S, d_model, d_ff)

    src = jax.random.normal(k_src, (B, S, n_encoder_inputs), dtype=jnp.float32)
    target_in = jax.random.normal(k_tgt, (B, S, n_decoder_inputs),
                                  dtype=jnp.float32)

    fwd = jax.jit(partial(transformer_forward, n_heads=n_heads))
    out = jax.block_until_ready(fwd(params, src, target_in))

    assert out.shape == (B, 1), out.shape
    assert bool(jnp.all(jnp.isfinite(out)))
    print("KERNEL_OK")
</pallas_src>

<mosaic_0001>
module attributes {stable_mosaic.version = 11 : i64} {
  func.func @_embed_kernel(%arg0: i32, %arg1: memref<8x4xf32, #tpu.memory_space<vmem>>, %arg2: memref<4x32xf32, #tpu.memory_space<vmem>>, %arg3: memref<1x32xf32, #tpu.memory_space<vmem>>, %arg4: memref<8x32xf32, #tpu.memory_space<vmem>>, %arg5: memref<8x32xf32, #tpu.memory_space<vmem>>, %arg6: memref<8x32xf32, #tpu.memory_space<vmem>>) attributes {dimension_semantics = [#tpu.dimension_semantics<parallel>], iteration_bounds = array<i64: 2>, scalar_prefetch = 0 : i64, scratch_operands = 0 : i64, tpu.core_type = #tpu.core_type<tc>, window_params = [{transform_indices = @transform_0, window_bounds = array<i64: 8, 4>}, {pipeline_mode = #tpu.pipeline_mode<synchronous>, transform_indices = @transform_1, window_bounds = array<i64: 4, 32>}, {pipeline_mode = #tpu.pipeline_mode<synchronous>, transform_indices = @transform_2, window_bounds = array<i64: 1, 32>}, {pipeline_mode = #tpu.pipeline_mode<synchronous>, transform_indices = @transform_3, window_bounds = array<i64: 8, 32>}, {transform_indices = @transform_4, window_bounds = array<i64: 8, 32>}, {transform_indices = @transform_5, window_bounds = array<i64: 8, 32>}]} {
    %c0 = arith.constant 0 : index
    %c0_0 = arith.constant 0 : index
    %0 = vector.load %arg1[%c0, %c0_0] : memref<8x4xf32, #tpu.memory_space<vmem>>, vector<8x4xf32>
    %c0_1 = arith.constant 0 : index
    %c0_2 = arith.constant 0 : index
    %1 = vector.load %arg2[%c0_1, %c0_2] : memref<4x32xf32, #tpu.memory_space<vmem>>, vector<4x32xf32>
    %cst = arith.constant dense<0.000000e+00> : vector<8x32xf32>
    %2 = tpu.matmul %0, %1, %cst {dimension_numbers = #tpu.dot_dimension_numbers<[1], [0], [0], [1], [0, 0, 1, 1], [], []>} : vector<8x4xf32>, vector<4x32xf32>, vector<8x32xf32> -> vector<8x32xf32>
    %c0_3 = arith.constant 0 : index
    %c0_4 = arith.constant 0 : index
    %3 = vector.load %arg3[%c0_3, %c0_4] : memref<1x32xf32, #tpu.memory_space<vmem>>, vector<1x32xf32>
    %4 = vector.broadcast %3 : vector<1x32xf32> to vector<8x32xf32>
    %5 = arith.addf %2, %4 : vector<8x32xf32>
    %c0_5 = arith.constant 0 : index
    %c0_6 = arith.constant 0 : index
    %6 = vector.load %arg5[%c0_5, %c0_6] : memref<8x32xf32, #tpu.memory_space<vmem>>, vector<8x32xf32>
    tpu.vector_store %arg5[%c0_5, %c0_6], %5 {strides = array<i32>} : memref<8x32xf32, #tpu.memory_space<vmem>>, vector<8x32xf32>,
    %cst_7 = arith.constant 2.000000e+00 : f32
    %7 = vector.broadcast %cst_7 : f32 to vector<8x32xf32>
    %8 = arith.mulf %7, %5 : vector<8x32xf32>
    %c0_8 = arith.constant 0 : index
    %c0_9 = arith.constant 0 : index
    %9 = vector.load %arg4[%c0_8, %c0_9] : memref<8x32xf32, #tpu.memory_space<vmem>>, vector<8x32xf32>
    %10 = arith.addf %8, %9 : vector<8x32xf32>
    %c0_10 = arith.constant 0 : index
    %c0_11 = arith.constant 0 : index
    %11 = vector.load %arg6[%c0_10, %c0_11] : memref<8x32xf32, #tpu.memory_space<vmem>>, vector<8x32xf32>
    tpu.vector_store %arg6[%c0_10, %c0_11], %10 {strides = array<i32>} : memref<8x32xf32, #tpu.memory_space<vmem>>, vector<8x32xf32>,
    return
  }
  func.func @transform_0(%arg0: i32) -> (i32, i32) {
    %c0_i32 = arith.constant 0 : i32
    %c0_i32_0 = arith.constant 0 : i32
    return %arg0, %c0_i32 : i32, i32
  }
  func.func @transform_1(%arg0: i32) -> (i32, i32) {
    %c0_i32 = arith.constant 0 : i32
    %c0_i32_0 = arith.constant 0 : i32
    %c0_i32_1 = arith.constant 0 : i32
    return %c0_i32, %c0_i32_0 : i32, i32
  }
  func.func @transform_2(%arg0: i32) -> (i32, i32) {
    %c0_i32 = arith.constant 0 : i32
    %c0_i32_0 = arith.constant 0 : i32
    %c0_i32_1 = arith.constant 0 : i32
    return %c0_i32, %c0_i32_0 : i32, i32
  }
  func.func @transform_3(%arg0: i32) -> (i32, i32) {
    %c0_i32 = arith.constant 0 : i32
    %c0_i32_0 = arith.constant 0 : i32
    %c0_i32_1 = arith.constant 0 : i32
    return %c0_i32, %c0_i32_0 : i32, i32
  }
  func.func @transform_4(%arg0: i32) -> (i32, i32) {
    %c0_i32 = arith.constant 0 : i32
    %c0_i32_0 = arith.constant 0 : i32
    return %arg0, %c0_i32 : i32, i32
  }
  func.func @transform_5(%arg0: i32) -> (i32, i32) {
    %c0_i32 = arith.constant 0 : i32
    %c0_i32_0 = arith.constant 0 : i32
    return %arg0, %c0_i32 : i32, i32
  }
}

module attributes {stable_mosaic.version = 11 : i64} {
  func.func @_enc_layer_kernel(%arg0: i32, %arg1: memref<8x32xf32, #tpu.memory_space<vmem>>, %arg2: memref<32x96xf32, #tpu.memory_space<vmem>>, %arg3: memref<1x96xf32, #tpu.memory_space<vmem>>, %arg4: memref<32x32xf32, #tpu.memory_space<vmem>>, %arg5: memref<1x32xf32, #tpu.memory_space<vmem>>, %arg6: memref<1x32xf32, #tpu.memory_space<vmem>>, %arg7: memref<1x32xf32, #tpu.memory_space<vmem>>, %arg8: memref<32x160xf32, #tpu.memory_space<vmem>>, %arg9: memref<1x160xf32, #tpu.memory_space<vmem>>, %arg10: memref<160x32xf32, #tpu.memory_space<vmem>>, %arg11: memref<1x32xf32, #tpu.memory_space<vmem>>, %arg12: memref<1x32xf32, #tpu.memory_space<vmem>>, %arg13: memref<1x32xf32, #tpu.memory_space<vmem>>, %arg14: memref<8x32xf32, #tpu.memory_space<vmem>>) attributes {dimension_semantics = [#tpu.dimension_semantics<parallel>], iteration_bounds = array<i64: 2>, scalar_prefetch = 0 : i64, scratch_operands = 0 : i64, tpu.core_type = #tpu.core_type<tc>, window_params = [{transform_indices = @transform_0, window_bounds = array<i64: 8, 32>}, {pipeline_mode = #tpu.pipeline_mode<synchronous>, transform_indices = @transform_1, window_bounds = array<i64: 32, 96>}, {pipeline_mode = #tpu.pipeline_mode<synchronous>, transform_indices = @transform_2, window_bounds = array<i64: 1, 96>}, {pipeline_mode = #tpu.pipeline_mode<synchronous>, transform_indices = @transform_3, window_bounds = array<i64: 32, 32>}, {pipeline_mode = #tpu.pipeline_mode<synchronous>, transform_indices = @transform_4, window_bounds = array<i64: 1, 32>}, {pipeline_mode = #tpu.pipeline_mode<synchronous>, transform_indices = @transform_5, window_bounds = array<i64: 1, 32>}, {pipeline_mode = #tpu.pipeline_mode<synchronous>, transform_indices = @transform_6, window_bounds = array<i64: 1, 32>}, {pipeline_mode = #tpu.pipeline_mode<synchronous>, transform_indices = @transform_7, window_bounds = array<i64: 32, 160>}, {pipeline_mode = #tpu.pipeline_mode<synchronous>, transform_indices = @transform_8, window_bounds = array<i64: 1, 160>}, {pipeline_mode = #tpu.pipeline_mode<synchronous>, transform_indices = @transform_9, window_bounds = array<i64: 160, 32>}, {pipeline_mode = #tpu.pipeline_mode<synchronous>, transform_indices = @transform_10, window_bounds = array<i64: 1, 32>}, {pipeline_mode = #tpu.pipeline_mode<synchronous>, transform_indices = @transform_11, window_bounds = array<i64: 1, 32>}, {pipeline_mode = #tpu.pipeline_mode<synchronous>, transform_indices = @transform_12, window_bounds = array<i64: 1, 32>}, {transform_indices = @transform_13, window_bounds = array<i64: 8, 32>}]} {
    %c0 = arith.constant 0 : index
    %c0_0 = arith.constant 0 : index
    %0 = vector.load %arg1[%c0, %c0_0] : memref<8x32xf32, #tpu.memory_space<vmem>>, vector<8x32xf32>
    %c0_1 = arith.constant 0 : index
    %c0_2 = arith.constant 0 : index
    %1 = vector.load %arg2[%c0_1, %c0_2] : memref<32x96xf32, #tpu.memory_space<vmem>>, vector<32x96xf32>
    %cst = arith.constant dense<0.000000e+00> : vector<8x96xf32>
    %2 = tpu.matmul %0, %1, %cst {dimension_numbers = #tpu.dot_dimension_numbers<[1], [0], [0], [1], [0, 0, 1, 1], [], []>} : vector<8x32xf32>, vector<32x96xf32>, vector<8x96xf32> -> vector<8x96xf32>
    %c0_3 = arith.constant 0 : index
    %c0_4 = arith.constant 0 : index
    %3 = vector.load %arg3[%c0_3, %c0_4] : memref<1x96xf32, #tpu.memory_space<vmem>>, vector<1x96xf32>
    %4 = vector.broadcast %3 : vector<1x96xf32> to vector<8x96xf32>
    %5 = arith.addf %2, %4 : vector<8x96xf32>
    %6 = vector.extract_strided_slice %5 {offsets = [0, 0], sizes = [8, 32], strides = [1, 1]} : vector<8x96xf32> to vector<8x32xf32>
    %7 = vector.extract_strided_slice %5 {offsets = [0, 32], sizes = [8, 32], strides = [1, 1]} : vector<8x96xf32> to vector<8x32xf32>
    %8 = vector.extract_strided_slice %5 {offsets = [0, 64], sizes = [8, 32], strides = [1, 1]} : vector<8x96xf32> to vector<8x32xf32>
    %c0_5 = arith.constant 0 : index
    %c0_6 = arith.constant 0 : index
    %9 = vector.load %arg4[%c0_5, %c0_6] : memref<32x32xf32, #tpu.memory_space<vmem>>, vector<32x32xf32>
    %c0_7 = arith.constant 0 : index
    %c0_8 = arith.constant 0 : index
    %10 = vector.load %arg5[%c0_7, %c0_8] : memref<1x32xf32, #tpu.memory_space<vmem>>, vector<1x32xf32>
    %11 = vector.extract_strided_slice %6 {offsets = [0, 0], sizes = [8, 8], strides = [1, 1]} : vector<8x32xf32> to vector<8x8xf32>
    %12 = vector.extract_strided_slice %7 {offsets = [0, 0], sizes = [8, 8], strides = [1, 1]} : vector<8x32xf32> to vector<8x8xf32>
    %cst_9 = arith.constant dense<0.000000e+00> : vector<8x8xf32>
    %13 = tpu.matmul %11, %12, %cst_9 {dimension_numbers = #tpu.dot_dimension_numbers<[1], [1], [0], [0], [0, 0, 1, 0], [], []>} : vector<8x8xf32>, vector<8x8xf32>, vector<8x8xf32> -> vector<8x8xf32>
    %cst_10 = arith.constant 0.353553385 : f32
    %14 = vector.broadcast %cst_10 : f32 to vector<8x8xf32>
    %15 = arith.mulf %13, %14 : vector<8x8xf32>
    %cst_11 = arith.constant dense<0xFF800000> : vector<8xf32>
    %16 = vector.multi_reduction <maximumf>, %15, %cst_11 [1] : vector<8x8xf32> to vector<8xf32>
    %17 = vector.shape_cast %16 : vector<8xf32> to vector<8x1xf32>
    %18 = vector.broadcast %17 : vector<8x1xf32> to vector<8x8xf32>
    %19 = arith.subf %15, %18 : vector<8x8xf32>
    %20 = math.exp %19 : vector<8x8xf32>
    %cst_12 = arith.constant dense<0.000000e+00> : vector<8xf32>
    %21 = vector.multi_reduction <add>, %20, %cst_12 [1] : vector<8x8xf32> to vector<8xf32>
    %22 = vector.shape_cast %21 : vector<8xf32> to vector<8x1xf32>
    %23 = tpu.reciprocal %22 {approx = true} : vector<8x1xf32> -> vector<8x1xf32>
    %24 = vector.broadcast %23 : vector<8x1xf32> to vector<8x8xf32>
    %25 = arith.mulf %20, %24 : vector<8x8xf32>
    %26 = vector.extract_strided_slice %8 {offsets = [0, 0], sizes = [8, 8], strides = [1, 1]} : vector<8x32xf32> to vector<8x8xf32>
    %cst_13 = arith.constant dense<0.000000e+00> : vector<8x8xf32>
    %27 = tpu.matmul %25, %26, %cst_13 {dimension_numbers = #tpu.dot_dimension_numbers<[1], [0], [0], [1], [0, 0, 1, 1], [], []>} : vector<8x8xf32>, vector<8x8xf32>, vector<8x8xf32> -> vector<8x8xf32>
    %28 = vector.extract_strided_slice %9 {offsets = [0, 0], sizes = [8, 32], strides = [1, 1]} : vector<32x32xf32> to vector<8x32xf32>
    %cst_14 = arith.constant dense<0.000000e+00> : vector<8x32xf32>
    %29 = tpu.matmul %27, %28, %cst_14 {dimension_numbers = #tpu.dot_dimension_numbers<[1], [0], [0], [1], [0, 0, 1, 1], [], []>} : vector<8x8xf32>, vector<8x32xf32>, vector<8x32xf32> -> vector<8x32xf32>
    %30 = vector.extract_strided_slice %6 {offsets = [0, 8], sizes = [8, 8], strides = [1, 1]} : vector<8x32xf32> to vector<8x8xf32>
    %31 = vector.extract_strided_slice %7 {offsets = [0, 8], sizes = [8, 8], strides = [1, 1]} : vector<8x32xf32> to vector<8x8xf32>
    %cst_15 = arith.constant dense<0.000000e+00> : vector<8x8xf32>
    %32 = tpu.matmul %30, %31, %cst_15 {dimension_numbers = #tpu.dot_dimension_numbers<[1], [1], [0], [0], [0, 0, 1, 0], [], []>} : vector<8x8xf32>, vector<8x8xf32>, vector<8x8xf32> -> vector<8x8xf32>
    %cst_16 = arith.constant 0.353553385 : f32
    %33 = vector.broadcast %cst_16 : f32 to vector<8x8xf32>
    %34 = arith.mulf %32, %33 : vector<8x8xf32>
    %cst_17 = arith.constant dense<0xFF800000> : vector<8xf32>
    %35 = vector.multi_reduction <maximumf>, %34, %cst_17 [1] : vector<8x8xf32> to vector<8xf32>
    %36 = vector.shape_cast %35 : vector<8xf32> to vector<8x1xf32>
    %37 = vector.broadcast %36 : vector<8x1xf32> to vector<8x8xf32>
    %38 = arith.subf %34, %37 : vector<8x8xf32>
    %39 = math.exp %38 : vector<8x8xf32>
    %cst_18 = arith.constant dense<0.000000e+00> : vector<8xf32>
    %40 = vector.multi_reduction <add>, %39, %cst_18 [1] : vector<8x8xf32> to vector<8xf32>
    %41 = vector.shape_cast %40 : vector<8xf32> to vector<8x1xf32>
    %42 = tpu.reciprocal %41 {approx = true} : vector<8x1xf32> -> vector<8x1xf32>
    %43 = vector.broadcast %42 : vector<8x1xf32> to vector<8x8xf32>
    %44 = arith.mulf %39, %43 : vector<8x8xf32>
    %45 = vector.extract_strided_slice %8 {offsets = [0, 8], sizes = [8, 8], strides = [1, 1]} : vector<8x32xf32> to vector<8x8xf32>
    %cst_19 = arith.constant dense<0.000000e+00> : vector<8x8xf32>
    %46 = tpu.matmul %44, %45, %cst_19 {dimension_numbers = #tpu.dot_dimension_numbers<[1], [0], [0], [1], [0, 0, 1, 1], [], []>} : vector<8x8xf32>, vector<8x8xf32>, vector<8x8xf32> -> vector<8x8xf32>
    %47 = vector.extract_strided_slice %9 {offsets = [8, 0], sizes = [8, 32], strides = [1, 1]} : vector<32x32xf32> to vector<8x32xf32>
    %cst_20 = arith.constant dense<0.000000e+00> : vector<8x32xf32>
    %48 = tpu.matmul %46, %47, %cst_20 {dimension_numbers = #tpu.dot_dimension_numbers<[1], [0], [0], [1], [0, 0, 1, 1], [], []>} : vector<8x8xf32>, vector<8x32xf32>, vector<8x32xf32> -> vector<8x32xf32>
    %49 = arith.addf %29, %48 : vector<8x32xf32>
    %50 = vector.extract_strided_slice %6 {offsets = [0, 16], sizes = [8, 8], strides = [1, 1]} : vector<8x32xf32> to vector<8x8xf32>
    %51 = vector.extract_strided_slice %7 {offsets = [0, 16], sizes = [8, 8], strides = [1, 1]} : vector<8x32xf32> to vector<8x8xf32>
    %cst_21 = arith.constant dense<0.000000e+00> : vector<8x8xf32>
    %52 = tpu.matmul %50, %51, %cst_21 {dimension_numbers = #tpu.dot_dimension_numbers<[1], [1], [0], [0], [0, 0, 1, 0], [], []>} : vector<8x8xf32>, vector<8x8xf32>, vector<8x8xf32> -> vector<8x8xf32>
    %cst_22 = arith.constant 0.353553385 : f32
    %53 = vector.broadcast %cst_22 : f32 to vector<8x8xf32>
    %54 = arith.mulf %52, %53 : vector<8x8xf32>
    %cst_23 = arith.constant dense<0xFF800000> : vector<8xf32>
    %55 = vector.multi_reduction <maximumf>, %54, %cst_23 [1] : vector<8x8xf32> to vector<8xf32>
    %56 = vector.shape_cast %55 : vector<8xf32> to vector<8x1xf32>
    %57 = vector.broadcast %56 : vector<8x1xf32> to vector<8x8xf32>
    %58 = arith.subf %54, %57 : vector<8x8xf32>
    %59 = math.exp %58 : vector<8x8xf32>
    %cst_24 = arith.constant dense<0.000000e+00> : vector<8xf32>
    %60 = vector.multi_reduction <add>, %59, %cst_24 [1] : vector<8x8xf32> to vector<8xf32>
    %61 = vector.shape_cast %60 : vector<8xf32> to vector<8x1xf32>
    %62 = tpu.reciprocal %61 {approx = true} : vector<8x1xf32> -> vector<8x1xf32>
    %63 = vector.broadcast %62 : vector<8x1xf32> to vector<8x8xf32>
    %64 = arith.mulf %59, %63 : vector<8x8xf32>
    %65 = vector.extract_strided_slice %8 {offsets = [0, 16], sizes = [8, 8], strides = [1, 1]} : vector<8x32xf32> to vector<8x8xf32>
    %cst_25 = arith.constant dense<0.000000e+00> : vector<8x8xf32>
    %66 = tpu.matmul %64, %65, %cst_25 {dimension_numbers = #tpu.dot_dimension_numbers<[1], [0], [0], [1], [0, 0, 1, 1], [], []>} : vector<8x8xf32>, vector<8x8xf32>, vector<8x8xf32> -> vector<8x8xf32>
    %67 = vector.extract_strided_slice %9 {offsets = [16, 0], sizes = [8, 32], strides = [1, 1]} : vector<32x32xf32> to vector<8x32xf32>
    %cst_26 = arith.constant dense<0.000000e+00> : vector<8x32xf32>
    %68 = tpu.matmul %66, %67, %cst_26 {dimension_numbers = #tpu.dot_dimension_numbers<[1], [0], [0], [1], [0, 0, 1, 1], [], []>} : vector<8x8xf32>, vector<8x32xf32>, vector<8x32xf32> -> vector<8x32xf32>
    %69 = arith.addf %49, %68 : vector<8x32xf32>
    %70 = vector.extract_strided_slice %6 {offsets = [0, 24], sizes = [8, 8], strides = [1, 1]} : vector<8x32xf32> to vector<8x8xf32>
    %71 = vector.extract_strided_slice %7 {offsets = [0, 24], sizes = [8, 8], strides = [1, 1]} : vector<8x32xf32> to vector<8x8xf32>
    %cst_27 = arith.constant dense<0.000000e+00> : vector<8x8xf32>
    %72 = tpu.matmul %70, %71, %cst_27 {dimension_numbers = #tpu.dot_dimension_numbers<[1], [1], [0], [0], [0, 0, 1, 0], [], []>} : vector<8x8xf32>, vector<8x8xf32>, vector<8x8xf32> -> vector<8x8xf32>
    %cst_28 = arith.constant 0.353553385 : f32
    %73 = vector.broadcast %cst_28 : f32 to vector<8x8xf32>
    %74 = arith.mulf %72, %73 : vector<8x8xf32>
    %cst_29 = arith.constant dense<0xFF800000> : vector<8xf32>
    %75 = vector.multi_reduction <maximumf>, %74, %cst_29 [1] : vector<8x8xf32> to vector<8xf32>
    %76 = vector.shape_cast %75 : vector<8xf32> to vector<8x1xf32>
    %77 = vector.broadcast %76 : vector<8x1xf32> to vector<8x8xf32>
    %78 = arith.subf %74, %77 : vector<8x8xf32>
    %79 = math.exp %78 : vector<8x8xf32>
    %cst_30 = arith.constant dense<0.000000e+00> : vector<8xf32>
    %80 = vector.multi_reduction <add>, %79, %cst_30 [1] : vector<8x8xf32> to vector<8xf32>
    %81 = vector.shape_cast %80 : vector<8xf32> to vector<8x1xf32>
    %82 = tpu.reciprocal %81 {approx = true} : vector<8x1xf32> -> vector<8x1xf32>
    %83 = vector.broadcast %82 : vector<8x1xf32> to vector<8x8xf32>
    %84 = arith.mulf %79, %83 : vector<8x8xf32>
    %85 = vector.extract_strided_slice %8 {offsets = [0, 24], sizes = [8, 8], strides = [1, 1]} : vector<8x32xf32> to vector<8x8xf32>
    %cst_31 = arith.constant dense<0.000000e+00> : vector<8x8xf32>
    %86 = tpu.matmul %84, %85, %cst_31 {dimension_numbers = #tpu.dot_dimension_numbers<[1], [0], [0], [1], [0, 0, 1, 1], [], []>} : vector<8x8xf32>, vector<8x8xf32>, vector<8x8xf32> -> vector<8x8xf32>
    %87 = vector.extract_strided_slice %9 {offsets = [24, 0], sizes = [8, 32], strides = [1, 1]} : vector<32x32xf32> to vector<8x32xf32>
    %cst_32 = arith.constant dense<0.000000e+00> : vector<8x32xf32>
    %88 = tpu.matmul %86, %87, %cst_32 {dimension_numbers = #tpu.dot_dimension_numbers<[1], [0], [0], [1], [0, 0, 1, 1], [], []>} : vector<8x8xf32>, vector<8x32xf32>, vector<8x32xf32> -> vector<8x32xf32>
    %89 = arith.addf %69, %88 : vector<8x32xf32>
    %90 = vector.broadcast %10 : vector<1x32xf32> to vector<8x32xf32>
    %91 = arith.addf %89, %90 : vector<8x32xf32>
    %92 = arith.addf %0, %91 : vector<8x32xf32>
    %c0_33 = arith.constant 0 : index
    %c0_34 = arith.constant 0 : index
    %93 = vector.load %arg6[%c0_33, %c0_34] : memref<1x32xf32, #tpu.memory_space<vmem>>, vector<1x32xf32>
    %c0_35 = arith.constant 0 : index
    %c0_36 = arith.constant 0 : index
    %94 = vector.load %arg7[%c0_35, %c0_36] : memref<1x32xf32, #tpu.memory_space<vmem>>, vector<1x32xf32>
    %cst_37 = arith.constant dense<0.000000e+00> : vector<8xf32>
    %95 = vector.multi_reduction <add>, %92, %cst_37 [1] : vector<8x32xf32> to vector<8xf32>
    %96 = vector.shape_cast %95 : vector<8xf32> to vector<8x1xf32>
    %cst_38 = arith.constant 3.200000e+01 : f32
    %97 = vector.broadcast %cst_38 : f32 to vector<8x1xf32>
    %98 = arith.divf %96, %97 : vector<8x1xf32>
    %99 = vector.broadcast %98 : vector<8x1xf32> to vector<8x32xf32>
    %100 = arith.subf %92, %99 : vector<8x32xf32>
    %101 = arith.mulf %100, %100 : vector<8x32xf32>
    %cst_39 = arith.constant dense<0.000000e+00> : vector<8xf32>
    %102 = vector.multi_reduction <add>, %101, %cst_39 [1] : vector<8x32xf32> to vector<8xf32>
    %103 = vector.shape_cast %102 : vector<8xf32> to vector<8x1xf32>
    %cst_40 = arith.constant 3.200000e+01 : f32
    %104 = vector.broadcast %cst_40 : f32 to vector<8x1xf32>
    %105 = arith.divf %103, %104 : vector<8x1xf32>
    %106 = vector.broadcast %98 : vector<8x1xf32> to vector<8x32xf32>
    %107 = arith.subf %92, %106 : vector<8x32xf32>
    %cst_41 = arith.constant 9.99999974E-6 : f32
    %108 = vector.broadcast %cst_41 : f32 to vector<8x1xf32>
    %109 = arith.addf %105, %108 : vector<8x1xf32>
    %110 = math.rsqrt %109 : vector<8x1xf32>
    %111 = vector.broadcast %110 : vector<8x1xf32> to vector<8x32xf32>
    %112 = arith.mulf %107, %111 : vector<8x32xf32>
    %113 = vector.broadcast %93 : vector<1x32xf32> to vector<8x32xf32>
    %114 = arith.mulf %112, %113 : vector<8x32xf32>
    %115 = vector.broadcast %94 : vector<1x32xf32> to vector<8x32xf32>
    %116 = arith.addf %114, %115 : vector<8x32xf32>
    %c0_42 = arith.constant 0 : index
    %c0_43 = arith.constant 0 : index
    %117 = vector.load %arg8[%c0_42, %c0_43] : memref<32x160xf32, #tpu.memory_space<vmem>>, vector<32x160xf32>
    %cst_44 = arith.constant dense<0.000000e+00> : vector<8x160xf32>
    %118 = tpu.matmul %116, %117, %cst_44 {dimension_numbers = #tpu.dot_dimension_numbers<[1], [0], [0], [1], [0, 0, 1, 1], [], []>} : vector<8x32xf32>, vector<32x160xf32>, vector<8x160xf32> -> vector<8x160xf32>
    %c0_45 = arith.constant 0 : index
    %c0_46 = arith.constant 0 : index
    %119 = vector.load %arg9[%c0_45, %c0_46] : memref<1x160xf32, #tpu.memory_space<vmem>>, vector<1x160xf32>
    %120 = vector.broadcast %119 : vector<1x160xf32> to vector<8x160xf32>
    %121 = arith.addf %118, %120 : vector<8x160xf32>
    %cst_47 = arith.constant 0.000000e+00 : f32
    %122 = vector.broadcast %cst_47 : f32 to vector<8x160xf32>
    %123 = arith.maximumf %121, %122 : vector<8x160xf32>
    %c0_48 = arith.constant 0 : index
    %c0_49 = arith.constant 0 : index
    %124 = vector.load %arg10[%c0_48, %c0_49] : memref<160x32xf32, #tpu.memory_space<vmem>>, vector<160x32xf32>
    %cst_50 = arith.constant dense<0.000000e+00> : vector<8x32xf32>
    %125 = tpu.matmul %123, %124, %cst_50 {dimension_numbers = #tpu.dot_dimension_numbers<[1], [0], [0], [1], [0, 0, 1, 1], [], []>} : vector<8x160xf32>, vector<160x32xf32>, vector<8x32xf32> -> vector<8x32xf32>
    %c0_51 = arith.constant 0 : index
    %c0_52 = arith.constant 0 : index
    %126 = vector.load %arg11[%c0_51, %c0_52] : memref<1x32xf32, #tpu.memory_space<vmem>>, vector<1x32xf32>
    %127 = vector.broadcast %126 : vector<1x32xf32> to vector<8x32xf32>
    %128 = arith.addf %125, %127 : vector<8x32xf32>
    %129 = arith.addf %116, %128 : vector<8x32xf32>
    %c0_53 = arith.constant 0 : index
    %c0_54 = arith.constant 0 : index
    %130 = vector.load %arg12[%c0_53, %c0_54] : memref<1x32xf32, #tpu.memory_space<vmem>>, vector<1x32xf32>
    %c0_55 = arith.constant 0 : index
    %c0_56 = arith.constant 0 : index
    %131 = vector.load %arg13[%c0_55, %c0_56] : memref<1x32xf32, #tpu.memory_space<vmem>>, vector<1x32xf32>
    %cst_57 = arith.constant dense<0.000000e+00> : vector<8xf32>
    %132 = vector.multi_reduction <add>, %129, %cst_57 [1] : vector<8x32xf32> to vector<8xf32>
    %133 = vector.shape_cast %132 : vector<8xf32> to vector<8x1xf32>
    %cst_58 = arith.constant 3.200000e+01 : f32
    %134 = vector.broadcast %cst_58 : f32 to vector<8x1xf32>
    %135 = arith.divf %133, %134 : vector<8x1xf32>
    %136 = vector.broadcast %135 : vector<8x1xf32> to vector<8x32xf32>
    %137 = arith.subf %129, %136 : vector<8x32xf32>
    %138 = arith.mulf %137, %137 : vector<8x32xf32>
    %cst_59 = arith.constant dense<0.000000e+00> : vector<8xf32>
    %139 = vector.multi_reduction <add>, %138, %cst_59 [1] : vector<8x32xf32> to vector<8xf32>
    %140 = vector.shape_cast %139 : vector<8xf32> to vector<8x1xf32>
    %cst_60 = arith.constant 3.200000e+01 : f32
    %141 = vector.broadcast %cst_60 : f32 to vector<8x1xf32>
    %142 = arith.divf %140, %141 : vector<8x1xf32>
    %143 = vector.broadcast %135 : vector<8x1xf32> to vector<8x32xf32>
    %144 = arith.subf %129, %143 : vector<8x32xf32>
    %cst_61 = arith.constant 9.99999974E-6 : f32
    %145 = vector.broadcast %cst_61 : f32 to vector<8x1xf32>
    %146 = arith.addf %142, %145 : vector<8x1xf32>
    %147 = math.rsqrt %146 : vector<8x1xf32>
    %148 = vector.broadcast %147 : vector<8x1xf32> to vector<8x32xf32>
    %149 = arith.mulf %144, %148 : vector<8x32xf32>
    %150 = vector.broadcast %130 : vector<1x32xf32> to vector<8x32xf32>
    %151 = arith.mulf %149, %150 : vector<8x32xf32>
    %152 = vector.broadcast %131 : vector<1x32xf32> to vector<8x32xf32>
    %153 = arith.addf %151, %152 : vector<8x32xf32>
    %c0_62 = arith.constant 0 : index
    %c0_63 = arith.constant 0 : index
    %154 = vector.load %arg14[%c0_62, %c0_63] : memref<8x32xf32, #tpu.memory_space<vmem>>, vector<8x32xf32>
    tpu.vector_store %arg14[%c0_62, %c0_63], %153 {strides = array<i32>} : memref<8x32xf32, #tpu.memory_space<vmem>>, vector<8x32xf32>,
    return
  }
  func.func @transform_0(%arg0: i32) -> (i32, i32) {
    %c0_i32 = arith.constant 0 : i32
    %c0_i32_0 = arith.constant 0 : i32
    return %arg0, %c0_i32 : i32, i32
  }
  func.func @transform_1(%arg0: i32) -> (i32, i32) {
    %c0_i32 = arith.constant 0 : i32
    %c0_i32_0 = arith.constant 0 : i32
    %c0_i32_1 = arith.constant 0 : i32
    return %c0_i32, %c0_i32_0 : i32, i32
  }
  func.func @transform_2(%arg0: i32) -> (i32, i32) {
    %c0_i32 = arith.constant 0 : i32
    %c0_i32_0 = arith.constant 0 : i32
    %c0_i32_1 = arith.constant 0 : i32
    return %c0_i32, %c0_i32_0 : i32, i32
  }
  func.func @transform_3(%arg0: i32) -> (i32, i32) {
    %c0_i32 = arith.constant 0 : i32
    %c0_i32_0 = arith.constant 0 : i32
    %c0_i32_1 = arith.constant 0 : i32
    return %c0_i32, %c0_i32_0 : i32, i32
  }
  func.func @transform_4(%arg0: i32) -> (i32, i32) {
    %c0_i32 = arith.constant 0 : i32
    %c0_i32_0 = arith.constant 0 : i32
    %c0_i32_1 = arith.constant 0 : i32
    return %c0_i32, %c0_i32_0 : i32, i32
  }
  func.func @transform_5(%arg0: i32) -> (i32, i32) {
    %c0_i32 = arith.constant 0 : i32
    %c0_i32_0 = arith.constant 0 : i32
    %c0_i32_1 = arith.constant 0 : i32
    return %c0_i32, %c0_i32_0 : i32, i32
  }
  func.func @transform_6(%arg0: i32) -> (i32, i32) {
    %c0_i32 = arith.constant 0 : i32
    %c0_i32_0 = arith.constant 0 : i32
    %c0_i32_1 = arith.constant 0 : i32
    return %c0_i32, %c0_i32_0 : i32, i32
  }
  func.func @transform_7(%arg0: i32) -> (i32, i32) {
    %c0_i32 = arith.constant 0 : i32
    %c0_i32_0 = arith.constant 0 : i32
    %c0_i32_1 = arith.constant 0 : i32
    return %c0_i32, %c0_i32_0 : i32, i32
  }
  func.func @transform_8(%arg0: i32) -> (i32, i32) {
    %c0_i32 = arith.constant 0 : i32
    %c0_i32_0 = arith.constant 0 : i32
    %c0_i32_1 = arith.constant 0 : i32
    return %c0_i32, %c0_i32_0 : i32, i32
  }
  func.func @transform_9(%arg0: i32) -> (i32, i32) {
    %c0_i32 = arith.constant 0 : i32
    %c0_i32_0 = arith.constant 0 : i32
    %c0_i32_1 = arith.constant 0 : i32
    return %c0_i32, %c0_i32_0 : i32, i32
  }
  func.func @transform_10(%arg0: i32) -> (i32, i32) {
    %c0_i32 = arith.constant 0 : i32
    %c0_i32_0 = arith.constant 0 : i32
    %c0_i32_1 = arith.constant 0 : i32
    return %c0_i32, %c0_i32_0 : i32, i32
  }
  func.func @transform_11(%arg0: i32) -> (i32, i32) {
    %c0_i32 = arith.constant 0 : i32
    %c0_i32_0 = arith.constant 0 : i32
    %c0_i32_1 = arith.constant 0 : i32
    return %c0_i32, %c0_i32_0 : i32, i32
  }
  func.func @transform_12(%arg0: i32) -> (i32, i32) {
    %c0_i32 = arith.constant 0 : i32
    %c0_i32_0 = arith.constant 0 : i32
    %c0_i32_1 = arith.constant 0 : i32
    return %c0_i32, %c0_i32_0 : i32, i32
  }
  func.func @transform_13(%arg0: i32) -> (i32, i32) {
    %c0_i32 = arith.constant 0 : i32
    %c0_i32_0 = arith.constant 0 : i32
    return %arg0, %c0_i32 : i32, i32
  }
}

module attributes {stable_mosaic.version = 11 : i64} {
  func.func @_enc_layer_kernel(%arg0: i32, %arg1: memref<8x32xf32, #tpu.memory_space<vmem>>, %arg2: memref<32x96xf32, #tpu.memory_space<vmem>>, %arg3: memref<1x96xf32, #tpu.memory_space<vmem>>, %arg4: memref<32x32xf32, #tpu.memory_space<vmem>>, %arg5: memref<1x32xf32, #tpu.memory_space<vmem>>, %arg6: memref<1x32xf32, #tpu.memory_space<vmem>>, %arg7: memref<1x32xf32, #tpu.memory_space<vmem>>, %arg8: memref<32x160xf32, #tpu.memory_space<vmem>>, %arg9: memref<1x160xf32, #tpu.memory_space<vmem>>, %arg10: memref<160x32xf32, #tpu.memory_space<vmem>>, %arg11: memref<1x32xf32, #tpu.memory_space<vmem>>, %arg12: memref<1x32xf32, #tpu.memory_space<vmem>>, %arg13: memref<1x32xf32, #tpu.memory_space<vmem>>, %arg14: memref<8x32xf32, #tpu.memory_space<vmem>>) attributes {dimension_semantics = [#tpu.dimension_semantics<parallel>], iteration_bounds = array<i64: 2>, scalar_prefetch = 0 : i64, scratch_operands = 0 : i64, tpu.core_type = #tpu.core_type<tc>, window_params = [{transform_indices = @transform_0, window_bounds = array<i64: 8, 32>}, {pipeline_mode = #tpu.pipeline_mode<synchronous>, transform_indices = @transform_1, window_bounds = array<i64: 32, 96>}, {pipeline_mode = #tpu.pipeline_mode<synchronous>, transform_indices = @transform_2, window_bounds = array<i64: 1, 96>}, {pipeline_mode = #tpu.pipeline_mode<synchronous>, transform_indices = @transform_3, window_bounds = array<i64: 32, 32>}, {pipeline_mode = #tpu.pipeline_mode<synchronous>, transform_indices = @transform_4, window_bounds = array<i64: 1, 32>}, {pipeline_mode = #tpu.pipeline_mode<synchronous>, transform_indices = @transform_5, window_bounds = array<i64: 1, 32>}, {pipeline_mode = #tpu.pipeline_mode<synchronous>, transform_indices = @transform_6, window_bounds = array<i64: 1, 32>}, {pipeline_mode = #tpu.pipeline_mode<synchronous>, transform_indices = @transform_7, window_bounds = array<i64: 32, 160>}, {pipeline_mode = #tpu.pipeline_mode<synchronous>, transform_indices = @transform_8, window_bounds = array<i64: 1, 160>}, {pipeline_mode = #tpu.pipeline_mode<synchronous>, transform_indices = @transform_9, window_bounds = array<i64: 160, 32>}, {pipeline_mode = #tpu.pipeline_mode<synchronous>, transform_indices = @transform_10, window_bounds = array<i64: 1, 32>}, {pipeline_mode = #tpu.pipeline_mode<synchronous>, transform_indices = @transform_11, window_bounds = array<i64: 1, 32>}, {pipeline_mode = #tpu.pipeline_mode<synchronous>, transform_indices = @transform_12, window_bounds = array<i64: 1, 32>}, {transform_indices = @transform_13, window_bounds = array<i64: 8, 32>}]} {
    %c0 = arith.constant 0 : index
    %c0_0 = arith.constant 0 : index
    %0 = vector.load %arg1[%c0, %c0_0] : memref<8x32xf32, #tpu.memory_space<vmem>>, vector<8x32xf32>
    %c0_1 = arith.constant 0 : index
    %c0_2 = arith.constant 0 : index
    %1 = vector.load %arg2[%c0_1, %c0_2] : memref<32x96xf32, #tpu.memory_space<vmem>>, vector<32x96xf32>
    %cst = arith.constant dense<0.000000e+00> : vector<8x96xf32>
    %2 = tpu.matmul %0, %1, %cst {dimension_numbers = #tpu.dot_dimension_numbers<[1], [0], [0], [1], [0, 0, 1, 1], [], []>} : vector<8x32xf32>, vector<32x96xf32>, vector<8x96xf32> -> vector<8x96xf32>
    %c0_3 = arith.constant 0 : index
    %c0_4 = arith.constant 0 : index
    %3 = vector.load %arg3[%c0_3, %c0_4] : memref<1x96xf32, #tpu.memory_space<vmem>>, vector<1x96xf32>
    %4 = vector.broadcast %3 : vector<1x96xf32> to vector<8x96xf32>
    %5 = arith.addf %2, %4 : vector<8x96xf32>
    %6 = vector.extract_strided_slice %5 {offsets = [0, 0], sizes = [8, 32], strides = [1, 1]} : vector<8x96xf32> to vector<8x32xf32>
    %7 = vector.extract_strided_slice %5 {offsets = [0, 32], sizes = [8, 32], strides = [1, 1]} : vector<8x96xf32> to vector<8x32xf32>
    %8 = vector.extract_strided_slice %5 {offsets = [0, 64], sizes = [8, 32], strides = [1, 1]} : vector<8x96xf32> to vector<8x32xf32>
    %c0_5 = arith.constant 0 : index
    %c0_6 = arith.constant 0 : index
    %9 = vector.load %arg4[%c0_5, %c0_6] : memref<32x32xf32, #tpu.memory_space<vmem>>, vector<32x32xf32>
    %c0_7 = arith.constant 0 : index
    %c0_8 = arith.constant 0 : index
    %10 = vector.load %arg5[%c0_7, %c0_8] : memref<1x32xf32, #tpu.memory_space<vmem>>, vector<1x32xf32>
    %11 = vector.extract_strided_slice %6 {offsets = [0, 0], sizes = [8, 8], strides = [1, 1]} : vector<8x32xf32> to vector<8x8xf32>
    %12 = vector.extract_strided_slice %7 {offsets = [0, 0], sizes = [8, 8], strides = [1, 1]} : vector<8x32xf32> to vector<8x8xf32>
    %cst_9 = arith.constant dense<0.000000e+00> : vector<8x8xf32>
    %13 = tpu.matmul %11, %12, %cst_9 {dimension_numbers = #tpu.dot_dimension_numbers<[1], [1], [0], [0], [0, 0, 1, 0], [], []>} : vector<8x8xf32>, vector<8x8xf32>, vector<8x8xf32> -> vector<8x8xf32>
    %cst_10 = arith.constant 0.353553385 : f32
    %14 = vector.broadcast %cst_10 : f32 to vector<8x8xf32>
    %15 = arith.mulf %13, %14 : vector<8x8xf32>
    %cst_11 = arith.constant dense<0xFF800000> : vector<8xf32>
    %16 = vector.multi_reduction <maximumf>, %15, %cst_11 [1] : vector<8x8xf32> to vector<8xf32>
    %17 = vector.shape_cast %16 : vector<8xf32> to vector<8x1xf32>
    %18 = vector.broadcast %17 : vector<8x1xf32> to vector<8x8xf32>
    %19 = arith.subf %15, %18 : vector<8x8xf32>
    %20 = math.exp %19 : vector<8x8xf32>
    %cst_12 = arith.constant dense<0.000000e+00> : vector<8xf32>
    %21 = vector.multi_reduction <add>, %20, %cst_12 [1] : vector<8x8xf32> to vector<8xf32>
    %22 = vector.shape_cast %21 : vector<8xf32> to vector<8x1xf32>
    %23 = tpu.reciprocal %22 {approx = true} : vector<8x1xf32> -> vector<8x1xf32>
    %24 = vector.broadcast %23 : vector<8x1xf32> to vector<8x8xf32>
    %25 = arith.mulf %20, %24 : vector<8x8xf32>
    %26 = vector.extract_strided_slice %8 {offsets = [0, 0], sizes = [8, 8], strides = [1, 1]} : vector<8x32xf32> to vector<8x8xf32>
    %cst_13 = arith.constant dense<0.000000e+00> : vector<8x8xf32>
    %27 = tpu.matmul %25, %26, %cst_13 {dimension_numbers = #tpu.dot_dimension_numbers<[1], [0], [0], [1], [0, 0, 1, 1], [], []>} : vector<8x8xf32>, vector<8x8xf32>, vector<8x8xf32> -> vector<8x8xf32>
    %28 = vector.extract_strided_slice %9 {offsets = [0, 0], sizes = [8, 32], strides = [1, 1]} : vector<32x32xf32> to vector<8x32xf32>
    %cst_14 = arith.constant dense<0.000000e+00> : vector<8x32xf32>
    %29 = tpu.matmul %27, %28, %cst_14 {dimension_numbers = #tpu.dot_dimension_numbers<[1], [0], [0], [1], [0, 0, 1, 1], [], []>} : vector<8x8xf32>, vector<8x32xf32>, vector<8x32xf32> -> vector<8x32xf32>
    %30 = vector.extract_strided_slice %6 {offsets = [0, 8], sizes = [8, 8], strides = [1, 1]} : vector<8x32xf32> to vector<8x8xf32>
    %31 = vector.extract_strided_slice %7 {offsets = [0, 8], sizes = [8, 8], strides = [1, 1]} : vector<8x32xf32> to vector<8x8xf32>
    %cst_15 = arith.constant dense<0.000000e+00> : vector<8x8xf32>
    %32 = tpu.matmul %30, %31, %cst_15 {dimension_numbers = #tpu.dot_dimension_numbers<[1], [1], [0], [0], [0, 0, 1, 0], [], []>} : vector<8x8xf32>, vector<8x8xf32>, vector<8x8xf32> -> vector<8x8xf32>
    %cst_16 = arith.constant 0.353553385 : f32
    %33 = vector.broadcast %cst_16 : f32 to vector<8x8xf32>
    %34 = arith.mulf %32, %33 : vector<8x8xf32>
    %cst_17 = arith.constant dense<0xFF800000> : vector<8xf32>
    %35 = vector.multi_reduction <maximumf>, %34, %cst_17 [1] : vector<8x8xf32> to vector<8xf32>
    %36 = vector.shape_cast %35 : vector<8xf32> to vector<8x1xf32>
    %37 = vector.broadcast %36 : vector<8x1xf32> to vector<8x8xf32>
    %38 = arith.subf %34, %37 : vector<8x8xf32>
    %39 = math.exp %38 : vector<8x8xf32>
    %cst_18 = arith.constant dense<0.000000e+00> : vector<8xf32>
    %40 = vector.multi_reduction <add>, %39, %cst_18 [1] : vector<8x8xf32> to vector<8xf32>
    %41 = vector.shape_cast %40 : vector<8xf32> to vector<8x1xf32>
    %42 = tpu.reciprocal %41 {approx = true} : vector<8x1xf32> -> vector<8x1xf32>
    %43 = vector.broadcast %42 : vector<8x1xf32> to vector<8x8xf32>
    %44 = arith.mulf %39, %43 : vector<8x8xf32>
    %45 = vector.extract_strided_slice %8 {offsets = [0, 8], sizes = [8, 8], strides = [1, 1]} : vector<8x32xf32> to vector<8x8xf32>
    %cst_19 = arith.constant dense<0.000000e+00> : vector<8x8xf32>
    %46 = tpu.matmul %44, %45, %cst_19 {dimension_numbers = #tpu.dot_dimension_numbers<[1], [0], [0], [1], [0, 0, 1, 1], [], []>} : vector<8x8xf32>, vector<8x8xf32>, vector<8x8xf32> -> vector<8x8xf32>
    %47 = vector.extract_strided_slice %9 {offsets = [8, 0], sizes = [8, 32], strides = [1, 1]} : vector<32x32xf32> to vector<8x32xf32>
    %cst_20 = arith.constant dense<0.000000e+00> : vector<8x32xf32>
    %48 = tpu.matmul %46, %47, %cst_20 {dimension_numbers = #tpu.dot_dimension_numbers<[1], [0], [0], [1], [0, 0, 1, 1], [], []>} : vector<8x8xf32>, vector<8x32xf32>, vector<8x32xf32> -> vector<8x32xf32>
    %49 = arith.addf %29, %48 : vector<8x32xf32>
    %50 = vector.extract_strided_slice %6 {offsets = [0, 16], sizes = [8, 8], strides = [1, 1]} : vector<8x32xf32> to vector<8x8xf32>
    %51 = vector.extract_strided_slice %7 {offsets = [0, 16], sizes = [8, 8], strides = [1, 1]} : vector<8x32xf32> to vector<8x8xf32>
    %cst_21 = arith.constant dense<0.000000e+00> : vector<8x8xf32>
    %52 = tpu.matmul %50, %51, %cst_21 {dimension_numbers = #tpu.dot_dimension_numbers<[1], [1], [0], [0], [0, 0, 1, 0], [], []>} : vector<8x8xf32>, vector<8x8xf32>, vector<8x8xf32> -> vector<8x8xf32>
    %cst_22 = arith.constant 0.353553385 : f32
    %53 = vector.broadcast %cst_22 : f32 to vector<8x8xf32>
    %54 = arith.mulf %52, %53 : vector<8x8xf32>
    %cst_23 = arith.constant dense<0xFF800000> : vector<8xf32>
    %55 = vector.multi_reduction <maximumf>, %54, %cst_23 [1] : vector<8x8xf32> to vector<8xf32>
    %56 = vector.shape_cast %55 : vector<8xf32> to vector<8x1xf32>
    %57 = vector.broadcast %56 : vector<8x1xf32> to vector<8x8xf32>
    %58 = arith.subf %54, %57 : vector<8x8xf32>
    %59 = math.exp %58 : vector<8x8xf32>
    %cst_24 = arith.constant dense<0.000000e+00> : vector<8xf32>
    %60 = vector.multi_reduction <add>, %59, %cst_24 [1] : vector<8x8xf32> to vector<8xf32>
    %61 = vector.shape_cast %60 : vector<8xf32> to vector<8x1xf32>
    %62 = tpu.reciprocal %61 {approx = true} : vector<8x1xf32> -> vector<8x1xf32>
    %63 = vector.broadcast %62 : vector<8x1xf32> to vector<8x8xf32>
    %64 = arith.mulf %59, %63 : vector<8x8xf32>
    %65 = vector.extract_strided_slice %8 {offsets = [0, 16], sizes = [8, 8], strides = [1, 1]} : vector<8x32xf32> to vector<8x8xf32>
    %cst_25 = arith.constant dense<0.000000e+00> : vector<8x8xf32>
    %66 = tpu.matmul %64, %65, %cst_25 {dimension_numbers = #tpu.dot_dimension_numbers<[1], [0], [0], [1], [0, 0, 1, 1], [], []>} : vector<8x8xf32>, vector<8x8xf32>, vector<8x8xf32> -> vector<8x8xf32>
    %67 = vector.extract_strided_slice %9 {offsets = [16, 0], sizes = [8, 32], strides = [1, 1]} : vector<32x32xf32> to vector<8x32xf32>
    %cst_26 = arith.constant dense<0.000000e+00> : vector<8x32xf32>
    %68 = tpu.matmul %66, %67, %cst_26 {dimension_numbers = #tpu.dot_dimension_numbers<[1], [0], [0], [1], [0, 0, 1, 1], [], []>} : vector<8x8xf32>, vector<8x32xf32>, vector<8x32xf32> -> vector<8x32xf32>
    %69 = arith.addf %49, %68 : vector<8x32xf32>
    %70 = vector.extract_strided_slice %6 {offsets = [0, 24], sizes = [8, 8], strides = [1, 1]} : vector<8x32xf32> to vector<8x8xf32>
    %71 = vector.extract_strided_slice %7 {offsets = [0, 24], sizes = [8, 8], strides = [1, 1]} : vector<8x32xf32> to vector<8x8xf32>
    %cst_27 = arith.constant dense<0.000000e+00> : vector<8x8xf32>
    %72 = tpu.matmul %70, %71, %cst_27 {dimension_numbers = #tpu.dot_dimension_numbers<[1], [1], [0], [0], [0, 0, 1, 0], [], []>} : vector<8x8xf32>, vector<8x8xf32>, vector<8x8xf32> -> vector<8x8xf32>
    %cst_28 = arith.constant 0.353553385 : f32
    %73 = vector.broadcast %cst_28 : f32 to vector<8x8xf32>
    %74 = arith.mulf %72, %73 : vector<8x8xf32>
    %cst_29 = arith.constant dense<0xFF800000> : vector<8xf32>
    %75 = vector.multi_reduction <maximumf>, %74, %cst_29 [1] : vector<8x8xf32> to vector<8xf32>
    %76 = vector.shape_cast %75 : vector<8xf32> to vector<8x1xf32>
    %77 = vector.broadcast %76 : vector<8x1xf32> to vector<8x8xf32>
    %78 = arith.subf %74, %77 : vector<8x8xf32>
    %79 = math.exp %78 : vector<8x8xf32>
    %cst_30 = arith.constant dense<0.000000e+00> : vector<8xf32>
    %80 = vector.multi_reduction <add>, %79, %cst_30 [1] : vector<8x8xf32> to vector<8xf32>
    %81 = vector.shape_cast %80 : vector<8xf32> to vector<8x1xf32>
    %82 = tpu.reciprocal %81 {approx = true} : vector<8x1xf32> -> vector<8x1xf32>
    %83 = vector.broadcast %82 : vector<8x1xf32> to vector<8x8xf32>
    %84 = arith.mulf %79, %83 : vector<8x8xf32>
    %85 = vector.extract_strided_slice %8 {offsets = [0, 24], sizes = [8, 8], strides = [1, 1]} : vector<8x32xf32> to vector<8x8xf32>
    %cst_31 = arith.constant dense<0.000000e+00> : vector<8x8xf32>
    %86 = tpu.matmul %84, %85, %cst_31 {dimension_numbers = #tpu.dot_dimension_numbers<[1], [0], [0], [1], [0, 0, 1, 1], [], []>} : vector<8x8xf32>, vector<8x8xf32>, vector<8x8xf32> -> vector<8x8xf32>
    %87 = vector.extract_strided_slice %9 {offsets = [24, 0], sizes = [8, 32], strides = [1, 1]} : vector<32x32xf32> to vector<8x32xf32>
    %cst_32 = arith.constant dense<0.000000e+00> : vector<8x32xf32>
    %88 = tpu.matmul %86, %87, %cst_32 {dimension_numbers = #tpu.dot_dimension_numbers<[1], [0], [0], [1], [0, 0, 1, 1], [], []>} : vector<8x8xf32>, vector<8x32xf32>, vector<8x32xf32> -> vector<8x32xf32>
    %89 = arith.addf %69, %88 : vector<8x32xf32>
    %90 = vector.broadcast %10 : vector<1x32xf32> to vector<8x32xf32>
    %91 = arith.addf %89, %90 : vector<8x32xf32>
    %92 = arith.addf %0, %91 : vector<8x32xf32>
    %c0_33 = arith.constant 0 : index
    %c0_34 = arith.constant 0 : index
    %93 = vector.load %arg6[%c0_33, %c0_34] : memref<1x32xf32, #tpu.memory_space<vmem>>, vector<1x32xf32>
    %c0_35 = arith.constant 0 : index
    %c0_36 = arith.constant 0 : index
    %94 = vector.load %arg7[%c0_35, %c0_36] : memref<1x32xf32, #tpu.memory_space<vmem>>, vector<1x32xf32>
    %cst_37 = arith.constant dense<0.000000e+00> : vector<8xf32>
    %95 = vector.multi_reduction <add>, %92, %cst_37 [1] : vector<8x32xf32> to vector<8xf32>
    %96 = vector.shape_cast %95 : vector<8xf32> to vector<8x1xf32>
    %cst_38 = arith.constant 3.200000e+01 : f32
    %97 = vector.broadcast %cst_38 : f32 to vector<8x1xf32>
    %98 = arith.divf %96, %97 : vector<8x1xf32>
    %99 = vector.broadcast %98 : vector<8x1xf32> to vector<8x32xf32>
    %100 = arith.subf %92, %99 : vector<8x32xf32>
    %101 = arith.mulf %100, %100 : vector<8x32xf32>
    %cst_39 = arith.constant dense<0.000000e+00> : vector<8xf32>
    %102 = vector.multi_reduction <add>, %101, %cst_39 [1] : vector<8x32xf32> to vector<8xf32>
    %103 = vector.shape_cast %102 : vector<8xf32> to vector<8x1xf32>
    %cst_40 = arith.constant 3.200000e+01 : f32
    %104 = vector.broadcast %cst_40 : f32 to vector<8x1xf32>
    %105 = arith.divf %103, %104 : vector<8x1xf32>
    %106 = vector.broadcast %98 : vector<8x1xf32> to vector<8x32xf32>
    %107 = arith.subf %92, %106 : vector<8x32xf32>
    %cst_41 = arith.constant 9.99999974E-6 : f32
    %108 = vector.broadcast %cst_41 : f32 to vector<8x1xf32>
    %109 = arith.addf %105, %108 : vector<8x1xf32>
    %110 = math.rsqrt %109 : vector<8x1xf32>
    %111 = vector.broadcast %110 : vector<8x1xf32> to vector<8x32xf32>
    %112 = arith.mulf %107, %111 : vector<8x32xf32>
    %113 = vector.broadcast %93 : vector<1x32xf32> to vector<8x32xf32>
    %114 = arith.mulf %112, %113 : vector<8x32xf32>
    %115 = vector.broadcast %94 : vector<1x32xf32> to vector<8x32xf32>
    %116 = arith.addf %114, %115 : vector<8x32xf32>
    %c0_42 = arith.constant 0 : index
    %c0_43 = arith.constant 0 : index
    %117 = vector.load %arg8[%c0_42, %c0_43] : memref<32x160xf32, #tpu.memory_space<vmem>>, vector<32x160xf32>
    %cst_44 = arith.constant dense<0.000000e+00> : vector<8x160xf32>
    %118 = tpu.matmul %116, %117, %cst_44 {dimension_numbers = #tpu.dot_dimension_numbers<[1], [0], [0], [1], [0, 0, 1, 1], [], []>} : vector<8x32xf32>, vector<32x160xf32>, vector<8x160xf32> -> vector<8x160xf32>
    %c0_45 = arith.constant 0 : index
    %c0_46 = arith.constant 0 : index
    %119 = vector.load %arg9[%c0_45, %c0_46] : memref<1x160xf32, #tpu.memory_space<vmem>>, vector<1x160xf32>
    %120 = vector.broadcast %119 : vector<1x160xf32> to vector<8x160xf32>
    %121 = arith.addf %118, %120 : vector<8x160xf32>
    %cst_47 = arith.constant 0.000000e+00 : f32
    %122 = vector.broadcast %cst_47 : f32 to vector<8x160xf32>
    %123 = arith.maximumf %121, %122 : vector<8x160xf32>
    %c0_48 = arith.constant 0 : index
    %c0_49 = arith.constant 0 : index
    %124 = vector.load %arg10[%c0_48, %c0_49] : memref<160x32xf32, #tpu.memory_space<vmem>>, vector<160x32xf32>
    %cst_50 = arith.constant dense<0.000000e+00> : vector<8x32xf32>
    %125 = tpu.matmul %123, %124, %cst_50 {dimension_numbers = #tpu.dot_dimension_numbers<[1], [0], [0], [1], [0, 0, 1, 1], [], []>} : vector<8x160xf32>, vector<160x32xf32>, vector<8x32xf32> -> vector<8x32xf32>
    %c0_51 = arith.constant 0 : index
    %c0_52 = arith.constant 0 : index
    %126 = vector.load %arg11[%c0_51, %c0_52] : memref<1x32xf32, #tpu.memory_space<vmem>>, vector<1x32xf32>
    %127 = vector.broadcast %126 : vector<1x32xf32> to vector<8x32xf32>
    %128 = arith.addf %125, %127 : vector<8x32xf32>
    %129 = arith.addf %116, %128 : vector<8x32xf32>
    %c0_53 = arith.constant 0 : index
    %c0_54 = arith.constant 0 : index
    %130 = vector.load %arg12[%c0_53, %c0_54] : memref<1x32xf32, #tpu.memory_space<vmem>>, vector<1x32xf32>
    %c0_55 = arith.constant 0 : index
    %c0_56 = arith.constant 0 : index
    %131 = vector.load %arg13[%c0_55, %c0_56] : memref<1x32xf32, #tpu.memory_space<vmem>>, vector<1x32xf32>
    %cst_57 = arith.constant dense<0.000000e+00> : vector<8xf32>
    %132 = vector.multi_reduction <add>, %129, %cst_57 [1] : vector<8x32xf32> to vector<8xf32>
    %133 = vector.shape_cast %132 : vector<8xf32> to vector<8x1xf32>
    %cst_58 = arith.constant 3.200000e+01 : f32
    %134 = vector.broadcast %cst_58 : f32 to vector<8x1xf32>
    %135 = arith.divf %133, %134 : vector<8x1xf32>
    %136 = vector.broadcast %135 : vector<8x1xf32> to vector<8x32xf32>
    %137 = arith.subf %129, %136 : vector<8x32xf32>
    %138 = arith.mulf %137, %137 : vector<8x32xf32>
    %cst_59 = arith.constant dense<0.000000e+00> : vector<8xf32>
    %139 = vector.multi_reduction <add>, %138, %cst_59 [1] : vector<8x32xf32> to vector<8xf32>
    %140 = vector.shape_cast %139 : vector<8xf32> to vector<8x1xf32>
    %cst_60 = arith.constant 3.200000e+01 : f32
    %141 = vector.broadcast %cst_60 : f32 to vector<8x1xf32>
    %142 = arith.divf %140, %141 : vector<8x1xf32>
    %143 = vector.broadcast %135 : vector<8x1xf32> to vector<8x32xf32>
    %144 = arith.subf %129, %143 : vector<8x32xf32>
    %cst_61 = arith.constant 9.99999974E-6 : f32
    %145 = vector.broadcast %cst_61 : f32 to vector<8x1xf32>
    %146 = arith.addf %142, %145 : vector<8x1xf32>
    %147 = math.rsqrt %146 : vector<8x1xf32>
    %148 = vector.broadcast %147 : vector<8x1xf32> to vector<8x32xf32>
    %149 = arith.mulf %144, %148 : vector<8x32xf32>
    %150 = vector.broadcast %130 : vector<1x32xf32> to vector<8x32xf32>
    %151 = arith.mulf %149, %150 : vector<8x32xf32>
    %152 = vector.broadcast %131 : vector<1x32xf32> to vector<8x32xf32>
    %153 = arith.addf %151, %152 : vector<8x32xf32>
    %c0_62 = arith.constant 0 : index
    %c0_63 = arith.constant 0 : index
    %154 = vector.load %arg14[%c0_62, %c0_63] : memref<8x32xf32, #tpu.memory_space<vmem>>, vector<8x32xf32>
    tpu.vector_store %arg14[%c0_62, %c0_63], %153 {strides = array<i32>} : memref<8x32xf32, #tpu.memory_space<vmem>>, vector<8x32xf32>,
    return
  }
  func.func @transform_0(%arg0: i32) -> (i32, i32) {
    %c0_i32 = arith.constant 0 : i32
    %c0_i32_0 = arith.constant 0 : i32
    return %arg0, %c0_i32 : i32, i32
  }
  func.func @transform_1(%arg0: i32) -> (i32, i32) {
    %c0_i32 = arith.constant 0 : i32
    %c0_i32_0 = arith.constant 0 : i32
    %c0_i32_1 = arith.constant 0 : i32
    return %c0_i32, %c0_i32_0 : i32, i32
  }
  func.func @transform_2(%arg0: i32) -> (i32, i32) {
    %c0_i32 = arith.constant 0 : i32
    %c0_i32_0 = arith.constant 0 : i32
    %c0_i32_1 = arith.constant 0 : i32
    return %c0_i32, %c0_i32_0 : i32, i32
  }
  func.func @transform_3(%arg0: i32) -> (i32, i32) {
    %c0_i32 = arith.constant 0 : i32
    %c0_i32_0 = arith.constant 0 : i32
    %c0_i32_1 = arith.constant 0 : i32
    return %c0_i32, %c0_i32_0 : i32, i32
  }
  func.func @transform_4(%arg0: i32) -> (i32, i32) {
    %c0_i32 = arith.constant 0 : i32
    %c0_i32_0 = arith.constant 0 : i32
    %c0_i32_1 = arith.constant 0 : i32
    return %c0_i32, %c0_i32_0 : i32, i32
  }
  func.func @transform_5(%arg0: i32) -> (i32, i32) {
    %c0_i32 = arith.constant 0 : i32
    %c0_i32_0 = arith.constant 0 : i32
    %c0_i32_1 = arith.constant 0 : i32
    return %c0_i32, %c0_i32_0 : i32, i32
  }
  func.func @transform_6(%arg0: i32) -> (i32, i32) {
    %c0_i32 = arith.constant 0 : i32
    %c0_i32_0 = arith.constant 0 : i32
    %c0_i32_1 = arith.constant 0 : i32
    return %c0_i32, %c0_i32_0 : i32, i32
  }
  func.func @transform_7(%arg0: i32) -> (i32, i32) {
    %c0_i32 = arith.constant 0 : i32
    %c0_i32_0 = arith.constant 0 : i32
    %c0_i32_1 = arith.constant 0 : i32
    return %c0_i32, %c0_i32_0 : i32, i32
  }
  func.func @transform_8(%arg0: i32) -> (i32, i32) {
    %c0_i32 = arith.constant 0 : i32
    %c0_i32_0 = arith.constant 0 : i32
    %c0_i32_1 = arith.constant 0 : i32
    return %c0_i32, %c0_i32_0 : i32, i32
  }
  func.func @transform_9(%arg0: i32) -> (i32, i32) {
    %c0_i32 = arith.constant 0 : i32
    %c0_i32_0 = arith.constant 0 : i32
    %c0_i32_1 = arith.constant 0 : i32
    return %c0_i32, %c0_i32_0 : i32, i32
  }
  func.func @transform_10(%arg0: i32) -> (i32, i32) {
    %c0_i32 = arith.constant 0 : i32
    %c0_i32_0 = arith.constant 0 : i32
    %c0_i32_1 = arith.constant 0 : i32
    return %c0_i32, %c0_i32_0 : i32, i32
  }
  func.func @transform_11(%arg0: i32) -> (i32, i32) {
    %c0_i32 = arith.constant 0 : i32
    %c0_i32_0 = arith.constant 0 : i32
    %c0_i32_1 = arith.constant 0 : i32
    return %c0_i32, %c0_i32_0 : i32, i32
  }
  func.func @transform_12(%arg0: i32) -> (i32, i32) {
    %c0_i32 = arith.constant 0 : i32
    %c0_i32_0 = arith.constant 0 : i32
    %c0_i32_1 = arith.constant 0 : i32
    return %c0_i32, %c0_i32_0 : i32, i32
  }
  func.func @transform_13(%arg0: i32) -> (i32, i32) {
    %c0_i32 = arith.constant 0 : i32
    %c0_i32_0 = arith.constant 0 : i32
    return %arg0, %c0_i32 : i32, i32
  }
}

module attributes {stable_mosaic.version = 11 : i64} {
  func.func @_enc_layer_kernel(%arg0: i32, %arg1: memref<8x32xf32, #tpu.memory_space<vmem>>, %arg2: memref<32x96xf32, #tpu.memory_space<vmem>>, %arg3: memref<1x96xf32, #tpu.memory_space<vmem>>, %arg4: memref<32x32xf32, #tpu.memory_space<vmem>>, %arg5: memref<1x32xf32, #tpu.memory_space<vmem>>, %arg6: memref<1x32xf32, #tpu.memory_space<vmem>>, %arg7: memref<1x32xf32, #tpu.memory_space<vmem>>, %arg8: memref<32x160xf32, #tpu.memory_space<vmem>>, %arg9: memref<1x160xf32, #tpu.memory_space<vmem>>, %arg10: memref<160x32xf32, #tpu.memory_space<vmem>>, %arg11: memref<1x32xf32, #tpu.memory_space<vmem>>, %arg12: memref<1x32xf32, #tpu.memory_space<vmem>>, %arg13: memref<1x32xf32, #tpu.memory_space<vmem>>, %arg14: memref<8x32xf32, #tpu.memory_space<vmem>>) attributes {dimension_semantics = [#tpu.dimension_semantics<parallel>], iteration_bounds = array<i64: 2>, scalar_prefetch = 0 : i64, scratch_operands = 0 : i64, tpu.core_type = #tpu.core_type<tc>, window_params = [{transform_indices = @transform_0, window_bounds = array<i64: 8, 32>}, {pipeline_mode = #tpu.pipeline_mode<synchronous>, transform_indices = @transform_1, window_bounds = array<i64: 32, 96>}, {pipeline_mode = #tpu.pipeline_mode<synchronous>, transform_indices = @transform_2, window_bounds = array<i64: 1, 96>}, {pipeline_mode = #tpu.pipeline_mode<synchronous>, transform_indices = @transform_3, window_bounds = array<i64: 32, 32>}, {pipeline_mode = #tpu.pipeline_mode<synchronous>, transform_indices = @transform_4, window_bounds = array<i64: 1, 32>}, {pipeline_mode = #tpu.pipeline_mode<synchronous>, transform_indices = @transform_5, window_bounds = array<i64: 1, 32>}, {pipeline_mode = #tpu.pipeline_mode<synchronous>, transform_indices = @transform_6, window_bounds = array<i64: 1, 32>}, {pipeline_mode = #tpu.pipeline_mode<synchronous>, transform_indices = @transform_7, window_bounds = array<i64: 32, 160>}, {pipeline_mode = #tpu.pipeline_mode<synchronous>, transform_indices = @transform_8, window_bounds = array<i64: 1, 160>}, {pipeline_mode = #tpu.pipeline_mode<synchronous>, transform_indices = @transform_9, window_bounds = array<i64: 160, 32>}, {pipeline_mode = #tpu.pipeline_mode<synchronous>, transform_indices = @transform_10, window_bounds = array<i64: 1, 32>}, {pipeline_mode = #tpu.pipeline_mode<synchronous>, transform_indices = @transform_11, window_bounds = array<i64: 1, 32>}, {pipeline_mode = #tpu.pipeline_mode<synchronous>, transform_indices = @transform_12, window_bounds = array<i64: 1, 32>}, {transform_indices = @transform_13, window_bounds = array<i64: 8, 32>}]} {
    %c0 = arith.constant 0 : index
    %c0_0 = arith.constant 0 : index
    %0 = vector.load %arg1[%c0, %c0_0] : memref<8x32xf32, #tpu.memory_space<vmem>>, vector<8x32xf32>
    %c0_1 = arith.constant 0 : index
    %c0_2 = arith.constant 0 : index
    %1 = vector.load %arg2[%c0_1, %c0_2] : memref<32x96xf32, #tpu.memory_space<vmem>>, vector<32x96xf32>
    %cst = arith.constant dense<0.000000e+00> : vector<8x96xf32>
    %2 = tpu.matmul %0, %1, %cst {dimension_numbers = #tpu.dot_dimension_numbers<[1], [0], [0], [1], [0, 0, 1, 1], [], []>} : vector<8x32xf32>, vector<32x96xf32>, vector<8x96xf32> -> vector<8x96xf32>
    %c0_3 = arith.constant 0 : index
    %c0_4 = arith.constant 0 : index
    %3 = vector.load %arg3[%c0_3, %c0_4] : memref<1x96xf32, #tpu.memory_space<vmem>>, vector<1x96xf32>
    %4 = vector.broadcast %3 : vector<1x96xf32> to vector<8x96xf32>
    %5 = arith.addf %2, %4 : vector<8x96xf32>
    %6 = vector.extract_strided_slice %5 {offsets = [0, 0], sizes = [8, 32], strides = [1, 1]} : vector<8x96xf32> to vector<8x32xf32>
    %7 = vector.extract_strided_slice %5 {offsets = [0, 32], sizes = [8, 32], strides = [1, 1]} : vector<8x96xf32> to vector<8x32xf32>
    %8 = vector.extract_strided_slice %5 {offsets = [0, 64], sizes = [8, 32], strides = [1, 1]} : vector<8x96xf32> to vector<8x32xf32>
    %c0_5 = arith.constant 0 : index
    %c0_6 = arith.constant 0 : index
    %9 = vector.load %arg4[%c0_5, %c0_6] : memref<32x32xf32, #tpu.memory_space<vmem>>, vector<32x32xf32>
    %c0_7 = arith.constant 0 : index
    %c0_8 = arith.constant 0 : index
    %10 = vector.load %arg5[%c0_7, %c0_8] : memref<1x32xf32, #tpu.memory_space<vmem>>, vector<1x32xf32>
    %11 = vector.extract_strided_slice %6 {offsets = [0, 0], sizes = [8, 8], strides = [1, 1]} : vector<8x32xf32> to vector<8x8xf32>
    %12 = vector.extract_strided_slice %7 {offsets = [0, 0], sizes = [8, 8], strides = [1, 1]} : vector<8x32xf32> to vector<8x8xf32>
    %cst_9 = arith.constant dense<0.000000e+00> : vector<8x8xf32>
    %13 = tpu.matmul %11, %12, %cst_9 {dimension_numbers = #tpu.dot_dimension_numbers<[1], [1], [0], [0], [0, 0, 1, 0], [], []>} : vector<8x8xf32>, vector<8x8xf32>, vector<8x8xf32> -> vector<8x8xf32>
    %cst_10 = arith.constant 0.353553385 : f32
    %14 = vector.broadcast %cst_10 : f32 to vector<8x8xf32>
    %15 = arith.mulf %13, %14 : vector<8x8xf32>
    %cst_11 = arith.constant dense<0xFF800000> : vector<8xf32>
    %16 = vector.multi_reduction <maximumf>, %15, %cst_11 [1] : vector<8x8xf32> to vector<8xf32>
    %17 = vector.shape_cast %16 : vector<8xf32> to vector<8x1xf32>
    %18 = vector.broadcast %17 : vector<8x1xf32> to vector<8x8xf32>
    %19 = arith.subf %15, %18 : vector<8x8xf32>
    %20 = math.exp %19 : vector<8x8xf32>
    %cst_12 = arith.constant dense<0.000000e+00> : vector<8xf32>
    %21 = vector.multi_reduction <add>, %20, %cst_12 [1] : vector<8x8xf32> to vector<8xf32>
    %22 = vector.shape_cast %21 : vector<8xf32> to vector<8x1xf32>
    %23 = tpu.reciprocal %22 {approx = true} : vector<8x1xf32> -> vector<8x1xf32>
    %24 = vector.broadcast %23 : vector<8x1xf32> to vector<8x8xf32>
    %25 = arith.mulf %20, %24 : vector<8x8xf32>
    %26 = vector.extract_strided_slice %8 {offsets = [0, 0], sizes = [8, 8], strides = [1, 1]} : vector<8x32xf32> to vector<8x8xf32>
    %cst_13 = arith.constant dense<0.000000e+00> : vector<8x8xf32>
    %27 = tpu.matmul %25, %26, %cst_13 {dimension_numbers = #tpu.dot_dimension_numbers<[1], [0], [0], [1], [0, 0, 1, 1], [], []>} : vector<8x8xf32>, vector<8x8xf32>, vector<8x8xf32> -> vector<8x8xf32>
    %28 = vector.extract_strided_slice %9 {offsets = [0, 0], sizes = [8, 32], strides = [1, 1]} : vector<32x32xf32> to vector<8x32xf32>
    %cst_14 = arith.constant dense<0.000000e+00> : vector<8x32xf32>
    %29 = tpu.matmul %27, %28, %cst_14 {dimension_numbers = #tpu.dot_dimension_numbers<[1], [0], [0], [1], [0, 0, 1, 1], [], []>} : vector<8x8xf32>, vector<8x32xf32>, vector<8x32xf32> -> vector<8x32xf32>
    %30 = vector.extract_strided_slice %6 {offsets = [0, 8], sizes = [8, 8], strides = [1, 1]} : vector<8x32xf32> to vector<8x8xf32>
    %31 = vector.extract_strided_slice %7 {offsets = [0, 8], sizes = [8, 8], strides = [1, 1]} : vector<8x32xf32> to vector<8x8xf32>
    %cst_15 = arith.constant dense<0.000000e+00> : vector<8x8xf32>
    %32 = tpu.matmul %30, %31, %cst_15 {dimension_numbers = #tpu.dot_dimension_numbers<[1], [1], [0], [0], [0, 0, 1, 0], [], []>} : vector<8x8xf32>, vector<8x8xf32>, vector<8x8xf32> -> vector<8x8xf32>
    %cst_16 = arith.constant 0.353553385 : f32
    %33 = vector.broadcast %cst_16 : f32 to vector<8x8xf32>
    %34 = arith.mulf %32, %33 : vector<8x8xf32>
    %cst_17 = arith.constant dense<0xFF800000> : vector<8xf32>
    %35 = vector.multi_reduction <maximumf>, %34, %cst_17 [1] : vector<8x8xf32> to vector<8xf32>
    %36 = vector.shape_cast %35 : vector<8xf32> to vector<8x1xf32>
    %37 = vector.broadcast %36 : vector<8x1xf32> to vector<8x8xf32>
    %38 = arith.subf %34, %37 : vector<8x8xf32>
    %39 = math.exp %38 : vector<8x8xf32>
    %cst_18 = arith.constant dense<0.000000e+00> : vector<8xf32>
    %40 = vector.multi_reduction <add>, %39, %cst_18 [1] : vector<8x8xf32> to vector<8xf32>
    %41 = vector.shape_cast %40 : vector<8xf32> to vector<8x1xf32>
    %42 = tpu.reciprocal %41 {approx = true} : vector<8x1xf32> -> vector<8x1xf32>
    %43 = vector.broadcast %42 : vector<8x1xf32> to vector<8x8xf32>
    %44 = arith.mulf %39, %43 : vector<8x8xf32>
    %45 = vector.extract_strided_slice %8 {offsets = [0, 8], sizes = [8, 8], strides = [1, 1]} : vector<8x32xf32> to vector<8x8xf32>
    %cst_19 = arith.constant dense<0.000000e+00> : vector<8x8xf32>
    %46 = tpu.matmul %44, %45, %cst_19 {dimension_numbers = #tpu.dot_dimension_numbers<[1], [0], [0], [1], [0, 0, 1, 1], [], []>} : vector<8x8xf32>, vector<8x8xf32>, vector<8x8xf32> -> vector<8x8xf32>
    %47 = vector.extract_strided_slice %9 {offsets = [8, 0], sizes = [8, 32], strides = [1, 1]} : vector<32x32xf32> to vector<8x32xf32>
    %cst_20 = arith.constant dense<0.000000e+00> : vector<8x32xf32>
    %48 = tpu.matmul %46, %47, %cst_20 {dimension_numbers = #tpu.dot_dimension_numbers<[1], [0], [0], [1], [0, 0, 1, 1], [], []>} : vector<8x8xf32>, vector<8x32xf32>, vector<8x32xf32> -> vector<8x32xf32>
    %49 = arith.addf %29, %48 : vector<8x32xf32>
    %50 = vector.extract_strided_slice %6 {offsets = [0, 16], sizes = [8, 8], strides = [1, 1]} : vector<8x32xf32> to vector<8x8xf32>
    %51 = vector.extract_strided_slice %7 {offsets = [0, 16], sizes = [8, 8], strides = [1, 1]} : vector<8x32xf32> to vector<8x8xf32>
    %cst_21 = arith.constant dense<0.000000e+00> : vector<8x8xf32>
    %52 = tpu.matmul %50, %51, %cst_21 {dimension_numbers = #tpu.dot_dimension_numbers<[1], [1], [0], [0], [0, 0, 1, 0], [], []>} : vector<8x8xf32>, vector<8x8xf32>, vector<8x8xf32> -> vector<8x8xf32>
    %cst_22 = arith.constant 0.353553385 : f32
    %53 = vector.broadcast %cst_22 : f32 to vector<8x8xf32>
    %54 = arith.mulf %52, %53 : vector<8x8xf32>
    %cst_23 = arith.constant dense<0xFF800000> : vector<8xf32>
    %55 = vector.multi_reduction <maximumf>, %54, %cst_23 [1] : vector<8x8xf32> to vector<8xf32>
    %56 = vector.shape_cast %55 : vector<8xf32> to vector<8x1xf32>
    %57 = vector.broadcast %56 : vector<8x1xf32> to vector<8x8xf32>
    %58 = arith.subf %54, %57 : vector<8x8xf32>
    %59 = math.exp %58 : vector<8x8xf32>
    %cst_24 = arith.constant dense<0.000000e+00> : vector<8xf32>
    %60 = vector.multi_reduction <add>, %59, %cst_24 [1] : vector<8x8xf32> to vector<8xf32>
    %61 = vector.shape_cast %60 : vector<8xf32> to vector<8x1xf32>
    %62 = tpu.reciprocal %61 {approx = true} : vector<8x1xf32> -> vector<8x1xf32>
    %63 = vector.broadcast %62 : vector<8x1xf32> to vector<8x8xf32>
    %64 = arith.mulf %59, %63 : vector<8x8xf32>
    %65 = vector.extract_strided_slice %8 {offsets = [0, 16], sizes = [8, 8], strides = [1, 1]} : vector<8x32xf32> to vector<8x8xf32>
    %cst_25 = arith.constant dense<0.000000e+00> : vector<8x8xf32>
    %66 = tpu.matmul %64, %65, %cst_25 {dimension_numbers = #tpu.dot_dimension_numbers<[1], [0], [0], [1], [0, 0, 1, 1], [], []>} : vector<8x8xf32>, vector<8x8xf32>, vector<8x8xf32> -> vector<8x8xf32>
    %67 = vector.extract_strided_slice %9 {offsets = [16, 0], sizes = [8, 32], strides = [1, 1]} : vector<32x32xf32> to vector<8x32xf32>
    %cst_26 = arith.constant dense<0.000000e+00> : vector<8x32xf32>
    %68 = tpu.matmul %66, %67, %cst_26 {dimension_numbers = #tpu.dot_dimension_numbers<[1], [0], [0], [1], [0, 0, 1, 1], [], []>} : vector<8x8xf32>, vector<8x32xf32>, vector<8x32xf32> -> vector<8x32xf32>
    %69 = arith.addf %49, %68 : vector<8x32xf32>
    %70 = vector.extract_strided_slice %6 {offsets = [0, 24], sizes = [8, 8], strides = [1, 1]} : vector<8x32xf32> to vector<8x8xf32>
    %71 = vector.extract_strided_slice %7 {offsets = [0, 24], sizes = [8, 8], strides = [1, 1]} : vector<8x32xf32> to vector<8x8xf32>
    %cst_27 = arith.constant dense<0.000000e+00> : vector<8x8xf32>
    %72 = tpu.matmul %70, %71, %cst_27 {dimension_numbers = #tpu.dot_dimension_numbers<[1], [1], [0], [0], [0, 0, 1, 0], [], []>} : vector<8x8xf32>, vector<8x8xf32>, vector<8x8xf32> -> vector<8x8xf32>
    %cst_28 = arith.constant 0.353553385 : f32
    %73 = vector.broadcast %cst_28 : f32 to vector<8x8xf32>
    %74 = arith.mulf %72, %73 : vector<8x8xf32>
    %cst_29 = arith.constant dense<0xFF800000> : vector<8xf32>
    %75 = vector.multi_reduction <maximumf>, %74, %cst_29 [1] : vector<8x8xf32> to vector<8xf32>
    %76 = vector.shape_cast %75 : vector<8xf32> to vector<8x1xf32>
    %77 = vector.broadcast %76 : vector<8x1xf32> to vector<8x8xf32>
    %78 = arith.subf %74, %77 : vector<8x8xf32>
    %79 = math.exp %78 : vector<8x8xf32>
    %cst_30 = arith.constant dense<0.000000e+00> : vector<8xf32>
    %80 = vector.multi_reduction <add>, %79, %cst_30 [1] : vector<8x8xf32> to vector<8xf32>
    %81 = vector.shape_cast %80 : vector<8xf32> to vector<8x1xf32>
    %82 = tpu.reciprocal %81 {approx = true} : vector<8x1xf32> -> vector<8x1xf32>
    %83 = vector.broadcast %82 : vector<8x1xf32> to vector<8x8xf32>
    %84 = arith.mulf %79, %83 : vector<8x8xf32>
    %85 = vector.extract_strided_slice %8 {offsets = [0, 24], sizes = [8, 8], strides = [1, 1]} : vector<8x32xf32> to vector<8x8xf32>
    %cst_31 = arith.constant dense<0.000000e+00> : vector<8x8xf32>
    %86 = tpu.matmul %84, %85, %cst_31 {dimension_numbers = #tpu.dot_dimension_numbers<[1], [0], [0], [1], [0, 0, 1, 1], [], []>} : vector<8x8xf32>, vector<8x8xf32>, vector<8x8xf32> -> vector<8x8xf32>
    %87 = vector.extract_strided_slice %9 {offsets = [24, 0], sizes = [8, 32], strides = [1, 1]} : vector<32x32xf32> to vector<8x32xf32>
    %cst_32 = arith.constant dense<0.000000e+00> : vector<8x32xf32>
    %88 = tpu.matmul %86, %87, %cst_32 {dimension_numbers = #tpu.dot_dimension_numbers<[1], [0], [0], [1], [0, 0, 1, 1], [], []>} : vector<8x8xf32>, vector<8x32xf32>, vector<8x32xf32> -> vector<8x32xf32>
    %89 = arith.addf %69, %88 : vector<8x32xf32>
    %90 = vector.broadcast %10 : vector<1x32xf32> to vector<8x32xf32>
    %91 = arith.addf %89, %90 : vector<8x32xf32>
    %92 = arith.addf %0, %91 : vector<8x32xf32>
    %c0_33 = arith.constant 0 : index
    %c0_34 = arith.constant 0 : index
    %93 = vector.load %arg6[%c0_33, %c0_34] : memref<1x32xf32, #tpu.memory_space<vmem>>, vector<1x32xf32>
    %c0_35 = arith.constant 0 : index
    %c0_36 = arith.constant 0 : index
    %94 = vector.load %arg7[%c0_35, %c0_36] : memref<1x32xf32, #tpu.memory_space<vmem>>, vector<1x32xf32>
    %cst_37 = arith.constant dense<0.000000e+00> : vector<8xf32>
    %95 = vector.multi_reduction <add>, %92, %cst_37 [1] : vector<8x32xf32> to vector<8xf32>
    %96 = vector.shape_cast %95 : vector<8xf32> to vector<8x1xf32>
    %cst_38 = arith.constant 3.200000e+01 : f32
    %97 = vector.broadcast %cst_38 : f32 to vector<8x1xf32>
    %98 = arith.divf %96, %97 : vector<8x1xf32>
    %99 = vector.broadcast %98 : vector<8x1xf32> to vector<8x32xf32>
    %100 = arith.subf %92, %99 : vector<8x32xf32>
    %101 = arith.mulf %100, %100 : vector<8x32xf32>
    %cst_39 = arith.constant dense<0.000000e+00> : vector<8xf32>
    %102 = vector.multi_reduction <add>, %101, %cst_39 [1] : vector<8x32xf32> to vector<8xf32>
    %103 = vector.shape_cast %102 : vector<8xf32> to vector<8x1xf32>
    %cst_40 = arith.constant 3.200000e+01 : f32
    %104 = vector.broadcast %cst_40 : f32 to vector<8x1xf32>
    %105 = arith.divf %103, %104 : vector<8x1xf32>
    %106 = vector.broadcast %98 : vector<8x1xf32> to vector<8x32xf32>
    %107 = arith.subf %92, %106 : vector<8x32xf32>
    %cst_41 = arith.constant 9.99999974E-6 : f32
    %108 = vector.broadcast %cst_41 : f32 to vector<8x1xf32>
    %109 = arith.addf %105, %108 : vector<8x1xf32>
    %110 = math.rsqrt %109 : vector<8x1xf32>
    %111 = vector.broadcast %110 : vector<8x1xf32> to vector<8x32xf32>
    %112 = arith.mulf %107, %111 : vector<8x32xf32>
    %113 = vector.broadcast %93 : vector<1x32xf32> to vector<8x32xf32>
    %114 = arith.mulf %112, %113 : vector<8x32xf32>
    %115 = vector.broadcast %94 : vector<1x32xf32> to vector<8x32xf32>
    %116 = arith.addf %114, %115 : vector<8x32xf32>
    %c0_42 = arith.constant 0 : index
    %c0_43 = arith.constant 0 : index
    %117 = vector.load %arg8[%c0_42, %c0_43] : memref<32x160xf32, #tpu.memory_space<vmem>>, vector<32x160xf32>
    %cst_44 = arith.constant dense<0.000000e+00> : vector<8x160xf32>
    %118 = tpu.matmul %116, %117, %cst_44 {dimension_numbers = #tpu.dot_dimension_numbers<[1], [0], [0], [1], [0, 0, 1, 1], [], []>} : vector<8x32xf32>, vector<32x160xf32>, vector<8x160xf32> -> vector<8x160xf32>
    %c0_45 = arith.constant 0 : index
    %c0_46 = arith.constant 0 : index
    %119 = vector.load %arg9[%c0_45, %c0_46] : memref<1x160xf32, #tpu.memory_space<vmem>>, vector<1x160xf32>
    %120 = vector.broadcast %119 : vector<1x160xf32> to vector<8x160xf32>
    %121 = arith.addf %118, %120 : vector<8x160xf32>
    %cst_47 = arith.constant 0.000000e+00 : f32
    %122 = vector.broadcast %cst_47 : f32 to vector<8x160xf32>
    %123 = arith.maximumf %121, %122 : vector<8x160xf32>
    %c0_48 = arith.constant 0 : index
    %c0_49 = arith.constant 0 : index
    %124 = vector.load %arg10[%c0_48, %c0_49] : memref<160x32xf32, #tpu.memory_space<vmem>>, vector<160x32xf32>
    %cst_50 = arith.constant dense<0.000000e+00> : vector<8x32xf32>
    %125 = tpu.matmul %123, %124, %cst_50 {dimension_numbers = #tpu.dot_dimension_numbers<[1], [0], [0], [1], [0, 0, 1, 1], [], []>} : vector<8x160xf32>, vector<160x32xf32>, vector<8x32xf32> -> vector<8x32xf32>
    %c0_51 = arith.constant 0 : index
    %c0_52 = arith.constant 0 : index
    %126 = vector.load %arg11[%c0_51, %c0_52] : memref<1x32xf32, #tpu.memory_space<vmem>>, vector<1x32xf32>
    %127 = vector.broadcast %126 : vector<1x32xf32> to vector<8x32xf32>
    %128 = arith.addf %125, %127 : vector<8x32xf32>
    %129 = arith.addf %116, %128 : vector<8x32xf32>
    %c0_53 = arith.constant 0 : index
    %c0_54 = arith.constant 0 : index
    %130 = vector.load %arg12[%c0_53, %c0_54] : memref<1x32xf32, #tpu.memory_space<vmem>>, vector<1x32xf32>
    %c0_55 = arith.constant 0 : index
    %c0_56 = arith.constant 0 : index
    %131 = vector.load %arg13[%c0_55, %c0_56] : memref<1x32xf32, #tpu.memory_space<vmem>>, vector<1x32xf32>
    %cst_57 = arith.constant dense<0.000000e+00> : vector<8xf32>
    %132 = vector.multi_reduction <add>, %129, %cst_57 [1] : vector<8x32xf32> to vector<8xf32>
    %133 = vector.shape_cast %132 : vector<8xf32> to vector<8x1xf32>
    %cst_58 = arith.constant 3.200000e+01 : f32
    %134 = vector.broadcast %cst_58 : f32 to vector<8x1xf32>
    %135 = arith.divf %133, %134 : vector<8x1xf32>
    %136 = vector.broadcast %135 : vector<8x1xf32> to vector<8x32xf32>
    %137 = arith.subf %129, %136 : vector<8x32xf32>
    %138 = arith.mulf %137, %137 : vector<8x32xf32>
    %cst_59 = arith.constant dense<0.000000e+00> : vector<8xf32>
    %139 = vector.multi_reduction <add>, %138, %cst_59 [1] : vector<8x32xf32> to vector<8xf32>
    %140 = vector.shape_cast %139 : vector<8xf32> to vector<8x1xf32>
    %cst_60 = arith.constant 3.200000e+01 : f32
    %141 = vector.broadcast %cst_60 : f32 to vector<8x1xf32>
    %142 = arith.divf %140, %141 : vector<8x1xf32>
    %143 = vector.broadcast %135 : vector<8x1xf32> to vector<8x32xf32>
    %144 = arith.subf %129, %143 : vector<8x32xf32>
    %cst_61 = arith.constant 9.99999974E-6 : f32
    %145 = vector.broadcast %cst_61 : f32 to vector<8x1xf32>
    %146 = arith.addf %142, %145 : vector<8x1xf32>
    %147 = math.rsqrt %146 : vector<8x1xf32>
    %148 = vector.broadcast %147 : vector<8x1xf32> to vector<8x32xf32>
    %149 = arith.mulf %144, %148 : vector<8x32xf32>
    %150 = vector.broadcast %130 : vector<1x32xf32> to vector<8x32xf32>
    %151 = arith.mulf %149, %150 : vector<8x32xf32>
    %152 = vector.broadcast %131 : vector<1x32xf32> to vector<8x32xf32>
    %153 = arith.addf %151, %152 : vector<8x32xf32>
    %c0_62 = arith.constant 0 : index
    %c0_63 = arith.constant 0 : index
    %154 = vector.load %arg14[%c0_62, %c0_63] : memref<8x32xf32, #tpu.memory_space<vmem>>, vector<8x32xf32>
    tpu.vector_store %arg14[%c0_62, %c0_63], %153 {strides = array<i32>} : memref<8x32xf32, #tpu.memory_space<vmem>>, vector<8x32xf32>,
    return
  }
  func.func @transform_0(%arg0: i32) -> (i32, i32) {
    %c0_i32 = arith.constant 0 : i32
    %c0_i32_0 = arith.constant 0 : i32
    return %arg0, %c0_i32 : i32, i32
  }
  func.func @transform_1(%arg0: i32) -> (i32, i32) {
    %c0_i32 = arith.constant 0 : i32
    %c0_i32_0 = arith.constant 0 : i32
    %c0_i32_1 = arith.constant 0 : i32
    return %c0_i32, %c0_i32_0 : i32, i32
  }
  func.func @transform_2(%arg0: i32) -> (i32, i32) {
    %c0_i32 = arith.constant 0 : i32
    %c0_i32_0 = arith.constant 0 : i32
    %c0_i32_1 = arith.constant 0 : i32
    return %c0_i32, %c0_i32_0 : i32, i32
  }
  func.func @transform_3(%arg0: i32) -> (i32, i32) {
    %c0_i32 = arith.constant 0 : i32
    %c0_i32_0 = arith.constant 0 : i32
    %c0_i32_1 = arith.constant 0 : i32
    return %c0_i32, %c0_i32_0 : i32, i32
  }
  func.func @transform_4(%arg0: i32) -> (i32, i32) {
    %c0_i32 = arith.constant 0 : i32
    %c0_i32_0 = arith.constant 0 : i32
    %c0_i32_1 = arith.constant 0 : i32
    return %c0_i32, %c0_i32_0 : i32, i32
  }
  func.func @transform_5(%arg0: i32) -> (i32, i32) {
    %c0_i32 = arith.constant 0 : i32
    %c0_i32_0 = arith.constant 0 : i32
    %c0_i32_1 = arith.constant 0 : i32
    return %c0_i32, %c0_i32_0 : i32, i32
  }
  func.func @transform_6(%arg0: i32) -> (i32, i32) {
    %c0_i32 = arith.constant 0 : i32
    %c0_i32_0 = arith.constant 0 : i32
    %c0_i32_1 = arith.constant 0 : i32
    return %c0_i32, %c0_i32_0 : i32, i32
  }
  func.func @transform_7(%arg0: i32) -> (i32, i32) {
    %c0_i32 = arith.constant 0 : i32
    %c0_i32_0 = arith.constant 0 : i32
    %c0_i32_1 = arith.constant 0 : i32
    return %c0_i32, %c0_i32_0 : i32, i32
  }
  func.func @transform_8(%arg0: i32) -> (i32, i32) {
    %c0_i32 = arith.constant 0 : i32
    %c0_i32_0 = arith.constant 0 : i32
    %c0_i32_1 = arith.constant 0 : i32
    return %c0_i32, %c0_i32_0 : i32, i32
  }
  func.func @transform_9(%arg0: i32) -> (i32, i32) {
    %c0_i32 = arith.constant 0 : i32
    %c0_i32_0 = arith.constant 0 : i32
    %c0_i32_1 = arith.constant 0 : i32
    return %c0_i32, %c0_i32_0 : i32, i32
  }
  func.func @transform_10(%arg0: i32) -> (i32, i32) {
    %c0_i32 = arith.constant 0 : i32
    %c0_i32_0 = arith.constant 0 : i32
    %c0_i32_1 = arith.constant 0 : i32
    return %c0_i32, %c0_i32_0 : i32, i32
  }
  func.func @transform_11(%arg0: i32) -> (i32, i32) {
    %c0_i32 = arith.constant 0 : i32
    %c0_i32_0 = arith.constant 0 : i32
    %c0_i32_1 = arith.constant 0 : i32
    return %c0_i32, %c0_i32_0 : i32, i32
  }
  func.func @transform_12(%arg0: i32) -> (i32, i32) {
    %c0_i32 = arith.constant 0 : i32
    %c0_i32_0 = arith.constant 0 : i32
    %c0_i32_1 = arith.constant 0 : i32
    return %c0_i32, %c0_i32_0 : i32, i32
  }
  func.func @transform_13(%arg0: i32) -> (i32, i32) {
    %c0_i32 = arith.constant 0 : i32
    %c0_i32_0 = arith.constant 0 : i32
    return %arg0, %c0_i32 : i32, i32
  }
}

module attributes {stable_mosaic.version = 11 : i64} {
  func.func @_embed_kernel(%arg0: i32, %arg1: memref<8x4xf32, #tpu.memory_space<vmem>>, %arg2: memref<4x32xf32, #tpu.memory_space<vmem>>, %arg3: memref<1x32xf32, #tpu.memory_space<vmem>>, %arg4: memref<8x32xf32, #tpu.memory_space<vmem>>, %arg5: memref<8x32xf32, #tpu.memory_space<vmem>>, %arg6: memref<8x32xf32, #tpu.memory_space<vmem>>) attributes {dimension_semantics = [#tpu.dimension_semantics<parallel>], iteration_bounds = array<i64: 2>, scalar_prefetch = 0 : i64, scratch_operands = 0 : i64, tpu.core_type = #tpu.core_type<tc>, window_params = [{transform_indices = @transform_0, window_bounds = array<i64: 8, 4>}, {pipeline_mode = #tpu.pipeline_mode<synchronous>, transform_indices = @transform_1, window_bounds = array<i64: 4, 32>}, {pipeline_mode = #tpu.pipeline_mode<synchronous>, transform_indices = @transform_2, window_bounds = array<i64: 1, 32>}, {pipeline_mode = #tpu.pipeline_mode<synchronous>, transform_indices = @transform_3, window_bounds = array<i64: 8, 32>}, {transform_indices = @transform_4, window_bounds = array<i64: 8, 32>}, {transform_indices = @transform_5, window_bounds = array<i64: 8, 32>}]} {
    %c0 = arith.constant 0 : index
    %c0_0 = arith.constant 0 : index
    %0 = vector.load %arg1[%c0, %c0_0] : memref<8x4xf32, #tpu.memory_space<vmem>>, vector<8x4xf32>
    %c0_1 = arith.constant 0 : index
    %c0_2 = arith.constant 0 : index
    %1 = vector.load %arg2[%c0_1, %c0_2] : memref<4x32xf32, #tpu.memory_space<vmem>>, vector<4x32xf32>
    %cst = arith.constant dense<0.000000e+00> : vector<8x32xf32>
    %2 = tpu.matmul %0, %1, %cst {dimension_numbers = #tpu.dot_dimension_numbers<[1], [0], [0], [1], [0, 0, 1, 1], [], []>} : vector<8x4xf32>, vector<4x32xf32>, vector<8x32xf32> -> vector<8x32xf32>
    %c0_3 = arith.constant 0 : index
    %c0_4 = arith.constant 0 : index
    %3 = vector.load %arg3[%c0_3, %c0_4] : memref<1x32xf32, #tpu.memory_space<vmem>>, vector<1x32xf32>
    %4 = vector.broadcast %3 : vector<1x32xf32> to vector<8x32xf32>
    %5 = arith.addf %2, %4 : vector<8x32xf32>
    %c0_5 = arith.constant 0 : index
    %c0_6 = arith.constant 0 : index
    %6 = vector.load %arg5[%c0_5, %c0_6] : memref<8x32xf32, #tpu.memory_space<vmem>>, vector<8x32xf32>
    tpu.vector_store %arg5[%c0_5, %c0_6], %5 {strides = array<i32>} : memref<8x32xf32, #tpu.memory_space<vmem>>, vector<8x32xf32>,
    %cst_7 = arith.constant 2.000000e+00 : f32
    %7 = vector.broadcast %cst_7 : f32 to vector<8x32xf32>
    %8 = arith.mulf %7, %5 : vector<8x32xf32>
    %c0_8 = arith.constant 0 : index
    %c0_9 = arith.constant 0 : index
    %9 = vector.load %arg4[%c0_8, %c0_9] : memref<8x32xf32, #tpu.memory_space<vmem>>, vector<8x32xf32>
    %10 = arith.addf %8, %9 : vector<8x32xf32>
    %c0_10 = arith.constant 0 : index
    %c0_11 = arith.constant 0 : index
    %11 = vector.load %arg6[%c0_10, %c0_11] : memref<8x32xf32, #tpu.memory_space<vmem>>, vector<8x32xf32>
    tpu.vector_store %arg6[%c0_10, %c0_11], %10 {strides = array<i32>} : memref<8x32xf32, #tpu.memory_space<vmem>>, vector<8x32xf32>,
    return
  }
  func.func @transform_0(%arg0: i32) -> (i32, i32) {
    %c0_i32 = arith.constant 0 : i32
    %c0_i32_0 = arith.constant 0 : i32
    return %arg0, %c0_i32 : i32, i32
  }
  func.func @transform_1(%arg0: i32) -> (i32, i32) {
    %c0_i32 = arith.constant 0 : i32
    %c0_i32_0 = arith.constant 0 : i32
    %c0_i32_1 = arith.constant 0 : i32
    return %c0_i32, %c0_i32_0 : i32, i32
  }
  func.func @transform_2(%arg0: i32) -> (i32, i32) {
    %c0_i32 = arith.constant 0 : i32
    %c0_i32_0 = arith.constant 0 : i32
    %c0_i32_1 = arith.constant 0 : i32
    return %c0_i32, %c0_i32_0 : i32, i32
  }
  func.func @transform_3(%arg0: i32) -> (i32, i32) {
    %c0_i32 = arith.constant 0 : i32
    %c0_i32_0 = arith.constant 0 : i32
    %c0_i32_1 = arith.constant 0 : i32
    return %c0_i32, %c0_i32_0 : i32, i32
  }
  func.func @transform_4(%arg0: i32) -> (i32, i32) {
    %c0_i32 = arith.constant 0 : i32
    %c0_i32_0 = arith.constant 0 : i32
    return %arg0, %c0_i32 : i32, i32
  }
  func.func @transform_5(%arg0: i32) -> (i32, i32) {
    %c0_i32 = arith.constant 0 : i32
    %c0_i32_0 = arith.constant 0 : i32
    return %arg0, %c0_i32 : i32, i32
  }
}

module attributes {stable_mosaic.version = 11 : i64} {
  func.func @_dec_layer_kernel(%arg0: i32, %arg1: memref<8x32xf32, #tpu.memory_space<vmem>>, %arg2: memref<8x32xf32, #tpu.memory_space<vmem>>, %arg3: memref<32x96xf32, #tpu.memory_space<vmem>>, %arg4: memref<1x96xf32, #tpu.memory_space<vmem>>, %arg5: memref<32x32xf32, #tpu.memory_space<vmem>>, %arg6: memref<1x32xf32, #tpu.memory_space<vmem>>, %arg7: memref<1x32xf32, #tpu.memory_space<vmem>>, %arg8: memref<1x32xf32, #tpu.memory_space<vmem>>, %arg9: memref<32x32xf32, #tpu.memory_space<vmem>>, %arg10: memref<1x32xf32, #tpu.memory_space<vmem>>, %arg11: memref<32x64xf32, #tpu.memory_space<vmem>>, %arg12: memref<1x64xf32, #tpu.memory_space<vmem>>, %arg13: memref<32x32xf32, #tpu.memory_space<vmem>>, %arg14: memref<1x32xf32, #tpu.memory_space<vmem>>, %arg15: memref<1x32xf32, #tpu.memory_space<vmem>>, %arg16: memref<1x32xf32, #tpu.memory_space<vmem>>, %arg17: memref<32x160xf32, #tpu.memory_space<vmem>>, %arg18: memref<1x160xf32, #tpu.memory_space<vmem>>, %arg19: memref<160x32xf32, #tpu.memory_space<vmem>>, %arg20: memref<1x32xf32, #tpu.memory_space<vmem>>, %arg21: memref<1x32xf32, #tpu.memory_space<vmem>>, %arg22: memref<1x32xf32, #tpu.memory_space<vmem>>, %arg23: memref<8x32xf32, #tpu.memory_space<vmem>>) attributes {dimension_semantics = [#tpu.dimension_semantics<parallel>], iteration_bounds = array<i64: 2>, scalar_prefetch = 0 : i64, scratch_operands = 0 : i64, tpu.core_type = #tpu.core_type<tc>, window_params = [{transform_indices = @transform_0, window_bounds = array<i64: 8, 32>}, {transform_indices = @transform_1, window_bounds = array<i64: 8, 32>}, {pipeline_mode = #tpu.pipeline_mode<synchronous>, transform_indices = @transform_2, window_bounds = array<i64: 32, 96>}, {pipeline_mode = #tpu.pipeline_mode<synchronous>, transform_indices = @transform_3, window_bounds = array<i64: 1, 96>}, {pipeline_mode = #tpu.pipeline_mode<synchronous>, transform_indices = @transform_4, window_bounds = array<i64: 32, 32>}, {pipeline_mode = #tpu.pipeline_mode<synchronous>, transform_indices = @transform_5, window_bounds = array<i64: 1, 32>}, {pipeline_mode = #tpu.pipeline_mode<synchronous>, transform_indices = @transform_6, window_bounds = array<i64: 1, 32>}, {pipeline_mode = #tpu.pipeline_mode<synchronous>, transform_indices = @transform_7, window_bounds = array<i64: 1, 32>}, {pipeline_mode = #tpu.pipeline_mode<synchronous>, transform_indices = @transform_8, window_bounds = array<i64: 32, 32>}, {pipeline_mode = #tpu.pipeline_mode<synchronous>, transform_indices = @transform_9, window_bounds = array<i64: 1, 32>}, {pipeline_mode = #tpu.pipeline_mode<synchronous>, transform_indices = @transform_10, window_bounds = array<i64: 32, 64>}, {pipeline_mode = #tpu.pipeline_mode<synchronous>, transform_indices = @transform_11, window_bounds = array<i64: 1, 64>}, {pipeline_mode = #tpu.pipeline_mode<synchronous>, transform_indices = @transform_12, window_bounds = array<i64: 32, 32>}, {pipeline_mode = #tpu.pipeline_mode<synchronous>, transform_indices = @transform_13, window_bounds = array<i64: 1, 32>}, {pipeline_mode = #tpu.pipeline_mode<synchronous>, transform_indices = @transform_14, window_bounds = array<i64: 1, 32>}, {pipeline_mode = #tpu.pipeline_mode<synchronous>, transform_indices = @transform_15, window_bounds = array<i64: 1, 32>}, {pipeline_mode = #tpu.pipeline_mode<synchronous>, transform_indices = @transform_16, window_bounds = array<i64: 32, 160>}, {pipeline_mode = #tpu.pipeline_mode<synchronous>, transform_indices = @transform_17, window_bounds = array<i64: 1, 160>}, {pipeline_mode = #tpu.pipeline_mode<synchronous>, transform_indices = @transform_18, window_bounds = array<i64: 160, 32>}, {pipeline_mode = #tpu.pipeline_mode<synchronous>, transform_indices = @transform_19, window_bounds = array<i64: 1, 32>}, {pipeline_mode = #tpu.pipeline_mode<synchronous>, transform_indices = @transform_20, window_bounds = array<i64: 1, 32>}, {pipeline_mode = #tpu.pipeline_mode<synchronous>, transform_indices = @transform_21, window_bounds = array<i64: 1, 32>}, {transform_indices = @transform_22, window_bounds = array<i64: 8, 32>}]} {
    %c0 = arith.constant 0 : index
    %c0_0 = arith.constant 0 : index
    %0 = vector.load %arg1[%c0, %c0_0] : memref<8x32xf32, #tpu.memory_space<vmem>>, vector<8x32xf32>
    %c0_1 = arith.constant 0 : index
    %c0_2 = arith.constant 0 : index
    %1 = vector.load %arg2[%c0_1, %c0_2] : memref<8x32xf32, #tpu.memory_space<vmem>>, vector<8x32xf32>
    %c0_3 = arith.constant 0 : index
    %c0_4 = arith.constant 0 : index
    %2 = vector.load %arg3[%c0_3, %c0_4] : memref<32x96xf32, #tpu.memory_space<vmem>>, vector<32x96xf32>
    %cst = arith.constant dense<0.000000e+00> : vector<8x96xf32>
    %3 = tpu.matmul %0, %2, %cst {dimension_numbers = #tpu.dot_dimension_numbers<[1], [0], [0], [1], [0, 0, 1, 1], [], []>} : vector<8x32xf32>, vector<32x96xf32>, vector<8x96xf32> -> vector<8x96xf32>
    %c0_5 = arith.constant 0 : index
    %c0_6 = arith.constant 0 : index
    %4 = vector.load %arg4[%c0_5, %c0_6] : memref<1x96xf32, #tpu.memory_space<vmem>>, vector<1x96xf32>
    %5 = vector.broadcast %4 : vector<1x96xf32> to vector<8x96xf32>
    %6 = arith.addf %3, %5 : vector<8x96xf32>
    %7 = vector.extract_strided_slice %6 {offsets = [0, 0], sizes = [8, 32], strides = [1, 1]} : vector<8x96xf32> to vector<8x32xf32>
    %8 = vector.extract_strided_slice %6 {offsets = [0, 32], sizes = [8, 32], strides = [1, 1]} : vector<8x96xf32> to vector<8x32xf32>
    %9 = vector.extract_strided_slice %6 {offsets = [0, 64], sizes = [8, 32], strides = [1, 1]} : vector<8x96xf32> to vector<8x32xf32>
    %c0_7 = arith.constant 0 : index
    %c0_8 = arith.constant 0 : index
    %10 = vector.load %arg5[%c0_7, %c0_8] : memref<32x32xf32, #tpu.memory_space<vmem>>, vector<32x32xf32>
    %c0_9 = arith.constant 0 : index
    %c0_10 = arith.constant 0 : index
    %11 = vector.load %arg6[%c0_9, %c0_10] : memref<1x32xf32, #tpu.memory_space<vmem>>, vector<1x32xf32>
    %12 = vector.extract_strided_slice %7 {offsets = [0, 0], sizes = [8, 8], strides = [1, 1]} : vector<8x32xf32> to vector<8x8xf32>
    %13 = vector.extract_strided_slice %8 {offsets = [0, 0], sizes = [8, 8], strides = [1, 1]} : vector<8x32xf32> to vector<8x8xf32>
    %cst_11 = arith.constant dense<0.000000e+00> : vector<8x8xf32>
    %14 = tpu.matmul %12, %13, %cst_11 {dimension_numbers = #tpu.dot_dimension_numbers<[1], [1], [0], [0], [0, 0, 1, 0], [], []>} : vector<8x8xf32>, vector<8x8xf32>, vector<8x8xf32> -> vector<8x8xf32>
    %cst_12 = arith.constant 0.353553385 : f32
    %15 = vector.broadcast %cst_12 : f32 to vector<8x8xf32>
    %16 = arith.mulf %14, %15 : vector<8x8xf32>
    %cst_13 = arith.constant dense<0xFF800000> : vector<8xf32>
    %17 = vector.multi_reduction <maximumf>, %16, %cst_13 [1] : vector<8x8xf32> to vector<8xf32>
    %18 = vector.shape_cast %17 : vector<8xf32> to vector<8x1xf32>
    %19 = vector.broadcast %18 : vector<8x1xf32> to vector<8x8xf32>
    %20 = arith.subf %16, %19 : vector<8x8xf32>
    %21 = math.exp %20 : vector<8x8xf32>
    %cst_14 = arith.constant dense<0.000000e+00> : vector<8xf32>
    %22 = vector.multi_reduction <add>, %21, %cst_14 [1] : vector<8x8xf32> to vector<8xf32>
    %23 = vector.shape_cast %22 : vector<8xf32> to vector<8x1xf32>
    %24 = tpu.reciprocal %23 {approx = true} : vector<8x1xf32> -> vector<8x1xf32>
    %25 = vector.broadcast %24 : vector<8x1xf32> to vector<8x8xf32>
    %26 = arith.mulf %21, %25 : vector<8x8xf32>
    %27 = vector.extract_strided_slice %9 {offsets = [0, 0], sizes = [8, 8], strides = [1, 1]} : vector<8x32xf32> to vector<8x8xf32>
    %cst_15 = arith.constant dense<0.000000e+00> : vector<8x8xf32>
    %28 = tpu.matmul %26, %27, %cst_15 {dimension_numbers = #tpu.dot_dimension_numbers<[1], [0], [0], [1], [0, 0, 1, 1], [], []>} : vector<8x8xf32>, vector<8x8xf32>, vector<8x8xf32> -> vector<8x8xf32>
    %29 = vector.extract_strided_slice %10 {offsets = [0, 0], sizes = [8, 32], strides = [1, 1]} : vector<32x32xf32> to vector<8x32xf32>
    %cst_16 = arith.constant dense<0.000000e+00> : vector<8x32xf32>
    %30 = tpu.matmul %28, %29, %cst_16 {dimension_numbers = #tpu.dot_dimension_numbers<[1], [0], [0], [1], [0, 0, 1, 1], [], []>} : vector<8x8xf32>, vector<8x32xf32>, vector<8x32xf32> -> vector<8x32xf32>
    %31 = vector.extract_strided_slice %7 {offsets = [0, 8], sizes = [8, 8], strides = [1, 1]} : vector<8x32xf32> to vector<8x8xf32>
    %32 = vector.extract_strided_slice %8 {offsets = [0, 8], sizes = [8, 8], strides = [1, 1]} : vector<8x32xf32> to vector<8x8xf32>
    %cst_17 = arith.constant dense<0.000000e+00> : vector<8x8xf32>
    %33 = tpu.matmul %31, %32, %cst_17 {dimension_numbers = #tpu.dot_dimension_numbers<[1], [1], [0], [0], [0, 0, 1, 0], [], []>} : vector<8x8xf32>, vector<8x8xf32>, vector<8x8xf32> -> vector<8x8xf32>
    %cst_18 = arith.constant 0.353553385 : f32
    %34 = vector.broadcast %cst_18 : f32 to vector<8x8xf32>
    %35 = arith.mulf %33, %34 : vector<8x8xf32>
    %cst_19 = arith.constant dense<0xFF800000> : vector<8xf32>
    %36 = vector.multi_reduction <maximumf>, %35, %cst_19 [1] : vector<8x8xf32> to vector<8xf32>
    %37 = vector.shape_cast %36 : vector<8xf32> to vector<8x1xf32>
    %38 = vector.broadcast %37 : vector<8x1xf32> to vector<8x8xf32>
    %39 = arith.subf %35, %38 : vector<8x8xf32>
    %40 = math.exp %39 : vector<8x8xf32>
    %cst_20 = arith.constant dense<0.000000e+00> : vector<8xf32>
    %41 = vector.multi_reduction <add>, %40, %cst_20 [1] : vector<8x8xf32> to vector<8xf32>
    %42 = vector.shape_cast %41 : vector<8xf32> to vector<8x1xf32>
    %43 = tpu.reciprocal %42 {approx = true} : vector<8x1xf32> -> vector<8x1xf32>
    %44 = vector.broadcast %43 : vector<8x1xf32> to vector<8x8xf32>
    %45 = arith.mulf %40, %44 : vector<8x8xf32>
    %46 = vector.extract_strided_slice %9 {offsets = [0, 8], sizes = [8, 8], strides = [1, 1]} : vector<8x32xf32> to vector<8x8xf32>
    %cst_21 = arith.constant dense<0.000000e+00> : vector<8x8xf32>
    %47 = tpu.matmul %45, %46, %cst_21 {dimension_numbers = #tpu.dot_dimension_numbers<[1], [0], [0], [1], [0, 0, 1, 1], [], []>} : vector<8x8xf32>, vector<8x8xf32>, vector<8x8xf32> -> vector<8x8xf32>
    %48 = vector.extract_strided_slice %10 {offsets = [8, 0], sizes = [8, 32], strides = [1, 1]} : vector<32x32xf32> to vector<8x32xf32>
    %cst_22 = arith.constant dense<0.000000e+00> : vector<8x32xf32>
    %49 = tpu.matmul %47, %48, %cst_22 {dimension_numbers = #tpu.dot_dimension_numbers<[1], [0], [0], [1], [0, 0, 1, 1], [], []>} : vector<8x8xf32>, vector<8x32xf32>, vector<8x32xf32> -> vector<8x32xf32>
    %50 = arith.addf %30, %49 : vector<8x32xf32>
    %51 = vector.extract_strided_slice %7 {offsets = [0, 16], sizes = [8, 8], strides = [1, 1]} : vector<8x32xf32> to vector<8x8xf32>
    %52 = vector.extract_strided_slice %8 {offsets = [0, 16], sizes = [8, 8], strides = [1, 1]} : vector<8x32xf32> to vector<8x8xf32>
    %cst_23 = arith.constant dense<0.000000e+00> : vector<8x8xf32>
    %53 = tpu.matmul %51, %52, %cst_23 {dimension_numbers = #tpu.dot_dimension_numbers<[1], [1], [0], [0], [0, 0, 1, 0], [], []>} : vector<8x8xf32>, vector<8x8xf32>, vector<8x8xf32> -> vector<8x8xf32>
    %cst_24 = arith.constant 0.353553385 : f32
    %54 = vector.broadcast %cst_24 : f32 to vector<8x8xf32>
    %55 = arith.mulf %53, %54 : vector<8x8xf32>
    %cst_25 = arith.constant dense<0xFF800000> : vector<8xf32>
    %56 = vector.multi_reduction <maximumf>, %55, %cst_25 [1] : vector<8x8xf32> to vector<8xf32>
    %57 = vector.shape_cast %56 : vector<8xf32> to vector<8x1xf32>
    %58 = vector.broadcast %57 : vector<8x1xf32> to vector<8x8xf32>
    %59 = arith.subf %55, %58 : vector<8x8xf32>
    %60 = math.exp %59 : vector<8x8xf32>
    %cst_26 = arith.constant dense<0.000000e+00> : vector<8xf32>
    %61 = vector.multi_reduction <add>, %60, %cst_26 [1] : vector<8x8xf32> to vector<8xf32>
    %62 = vector.shape_cast %61 : vector<8xf32> to vector<8x1xf32>
    %63 = tpu.reciprocal %62 {approx = true} : vector<8x1xf32> -> vector<8x1xf32>
    %64 = vector.broadcast %63 : vector<8x1xf32> to vector<8x8xf32>
    %65 = arith.mulf %60, %64 : vector<8x8xf32>
    %66 = vector.extract_strided_slice %9 {offsets = [0, 16], sizes = [8, 8], strides = [1, 1]} : vector<8x32xf32> to vector<8x8xf32>
    %cst_27 = arith.constant dense<0.000000e+00> : vector<8x8xf32>
    %67 = tpu.matmul %65, %66, %cst_27 {dimension_numbers = #tpu.dot_dimension_numbers<[1], [0], [0], [1], [0, 0, 1, 1], [], []>} : vector<8x8xf32>, vector<8x8xf32>, vector<8x8xf32> -> vector<8x8xf32>
    %68 = vector.extract_strided_slice %10 {offsets = [16, 0], sizes = [8, 32], strides = [1, 1]} : vector<32x32xf32> to vector<8x32xf32>
    %cst_28 = arith.constant dense<0.000000e+00> : vector<8x32xf32>
    %69 = tpu.matmul %67, %68, %cst_28 {dimension_numbers = #tpu.dot_dimension_numbers<[1], [0], [0], [1], [0, 0, 1, 1], [], []>} : vector<8x8xf32>, vector<8x32xf32>, vector<8x32xf32> -> vector<8x32xf32>
    %70 = arith.addf %50, %69 : vector<8x32xf32>
    %71 = vector.extract_strided_slice %7 {offsets = [0, 24], sizes = [8, 8], strides = [1, 1]} : vector<8x32xf32> to vector<8x8xf32>
    %72 = vector.extract_strided_slice %8 {offsets = [0, 24], sizes = [8, 8], strides = [1, 1]} : vector<8x32xf32> to vector<8x8xf32>
    %cst_29 = arith.constant dense<0.000000e+00> : vector<8x8xf32>
    %73 = tpu.matmul %71, %72, %cst_29 {dimension_numbers = #tpu.dot_dimension_numbers<[1], [1], [0], [0], [0, 0, 1, 0], [], []>} : vector<8x8xf32>, vector<8x8xf32>, vector<8x8xf32> -> vector<8x8xf32>
    %cst_30 = arith.constant 0.353553385 : f32
    %74 = vector.broadcast %cst_30 : f32 to vector<8x8xf32>
    %75 = arith.mulf %73, %74 : vector<8x8xf32>
    %cst_31 = arith.constant dense<0xFF800000> : vector<8xf32>
    %76 = vector.multi_reduction <maximumf>, %75, %cst_31 [1] : vector<8x8xf32> to vector<8xf32>
    %77 = vector.shape_cast %76 : vector<8xf32> to vector<8x1xf32>
    %78 = vector.broadcast %77 : vector<8x1xf32> to vector<8x8xf32>
    %79 = arith.subf %75, %78 : vector<8x8xf32>
    %80 = math.exp %79 : vector<8x8xf32>
    %cst_32 = arith.constant dense<0.000000e+00> : vector<8xf32>
    %81 = vector.multi_reduction <add>, %80, %cst_32 [1] : vector<8x8xf32> to vector<8xf32>
    %82 = vector.shape_cast %81 : vector<8xf32> to vector<8x1xf32>
    %83 = tpu.reciprocal %82 {approx = true} : vector<8x1xf32> -> vector<8x1xf32>
    %84 = vector.broadcast %83 : vector<8x1xf32> to vector<8x8xf32>
    %85 = arith.mulf %80, %84 : vector<8x8xf32>
    %86 = vector.extract_strided_slice %9 {offsets = [0, 24], sizes = [8, 8], strides = [1, 1]} : vector<8x32xf32> to vector<8x8xf32>
    %cst_33 = arith.constant dense<0.000000e+00> : vector<8x8xf32>
    %87 = tpu.matmul %85, %86, %cst_33 {dimension_numbers = #tpu.dot_dimension_numbers<[1], [0], [0], [1], [0, 0, 1, 1], [], []>} : vector<8x8xf32>, vector<8x8xf32>, vector<8x8xf32> -> vector<8x8xf32>
    %88 = vector.extract_strided_slice %10 {offsets = [24, 0], sizes = [8, 32], strides = [1, 1]} : vector<32x32xf32> to vector<8x32xf32>
    %cst_34 = arith.constant dense<0.000000e+00> : vector<8x32xf32>
    %89 = tpu.matmul %87, %88, %cst_34 {dimension_numbers = #tpu.dot_dimension_numbers<[1], [0], [0], [1], [0, 0, 1, 1], [], []>} : vector<8x8xf32>, vector<8x32xf32>, vector<8x32xf32> -> vector<8x32xf32>
    %90 = arith.addf %70, %89 : vector<8x32xf32>
    %91 = vector.broadcast %11 : vector<1x32xf32> to vector<8x32xf32>
    %92 = arith.addf %90, %91 : vector<8x32xf32>
    %93 = arith.addf %0, %92 : vector<8x32xf32>
    %c0_35 = arith.constant 0 : index
    %c0_36 = arith.constant 0 : index
    %94 = vector.load %arg7[%c0_35, %c0_36] : memref<1x32xf32, #tpu.memory_space<vmem>>, vector<1x32xf32>
    %c0_37 = arith.constant 0 : index
    %c0_38 = arith.constant 0 : index
    %95 = vector.load %arg8[%c0_37, %c0_38] : memref<1x32xf32, #tpu.memory_space<vmem>>, vector<1x32xf32>
    %cst_39 = arith.constant dense<0.000000e+00> : vector<8xf32>
    %96 = vector.multi_reduction <add>, %93, %cst_39 [1] : vector<8x32xf32> to vector<8xf32>
    %97 = vector.shape_cast %96 : vector<8xf32> to vector<8x1xf32>
    %cst_40 = arith.constant 3.200000e+01 : f32
    %98 = vector.broadcast %cst_40 : f32 to vector<8x1xf32>
    %99 = arith.divf %97, %98 : vector<8x1xf32>
    %100 = vector.broadcast %99 : vector<8x1xf32> to vector<8x32xf32>
    %101 = arith.subf %93, %100 : vector<8x32xf32>
    %102 = arith.mulf %101, %101 : vector<8x32xf32>
    %cst_41 = arith.constant dense<0.000000e+00> : vector<8xf32>
    %103 = vector.multi_reduction <add>, %102, %cst_41 [1] : vector<8x32xf32> to vector<8xf32>
    %104 = vector.shape_cast %103 : vector<8xf32> to vector<8x1xf32>
    %cst_42 = arith.constant 3.200000e+01 : f32
    %105 = vector.broadcast %cst_42 : f32 to vector<8x1xf32>
    %106 = arith.divf %104, %105 : vector<8x1xf32>
    %107 = vector.broadcast %99 : vector<8x1xf32> to vector<8x32xf32>
    %108 = arith.subf %93, %107 : vector<8x32xf32>
    %cst_43 = arith.constant 9.99999974E-6 : f32
    %109 = vector.broadcast %cst_43 : f32 to vector<8x1xf32>
    %110 = arith.addf %106, %109 : vector<8x1xf32>
    %111 = math.rsqrt %110 : vector<8x1xf32>
    %112 = vector.broadcast %111 : vector<8x1xf32> to vector<8x32xf32>
    %113 = arith.mulf %108, %112 : vector<8x32xf32>
    %114 = vector.broadcast %94 : vector<1x32xf32> to vector<8x32xf32>
    %115 = arith.mulf %113, %114 : vector<8x32xf32>
    %116 = vector.broadcast %95 : vector<1x32xf32> to vector<8x32xf32>
    %117 = arith.addf %115, %116 : vector<8x32xf32>
    %c0_44 = arith.constant 0 : index
    %c0_45 = arith.constant 0 : index
    %118 = vector.load %arg9[%c0_44, %c0_45] : memref<32x32xf32, #tpu.memory_space<vmem>>, vector<32x32xf32>
    %cst_46 = arith.constant dense<0.000000e+00> : vector<8x32xf32>
    %119 = tpu.matmul %117, %118, %cst_46 {dimension_numbers = #tpu.dot_dimension_numbers<[1], [0], [0], [1], [0, 0, 1, 1], [], []>} : vector<8x32xf32>, vector<32x32xf32>, vector<8x32xf32> -> vector<8x32xf32>
    %c0_47 = arith.constant 0 : index
    %c0_48 = arith.constant 0 : index
    %120 = vector.load %arg10[%c0_47, %c0_48] : memref<1x32xf32, #tpu.memory_space<vmem>>, vector<1x32xf32>
    %121 = vector.broadcast %120 : vector<1x32xf32> to vector<8x32xf32>
    %122 = arith.addf %119, %121 : vector<8x32xf32>
    %c0_49 = arith.constant 0 : index
    %c0_50 = arith.constant 0 : index
    %123 = vector.load %arg11[%c0_49, %c0_50] : memref<32x64xf32, #tpu.memory_space<vmem>>, vector<32x64xf32>
    %cst_51 = arith.constant dense<0.000000e+00> : vector<8x64xf32>
    %124 = tpu.matmul %1, %123, %cst_51 {dimension_numbers = #tpu.dot_dimension_numbers<[1], [0], [0], [1], [0, 0, 1, 1], [], []>} : vector<8x32xf32>, vector<32x64xf32>, vector<8x64xf32> -> vector<8x64xf32>
    %c0_52 = arith.constant 0 : index
    %c0_53 = arith.constant 0 : index
    %125 = vector.load %arg12[%c0_52, %c0_53] : memref<1x64xf32, #tpu.memory_space<vmem>>, vector<1x64xf32>
    %126 = vector.broadcast %125 : vector<1x64xf32> to vector<8x64xf32>
    %127 = arith.addf %124, %126 : vector<8x64xf32>
    %128 = vector.extract_strided_slice %127 {offsets = [0, 0], sizes = [8, 32], strides = [1, 1]} : vector<8x64xf32> to vector<8x32xf32>
    %129 = vector.extract_strided_slice %127 {offsets = [0, 32], sizes = [8, 32], strides = [1, 1]} : vector<8x64xf32> to vector<8x32xf32>
    %c0_54 = arith.constant 0 : index
    %c0_55 = arith.constant 0 : index
    %130 = vector.load %arg13[%c0_54, %c0_55] : memref<32x32xf32, #tpu.memory_space<vmem>>, vector<32x32xf32>
    %c0_56 = arith.constant 0 : index
    %c0_57 = arith.constant 0 : index
    %131 = vector.load %arg14[%c0_56, %c0_57] : memref<1x32xf32, #tpu.memory_space<vmem>>, vector<1x32xf32>
    %132 = vector.extract_strided_slice %122 {offsets = [0, 0], sizes = [8, 8], strides = [1, 1]} : vector<8x32xf32> to vector<8x8xf32>
    %133 = vector.extract_strided_slice %128 {offsets = [0, 0], sizes = [8, 8], strides = [1, 1]} : vector<8x32xf32> to vector<8x8xf32>
    %cst_58 = arith.constant dense<0.000000e+00> : vector<8x8xf32>
    %134 = tpu.matmul %132, %133, %cst_58 {dimension_numbers = #tpu.dot_dimension_numbers<[1], [1], [0], [0], [0, 0, 1, 0], [], []>} : vector<8x8xf32>, vector<8x8xf32>, vector<8x8xf32> -> vector<8x8xf32>
    %cst_59 = arith.constant 0.353553385 : f32
    %135 = vector.broadcast %cst_59 : f32 to vector<8x8xf32>
    %136 = arith.mulf %134, %135 : vector<8x8xf32>
    %cst_60 = arith.constant dense<0xFF800000> : vector<8xf32>
    %137 = vector.multi_reduction <maximumf>, %136, %cst_60 [1] : vector<8x8xf32> to vector<8xf32>
    %138 = vector.shape_cast %137 : vector<8xf32> to vector<8x1xf32>
    %139 = vector.broadcast %138 : vector<8x1xf32> to vector<8x8xf32>
    %140 = arith.subf %136, %139 : vector<8x8xf32>
    %141 = math.exp %140 : vector<8x8xf32>
    %cst_61 = arith.constant dense<0.000000e+00> : vector<8xf32>
    %142 = vector.multi_reduction <add>, %141, %cst_61 [1] : vector<8x8xf32> to vector<8xf32>
    %143 = vector.shape_cast %142 : vector<8xf32> to vector<8x1xf32>
    %144 = tpu.reciprocal %143 {approx = true} : vector<8x1xf32> -> vector<8x1xf32>
    %145 = vector.broadcast %144 : vector<8x1xf32> to vector<8x8xf32>
    %146 = arith.mulf %141, %145 : vector<8x8xf32>
    %147 = vector.extract_strided_slice %129 {offsets = [0, 0], sizes = [8, 8], strides = [1, 1]} : vector<8x32xf32> to vector<8x8xf32>
    %cst_62 = arith.constant dense<0.000000e+00> : vector<8x8xf32>
    %148 = tpu.matmul %146, %147, %cst_62 {dimension_numbers = #tpu.dot_dimension_numbers<[1], [0], [0], [1], [0, 0, 1, 1], [], []>} : vector<8x8xf32>, vector<8x8xf32>, vector<8x8xf32> -> vector<8x8xf32>
    %149 = vector.extract_strided_slice %130 {offsets = [0, 0], sizes = [8, 32], strides = [1, 1]} : vector<32x32xf32> to vector<8x32xf32>
    %cst_63 = arith.constant dense<0.000000e+00> : vector<8x32xf32>
    %150 = tpu.matmul %148, %149, %cst_63 {dimension_numbers = #tpu.dot_dimension_numbers<[1], [0], [0], [1], [0, 0, 1, 1], [], []>} : vector<8x8xf32>, vector<8x32xf32>, vector<8x32xf32> -> vector<8x32xf32>
    %151 = vector.extract_strided_slice %122 {offsets = [0, 8], sizes = [8, 8], strides = [1, 1]} : vector<8x32xf32> to vector<8x8xf32>
    %152 = vector.extract_strided_slice %128 {offsets = [0, 8], sizes = [8, 8], strides = [1, 1]} : vector<8x32xf32> to vector<8x8xf32>
    %cst_64 = arith.constant dense<0.000000e+00> : vector<8x8xf32>
    %153 = tpu.matmul %151, %152, %cst_64 {dimension_numbers = #tpu.dot_dimension_numbers<[1], [1], [0], [0], [0, 0, 1, 0], [], []>} : vector<8x8xf32>, vector<8x8xf32>, vector<8x8xf32> -> vector<8x8xf32>
    %cst_65 = arith.constant 0.353553385 : f32
    %154 = vector.broadcast %cst_65 : f32 to vector<8x8xf32>
    %155 = arith.mulf %153, %154 : vector<8x8xf32>
    %cst_66 = arith.constant dense<0xFF800000> : vector<8xf32>
    %156 = vector.multi_reduction <maximumf>, %155, %cst_66 [1] : vector<8x8xf32> to vector<8xf32>
    %157 = vector.shape_cast %156 : vector<8xf32> to vector<8x1xf32>
    %158 = vector.broadcast %157 : vector<8x1xf32> to vector<8x8xf32>
    %159 = arith.subf %155, %158 : vector<8x8xf32>
    %160 = math.exp %159 : vector<8x8xf32>
    %cst_67 = arith.constant dense<0.000000e+00> : vector<8xf32>
    %161 = vector.multi_reduction <add>, %160, %cst_67 [1] : vector<8x8xf32> to vector<8xf32>
    %162 = vector.shape_cast %161 : vector<8xf32> to vector<8x1xf32>
    %163 = tpu.reciprocal %162 {approx = true} : vector<8x1xf32> -> vector<8x1xf32>
    %164 = vector.broadcast %163 : vector<8x1xf32> to vector<8x8xf32>
    %165 = arith.mulf %160, %164 : vector<8x8xf32>
    %166 = vector.extract_strided_slice %129 {offsets = [0, 8], sizes = [8, 8], strides = [1, 1]} : vector<8x32xf32> to vector<8x8xf32>
    %cst_68 = arith.constant dense<0.000000e+00> : vector<8x8xf32>
    %167 = tpu.matmul %165, %166, %cst_68 {dimension_numbers = #tpu.dot_dimension_numbers<[1], [0], [0], [1], [0, 0, 1, 1], [], []>} : vector<8x8xf32>, vector<8x8xf32>, vector<8x8xf32> -> vector<8x8xf32>
    %168 = vector.extract_strided_slice %130 {offsets = [8, 0], sizes = [8, 32], strides = [1, 1]} : vector<32x32xf32> to vector<8x32xf32>
    %cst_69 = arith.constant dense<0.000000e+00> : vector<8x32xf32>
    %169 = tpu.matmul %167, %168, %cst_69 {dimension_numbers = #tpu.dot_dimension_numbers<[1], [0], [0], [1], [0, 0, 1, 1], [], []>} : vector<8x8xf32>, vector<8x32xf32>, vector<8x32xf32> -> vector<8x32xf32>
    %170 = arith.addf %150, %169 : vector<8x32xf32>
    %171 = vector.extract_strided_slice %122 {offsets = [0, 16], sizes = [8, 8], strides = [1, 1]} : vector<8x32xf32> to vector<8x8xf32>
    %172 = vector.extract_strided_slice %128 {offsets = [0, 16], sizes = [8, 8], strides = [1, 1]} : vector<8x32xf32> to vector<8x8xf32>
    %cst_70 = arith.constant dense<0.000000e+00> : vector<8x8xf32>
    %173 = tpu.matmul %171, %172, %cst_70 {dimension_numbers = #tpu.dot_dimension_numbers<[1], [1], [0], [0], [0, 0, 1, 0], [], []>} : vector<8x8xf32>, vector<8x8xf32>, vector<8x8xf32> -> vector<8x8xf32>
    %cst_71 = arith.constant 0.353553385 : f32
    %174 = vector.broadcast %cst_71 : f32 to vector<8x8xf32>
    %175 = arith.mulf %173, %174 : vector<8x8xf32>
    %cst_72 = arith.constant dense<0xFF800000> : vector<8xf32>
    %176 = vector.multi_reduction <maximumf>, %175, %cst_72 [1] : vector<8x8xf32> to vector<8xf32>
    %177 = vector.shape_cast %176 : vector<8xf32> to vector<8x1xf32>
    %178 = vector.broadcast %177 : vector<8x1xf32> to vector<8x8xf32>
    %179 = arith.subf %175, %178 : vector<8x8xf32>
    %180 = math.exp %179 : vector<8x8xf32>
    %cst_73 = arith.constant dense<0.000000e+00> : vector<8xf32>
    %181 = vector.multi_reduction <add>, %180, %cst_73 [1] : vector<8x8xf32> to vector<8xf32>
    %182 = vector.shape_cast %181 : vector<8xf32> to vector<8x1xf32>
    %183 = tpu.reciprocal %182 {approx = true} : vector<8x1xf32> -> vector<8x1xf32>
    %184 = vector.broadcast %183 : vector<8x1xf32> to vector<8x8xf32>
    %185 = arith.mulf %180, %184 : vector<8x8xf32>
    %186 = vector.extract_strided_slice %129 {offsets = [0, 16], sizes = [8, 8], strides = [1, 1]} : vector<8x32xf32> to vector<8x8xf32>
    %cst_74 = arith.constant dense<0.000000e+00> : vector<8x8xf32>
    %187 = tpu.matmul %185, %186, %cst_74 {dimension_numbers = #tpu.dot_dimension_numbers<[1], [0], [0], [1], [0, 0, 1, 1], [], []>} : vector<8x8xf32>, vector<8x8xf32>, vector<8x8xf32> -> vector<8x8xf32>
    %188 = vector.extract_strided_slice %130 {offsets = [16, 0], sizes = [8, 32], strides = [1, 1]} : vector<32x32xf32> to vector<8x32xf32>
    %cst_75 = arith.constant dense<0.000000e+00> : vector<8x32xf32>
    %189 = tpu.matmul %187, %188, %cst_75 {dimension_numbers = #tpu.dot_dimension_numbers<[1], [0], [0], [1], [0, 0, 1, 1], [], []>} : vector<8x8xf32>, vector<8x32xf32>, vector<8x32xf32> -> vector<8x32xf32>
    %190 = arith.addf %170, %189 : vector<8x32xf32>
    %191 = vector.extract_strided_slice %122 {offsets = [0, 24], sizes = [8, 8], strides = [1, 1]} : vector<8x32xf32> to vector<8x8xf32>
    %192 = vector.extract_strided_slice %128 {offsets = [0, 24], sizes = [8, 8], strides = [1, 1]} : vector<8x32xf32> to vector<8x8xf32>
    %cst_76 = arith.constant dense<0.000000e+00> : vector<8x8xf32>
    %193 = tpu.matmul %191, %192, %cst_76 {dimension_numbers = #tpu.dot_dimension_numbers<[1], [1], [0], [0], [0, 0, 1, 0], [], []>} : vector<8x8xf32>, vector<8x8xf32>, vector<8x8xf32> -> vector<8x8xf32>
    %cst_77 = arith.constant 0.353553385 : f32
    %194 = vector.broadcast %cst_77 : f32 to vector<8x8xf32>
    %195 = arith.mulf %193, %194 : vector<8x8xf32>
    %cst_78 = arith.constant dense<0xFF800000> : vector<8xf32>
    %196 = vector.multi_reduction <maximumf>, %195, %cst_78 [1] : vector<8x8xf32> to vector<8xf32>
    %197 = vector.shape_cast %196 : vector<8xf32> to vector<8x1xf32>
    %198 = vector.broadcast %197 : vector<8x1xf32> to vector<8x8xf32>
    %199 = arith.subf %195, %198 : vector<8x8xf32>
    %200 = math.exp %199 : vector<8x8xf32>
    %cst_79 = arith.constant dense<0.000000e+00> : vector<8xf32>
    %201 = vector.multi_reduction <add>, %200, %cst_79 [1] : vector<8x8xf32> to vector<8xf32>
    %202 = vector.shape_cast %201 : vector<8xf32> to vector<8x1xf32>
    %203 = tpu.reciprocal %202 {approx = true} : vector<8x1xf32> -> vector<8x1xf32>
    %204 = vector.broadcast %203 : vector<8x1xf32> to vector<8x8xf32>
    %205 = arith.mulf %200, %204 : vector<8x8xf32>
    %206 = vector.extract_strided_slice %129 {offsets = [0, 24], sizes = [8, 8], strides = [1, 1]} : vector<8x32xf32> to vector<8x8xf32>
    %cst_80 = arith.constant dense<0.000000e+00> : vector<8x8xf32>
    %207 = tpu.matmul %205, %206, %cst_80 {dimension_numbers = #tpu.dot_dimension_numbers<[1], [0], [0], [1], [0, 0, 1, 1], [], []>} : vector<8x8xf32>, vector<8x8xf32>, vector<8x8xf32> -> vector<8x8xf32>
    %208 = vector.extract_strided_slice %130 {offsets = [24, 0], sizes = [8, 32], strides = [1, 1]} : vector<32x32xf32> to vector<8x32xf32>
    %cst_81 = arith.constant dense<0.000000e+00> : vector<8x32xf32>
    %209 = tpu.matmul %207, %208, %cst_81 {dimension_numbers = #tpu.dot_dimension_numbers<[1], [0], [0], [1], [0, 0, 1, 1], [], []>} : vector<8x8xf32>, vector<8x32xf32>, vector<8x32xf32> -> vector<8x32xf32>
    %210 = arith.addf %190, %209 : vector<8x32xf32>
    %211 = vector.broadcast %131 : vector<1x32xf32> to vector<8x32xf32>
    %212 = arith.addf %210, %211 : vector<8x32xf32>
    %213 = arith.addf %117, %212 : vector<8x32xf32>
    %c0_82 = arith.constant 0 : index
    %c0_83 = arith.constant 0 : index
    %214 = vector.load %arg15[%c0_82, %c0_83] : memref<1x32xf32, #tpu.memory_space<vmem>>, vector<1x32xf32>
    %c0_84 = arith.constant 0 : index
    %c0_85 = arith.constant 0 : index
    %215 = vector.load %arg16[%c0_84, %c0_85] : memref<1x32xf32, #tpu.memory_space<vmem>>, vector<1x32xf32>
    %cst_86 = arith.constant dense<0.000000e+00> : vector<8xf32>
    %216 = vector.multi_reduction <add>, %213, %cst_86 [1] : vector<8x32xf32> to vector<8xf32>
    %217 = vector.shape_cast %216 : vector<8xf32> to vector<8x1xf32>
    %cst_87 = arith.constant 3.200000e+01 : f32
    %218 = vector.broadcast %cst_87 : f32 to vector<8x1xf32>
    %219 = arith.divf %217, %218 : vector<8x1xf32>
    %220 = vector.broadcast %219 : vector<8x1xf32> to vector<8x32xf32>
    %221 = arith.subf %213, %220 : vector<8x32xf32>
    %222 = arith.mulf %221, %221 : vector<8x32xf32>
    %cst_88 = arith.constant dense<0.000000e+00> : vector<8xf32>
    %223 = vector.multi_reduction <add>, %222, %cst_88 [1] : vector<8x32xf32> to vector<8xf32>
    %224 = vector.shape_cast %223 : vector<8xf32> to vector<8x1xf32>
    %cst_89 = arith.constant 3.200000e+01 : f32
    %225 = vector.broadcast %cst_89 : f32 to vector<8x1xf32>
    %226 = arith.divf %224, %225 : vector<8x1xf32>
    %227 = vector.broadcast %219 : vector<8x1xf32> to vector<8x32xf32>
    %228 = arith.subf %213, %227 : vector<8x32xf32>
    %cst_90 = arith.constant 9.99999974E-6 : f32
    %229 = vector.broadcast %cst_90 : f32 to vector<8x1xf32>
    %230 = arith.addf %226, %229 : vector<8x1xf32>
    %231 = math.rsqrt %230 : vector<8x1xf32>
    %232 = vector.broadcast %231 : vector<8x1xf32> to vector<8x32xf32>
    %233 = arith.mulf %228, %232 : vector<8x32xf32>
    %234 = vector.broadcast %214 : vector<1x32xf32> to vector<8x32xf32>
    %235 = arith.mulf %233, %234 : vector<8x32xf32>
    %236 = vector.broadcast %215 : vector<1x32xf32> to vector<8x32xf32>
    %237 = arith.addf %235, %236 : vector<8x32xf32>
    %c0_91 = arith.constant 0 : index
    %c0_92 = arith.constant 0 : index
    %238 = vector.load %arg17[%c0_91, %c0_92] : memref<32x160xf32, #tpu.memory_space<vmem>>, vector<32x160xf32>
    %cst_93 = arith.constant dense<0.000000e+00> : vector<8x160xf32>
    %239 = tpu.matmul %237, %238, %cst_93 {dimension_numbers = #tpu.dot_dimension_numbers<[1], [0], [0], [1], [0, 0, 1, 1], [], []>} : vector<8x32xf32>, vector<32x160xf32>, vector<8x160xf32> -> vector<8x160xf32>
    %c0_94 = arith.constant 0 : index
    %c0_95 = arith.constant 0 : index
    %240 = vector.load %arg18[%c0_94, %c0_95] : memref<1x160xf32, #tpu.memory_space<vmem>>, vector<1x160xf32>
    %241 = vector.broadcast %240 : vector<1x160xf32> to vector<8x160xf32>
    %242 = arith.addf %239, %241 : vector<8x160xf32>
    %cst_96 = arith.constant 0.000000e+00 : f32
    %243 = vector.broadcast %cst_96 : f32 to vector<8x160xf32>
    %244 = arith.maximumf %242, %243 : vector<8x160xf32>
    %c0_97 = arith.constant 0 : index
    %c0_98 = arith.constant 0 : index
    %245 = vector.load %arg19[%c0_97, %c0_98] : memref<160x32xf32, #tpu.memory_space<vmem>>, vector<160x32xf32>
    %cst_99 = arith.constant dense<0.000000e+00> : vector<8x32xf32>
    %246 = tpu.matmul %244, %245, %cst_99 {dimension_numbers = #tpu.dot_dimension_numbers<[1], [0], [0], [1], [0, 0, 1, 1], [], []>} : vector<8x160xf32>, vector<160x32xf32>, vector<8x32xf32> -> vector<8x32xf32>
    %c0_100 = arith.constant 0 : index
    %c0_101 = arith.constant 0 : index
    %247 = vector.load %arg20[%c0_100, %c0_101] : memref<1x32xf32, #tpu.memory_space<vmem>>, vector<1x32xf32>
    %248 = vector.broadcast %247 : vector<1x32xf32> to vector<8x32xf32>
    %249 = arith.addf %246, %248 : vector<8x32xf32>
    %250 = arith.addf %237, %249 : vector<8x32xf32>
    %c0_102 = arith.constant 0 : index
    %c0_103 = arith.constant 0 : index
    %251 = vector.load %arg21[%c0_102, %c0_103] : memref<1x32xf32, #tpu.memory_space<vmem>>, vector<1x32xf32>
    %c0_104 = arith.constant 0 : index
    %c0_105 = arith.constant 0 : index
    %252 = vector.load %arg22[%c0_104, %c0_105] : memref<1x32xf32, #tpu.memory_space<vmem>>, vector<1x32xf32>
    %cst_106 = arith.constant dense<0.000000e+00> : vector<8xf32>
    %253 = vector.multi_reduction <add>, %250, %cst_106 [1] : vector<8x32xf32> to vector<8xf32>
    %254 = vector.shape_cast %253 : vector<8xf32> to vector<8x1xf32>
    %cst_107 = arith.constant 3.200000e+01 : f32
    %255 = vector.broadcast %cst_107 : f32 to vector<8x1xf32>
    %256 = arith.divf %254, %255 : vector<8x1xf32>
    %257 = vector.broadcast %256 : vector<8x1xf32> to vector<8x32xf32>
    %258 = arith.subf %250, %257 : vector<8x32xf32>
    %259 = arith.mulf %258, %258 : vector<8x32xf32>
    %cst_108 = arith.constant dense<0.000000e+00> : vector<8xf32>
    %260 = vector.multi_reduction <add>, %259, %cst_108 [1] : vector<8x32xf32> to vector<8xf32>
    %261 = vector.shape_cast %260 : vector<8xf32> to vector<8x1xf32>
    %cst_109 = arith.constant 3.200000e+01 : f32
    %262 = vector.broadcast %cst_109 : f32 to vector<8x1xf32>
    %263 = arith.divf %261, %262 : vector<8x1xf32>
    %264 = vector.broadcast %256 : vector<8x1xf32> to vector<8x32xf32>
    %265 = arith.subf %250, %264 : vector<8x32xf32>
    %cst_110 = arith.constant 9.99999974E-6 : f32
    %266 = vector.broadcast %cst_110 : f32 to vector<8x1xf32>
    %267 = arith.addf %263, %266 : vector<8x1xf32>
    %268 = math.rsqrt %267 : vector<8x1xf32>
    %269 = vector.broadcast %268 : vector<8x1xf32> to vector<8x32xf32>
    %270 = arith.mulf %265, %269 : vector<8x32xf32>
    %271 = vector.broadcast %251 : vector<1x32xf32> to vector<8x32xf32>
    %272 = arith.mulf %270, %271 : vector<8x32xf32>
    %273 = vector.broadcast %252 : vector<1x32xf32> to vector<8x32xf32>
    %274 = arith.addf %272, %273 : vector<8x32xf32>
    %c0_111 = arith.constant 0 : index
    %c0_112 = arith.constant 0 : index
    %275 = vector.load %arg23[%c0_111, %c0_112] : memref<8x32xf32, #tpu.memory_space<vmem>>, vector<8x32xf32>
    tpu.vector_store %arg23[%c0_111, %c0_112], %274 {strides = array<i32>} : memref<8x32xf32, #tpu.memory_space<vmem>>, vector<8x32xf32>,
    return
  }
  func.func @transform_0(%arg0: i32) -> (i32, i32) {
    %c0_i32 = arith.constant 0 : i32
    %c0_i32_0 = arith.constant 0 : i32
    return %arg0, %c0_i32 : i32, i32
  }
  func.func @transform_1(%arg0: i32) -> (i32, i32) {
    %c0_i32 = arith.constant 0 : i32
    %c0_i32_0 = arith.constant 0 : i32
    return %arg0, %c0_i32 : i32, i32
  }
  func.func @transform_2(%arg0: i32) -> (i32, i32) {
    %c0_i32 = arith.constant 0 : i32
    %c0_i32_0 = arith.constant 0 : i32
    %c0_i32_1 = arith.constant 0 : i32
    return %c0_i32, %c0_i32_0 : i32, i32
  }
  func.func @transform_3(%arg0: i32) -> (i32, i32) {
    %c0_i32 = arith.constant 0 : i32
    %c0_i32_0 = arith.constant 0 : i32
    %c0_i32_1 = arith.constant 0 : i32
    return %c0_i32, %c0_i32_0 : i32, i32
  }
  func.func @transform_4(%arg0: i32) -> (i32, i32) {
    %c0_i32 = arith.constant 0 : i32
    %c0_i32_0 = arith.constant 0 : i32
    %c0_i32_1 = arith.constant 0 : i32
    return %c0_i32, %c0_i32_0 : i32, i32
  }
  func.func @transform_5(%arg0: i32) -> (i32, i32) {
    %c0_i32 = arith.constant 0 : i32
    %c0_i32_0 = arith.constant 0 : i32
    %c0_i32_1 = arith.constant 0 : i32
    return %c0_i32, %c0_i32_0 : i32, i32
  }
  func.func @transform_6(%arg0: i32) -> (i32, i32) {
    %c0_i32 = arith.constant 0 : i32
    %c0_i32_0 = arith.constant 0 : i32
    %c0_i32_1 = arith.constant 0 : i32
    return %c0_i32, %c0_i32_0 : i32, i32
  }
  func.func @transform_7(%arg0: i32) -> (i32, i32) {
    %c0_i32 = arith.constant 0 : i32
    %c0_i32_0 = arith.constant 0 : i32
    %c0_i32_1 = arith.constant 0 : i32
    return %c0_i32, %c0_i32_0 : i32, i32
  }
  func.func @transform_8(%arg0: i32) -> (i32, i32) {
    %c0_i32 = arith.constant 0 : i32
    %c0_i32_0 = arith.constant 0 : i32
    %c0_i32_1 = arith.constant 0 : i32
    return %c0_i32, %c0_i32_0 : i32, i32
  }
  func.func @transform_9(%arg0: i32) -> (i32, i32) {
    %c0_i32 = arith.constant 0 : i32
    %c0_i32_0 = arith.constant 0 : i32
    %c0_i32_1 = arith.constant 0 : i32
    return %c0_i32, %c0_i32_0 : i32, i32
  }
  func.func @transform_10(%arg0: i32) -> (i32, i32) {
    %c0_i32 = arith.constant 0 : i32
    %c0_i32_0 = arith.constant 0 : i32
    %c0_i32_1 = arith.constant 0 : i32
    return %c0_i32, %c0_i32_0 : i32, i32
  }
  func.func @transform_11(%arg0: i32) -> (i32, i32) {
    %c0_i32 = arith.constant 0 : i32
    %c0_i32_0 = arith.constant 0 : i32
    %c0_i32_1 = arith.constant 0 : i32
    return %c0_i32, %c0_i32_0 : i32, i32
  }
  func.func @transform_12(%arg0: i32) -> (i32, i32) {
    %c0_i32 = arith.constant 0 : i32
    %c0_i32_0 = arith.constant 0 : i32
    %c0_i32_1 = arith.constant 0 : i32
    return %c0_i32, %c0_i32_0 : i32, i32
  }
  func.func @transform_13(%arg0: i32) -> (i32, i32) {
    %c0_i32 = arith.constant 0 : i32
    %c0_i32_0 = arith.constant 0 : i32
    %c0_i32_1 = arith.constant 0 : i32
    return %c0_i32, %c0_i32_0 : i32, i32
  }
  func.func @transform_14(%arg0: i32) -> (i32, i32) {
    %c0_i32 = arith.constant 0 : i32
    %c0_i32_0 = arith.constant 0 : i32
    %c0_i32_1 = arith.constant 0 : i32
    return %c0_i32, %c0_i32_0 : i32, i32
  }
  func.func @transform_15(%arg0: i32) -> (i32, i32) {
    %c0_i32 = arith.constant 0 : i32
    %c0_i32_0 = arith.constant 0 : i32
    %c0_i32_1 = arith.constant 0 : i32
    return %c0_i32, %c0_i32_0 : i32, i32
  }
  func.func @transform_16(%arg0: i32) -> (i32, i32) {
    %c0_i32 = arith.constant 0 : i32
    %c0_i32_0 = arith.constant 0 : i32
    %c0_i32_1 = arith.constant 0 : i32
    return %c0_i32, %c0_i32_0 : i32, i32
  }
  func.func @transform_17(%arg0: i32) -> (i32, i32) {
    %c0_i32 = arith.constant 0 : i32
    %c0_i32_0 = arith.constant 0 : i32
    %c0_i32_1 = arith.constant 0 : i32
    return %c0_i32, %c0_i32_0 : i32, i32
  }
  func.func @transform_18(%arg0: i32) -> (i32, i32) {
    %c0_i32 = arith.constant 0 : i32
    %c0_i32_0 = arith.constant 0 : i32
    %c0_i32_1 = arith.constant 0 : i32
    return %c0_i32, %c0_i32_0 : i32, i32
  }
  func.func @transform_19(%arg0: i32) -> (i32, i32) {
    %c0_i32 = arith.constant 0 : i32
    %c0_i32_0 = arith.constant 0 : i32
    %c0_i32_1 = arith.constant 0 : i32
    return %c0_i32, %c0_i32_0 : i32, i32
  }
  func.func @transform_20(%arg0: i32) -> (i32, i32) {
    %c0_i32 = arith.constant 0 : i32
    %c0_i32_0 = arith.constant 0 : i32
    %c0_i32_1 = arith.constant 0 : i32
    return %c0_i32, %c0_i32_0 : i32, i32
  }
  func.func @transform_21(%arg0: i32) -> (i32, i32) {
    %c0_i32 = arith.constant 0 : i32
    %c0_i32_0 = arith.constant 0 : i32
    %c0_i32_1 = arith.constant 0 : i32
    return %c0_i32, %c0_i32_0 : i32, i32
  }
  func.func @transform_22(%arg0: i32) -> (i32, i32) {
    %c0_i32 = arith.constant 0 : i32
    %c0_i32_0 = arith.constant 0 : i32
    return %arg0, %c0_i32 : i32, i32
  }
}

module attributes {stable_mosaic.version = 11 : i64} {
  func.func @_dec_layer_kernel(%arg0: i32, %arg1: memref<8x32xf32, #tpu.memory_space<vmem>>, %arg2: memref<8x32xf32, #tpu.memory_space<vmem>>, %arg3: memref<32x96xf32, #tpu.memory_space<vmem>>, %arg4: memref<1x96xf32, #tpu.memory_space<vmem>>, %arg5: memref<32x32xf32, #tpu.memory_space<vmem>>, %arg6: memref<1x32xf32, #tpu.memory_space<vmem>>, %arg7: memref<1x32xf32, #tpu.memory_space<vmem>>, %arg8: memref<1x32xf32, #tpu.memory_space<vmem>>, %arg9: memref<32x32xf32, #tpu.memory_space<vmem>>, %arg10: memref<1x32xf32, #tpu.memory_space<vmem>>, %arg11: memref<32x64xf32, #tpu.memory_space<vmem>>, %arg12: memref<1x64xf32, #tpu.memory_space<vmem>>, %arg13: memref<32x32xf32, #tpu.memory_space<vmem>>, %arg14: memref<1x32xf32, #tpu.memory_space<vmem>>, %arg15: memref<1x32xf32, #tpu.memory_space<vmem>>, %arg16: memref<1x32xf32, #tpu.memory_space<vmem>>, %arg17: memref<32x160xf32, #tpu.memory_space<vmem>>, %arg18: memref<1x160xf32, #tpu.memory_space<vmem>>, %arg19: memref<160x32xf32, #tpu.memory_space<vmem>>, %arg20: memref<1x32xf32, #tpu.memory_space<vmem>>, %arg21: memref<1x32xf32, #tpu.memory_space<vmem>>, %arg22: memref<1x32xf32, #tpu.memory_space<vmem>>, %arg23: memref<8x32xf32, #tpu.memory_space<vmem>>) attributes {dimension_semantics = [#tpu.dimension_semantics<parallel>], iteration_bounds = array<i64: 2>, scalar_prefetch = 0 : i64, scratch_operands = 0 : i64, tpu.core_type = #tpu.core_type<tc>, window_params = [{transform_indices = @transform_0, window_bounds = array<i64: 8, 32>}, {transform_indices = @transform_1, window_bounds = array<i64: 8, 32>}, {pipeline_mode = #tpu.pipeline_mode<synchronous>, transform_indices = @transform_2, window_bounds = array<i64: 32, 96>}, {pipeline_mode = #tpu.pipeline_mode<synchronous>, transform_indices = @transform_3, window_bounds = array<i64: 1, 96>}, {pipeline_mode = #tpu.pipeline_mode<synchronous>, transform_indices = @transform_4, window_bounds = array<i64: 32, 32>}, {pipeline_mode = #tpu.pipeline_mode<synchronous>, transform_indices = @transform_5, window_bounds = array<i64: 1, 32>}, {pipeline_mode = #tpu.pipeline_mode<synchronous>, transform_indices = @transform_6, window_bounds = array<i64: 1, 32>}, {pipeline_mode = #tpu.pipeline_mode<synchronous>, transform_indices = @transform_7, window_bounds = array<i64: 1, 32>}, {pipeline_mode = #tpu.pipeline_mode<synchronous>, transform_indices = @transform_8, window_bounds = array<i64: 32, 32>}, {pipeline_mode = #tpu.pipeline_mode<synchronous>, transform_indices = @transform_9, window_bounds = array<i64: 1, 32>}, {pipeline_mode = #tpu.pipeline_mode<synchronous>, transform_indices = @transform_10, window_bounds = array<i64: 32, 64>}, {pipeline_mode = #tpu.pipeline_mode<synchronous>, transform_indices = @transform_11, window_bounds = array<i64: 1, 64>}, {pipeline_mode = #tpu.pipeline_mode<synchronous>, transform_indices = @transform_12, window_bounds = array<i64: 32, 32>}, {pipeline_mode = #tpu.pipeline_mode<synchronous>, transform_indices = @transform_13, window_bounds = array<i64: 1, 32>}, {pipeline_mode = #tpu.pipeline_mode<synchronous>, transform_indices = @transform_14, window_bounds = array<i64: 1, 32>}, {pipeline_mode = #tpu.pipeline_mode<synchronous>, transform_indices = @transform_15, window_bounds = array<i64: 1, 32>}, {pipeline_mode = #tpu.pipeline_mode<synchronous>, transform_indices = @transform_16, window_bounds = array<i64: 32, 160>}, {pipeline_mode = #tpu.pipeline_mode<synchronous>, transform_indices = @transform_17, window_bounds = array<i64: 1, 160>}, {pipeline_mode = #tpu.pipeline_mode<synchronous>, transform_indices = @transform_18, window_bounds = array<i64: 160, 32>}, {pipeline_mode = #tpu.pipeline_mode<synchronous>, transform_indices = @transform_19, window_bounds = array<i64: 1, 32>}, {pipeline_mode = #tpu.pipeline_mode<synchronous>, transform_indices = @transform_20, window_bounds = array<i64: 1, 32>}, {pipeline_mode = #tpu.pipeline_mode<synchronous>, transform_indices = @transform_21, window_bounds = array<i64: 1, 32>}, {transform_indices = @transform_22, window_bounds = array<i64: 8, 32>}]} {
    %c0 = arith.constant 0 : index
    %c0_0 = arith.constant 0 : index
    %0 = vector.load %arg1[%c0, %c0_0] : memref<8x32xf32, #tpu.memory_space<vmem>>, vector<8x32xf32>
    %c0_1 = arith.constant 0 : index
    %c0_2 = arith.constant 0 : index
    %1 = vector.load %arg2[%c0_1, %c0_2] : memref<8x32xf32, #tpu.memory_space<vmem>>, vector<8x32xf32>
    %c0_3 = arith.constant 0 : index
    %c0_4 = arith.constant 0 : index
    %2 = vector.load %arg3[%c0_3, %c0_4] : memref<32x96xf32, #tpu.memory_space<vmem>>, vector<32x96xf32>
    %cst = arith.constant dense<0.000000e+00> : vector<8x96xf32>
    %3 = tpu.matmul %0, %2, %cst {dimension_numbers = #tpu.dot_dimension_numbers<[1], [0], [0], [1], [0, 0, 1, 1], [], []>} : vector<8x32xf32>, vector<32x96xf32>, vector<8x96xf32> -> vector<8x96xf32>
    %c0_5 = arith.constant 0 : index
    %c0_6 = arith.constant 0 : index
    %4 = vector.load %arg4[%c0_5, %c0_6] : memref<1x96xf32, #tpu.memory_space<vmem>>, vector<1x96xf32>
    %5 = vector.broadcast %4 : vector<1x96xf32> to vector<8x96xf32>
    %6 = arith.addf %3, %5 : vector<8x96xf32>
    %7 = vector.extract_strided_slice %6 {offsets = [0, 0], sizes = [8, 32], strides = [1, 1]} : vector<8x96xf32> to vector<8x32xf32>
    %8 = vector.extract_strided_slice %6 {offsets = [0, 32], sizes = [8, 32], strides = [1, 1]} : vector<8x96xf32> to vector<8x32xf32>
    %9 = vector.extract_strided_slice %6 {offsets = [0, 64], sizes = [8, 32], strides = [1, 1]} : vector<8x96xf32> to vector<8x32xf32>
    %c0_7 = arith.constant 0 : index
    %c0_8 = arith.constant 0 : index
    %10 = vector.load %arg5[%c0_7, %c0_8] : memref<32x32xf32, #tpu.memory_space<vmem>>, vector<32x32xf32>
    %c0_9 = arith.constant 0 : index
    %c0_10 = arith.constant 0 : index
    %11 = vector.load %arg6[%c0_9, %c0_10] : memref<1x32xf32, #tpu.memory_space<vmem>>, vector<1x32xf32>
    %12 = vector.extract_strided_slice %7 {offsets = [0, 0], sizes = [8, 8], strides = [1, 1]} : vector<8x32xf32> to vector<8x8xf32>
    %13 = vector.extract_strided_slice %8 {offsets = [0, 0], sizes = [8, 8], strides = [1, 1]} : vector<8x32xf32> to vector<8x8xf32>
    %cst_11 = arith.constant dense<0.000000e+00> : vector<8x8xf32>
    %14 = tpu.matmul %12, %13, %cst_11 {dimension_numbers = #tpu.dot_dimension_numbers<[1], [1], [0], [0], [0, 0, 1, 0], [], []>} : vector<8x8xf32>, vector<8x8xf32>, vector<8x8xf32> -> vector<8x8xf32>
    %cst_12 = arith.constant 0.353553385 : f32
    %15 = vector.broadcast %cst_12 : f32 to vector<8x8xf32>
    %16 = arith.mulf %14, %15 : vector<8x8xf32>
    %cst_13 = arith.constant dense<0xFF800000> : vector<8xf32>
    %17 = vector.multi_reduction <maximumf>, %16, %cst_13 [1] : vector<8x8xf32> to vector<8xf32>
    %18 = vector.shape_cast %17 : vector<8xf32> to vector<8x1xf32>
    %19 = vector.broadcast %18 : vector<8x1xf32> to vector<8x8xf32>
    %20 = arith.subf %16, %19 : vector<8x8xf32>
    %21 = math.exp %20 : vector<8x8xf32>
    %cst_14 = arith.constant dense<0.000000e+00> : vector<8xf32>
    %22 = vector.multi_reduction <add>, %21, %cst_14 [1] : vector<8x8xf32> to vector<8xf32>
    %23 = vector.shape_cast %22 : vector<8xf32> to vector<8x1xf32>
    %24 = tpu.reciprocal %23 {approx = true} : vector<8x1xf32> -> vector<8x1xf32>
    %25 = vector.broadcast %24 : vector<8x1xf32> to vector<8x8xf32>
    %26 = arith.mulf %21, %25 : vector<8x8xf32>
    %27 = vector.extract_strided_slice %9 {offsets = [0, 0], sizes = [8, 8], strides = [1, 1]} : vector<8x32xf32> to vector<8x8xf32>
    %cst_15 = arith.constant dense<0.000000e+00> : vector<8x8xf32>
    %28 = tpu.matmul %26, %27, %cst_15 {dimension_numbers = #tpu.dot_dimension_numbers<[1], [0], [0], [1], [0, 0, 1, 1], [], []>} : vector<8x8xf32>, vector<8x8xf32>, vector<8x8xf32> -> vector<8x8xf32>
    %29 = vector.extract_strided_slice %10 {offsets = [0, 0], sizes = [8, 32], strides = [1, 1]} : vector<32x32xf32> to vector<8x32xf32>
    %cst_16 = arith.constant dense<0.000000e+00> : vector<8x32xf32>
    %30 = tpu.matmul %28, %29, %cst_16 {dimension_numbers = #tpu.dot_dimension_numbers<[1], [0], [0], [1], [0, 0, 1, 1], [], []>} : vector<8x8xf32>, vector<8x32xf32>, vector<8x32xf32> -> vector<8x32xf32>
    %31 = vector.extract_strided_slice %7 {offsets = [0, 8], sizes = [8, 8], strides = [1, 1]} : vector<8x32xf32> to vector<8x8xf32>
    %32 = vector.extract_strided_slice %8 {offsets = [0, 8], sizes = [8, 8], strides = [1, 1]} : vector<8x32xf32> to vector<8x8xf32>
    %cst_17 = arith.constant dense<0.000000e+00> : vector<8x8xf32>
    %33 = tpu.matmul %31, %32, %cst_17 {dimension_numbers = #tpu.dot_dimension_numbers<[1], [1], [0], [0], [0, 0, 1, 0], [], []>} : vector<8x8xf32>, vector<8x8xf32>, vector<8x8xf32> -> vector<8x8xf32>
    %cst_18 = arith.constant 0.353553385 : f32
    %34 = vector.broadcast %cst_18 : f32 to vector<8x8xf32>
    %35 = arith.mulf %33, %34 : vector<8x8xf32>
    %cst_19 = arith.constant dense<0xFF800000> : vector<8xf32>
    %36 = vector.multi_reduction <maximumf>, %35, %cst_19 [1] : vector<8x8xf32> to vector<8xf32>
    %37 = vector.shape_cast %36 : vector<8xf32> to vector<8x1xf32>
    %38 = vector.broadcast %37 : vector<8x1xf32> to vector<8x8xf32>
    %39 = arith.subf %35, %38 : vector<8x8xf32>
    %40 = math.exp %39 : vector<8x8xf32>
    %cst_20 = arith.constant dense<0.000000e+00> : vector<8xf32>
    %41 = vector.multi_reduction <add>, %40, %cst_20 [1] : vector<8x8xf32> to vector<8xf32>
    %42 = vector.shape_cast %41 : vector<8xf32> to vector<8x1xf32>
    %43 = tpu.reciprocal %42 {approx = true} : vector<8x1xf32> -> vector<8x1xf32>
    %44 = vector.broadcast %43 : vector<8x1xf32> to vector<8x8xf32>
    %45 = arith.mulf %40, %44 : vector<8x8xf32>
    %46 = vector.extract_strided_slice %9 {offsets = [0, 8], sizes = [8, 8], strides = [1, 1]} : vector<8x32xf32> to vector<8x8xf32>
    %cst_21 = arith.constant dense<0.000000e+00> : vector<8x8xf32>
    %47 = tpu.matmul %45, %46, %cst_21 {dimension_numbers = #tpu.dot_dimension_numbers<[1], [0], [0], [1], [0, 0, 1, 1], [], []>} : vector<8x8xf32>, vector<8x8xf32>, vector<8x8xf32> -> vector<8x8xf32>
    %48 = vector.extract_strided_slice %10 {offsets = [8, 0], sizes = [8, 32], strides = [1, 1]} : vector<32x32xf32> to vector<8x32xf32>
    %cst_22 = arith.constant dense<0.000000e+00> : vector<8x32xf32>
    %49 = tpu.matmul %47, %48, %cst_22 {dimension_numbers = #tpu.dot_dimension_numbers<[1], [0], [0], [1], [0, 0, 1, 1], [], []>} : vector<8x8xf32>, vector<8x32xf32>, vector<8x32xf32> -> vector<8x32xf32>
    %50 = arith.addf %30, %49 : vector<8x32xf32>
    %51 = vector.extract_strided_slice %7 {offsets = [0, 16], sizes = [8, 8], strides = [1, 1]} : vector<8x32xf32> to vector<8x8xf32>
    %52 = vector.extract_strided_slice %8 {offsets = [0, 16], sizes = [8, 8], strides = [1, 1]} : vector<8x32xf32> to vector<8x8xf32>
    %cst_23 = arith.constant dense<0.000000e+00> : vector<8x8xf32>
    %53 = tpu.matmul %51, %52, %cst_23 {dimension_numbers = #tpu.dot_dimension_numbers<[1], [1], [0], [0], [0, 0, 1, 0], [], []>} : vector<8x8xf32>, vector<8x8xf32>, vector<8x8xf32> -> vector<8x8xf32>
    %cst_24 = arith.constant 0.353553385 : f32
    %54 = vector.broadcast %cst_24 : f32 to vector<8x8xf32>
    %55 = arith.mulf %53, %54 : vector<8x8xf32>
    %cst_25 = arith.constant dense<0xFF800000> : vector<8xf32>
    %56 = vector.multi_reduction <maximumf>, %55, %cst_25 [1] : vector<8x8xf32> to vector<8xf32>
    %57 = vector.shape_cast %56 : vector<8xf32> to vector<8x1xf32>
    %58 = vector.broadcast %57 : vector<8x1xf32> to vector<8x8xf32>
    %59 = arith.subf %55, %58 : vector<8x8xf32>
    %60 = math.exp %59 : vector<8x8xf32>
    %cst_26 = arith.constant dense<0.000000e+00> : vector<8xf32>
    %61 = vector.multi_reduction <add>, %60, %cst_26 [1] : vector<8x8xf32> to vector<8xf32>
    %62 = vector.shape_cast %61 : vector<8xf32> to vector<8x1xf32>
    %63 = tpu.reciprocal %62 {approx = true} : vector<8x1xf32> -> vector<8x1xf32>
    %64 = vector.broadcast %63 : vector<8x1xf32> to vector<8x8xf32>
    %65 = arith.mulf %60, %64 : vector<8x8xf32>
    %66 = vector.extract_strided_slice %9 {offsets = [0, 16], sizes = [8, 8], strides = [1, 1]} : vector<8x32xf32> to vector<8x8xf32>
    %cst_27 = arith.constant dense<0.000000e+00> : vector<8x8xf32>
    %67 = tpu.matmul %65, %66, %cst_27 {dimension_numbers = #tpu.dot_dimension_numbers<[1], [0], [0], [1], [0, 0, 1, 1], [], []>} : vector<8x8xf32>, vector<8x8xf32>, vector<8x8xf32> -> vector<8x8xf32>
    %68 = vector.extract_strided_slice %10 {offsets = [16, 0], sizes = [8, 32], strides = [1, 1]} : vector<32x32xf32> to vector<8x32xf32>
    %cst_28 = arith.constant dense<0.000000e+00> : vector<8x32xf32>
    %69 = tpu.matmul %67, %68, %cst_28 {dimension_numbers = #tpu.dot_dimension_numbers<[1], [0], [0], [1], [0, 0, 1, 1], [], []>} : vector<8x8xf32>, vector<8x32xf32>, vector<8x32xf32> -> vector<8x32xf32>
    %70 = arith.addf %50, %69 : vector<8x32xf32>
    %71 = vector.extract_strided_slice %7 {offsets = [0, 24], sizes = [8, 8], strides = [1, 1]} : vector<8x32xf32> to vector<8x8xf32>
    %72 = vector.extract_strided_slice %8 {offsets = [0, 24], sizes = [8, 8], strides = [1, 1]} : vector<8x32xf32> to vector<8x8xf32>
    %cst_29 = arith.constant dense<0.000000e+00> : vector<8x8xf32>
    %73 = tpu.matmul %71, %72, %cst_29 {dimension_numbers = #tpu.dot_dimension_numbers<[1], [1], [0], [0], [0, 0, 1, 0], [], []>} : vector<8x8xf32>, vector<8x8xf32>, vector<8x8xf32> -> vector<8x8xf32>
    %cst_30 = arith.constant 0.353553385 : f32
    %74 = vector.broadcast %cst_30 : f32 to vector<8x8xf32>
    %75 = arith.mulf %73, %74 : vector<8x8xf32>
    %cst_31 = arith.constant dense<0xFF800000> : vector<8xf32>
    %76 = vector.multi_reduction <maximumf>, %75, %cst_31 [1] : vector<8x8xf32> to vector<8xf32>
    %77 = vector.shape_cast %76 : vector<8xf32> to vector<8x1xf32>
    %78 = vector.broadcast %77 : vector<8x1xf32> to vector<8x8xf32>
    %79 = arith.subf %75, %78 : vector<8x8xf32>
    %80 = math.exp %79 : vector<8x8xf32>
    %cst_32 = arith.constant dense<0.000000e+00> : vector<8xf32>
    %81 = vector.multi_reduction <add>, %80, %cst_32 [1] : vector<8x8xf32> to vector<8xf32>
    %82 = vector.shape_cast %81 : vector<8xf32> to vector<8x1xf32>
    %83 = tpu.reciprocal %82 {approx = true} : vector<8x1xf32> -> vector<8x1xf32>
    %84 = vector.broadcast %83 : vector<8x1xf32> to vector<8x8xf32>
    %85 = arith.mulf %80, %84 : vector<8x8xf32>
    %86 = vector.extract_strided_slice %9 {offsets = [0, 24], sizes = [8, 8], strides = [1, 1]} : vector<8x32xf32> to vector<8x8xf32>
    %cst_33 = arith.constant dense<0.000000e+00> : vector<8x8xf32>
    %87 = tpu.matmul %85, %86, %cst_33 {dimension_numbers = #tpu.dot_dimension_numbers<[1], [0], [0], [1], [0, 0, 1, 1], [], []>} : vector<8x8xf32>, vector<8x8xf32>, vector<8x8xf32> -> vector<8x8xf32>
    %88 = vector.extract_strided_slice %10 {offsets = [24, 0], sizes = [8, 32], strides = [1, 1]} : vector<32x32xf32> to vector<8x32xf32>
    %cst_34 = arith.constant dense<0.000000e+00> : vector<8x32xf32>
    %89 = tpu.matmul %87, %88, %cst_34 {dimension_numbers = #tpu.dot_dimension_numbers<[1], [0], [0], [1], [0, 0, 1, 1], [], []>} : vector<8x8xf32>, vector<8x32xf32>, vector<8x32xf32> -> vector<8x32xf32>
    %90 = arith.addf %70, %89 : vector<8x32xf32>
    %91 = vector.broadcast %11 : vector<1x32xf32> to vector<8x32xf32>
    %92 = arith.addf %90, %91 : vector<8x32xf32>
    %93 = arith.addf %0, %92 : vector<8x32xf32>
    %c0_35 = arith.constant 0 : index
    %c0_36 = arith.constant 0 : index
    %94 = vector.load %arg7[%c0_35, %c0_36] : memref<1x32xf32, #tpu.memory_space<vmem>>, vector<1x32xf32>
    %c0_37 = arith.constant 0 : index
    %c0_38 = arith.constant 0 : index
    %95 = vector.load %arg8[%c0_37, %c0_38] : memref<1x32xf32, #tpu.memory_space<vmem>>, vector<1x32xf32>
    %cst_39 = arith.constant dense<0.000000e+00> : vector<8xf32>
    %96 = vector.multi_reduction <add>, %93, %cst_39 [1] : vector<8x32xf32> to vector<8xf32>
    %97 = vector.shape_cast %96 : vector<8xf32> to vector<8x1xf32>
    %cst_40 = arith.constant 3.200000e+01 : f32
    %98 = vector.broadcast %cst_40 : f32 to vector<8x1xf32>
    %99 = arith.divf %97, %98 : vector<8x1xf32>
    %100 = vector.broadcast %99 : vector<8x1xf32> to vector<8x32xf32>
    %101 = arith.subf %93, %100 : vector<8x32xf32>
    %102 = arith.mulf %101, %101 : vector<8x32xf32>
    %cst_41 = arith.constant dense<0.000000e+00> : vector<8xf32>
    %103 = vector.multi_reduction <add>, %102, %cst_41 [1] : vector<8x32xf32> to vector<8xf32>
    %104 = vector.shape_cast %103 : vector<8xf32> to vector<8x1xf32>
    %cst_42 = arith.constant 3.200000e+01 : f32
    %105 = vector.broadcast %cst_42 : f32 to vector<8x1xf32>
    %106 = arith.divf %104, %105 : vector<8x1xf32>
    %107 = vector.broadcast %99 : vector<8x1xf32> to vector<8x32xf32>
    %108 = arith.subf %93, %107 : vector<8x32xf32>
    %cst_43 = arith.constant 9.99999974E-6 : f32
    %109 = vector.broadcast %cst_43 : f32 to vector<8x1xf32>
    %110 = arith.addf %106, %109 : vector<8x1xf32>
    %111 = math.rsqrt %110 : vector<8x1xf32>
    %112 = vector.broadcast %111 : vector<8x1xf32> to vector<8x32xf32>
    %113 = arith.mulf %108, %112 : vector<8x32xf32>
    %114 = vector.broadcast %94 : vector<1x32xf32> to vector<8x32xf32>
    %115 = arith.mulf %113, %114 : vector<8x32xf32>
    %116 = vector.broadcast %95 : vector<1x32xf32> to vector<8x32xf32>
    %117 = arith.addf %115, %116 : vector<8x32xf32>
    %c0_44 = arith.constant 0 : index
    %c0_45 = arith.constant 0 : index
    %118 = vector.load %arg9[%c0_44, %c0_45] : memref<32x32xf32, #tpu.memory_space<vmem>>, vector<32x32xf32>
    %cst_46 = arith.constant dense<0.000000e+00> : vector<8x32xf32>
    %119 = tpu.matmul %117, %118, %cst_46 {dimension_numbers = #tpu.dot_dimension_numbers<[1], [0], [0], [1], [0, 0, 1, 1], [], []>} : vector<8x32xf32>, vector<32x32xf32>, vector<8x32xf32> -> vector<8x32xf32>
    %c0_47 = arith.constant 0 : index
    %c0_48 = arith.constant 0 : index
    %120 = vector.load %arg10[%c0_47, %c0_48] : memref<1x32xf32, #tpu.memory_space<vmem>>, vector<1x32xf32>
    %121 = vector.broadcast %120 : vector<1x32xf32> to vector<8x32xf32>
    %122 = arith.addf %119, %121 : vector<8x32xf32>
    %c0_49 = arith.constant 0 : index
    %c0_50 = arith.constant 0 : index
    %123 = vector.load %arg11[%c0_49, %c0_50] : memref<32x64xf32, #tpu.memory_space<vmem>>, vector<32x64xf32>
    %cst_51 = arith.constant dense<0.000000e+00> : vector<8x64xf32>
    %124 = tpu.matmul %1, %123, %cst_51 {dimension_numbers = #tpu.dot_dimension_numbers<[1], [0], [0], [1], [0, 0, 1, 1], [], []>} : vector<8x32xf32>, vector<32x64xf32>, vector<8x64xf32> -> vector<8x64xf32>
    %c0_52 = arith.constant 0 : index
    %c0_53 = arith.constant 0 : index
    %125 = vector.load %arg12[%c0_52, %c0_53] : memref<1x64xf32, #tpu.memory_space<vmem>>, vector<1x64xf32>
    %126 = vector.broadcast %125 : vector<1x64xf32> to vector<8x64xf32>
    %127 = arith.addf %124, %126 : vector<8x64xf32>
    %128 = vector.extract_strided_slice %127 {offsets = [0, 0], sizes = [8, 32], strides = [1, 1]} : vector<8x64xf32> to vector<8x32xf32>
    %129 = vector.extract_strided_slice %127 {offsets = [0, 32], sizes = [8, 32], strides = [1, 1]} : vector<8x64xf32> to vector<8x32xf32>
    %c0_54 = arith.constant 0 : index
    %c0_55 = arith.constant 0 : index
    %130 = vector.load %arg13[%c0_54, %c0_55] : memref<32x32xf32, #tpu.memory_space<vmem>>, vector<32x32xf32>
    %c0_56 = arith.constant 0 : index
    %c0_57 = arith.constant 0 : index
    %131 = vector.load %arg14[%c0_56, %c0_57] : memref<1x32xf32, #tpu.memory_space<vmem>>, vector<1x32xf32>
    %132 = vector.extract_strided_slice %122 {offsets = [0, 0], sizes = [8, 8], strides = [1, 1]} : vector<8x32xf32> to vector<8x8xf32>
    %133 = vector.extract_strided_slice %128 {offsets = [0, 0], sizes = [8, 8], strides = [1, 1]} : vector<8x32xf32> to vector<8x8xf32>
    %cst_58 = arith.constant dense<0.000000e+00> : vector<8x8xf32>
    %134 = tpu.matmul %132, %133, %cst_58 {dimension_numbers = #tpu.dot_dimension_numbers<[1], [1], [0], [0], [0, 0, 1, 0], [], []>} : vector<8x8xf32>, vector<8x8xf32>, vector<8x8xf32> -> vector<8x8xf32>
    %cst_59 = arith.constant 0.353553385 : f32
    %135 = vector.broadcast %cst_59 : f32 to vector<8x8xf32>
    %136 = arith.mulf %134, %135 : vector<8x8xf32>
    %cst_60 = arith.constant dense<0xFF800000> : vector<8xf32>
    %137 = vector.multi_reduction <maximumf>, %136, %cst_60 [1] : vector<8x8xf32> to vector<8xf32>
    %138 = vector.shape_cast %137 : vector<8xf32> to vector<8x1xf32>
    %139 = vector.broadcast %138 : vector<8x1xf32> to vector<8x8xf32>
    %140 = arith.subf %136, %139 : vector<8x8xf32>
    %141 = math.exp %140 : vector<8x8xf32>
    %cst_61 = arith.constant dense<0.000000e+00> : vector<8xf32>
    %142 = vector.multi_reduction <add>, %141, %cst_61 [1] : vector<8x8xf32> to vector<8xf32>
    %143 = vector.shape_cast %142 : vector<8xf32> to vector<8x1xf32>
    %144 = tpu.reciprocal %143 {approx = true} : vector<8x1xf32> -> vector<8x1xf32>
    %145 = vector.broadcast %144 : vector<8x1xf32> to vector<8x8xf32>
    %146 = arith.mulf %141, %145 : vector<8x8xf32>
    %147 = vector.extract_strided_slice %129 {offsets = [0, 0], sizes = [8, 8], strides = [1, 1]} : vector<8x32xf32> to vector<8x8xf32>
    %cst_62 = arith.constant dense<0.000000e+00> : vector<8x8xf32>
    %148 = tpu.matmul %146, %147, %cst_62 {dimension_numbers = #tpu.dot_dimension_numbers<[1], [0], [0], [1], [0, 0, 1, 1], [], []>} : vector<8x8xf32>, vector<8x8xf32>, vector<8x8xf32> -> vector<8x8xf32>
    %149 = vector.extract_strided_slice %130 {offsets = [0, 0], sizes = [8, 32], strides = [1, 1]} : vector<32x32xf32> to vector<8x32xf32>
    %cst_63 = arith.constant dense<0.000000e+00> : vector<8x32xf32>
    %150 = tpu.matmul %148, %149, %cst_63 {dimension_numbers = #tpu.dot_dimension_numbers<[1], [0], [0], [1], [0, 0, 1, 1], [], []>} : vector<8x8xf32>, vector<8x32xf32>, vector<8x32xf32> -> vector<8x32xf32>
    %151 = vector.extract_strided_slice %122 {offsets = [0, 8], sizes = [8, 8], strides = [1, 1]} : vector<8x32xf32> to vector<8x8xf32>
    %152 = vector.extract_strided_slice %128 {offsets = [0, 8], sizes = [8, 8], strides = [1, 1]} : vector<8x32xf32> to vector<8x8xf32>
    %cst_64 = arith.constant dense<0.000000e+00> : vector<8x8xf32>
    %153 = tpu.matmul %151, %152, %cst_64 {dimension_numbers = #tpu.dot_dimension_numbers<[1], [1], [0], [0], [0, 0, 1, 0], [], []>} : vector<8x8xf32>, vector<8x8xf32>, vector<8x8xf32> -> vector<8x8xf32>
    %cst_65 = arith.constant 0.353553385 : f32
    %154 = vector.broadcast %cst_65 : f32 to vector<8x8xf32>
    %155 = arith.mulf %153, %154 : vector<8x8xf32>
    %cst_66 = arith.constant dense<0xFF800000> : vector<8xf32>
    %156 = vector.multi_reduction <maximumf>, %155, %cst_66 [1] : vector<8x8xf32> to vector<8xf32>
    %157 = vector.shape_cast %156 : vector<8xf32> to vector<8x1xf32>
    %158 = vector.broadcast %157 : vector<8x1xf32> to vector<8x8xf32>
    %159 = arith.subf %155, %158 : vector<8x8xf32>
    %160 = math.exp %159 : vector<8x8xf32>
    %cst_67 = arith.constant dense<0.000000e+00> : vector<8xf32>
    %161 = vector.multi_reduction <add>, %160, %cst_67 [1] : vector<8x8xf32> to vector<8xf32>
    %162 = vector.shape_cast %161 : vector<8xf32> to vector<8x1xf32>
    %163 = tpu.reciprocal %162 {approx = true} : vector<8x1xf32> -> vector<8x1xf32>
    %164 = vector.broadcast %163 : vector<8x1xf32> to vector<8x8xf32>
    %165 = arith.mulf %160, %164 : vector<8x8xf32>
    %166 = vector.extract_strided_slice %129 {offsets = [0, 8], sizes = [8, 8], strides = [1, 1]} : vector<8x32xf32> to vector<8x8xf32>
    %cst_68 = arith.constant dense<0.000000e+00> : vector<8x8xf32>
    %167 = tpu.matmul %165, %166, %cst_68 {dimension_numbers = #tpu.dot_dimension_numbers<[1], [0], [0], [1], [0, 0, 1, 1], [], []>} : vector<8x8xf32>, vector<8x8xf32>, vector<8x8xf32> -> vector<8x8xf32>
    %168 = vector.extract_strided_slice %130 {offsets = [8, 0], sizes = [8, 32], strides = [1, 1]} : vector<32x32xf32> to vector<8x32xf32>
    %cst_69 = arith.constant dense<0.000000e+00> : vector<8x32xf32>
    %169 = tpu.matmul %167, %168, %cst_69 {dimension_numbers = #tpu.dot_dimension_numbers<[1], [0], [0], [1], [0, 0, 1, 1], [], []>} : vector<8x8xf32>, vector<8x32xf32>, vector<8x32xf32> -> vector<8x32xf32>
    %170 = arith.addf %150, %169 : vector<8x32xf32>
    %171 = vector.extract_strided_slice %122 {offsets = [0, 16], sizes = [8, 8], strides = [1, 1]} : vector<8x32xf32> to vector<8x8xf32>
    %172 = vector.extract_strided_slice %128 {offsets = [0, 16], sizes = [8, 8], strides = [1, 1]} : vector<8x32xf32> to vector<8x8xf32>
    %cst_70 = arith.constant dense<0.000000e+00> : vector<8x8xf32>
    %173 = tpu.matmul %171, %172, %cst_70 {dimension_numbers = #tpu.dot_dimension_numbers<[1], [1], [0], [0], [0, 0, 1, 0], [], []>} : vector<8x8xf32>, vector<8x8xf32>, vector<8x8xf32> -> vector<8x8xf32>
    %cst_71 = arith.constant 0.353553385 : f32
    %174 = vector.broadcast %cst_71 : f32 to vector<8x8xf32>
    %175 = arith.mulf %173, %174 : vector<8x8xf32>
    %cst_72 = arith.constant dense<0xFF800000> : vector<8xf32>
    %176 = vector.multi_reduction <maximumf>, %175, %cst_72 [1] : vector<8x8xf32> to vector<8xf32>
    %177 = vector.shape_cast %176 : vector<8xf32> to vector<8x1xf32>
    %178 = vector.broadcast %177 : vector<8x1xf32> to vector<8x8xf32>
    %179 = arith.subf %175, %178 : vector<8x8xf32>
    %180 = math.exp %179 : vector<8x8xf32>
    %cst_73 = arith.constant dense<0.000000e+00> : vector<8xf32>
    %181 = vector.multi_reduction <add>, %180, %cst_73 [1] : vector<8x8xf32> to vector<8xf32>
    %182 = vector.shape_cast %181 : vector<8xf32> to vector<8x1xf32>
    %183 = tpu.reciprocal %182 {approx = true} : vector<8x1xf32> -> vector<8x1xf32>
    %184 = vector.broadcast %183 : vector<8x1xf32> to vector<8x8xf32>
    %185 = arith.mulf %180, %184 : vector<8x8xf32>
    %186 = vector.extract_strided_slice %129 {offsets = [0, 16], sizes = [8, 8], strides = [1, 1]} : vector<8x32xf32> to vector<8x8xf32>
    %cst_74 = arith.constant dense<0.000000e+00> : vector<8x8xf32>
    %187 = tpu.matmul %185, %186, %cst_74 {dimension_numbers = #tpu.dot_dimension_numbers<[1], [0], [0], [1], [0, 0, 1, 1], [], []>} : vector<8x8xf32>, vector<8x8xf32>, vector<8x8xf32> -> vector<8x8xf32>
    %188 = vector.extract_strided_slice %130 {offsets = [16, 0], sizes = [8, 32], strides = [1, 1]} : vector<32x32xf32> to vector<8x32xf32>
    %cst_75 = arith.constant dense<0.000000e+00> : vector<8x32xf32>
    %189 = tpu.matmul %187, %188, %cst_75 {dimension_numbers = #tpu.dot_dimension_numbers<[1], [0], [0], [1], [0, 0, 1, 1], [], []>} : vector<8x8xf32>, vector<8x32xf32>, vector<8x32xf32> -> vector<8x32xf32>
    %190 = arith.addf %170, %189 : vector<8x32xf32>
    %191 = vector.extract_strided_slice %122 {offsets = [0, 24], sizes = [8, 8], strides = [1, 1]} : vector<8x32xf32> to vector<8x8xf32>
    %192 = vector.extract_strided_slice %128 {offsets = [0, 24], sizes = [8, 8], strides = [1, 1]} : vector<8x32xf32> to vector<8x8xf32>
    %cst_76 = arith.constant dense<0.000000e+00> : vector<8x8xf32>
    %193 = tpu.matmul %191, %192, %cst_76 {dimension_numbers = #tpu.dot_dimension_numbers<[1], [1], [0], [0], [0, 0, 1, 0], [], []>} : vector<8x8xf32>, vector<8x8xf32>, vector<8x8xf32> -> vector<8x8xf32>
    %cst_77 = arith.constant 0.353553385 : f32
    %194 = vector.broadcast %cst_77 : f32 to vector<8x8xf32>
    %195 = arith.mulf %193, %194 : vector<8x8xf32>
    %cst_78 = arith.constant dense<0xFF800000> : vector<8xf32>
    %196 = vector.multi_reduction <maximumf>, %195, %cst_78 [1] : vector<8x8xf32> to vector<8xf32>
    %197 = vector.shape_cast %196 : vector<8xf32> to vector<8x1xf32>
    %198 = vector.broadcast %197 : vector<8x1xf32> to vector<8x8xf32>
    %199 = arith.subf %195, %198 : vector<8x8xf32>
    %200 = math.exp %199 : vector<8x8xf32>
    %cst_79 = arith.constant dense<0.000000e+00> : vector<8xf32>
    %201 = vector.multi_reduction <add>, %200, %cst_79 [1] : vector<8x8xf32> to vector<8xf32>
    %202 = vector.shape_cast %201 : vector<8xf32> to vector<8x1xf32>
    %203 = tpu.reciprocal %202 {approx = true} : vector<8x1xf32> -> vector<8x1xf32>
    %204 = vector.broadcast %203 : vector<8x1xf32> to vector<8x8xf32>
    %205 = arith.mulf %200, %204 : vector<8x8xf32>
    %206 = vector.extract_strided_slice %129 {offsets = [0, 24], sizes = [8, 8], strides = [1, 1]} : vector<8x32xf32> to vector<8x8xf32>
    %cst_80 = arith.constant dense<0.000000e+00> : vector<8x8xf32>
    %207 = tpu.matmul %205, %206, %cst_80 {dimension_numbers = #tpu.dot_dimension_numbers<[1], [0], [0], [1], [0, 0, 1, 1], [], []>} : vector<8x8xf32>, vector<8x8xf32>, vector<8x8xf32> -> vector<8x8xf32>
    %208 = vector.extract_strided_slice %130 {offsets = [24, 0], sizes = [8, 32], strides = [1, 1]} : vector<32x32xf32> to vector<8x32xf32>
    %cst_81 = arith.constant dense<0.000000e+00> : vector<8x32xf32>
    %209 = tpu.matmul %207, %208, %cst_81 {dimension_numbers = #tpu.dot_dimension_numbers<[1], [0], [0], [1], [0, 0, 1, 1], [], []>} : vector<8x8xf32>, vector<8x32xf32>, vector<8x32xf32> -> vector<8x32xf32>
    %210 = arith.addf %190, %209 : vector<8x32xf32>
    %211 = vector.broadcast %131 : vector<1x32xf32> to vector<8x32xf32>
    %212 = arith.addf %210, %211 : vector<8x32xf32>
    %213 = arith.addf %117, %212 : vector<8x32xf32>
    %c0_82 = arith.constant 0 : index
    %c0_83 = arith.constant 0 : index
    %214 = vector.load %arg15[%c0_82, %c0_83] : memref<1x32xf32, #tpu.memory_space<vmem>>, vector<1x32xf32>
    %c0_84 = arith.constant 0 : index
    %c0_85 = arith.constant 0 : index
    %215 = vector.load %arg16[%c0_84, %c0_85] : memref<1x32xf32, #tpu.memory_space<vmem>>, vector<1x32xf32>
    %cst_86 = arith.constant dense<0.000000e+00> : vector<8xf32>
    %216 = vector.multi_reduction <add>, %213, %cst_86 [1] : vector<8x32xf32> to vector<8xf32>
    %217 = vector.shape_cast %216 : vector<8xf32> to vector<8x1xf32>
    %cst_87 = arith.constant 3.200000e+01 : f32
    %218 = vector.broadcast %cst_87 : f32 to vector<8x1xf32>
    %219 = arith.divf %217, %218 : vector<8x1xf32>
    %220 = vector.broadcast %219 : vector<8x1xf32> to vector<8x32xf32>
    %221 = arith.subf %213, %220 : vector<8x32xf32>
    %222 = arith.mulf %221, %221 : vector<8x32xf32>
    %cst_88 = arith.constant dense<0.000000e+00> : vector<8xf32>
    %223 = vector.multi_reduction <add>, %222, %cst_88 [1] : vector<8x32xf32> to vector<8xf32>
    %224 = vector.shape_cast %223 : vector<8xf32> to vector<8x1xf32>
    %cst_89 = arith.constant 3.200000e+01 : f32
    %225 = vector.broadcast %cst_89 : f32 to vector<8x1xf32>
    %226 = arith.divf %224, %225 : vector<8x1xf32>
    %227 = vector.broadcast %219 : vector<8x1xf32> to vector<8x32xf32>
    %228 = arith.subf %213, %227 : vector<8x32xf32>
    %cst_90 = arith.constant 9.99999974E-6 : f32
    %229 = vector.broadcast %cst_90 : f32 to vector<8x1xf32>
    %230 = arith.addf %226, %229 : vector<8x1xf32>
    %231 = math.rsqrt %230 : vector<8x1xf32>
    %232 = vector.broadcast %231 : vector<8x1xf32> to vector<8x32xf32>
    %233 = arith.mulf %228, %232 : vector<8x32xf32>
    %234 = vector.broadcast %214 : vector<1x32xf32> to vector<8x32xf32>
    %235 = arith.mulf %233, %234 : vector<8x32xf32>
    %236 = vector.broadcast %215 : vector<1x32xf32> to vector<8x32xf32>
    %237 = arith.addf %235, %236 : vector<8x32xf32>
    %c0_91 = arith.constant 0 : index
    %c0_92 = arith.constant 0 : index
    %238 = vector.load %arg17[%c0_91, %c0_92] : memref<32x160xf32, #tpu.memory_space<vmem>>, vector<32x160xf32>
    %cst_93 = arith.constant dense<0.000000e+00> : vector<8x160xf32>
    %239 = tpu.matmul %237, %238, %cst_93 {dimension_numbers = #tpu.dot_dimension_numbers<[1], [0], [0], [1], [0, 0, 1, 1], [], []>} : vector<8x32xf32>, vector<32x160xf32>, vector<8x160xf32> -> vector<8x160xf32>
    %c0_94 = arith.constant 0 : index
    %c0_95 = arith.constant 0 : index
    %240 = vector.load %arg18[%c0_94, %c0_95] : memref<1x160xf32, #tpu.memory_space<vmem>>, vector<1x160xf32>
    %241 = vector.broadcast %240 : vector<1x160xf32> to vector<8x160xf32>
    %242 = arith.addf %239, %241 : vector<8x160xf32>
    %cst_96 = arith.constant 0.000000e+00 : f32
    %243 = vector.broadcast %cst_96 : f32 to vector<8x160xf32>
    %244 = arith.maximumf %242, %243 : vector<8x160xf32>
    %c0_97 = arith.constant 0 : index
    %c0_98 = arith.constant 0 : index
    %245 = vector.load %arg19[%c0_97, %c0_98] : memref<160x32xf32, #tpu.memory_space<vmem>>, vector<160x32xf32>
    %cst_99 = arith.constant dense<0.000000e+00> : vector<8x32xf32>
    %246 = tpu.matmul %244, %245, %cst_99 {dimension_numbers = #tpu.dot_dimension_numbers<[1], [0], [0], [1], [0, 0, 1, 1], [], []>} : vector<8x160xf32>, vector<160x32xf32>, vector<8x32xf32> -> vector<8x32xf32>
    %c0_100 = arith.constant 0 : index
    %c0_101 = arith.constant 0 : index
    %247 = vector.load %arg20[%c0_100, %c0_101] : memref<1x32xf32, #tpu.memory_space<vmem>>, vector<1x32xf32>
    %248 = vector.broadcast %247 : vector<1x32xf32> to vector<8x32xf32>
    %249 = arith.addf %246, %248 : vector<8x32xf32>
    %250 = arith.addf %237, %249 : vector<8x32xf32>
    %c0_102 = arith.constant 0 : index
    %c0_103 = arith.constant 0 : index
    %251 = vector.load %arg21[%c0_102, %c0_103] : memref<1x32xf32, #tpu.memory_space<vmem>>, vector<1x32xf32>
    %c0_104 = arith.constant 0 : index
    %c0_105 = arith.constant 0 : index
    %252 = vector.load %arg22[%c0_104, %c0_105] : memref<1x32xf32, #tpu.memory_space<vmem>>, vector<1x32xf32>
    %cst_106 = arith.constant dense<0.000000e+00> : vector<8xf32>
    %253 = vector.multi_reduction <add>, %250, %cst_106 [1] : vector<8x32xf32> to vector<8xf32>
    %254 = vector.shape_cast %253 : vector<8xf32> to vector<8x1xf32>
    %cst_107 = arith.constant 3.200000e+01 : f32
    %255 = vector.broadcast %cst_107 : f32 to vector<8x1xf32>
    %256 = arith.divf %254, %255 : vector<8x1xf32>
    %257 = vector.broadcast %256 : vector<8x1xf32> to vector<8x32xf32>
    %258 = arith.subf %250, %257 : vector<8x32xf32>
    %259 = arith.mulf %258, %258 : vector<8x32xf32>
    %cst_108 = arith.constant dense<0.000000e+00> : vector<8xf32>
    %260 = vector.multi_reduction <add>, %259, %cst_108 [1] : vector<8x32xf32> to vector<8xf32>
    %261 = vector.shape_cast %260 : vector<8xf32> to vector<8x1xf32>
    %cst_109 = arith.constant 3.200000e+01 : f32
    %262 = vector.broadcast %cst_109 : f32 to vector<8x1xf32>
    %263 = arith.divf %261, %262 : vector<8x1xf32>
    %264 = vector.broadcast %256 : vector<8x1xf32> to vector<8x32xf32>
    %265 = arith.subf %250, %264 : vector<8x32xf32>
    %cst_110 = arith.constant 9.99999974E-6 : f32
    %266 = vector.broadcast %cst_110 : f32 to vector<8x1xf32>
    %267 = arith.addf %263, %266 : vector<8x1xf32>
    %268 = math.rsqrt %267 : vector<8x1xf32>
    %269 = vector.broadcast %268 : vector<8x1xf32> to vector<8x32xf32>
    %270 = arith.mulf %265, %269 : vector<8x32xf32>
    %271 = vector.broadcast %251 : vector<1x32xf32> to vector<8x32xf32>
    %272 = arith.mulf %270, %271 : vector<8x32xf32>
    %273 = vector.broadcast %252 : vector<1x32xf32> to vector<8x32xf32>
    %274 = arith.addf %272, %273 : vector<8x32xf32>
    %c0_111 = arith.constant 0 : index
    %c0_112 = arith.constant 0 : index
    %275 = vector.load %arg23[%c0_111, %c0_112] : memref<8x32xf32, #tpu.memory_space<vmem>>, vector<8x32xf32>
    tpu.vector_store %arg23[%c0_111, %c0_112], %274 {strides = array<i32>} : memref<8x32xf32, #tpu.memory_space<vmem>>, vector<8x32xf32>,
    return
  }
  func.func @transform_0(%arg0: i32) -> (i32, i32) {
    %c0_i32 = arith.constant 0 : i32
    %c0_i32_0 = arith.constant 0 : i32
    return %arg0, %c0_i32 : i32, i32
  }
  func.func @transform_1(%arg0: i32) -> (i32, i32) {
    %c0_i32 = arith.constant 0 : i32
    %c0_i32_0 = arith.constant 0 : i32
    return %arg0, %c0_i32 : i32, i32
  }
  func.func @transform_2(%arg0: i32) -> (i32, i32) {
    %c0_i32 = arith.constant 0 : i32
    %c0_i32_0 = arith.constant 0 : i32
    %c0_i32_1 = arith.constant 0 : i32
    return %c0_i32, %c0_i32_0 : i32, i32
  }
  func.func @transform_3(%arg0: i32) -> (i32, i32) {
    %c0_i32 = arith.constant 0 : i32
    %c0_i32_0 = arith.constant 0 : i32
    %c0_i32_1 = arith.constant 0 : i32
    return %c0_i32, %c0_i32_0 : i32, i32
  }
  func.func @transform_4(%arg0: i32) -> (i32, i32) {
    %c0_i32 = arith.constant 0 : i32
    %c0_i32_0 = arith.constant 0 : i32
    %c0_i32_1 = arith.constant 0 : i32
    return %c0_i32, %c0_i32_0 : i32, i32
  }
  func.func @transform_5(%arg0: i32) -> (i32, i32) {
    %c0_i32 = arith.constant 0 : i32
    %c0_i32_0 = arith.constant 0 : i32
    %c0_i32_1 = arith.constant 0 : i32
    return %c0_i32, %c0_i32_0 : i32, i32
  }
  func.func @transform_6(%arg0: i32) -> (i32, i32) {
    %c0_i32 = arith.constant 0 : i32
    %c0_i32_0 = arith.constant 0 : i32
    %c0_i32_1 = arith.constant 0 : i32
    return %c0_i32, %c0_i32_0 : i32, i32
  }
  func.func @transform_7(%arg0: i32) -> (i32, i32) {
    %c0_i32 = arith.constant 0 : i32
    %c0_i32_0 = arith.constant 0 : i32
    %c0_i32_1 = arith.constant 0 : i32
    return %c0_i32, %c0_i32_0 : i32, i32
  }
  func.func @transform_8(%arg0: i32) -> (i32, i32) {
    %c0_i32 = arith.constant 0 : i32
    %c0_i32_0 = arith.constant 0 : i32
    %c0_i32_1 = arith.constant 0 : i32
    return %c0_i32, %c0_i32_0 : i32, i32
  }
  func.func @transform_9(%arg0: i32) -> (i32, i32) {
    %c0_i32 = arith.constant 0 : i32
    %c0_i32_0 = arith.constant 0 : i32
    %c0_i32_1 = arith.constant 0 : i32
    return %c0_i32, %c0_i32_0 : i32, i32
  }
  func.func @transform_10(%arg0: i32) -> (i32, i32) {
    %c0_i32 = arith.constant 0 : i32
    %c0_i32_0 = arith.constant 0 : i32
    %c0_i32_1 = arith.constant 0 : i32
    return %c0_i32, %c0_i32_0 : i32, i32
  }
  func.func @transform_11(%arg0: i32) -> (i32, i32) {
    %c0_i32 = arith.constant 0 : i32
    %c0_i32_0 = arith.constant 0 : i32
    %c0_i32_1 = arith.constant 0 : i32
    return %c0_i32, %c0_i32_0 : i32, i32
  }
  func.func @transform_12(%arg0: i32) -> (i32, i32) {
    %c0_i32 = arith.constant 0 : i32
    %c0_i32_0 = arith.constant 0 : i32
    %c0_i32_1 = arith.constant 0 : i32
    return %c0_i32, %c0_i32_0 : i32, i32
  }
  func.func @transform_13(%arg0: i32) -> (i32, i32) {
    %c0_i32 = arith.constant 0 : i32
    %c0_i32_0 = arith.constant 0 : i32
    %c0_i32_1 = arith.constant 0 : i32
    return %c0_i32, %c0_i32_0 : i32, i32
  }
  func.func @transform_14(%arg0: i32) -> (i32, i32) {
    %c0_i32 = arith.constant 0 : i32
    %c0_i32_0 = arith.constant 0 : i32
    %c0_i32_1 = arith.constant 0 : i32
    return %c0_i32, %c0_i32_0 : i32, i32
  }
  func.func @transform_15(%arg0: i32) -> (i32, i32) {
    %c0_i32 = arith.constant 0 : i32
    %c0_i32_0 = arith.constant 0 : i32
    %c0_i32_1 = arith.constant 0 : i32
    return %c0_i32, %c0_i32_0 : i32, i32
  }
  func.func @transform_16(%arg0: i32) -> (i32, i32) {
    %c0_i32 = arith.constant 0 : i32
    %c0_i32_0 = arith.constant 0 : i32
    %c0_i32_1 = arith.constant 0 : i32
    return %c0_i32, %c0_i32_0 : i32, i32
  }
  func.func @transform_17(%arg0: i32) -> (i32, i32) {
    %c0_i32 = arith.constant 0 : i32
    %c0_i32_0 = arith.constant 0 : i32
    %c0_i32_1 = arith.constant 0 : i32
    return %c0_i32, %c0_i32_0 : i32, i32
  }
  func.func @transform_18(%arg0: i32) -> (i32, i32) {
    %c0_i32 = arith.constant 0 : i32
    %c0_i32_0 = arith.constant 0 : i32
    %c0_i32_1 = arith.constant 0 : i32
    return %c0_i32, %c0_i32_0 : i32, i32
  }
  func.func @transform_19(%arg0: i32) -> (i32, i32) {
    %c0_i32 = arith.constant 0 : i32
    %c0_i32_0 = arith.constant 0 : i32
    %c0_i32_1 = arith.constant 0 : i32
    return %c0_i32, %c0_i32_0 : i32, i32
  }
  func.func @transform_20(%arg0: i32) -> (i32, i32) {
    %c0_i32 = arith.constant 0 : i32
    %c0_i32_0 = arith.constant 0 : i32
    %c0_i32_1 = arith.constant 0 : i32
    return %c0_i32, %c0_i32_0 : i32, i32
  }
  func.func @transform_21(%arg0: i32) -> (i32, i32) {
    %c0_i32 = arith.constant 0 : i32
    %c0_i32_0 = arith.constant 0 : i32
    %c0_i32_1 = arith.constant 0 : i32
    return %c0_i32, %c0_i32_0 : i32, i32
  }
  func.func @transform_22(%arg0: i32) -> (i32, i32) {
    %c0_i32 = arith.constant 0 : i32
    %c0_i32_0 = arith.constant 0 : i32
    return %arg0, %c0_i32 : i32, i32
  }
}

</mosaic_0001>

<bundles_post_ra>
// kernel: transformer_forward.10
= control target key start
LH: loop header
LB: loop body
LE: loop exit
PB: predicated region body
PF: predicated region fallthrough
CT: control target
= control target key end

     0   :  { %s414_s18 = smov 0   ;;  %s443_s0 = inlined_call_operand.vmem [shape: f32[16,4], index: 0, kind: input, shape index: {}]   ;;  %s444_s1 = inlined_call_operand.vmem [shape: f32[4,32], index: 1, kind: input, shape index: {}]   ;;  %s445_s2 = inlined_call_operand.vmem [shape: f32[1,32], index: 2, kind: input, shape index: {}]   ;;  %s446_s3 = inlined_call_operand.vmem [shape: f32[8,32], index: 3, kind: input, shape index: {}]   ;;  %s447_s4 = inlined_call_operand.vmem [shape: f32[16,32], index: 4, kind: output, shape index: {0}]   ;;  %s448_s5 = inlined_call_operand.vmem [shape: f32[16,32], index: 5, kind: output, shape index: {1}]  }
   0x1 LB: > { %s355_s19 = sadd.s32 4294967295, %s382_s18   ;;  %p359_p0 = scmp.ge.s32.totalorder %s382_s18, 1  ;;  %s382_s18 = sphi %s414_s18, %s16_s18  }
   0x2   : > { %p189_p1 = scmp.lt.s32.totalorder %s382_s18, 3 }
   0x4   : > { %p190_p2 = pnand %p359_p0, %p189_p1 }
   0x5   : > { %p219_p3 = scmp.lt.s32.totalorder (!%p190_p2), %s355_s19, 1 }
   0x6   : > { %193 = sbr.rel (%p190_p2) target bundleno = 148 (0x94), region = 36 }
   0xb   : > { %v232_v0 = vld [vmem:[%s444_s1] sm:$0xf]  ;;  %vm241_vm0 = vcmask 1043456   ;;  %s450_s19 = smov (!%p219_p3, %s355_s19), 1  ;;  %vm237_vm1 = vcmask 31744   ;;  %vm265_vm2 = vcmask 261120  }
   0xc   : > { %363 = vmatpush.msk.msra.mxu0 %vm241_vm0, %v232_v0  ;;  %s360_s22 = sshll.u32 %s450_s19, 3  ;;  %v375_v2 = vld [vmem:[%s445_s2] ss:$0 sm:$0xff] }
   0xd   : > { %s222_s25 = scalar_lea.vmem %s443_s0, %s360_s22  ;;  %s226_s30 = scalar_lea.vmem %s447_s4, %s360_s22  ;;  %v268_v5 = vld [vmem:[%s446_s3] sm:$0xff] }
   0xe   : > { %v231_v1 = vld [vmem:[%s222_s25] sm:$0xff]  ;;  %s230_s10 = scalar_lea.vmem %s448_s5, %s360_s22 }
   0xf   : > { %364 = vmatmul.msk.f32.vlgmr.msra.gmra.mxu0 %vm237_vm1, %v231_v1 }
  0x8c   : > { %v262_v3 = vpop.f32.mrf.mxu0 }
  0x8d   : > { %v263_v4 = vadd.f32 %v375_v2, %v262_v3 }
  0x8f   : > { %266 = vst.msk [vmem:[%s226_s30] sm:$0xff] %vm265_vm2, %v263_v4  ;;  %v267_v6 = vmul.f32 2.0, %v263_v4 }
  0x91   : > { %v269_v7 = vadd.f32 %v268_v5, %v267_v6 }
  0x93   : > { %270 = vst.msk [vmem:[%s230_s10] sm:$0xff] %vm265_vm2, %v269_v7 }
  0x94 PF: > { %s16_s18 = sadd.s32 1, %s382_s18  }
  0x95   : > { %p13_p4 = scmp.ge.s32.totalorder %s16_s18, 4  }
  0x97   :  { %15 = sbr.rel (!%p13_p4) target bundleno = 1 (0x1), region = 78 }

// kernel: transformer_forward.14
= control target key start
LH: loop header
LB: loop body
LE: loop exit
PB: predicated region body
PF: predicated region fallthrough
CT: control target
= control target key end

     0   :  { %s2011_s0 = inlined_call_operand.vmem [shape: f32[16,32], index: 0, kind: input, shape index: {}]   ;;  %s2012_s1 = inlined_call_operand.vmem [shape: f32[32,96], index: 1, kind: input, shape index: {}]   ;;  %s2013_s2 = inlined_call_operand.hbm [shape: f32[1,96], index: 2, kind: input, shape index: {}]   ;;  %s2014_s3 = inlined_call_operand.vmem [shape: f32[32,32], index: 3, kind: input, shape index: {}]   ;;  %s2015_s4 = inlined_call_operand.hbm [shape: f32[1,32], index: 4, kind: input, shape index: {}]   ;;  %s2016_s5 = inlined_call_operand.hbm [shape: f32[1,32], index: 5, kind: input, shape index: {}]   ;;  %s2017_s6 = inlined_call_operand.hbm [shape: f32[1,32], index: 6, kind: input, shape index: {}]   ;;  %s2018_s7 = inlined_call_operand.vmem [shape: f32[32,160], index: 7, kind: input, shape index: {}]   ;;  %s2019_s8 = inlined_call_operand.vmem [shape: f32[1,160], index: 8, kind: input, shape index: {}]   ;;  %s2020_s9 = inlined_call_operand.vmem [shape: f32[160,32], index: 9, kind: input, shape index: {}]   ;;  %s2021_s10 = inlined_call_operand.hbm [shape: f32[1,32], index: 10, kind: input, shape index: {}]   ;;  %s2022_s11 = inlined_call_operand.hbm [shape: f32[1,32], index: 11, kind: input, shape index: {}]   ;;  %s2023_s12 = inlined_call_operand.hbm [shape: f32[1,32], index: 12, kind: input, shape index: {}]   ;;  %s2024_s13 = inlined_call_operand.vmem [shape: f32[16,32], index: 13, kind: output, shape index: {}]  }
   0x1   :  { %2025 = sst [smem:[#allocation17_spill]] %s2015_s4 }
   0x2   :  { %18 = vsyncpa [#allocation3], 0 }
   0x3   :  { %19 = vsyncpa [#allocation5], 0 }
   0x4   :  { %20 = vsyncpa [#allocation8], 0 }
   0x5   :  { %21 = vsyncpa [#allocation11], 0  ;;  %s1746_s25 = smov 0  }
   0x6 LB: > { %s2026_s4 = sld [smem:[#allocation17_spill]]  ;;  %s1755_s29 = sadd.s32 4294967295, %s1655_s25   ;;  %s1655_s25 = sphi %s1746_s25, %s27_s25  }
   0x7   : > { %p1262_p0 = scmp.ge.s32.totalorder %s1655_s25, 1  ;;  %p336_p1 = scmp.lt.s32.totalorder %s1655_s25, 3 }
   0x8   : > { %p1353_p2 = scmp.eq.s32.totalorder %s1755_s29, 0  ;;  %s1657_s14 = smov [#allocation4]  }
   0x9   : > { %p1760_p3 = pnand %p1262_p0, %p336_p1  ;;  %s368_s15 = sshll.u32 %s1657_s14, 4  ;;  %s369_s15 = int_to_ptr.vmem [resolvable:$true] %s368_s15 }
   0xa   : > { %s390_s18 = sshll.u32 %s2017_s6, 4  ;;  %s423_s21 = sshll.u32 %s2022_s11, 4  ;;  %s391_s18 = int_to_ptr.hbm [resolvable:$true] %s390_s18  ;;  %s424_s21 = int_to_ptr.hbm [resolvable:$true] %s423_s21 }
   0xb   : > { %p1331_p4 = pneg %p1760_p3  ;;  %s1658_s23 = smov [#allocation7]  }
   0xc   : > { %s366_s28 = sshll.u32 %s2026_s4, 4  ;;  %s392_s24 = sshll.u32 %s1658_s23, 4  ;;  %s367_s28 = int_to_ptr.hbm [resolvable:$true] %s366_s28  ;;  %s393_s24 = int_to_ptr.vmem [resolvable:$true] %s392_s24 }
   0xd   : > { %p1774_p5 = pnand %p1353_p2, %p1331_p4  ;;  %s1659_s26 = smov [#allocation10]  }
   0xe   : > { %s425_s27 = sshll.u32 %s1659_s26, 4  ;;  %s351_s17 = sshll.u32 %s2013_s2, 4  ;;  %s426_s27 = int_to_ptr.vmem [resolvable:$true] %s425_s27  ;;  %s352_s17 = int_to_ptr.hbm [resolvable:$true] %s351_s17 }
   0xf   : > { %1337 = dma.hbm_to_vmem [thread:$0]  (!%p1774_p5), %s367_s28, 16, %s369_s15, [#allocation5]  }
  0x10   : > { %1343 = dma.hbm_to_vmem [thread:$0]  (!%p1774_p5), %s391_s18, 16, %s393_s24, [#allocation8]  }
  0x11   : > { %1349 = dma.hbm_to_vmem [thread:$0]  (!%p1774_p5), %s424_s21, 16, %s426_s27, [#allocation11]  }
  0x12   : > { %s378_s23 = sshll.u32 %s2016_s5, 4  ;;  %s1660_s4 = smov [#allocation2]   ;;  %s379_s23 = int_to_ptr.hbm [resolvable:$true] %s378_s23 }
  0x13   : > { %s353_s28 = sshll.u32 %s1660_s4, 4  ;;  %s1661_s15 = smov [#allocation6]   ;;  %s354_s28 = int_to_ptr.vmem [resolvable:$true] %s353_s28 }
  0x14   : > { %1334 = dma.hbm_to_vmem [thread:$0]  (!%p1774_p5), %s352_s17, 16, %s354_s28, [#allocation3]  }
  0x15   : > { %s380_s18 = sshll.u32 %s1661_s15, 4  ;;  %s411_s14 = sshll.u32 %s2021_s10, 4  ;;  %s381_s18 = int_to_ptr.vmem [resolvable:$true] %s380_s18  ;;  %s412_s14 = int_to_ptr.hbm [resolvable:$true] %s411_s14 }
  0x16   : > { %1340 = dma.hbm_to_vmem [thread:$0]  (!%p1774_p5), %s379_s23, 16, %s381_s18, [#allocation5]  }
  0x17   : > { %s435_s16 = sshll.u32 %s2023_s12, 4  ;;  %s1662_s4 = smov [#allocation9]   ;;  %s436_s16 = int_to_ptr.hbm [resolvable:$true] %s435_s16 }
  0x18   : > { %s413_s19 = sshll.u32 %s1662_s4, 4  ;;  %s1663_s17 = smov [#allocation12]   ;;  %s414_s19 = int_to_ptr.vmem [resolvable:$true] %s413_s19 }
  0x19   : > { %1346 = dma.hbm_to_vmem [thread:$0]  (!%p1774_p5), %s412_s14, 16, %s414_s19, [#allocation8]  }
  0x1a   : > { %s437_s20 = sshll.u32 %s1663_s17, 4  ;;  %457 = sbr.rel (%p1760_p3) target bundleno = 2312 (0x908), region = 72  ;;  %s438_s20 = int_to_ptr.vmem [resolvable:$true] %s437_s20 }
  0x1b   : > { %1352 = dma.hbm_to_vmem [thread:$0]  (!%p1774_p5), %s436_s16, 16, %s438_s20, [#allocation11]  }
  0x1f   : > { %1638 = dma.done.wait (%p1353_p2), [#allocation3], 16  }
  0x20   : > { %1640 = vsyncadd (%p1353_p2), [#allocation3], 4294967280 }
  0x21   : > { %1642 = dma.done.wait (%p1353_p2), [#allocation5], 32  }
  0x22   : > { %1644 = vsyncadd (%p1353_p2), [#allocation5], 4294967264 }
  0x23   : > { %1646 = dma.done.wait (%p1353_p2), [#allocation8], 32  }
  0x24   : > { %1648 = vsyncadd (%p1353_p2), [#allocation8], 4294967264 }
  0x25   : > { %1650 = dma.done.wait (%p1353_p2), [#allocation11], 32  }
  0x26   : > { %1652 = vsyncadd (%p1353_p2), [#allocation11], 4294967264  ;;  %p530_p6 = scmp.lt.s32.totalorder %s1755_s29, 1  ;;  %v542_v0 = vld [vmem:[%s2012_s1 + $0x18] sm:$0xff]  ;;  %v541_v1 = vld [vmem:[%s2012_s1 + $0x10] sm:$0xff]  ;;  %vm547_vm0 = vcmask 261120  }
  0x27   : > { %563 = vmatpush.msra.mxu1 %v542_v0  ;;  %v540_v2 = vld [vmem:[%s2012_s1 + $0x8] sm:$0xff]  ;;  %v539_v3 = vld [vmem:[%s2012_s1] sm:$0xff]  ;;  %s1664_s4 = smov 88   ;;  %s1665_s19 = smov 96   ;;  %vm579_vm1 = vcmask 64512  }
  0x28   : > { %s2030_s29 = smov (!%p530_p6, %s1755_s29), 1  ;;  %v1394_v5 = vld [vmem:[#allocation2] ss:$0 sm:$0xff]  ;;  %s1666_s17 = smov 120  }
  0x29   : > { %s1279_s30 = sshll.u32 %s2030_s29, 3  ;;  %564 = vmatpush.msra.mxu1 %v541_v1  ;;  %s1667_s20 = smov 80   ;;  %v571_v8 = vld [vmem:[%s2014_s3] sm:$0xff] }
  0x2a   : > { %s533_s21 = scalar_lea.vmem %s2011_s0, %s1279_s30  ;;  %s1668_s22 = smov 112  }
  0x2b   : > { %565 = vmatpush.msra.mxu1 %v540_v2  ;;  %v1844_v4 = vld [vmem:[%s533_s21] sm:$0xff]  ;;  %s1669_s23 = smov 72   ;;  %s1670_s18 = smov 64   ;;  %v574_v2 = vld [vmem:[%s2014_s3 + $0x18] sm:$0xff] }
  0x2c   : > { %s1671_s24 = smov 104   ;;  %s1672_s26 = smov 48  }
  0x2d   : > { %566 = vmatpush.msra.mxu1 %v539_v3  ;;  %s1673_s14 = smov 56   ;;  %s1674_s21 = smov 40   ;;  %v572_v3 = vld [vmem:[%s2014_s3 + $0x8] sm:$0xff] }
  0x2e   : > { %1281 = vmatmul.msk.f32.vlgmr.msra.gmra.mxu1 %vm547_vm0, %v1844_v4 }
  0xab   : > { %v568_v6 = vpop.f32.mrf.mxu1 }
  0xac   : > { %v1848_v7 = vadd.f32 %v1394_v5, %v568_v6  ;;  %v573_v5 = vld [vmem:[%s2014_s3 + $0x10] sm:$0xff] }
  0xae   : > { %644 = vrot.lane.b32.xlu2 %v1848_v7, %s1664_s4  ;;  %577 = vrot.lane.b32.xlu0 %v1848_v7, %s1665_s19 }
  0xb6   : > { %642 = vrot.lane.b32.xlu2 %v1848_v7, %s1666_s17 }
  0xbe   : > { %756 = vrot.lane.b32.xlu2 %v1848_v7, %s1667_s20 }
  0xc6   : > { %754 = vrot.lane.b32.xlu2 %v1848_v7, %s1668_s22  ;;  %s537_s22 = scalar_lea.vmem %s2024_s13, %s1279_s30 }
  0xce   : > { %846 = vrot.lane.b32.xlu2 %v1848_v7, %s1669_s23 }
 0x108   : > { %v645_v9 = vpop.permute.xlu2 %644 }
 0x109   : > { %1285 = vmatpush.xpose.msk.msra.mxu3 %vm579_vm1, %v645_v9 }
 0x10d   : > { %749 = vmatpush.msrb.mxu3 %v571_v8 }
 0x110   : > { %v643_v10 = vpop.permute.xlu2 %642 }
 0x111   : > { %1286 = vmatmul.msk.f32.vlgmr.msra.gmra.mxu3 %vm579_vm1, %v643_v10 }
 0x118   : > { %v757_v11 = vpop.permute.xlu2 %756 }
 0x119   : > { %1290 = vmatpush.xpose.msk.msra.mxu3 %vm579_vm1, %v757_v11 }
 0x120   : > { %v578_v12 = vpop.permute.xlu0 %577  ;;  %v755_v28 = vpop.permute.xlu2 %754 }
 0x121   : > { %1282 = vmatpush.xpose.msk.msrb.mxu1 %vm579_vm1, %v578_v12 }
 0x124   : > { %1283 = vmatmul.msk.f32.vlgmr.msrb.gmra.mxu1 %vm579_vm1, %v1848_v7 }
 0x125   : > { %726 = vmatpush.msra.mxu1 %v572_v3  ;;  %v1038_v3 = vld [vmem:[%s2020_s9 + $0x8] sm:$0xff] }
 0x127   : > { %838 = vmatpush.msrb.mxu1 %v573_v5  ;;  %v1037_v5 = vld [vmem:[%s2020_s9] sm:$0xff] }
 0x128   : > { %v847_v30 = vpop.permute.xlu2 %846 }
 0x194   : > { %v667_v13 = vpop.f32.mrf.mxu3 }
 0x195   : > { %v670_v14 = vmul.f32 0.35355338, %v667_v13  ;;  %v1395_v13 = vld [vmem:[#allocation4] ss:$0 sm:$0xff] }
 0x197   : > { %v671_v15 = vsel %vm579_vm1, %v670_v14, -inf }
 0x198   : > { %672 = vmax.xlane.f32.xlu2 %v671_v15 }
 0x1a1   : > { %v601_v16 = vpop.f32.mrf.mxu1 }
 0x1a2   : > { %v604_v17 = vmul.f32 0.35355338, %v601_v16 }
 0x1a4   : > { %v605_v18 = vsel %vm579_vm1, %v604_v17, -inf }
 0x1a5   : > { %606 = vmax.xlane.f32.xlu0 %v605_v18 }
 0x20b   : > { %v673_v33 = vpop.xlane.xlu2 %672 }
 0x20c   : > { %v674_v36 = vsub.f32 %v670_v14, %v673_v33  ;;  %v983_v33 = vld [vmem:[%s2018_s7 + $0x28] sm:$0xff] }
 0x20e   : > { %v675_v38 = vmul.f32 1.442695, %v674_v36  ;;  %v978_v36 = vld [vmem:[%s2018_s7] sm:$0xff] }
 0x218   : > { %v607_v19 = vpop.xlane.xlu0 %606 }
 0x219   : > { %v608_v20 = vsub.f32 %v604_v17, %v607_v19  ;;  %v1675_v19 = vmov 32.0  }
 0x21b   : > { %v609_v21 = vmul.f32 1.442695, %v608_v20 }
 0x21d   : > { %1401 = vpow2.f32 %v609_v21 }
 0x223   : > { %v1402_v22 = vpop.eup %1401 }
 0x224   : > { %v611_v23 = vsel %vm579_vm1, %v1402_v22, 0.0 }
 0x225   : > { %612 = vadd.xlane.f32.xlu1 %v611_v23 }
 0x23e   : > { %616 = vrot.lane.b32.xlu1 %v1848_v7, %s1670_s18 }
 0x246   : > { %844 = vrot.lane.b32.xlu1 %v1848_v7, %s1671_s24 }
 0x298   : > { %v613_v24 = vpop.xlane.xlu1 %612 }
 0x299   : > { %1403 = vrcp.f32 %v613_v24 }
 0x29a   : > { %1405 = vpow2.f32 %v675_v38  ;;  %v1052_v38 = vld [vmem:[%s2020_s9 + $0x78] sm:$0xff] }
 0x29f   : > { %v1404_v25 = vpop.eup %1403 }
 0x2a0   : > { %v615_v27 = vmul.f32 %v1404_v25, %v1402_v22  ;;  %v1406_v42 = vpop.eup %1405 }
 0x2a1   : > { %v677_v43 = vsel %vm579_vm1, %v1406_v42, 0.0 }
 0x2b0   : > { %v617_v26 = vpop.permute.xlu1 %616 }
 0x2b1   : > { %637 = vmatpush.msra.mxu2 %v617_v26 }
 0x2b2   : > { %1284 = vmatmul.msk.f32.vlgmr.msra.gmra.mxu2 %vm579_vm1, %v615_v27 }
 0x2b8   : > { %v845_v31 = vpop.permute.xlu1 %844 }
 0x335   : > { %v639_v29 = vpop.f32.mrf.mxu2 }
 0x336   : > { %1289 = vmatmul.msk.f32.vlgmr.msrb.gmra.mxu3 %vm579_vm1, %v639_v29 }
 0x337   : > { %1294 = vmatpush.xpose.msk.msrb.mxu3 %vm579_vm1, %v847_v30  ;;  %v984_v30 = vld [vmem:[%s2018_s7 + $0x30] sm:$0xff] }
 0x33e   : > { %1291 = vmatmul.msk.f32.vlgmr.msra.gmra.mxu3 %vm579_vm1, %v755_v28 }
 0x346   : > { %1295 = vmatmul.msk.f32.vlgmr.msrb.gmra.mxu3 %vm579_vm1, %v845_v31  ;;  %v985_v31 = vld [vmem:[%s2018_s7 + $0x38] sm:$0xff] }
 0x347   : > { %1027 = vmatpush.msra.mxu3 %v985_v31 }
 0x349   : > { %1028 = vmatpush.msra.mxu3 %v983_v33 }
 0x3b9   : > { %v1875_v32 = vpop.f32.mrf.mxu3 }
 0x3c1   : > { %v779_v34 = vpop.f32.mrf.mxu3 }
 0x3c2   : > { %v782_v35 = vmul.f32 0.35355338, %v779_v34  ;;  %v980_v34 = vld [vmem:[%s2018_s7 + $0x10] sm:$0xff] }
 0x3c4   : > { %v783_v37 = vsel %vm579_vm1, %v782_v35, -inf }
 0x3c5   : > { %784 = vmax.xlane.f32.xlu1 %v783_v37  ;;  %v979_v37 = vld [vmem:[%s2018_s7 + $0x8] sm:$0xff] }
 0x3c9   : > { %v869_v39 = vpop.f32.mrf.mxu3 }
 0x3ca   : > { %v872_v40 = vmul.f32 0.35355338, %v869_v39  ;;  %v1051_v39 = vld [vmem:[%s2020_s9 + $0x70] sm:$0xff] }
 0x3cc   : > { %v873_v41 = vsel %vm579_vm1, %v872_v40, -inf }
 0x3cd   : > { %874 = vmax.xlane.f32.xlu0 %v873_v41 }
 0x3d5   : > { %678 = vadd.xlane.f32.xlu0 %v677_v43  ;;  %v1049_v43 = vld [vmem:[%s2020_s9 + $0x60] sm:$0xff] }
 0x3de   : > { %794 = vrot.lane.b32.xlu1 %v1848_v7, %s1672_s26 }
 0x438   : > { %v785_v44 = vpop.xlane.xlu1 %784 }
 0x439   : > { %v786_v45 = vsub.f32 %v782_v35, %v785_v44  ;;  %v981_v35 = vld [vmem:[%s2018_s7 + $0x18] sm:$0xff] }
 0x43a   : > { %1029 = vmatpush.msra.mxu3 %v981_v35 }
 0x43b   : > { %v787_v46 = vmul.f32 1.442695, %v786_v45  ;;  %v1048_v45 = vld [vmem:[%s2020_s9 + $0x58] sm:$0xff] }
 0x43c   : > { %1030 = vmatpush.msra.mxu3 %v979_v37 }
 0x43d   : > { %1407 = vpow2.f32 %v787_v46  ;;  %v1047_v46 = vld [vmem:[%s2020_s9 + $0x50] sm:$0xff] }
 0x440   : > { %v875_v47 = vpop.xlane.xlu0 %874 }
 0x441   : > { %v876_v48 = vsub.f32 %v872_v40, %v875_v47  ;;  %v1050_v40 = vld [vmem:[%s2020_s9 + $0x68] sm:$0xff] }
 0x442   : > { %v1046_v47 = vld [vmem:[%s2020_s9 + $0x48] sm:$0xff] }
 0x443   : > { %v1408_v49 = vpop.eup %1407  ;;  %v877_v50 = vmul.f32 1.442695, %v876_v48  ;;  %v1045_v48 = vld [vmem:[%s2020_s9 + $0x40] sm:$0xff] }
 0x444   : > { %v789_v51 = vsel %vm579_vm1, %v1408_v49, 0.0 }
 0x445   : > { %1409 = vpow2.f32 %v877_v50  ;;  %790 = vadd.xlane.f32.xlu0 %v789_v51  ;;  %v1044_v50 = vld [vmem:[%s2020_s9 + $0x38] sm:$0xff] }
 0x448   : > { %v679_v54 = vpop.xlane.xlu0 %678 }
 0x44b   : > { %v1410_v52 = vpop.eup %1409 }
 0x44c   : > { %v879_v53 = vsel %vm579_vm1, %v1410_v52, 0.0 }
 0x44d   : > { %880 = vadd.xlane.f32.xlu2 %v879_v53 }
 0x450   : > { %v795_v63 = vpop.permute.xlu1 %794 }
 0x459   : > { %682 = vrot.lane.b32.xlu0 %v1848_v7, %s1673_s14 }
 0x465   : > { %884 = vrot.lane.b32.xlu2 %v1848_v7, %s1674_s21 }
 0x4b8   : > { %v791_v56 = vpop.xlane.xlu0 %790 }
 0x4c0   : > { %v881_v55 = vpop.xlane.xlu2 %880 }
 0x4c1   : > { %1411 = vrcp.f32 %v881_v55 }
 0x4c2   : > { %1413 = vrcp.f32 %v679_v54  ;;  %v1042_v54 = vld [vmem:[%s2020_s9 + $0x28] sm:$0xff] }
 0x4c3   : > { %1415 = vrcp.f32 %v791_v56  ;;  %v1041_v56 = vld [vmem:[%s2020_s9 + $0x20] sm:$0xff] }
 0x4c4   : > { %1417 = vrcp.f32 %v1675_v19  ;;  %v1398_v19 = vld [vmem:[#allocation9] ss:$0 sm:$0xff] }
 0x4c7   : > { %v1412_v57 = vpop.eup %1411 }
 0x4c8   : > { %v1414_v58 = vpop.eup %1413  ;;  %v885_v59 = vpop.permute.xlu2 %884  ;;  %v883_v60 = vmul.f32 %v1412_v57, %v1410_v52  ;;  %v1043_v52 = vld [vmem:[%s2020_s9 + $0x30] sm:$0xff] }
 0x4c9   : > { %905 = vmatpush.msra.mxu0 %v885_v59  ;;  %v681_v62 = vmul.f32 %v1414_v58, %v1406_v42  ;;  %v1416_v0 = vpop.eup %1415  ;;  %v1040_v58 = vld [vmem:[%s2020_s9 + $0x18] sm:$0xff] }
 0x4ca   : > { %1296 = vmatmul.msk.f32.vlgmr.msra.gmra.mxu0 %vm579_vm1, %v883_v60  ;;  %v793_v1 = vmul.f32 %v1416_v0, %v1408_v49  ;;  %v1418_v20 = vpop.eup %1417  ;;  %v1396_v60 = vld [vmem:[#allocation6] ss:$0 sm:$0xff] }
 0x4cb   : > { %v683_v61 = vpop.permute.xlu0 %682  ;;  %v945_v21 = vmul.f32 32.0, %v1418_v20  ;;  %vm949_vm2 = vweird.f32 %v1418_v20  ;;  %1064 = vmatpush.msrb.mxu0 %v1052_v38 }
 0x4cc   : > { %703 = vmatpush.msrb.mxu2 %v683_v61 }
 0x4cd   : > { %1287 = vmatmul.msk.f32.vlgmr.msrb.gmra.mxu2 %vm579_vm1, %v681_v62  ;;  %v946_v22 = vsub.f32 1.0, %v945_v21  ;;  %1065 = vmatpush.msrb.mxu0 %v1051_v39 }
 0x4ce   : > { %815 = vmatpush.msra.mxu2 %v795_v63  ;;  %v1397_v63 = vld [vmem:[#allocation7] ss:$0 sm:$0xff] }
 0x4cf   : > { %v947_v23 = vmul.f32 %v1418_v20, %v946_v22  ;;  %1066 = vmatpush.msrb.mxu0 %v1050_v40  ;;  %v1399_v40 = vld [vmem:[#allocation10] ss:$0 sm:$0xff] }
 0x4d0   : > { %928 = vmatpush.msrb.mxu2 %v574_v2  ;;  %v1039_v2 = vld [vmem:[%s2020_s9 + $0x10] sm:$0xff] }
 0x4d1   : > { %v948_v24 = vadd.f32 %v1418_v20, %v947_v23  ;;  %1067 = vmatpush.msrb.mxu0 %v1049_v43 }
 0x4d3   : > { %v1903_v25 = vsel %vm949_vm2, %v1418_v20, %v948_v24  ;;  %1068 = vmatpush.msrb.mxu0 %v1048_v45 }
 0x4d5   : > { %1292 = vmatmul.msk.f32.vlgmr.msra.gmra.mxu2 %vm579_vm1, %v793_v1  ;;  %1069 = vmatpush.msrb.mxu0 %v1047_v46 }
 0x4d7   : > { %1070 = vmatpush.msrb.mxu0 %v1046_v47 }
 0x4d9   : > { %1071 = vmatpush.msrb.mxu0 %v1045_v48 }
 0x4db   : > { %1072 = vmatpush.msrb.mxu0 %v1044_v50 }
 0x4dd   : > { %1073 = vmatpush.msrb.mxu0 %v1043_v52 }
 0x4df   : > { %1074 = vmatpush.msrb.mxu0 %v1042_v54 }
 0x4e1   : > { %1075 = vmatpush.msrb.mxu0 %v1041_v56 }
 0x4e3   : > { %1076 = vmatpush.msrb.mxu0 %v1040_v58 }
 0x4e5   : > { %1077 = vmatpush.msrb.mxu0 %v1039_v2 }
 0x4e7   : > { %1078 = vmatpush.msrb.mxu0 %v1038_v3 }
 0x4e9   : > { %1079 = vmatpush.msrb.mxu0 %v1037_v5 }
 0x547   : > { %v907_v6 = vpop.f32.mrf.mxu0 }
 0x548   : > { %1297 = vmatmul.msk.f32.vlgmr.msrb.gmra.mxu2 %vm579_vm1, %v907_v6  ;;  %v1056_v6 = vld [vmem:[%s2020_s9 + $0x98] sm:$0xff] }
 0x549   : > { %1096 = vmatpush.msra.mxu2 %v1056_v6 }
 0x550   : > { %v705_v7 = vpop.f32.mrf.mxu2 }
 0x551   : > { %1288 = vmatmul.msk.f32.vlgmr.msra.gmra.mxu1 %vm579_vm1, %v705_v7  ;;  %v1055_v7 = vld [vmem:[%s2020_s9 + $0x90] sm:$0xff] }
 0x552   : > { %1007 = vmatpush.msra.mxu1 %v984_v30  ;;  %1097 = vmatpush.msra.mxu2 %v1055_v7 }
 0x558   : > { %v817_v8 = vpop.f32.mrf.mxu2 }
 0x559   : > { %1293 = vmatmul.msk.f32.vlgmr.msrb.gmra.mxu1 %vm579_vm1, %v817_v8  ;;  %v1054_v8 = vld [vmem:[%s2020_s9 + $0x88] sm:$0xff] }
 0x55a   : > { %1098 = vmatpush.msra.mxu2 %v1054_v8 }
 0x5cb   : > { %v930_v14 = vpop.f32.mrf.mxu2 }
 0x5ce   : > { %v728_v9 = vpop.f32.mrf.mxu1 }
 0x5cf   : > { %v752_v10 = vadd.f32 %v1875_v32, %v728_v9  ;;  %v982_v32 = vld [vmem:[%s2018_s7 + $0x20] sm:$0xff] }
 0x5d0   : > { %1008 = vmatpush.msra.mxu1 %v982_v32  ;;  %v1053_v9 = vld [vmem:[%s2020_s9 + $0x80] sm:$0xff] }
 0x5d1   : > { %1099 = vmatpush.msra.mxu2 %v1053_v9 }
 0x5d2   : > { %1009 = vmatpush.msra.mxu1 %v980_v34 }
 0x5d4   : > { %1010 = vmatpush.msra.mxu1 %v978_v36 }
 0x5d6   : > { %v840_v11 = vpop.f32.mrf.mxu1 }
 0x5d7   : > { %v843_v12 = vadd.f32 %v840_v11, %v752_v10  ;;  %v986_v10 = vld [vmem:[%s2019_s8] sm:$0x3] }
 0x5d8   : > { %v988_v11 = vperm.slane %v986_v10, 0 }
 0x5d9   : > { %v933_v15 = vadd.f32 %v930_v14, %v843_v12 }
 0x5db   : > { %v937_v16 = vadd.f32 %v1395_v13, %v933_v15  ;;  %v989_v15 = vperm.slane %v986_v10, 1 }
 0x5dd   : > { %v938_v17 = vadd.f32 %v937_v16, %v1844_v4 }
 0x5df   : > { %v941_v18 = vsel %vm547_vm0, %v938_v17, 0.0 }
 0x5e0   : > { %942 = vadd.xlane.f32.xlu0 %v941_v18 }
 0x653   : > { %v943_v26 = vpop.xlane.xlu0 %942 }
 0x654   : > { %v951_v27 = vmul.f32 %v1903_v25, %v943_v26 }
 0x656   : > { %v952_v28 = vsub.f32 %v938_v17, %v951_v27 }
 0x658   : > { %v953_v29 = vmul.f32 %v952_v28, %v952_v28 }
 0x65a   : > { %v954_v4 = vsel %vm547_vm0, %v953_v29, 0.0 }
 0x65b   : > { %955 = vadd.xlane.f32.xlu1 %v954_v4 }
 0x6ce   : > { %v956_v41 = vpop.xlane.xlu1 %955 }
 0x6cf   : > { %v957_v42 = vmul.f32 %v956_v41, %v1903_v25 }
 0x6d1   : > { %v958_v44 = vadd.f32 1e-05, %v957_v42  ;;  %v1400_v42 = vld [vmem:[#allocation12] ss:$0 sm:$0xff] }
 0x6d3   : > { %1419 = vrsqrt.f32 %v958_v44  ;;  %vm965_vm4 = vweird.f32 %v958_v44 }
 0x6d9   : > { %v1420_v49 = vpop.eup %1419 }
 0x6da   : > { %v960_v51 = vmul.f32 %v1420_v49, %v958_v44  ;;  %vm966_vm3 = vweird.f32 %v1420_v49 }
 0x6db   : > { %vm967_vm5 = vmor %vm965_vm4, %vm966_vm3 }
 0x6dc   : > { %v961_v53 = vmul.f32 %v1420_v49, %v960_v51 }
 0x6de   : > { %v962_v55 = vmul.f32 0.5, %v961_v53 }
 0x6e0   : > { %v963_v57 = vsub.f32 1.5, %v962_v55 }
 0x6e2   : > { %v964_v59 = vmul.f32 %v1420_v49, %v963_v57 }
 0x6e4   : > { %v968_v61 = vsel %vm967_vm5, %v1420_v49, %v964_v59 }
 0x6e5   : > { %v969_v62 = vmul.f32 %v968_v61, %v952_v28 }
 0x6e7   : > { %v973_v0 = vmul.f32 %v1396_v60, %v969_v62 }
 0x6e9   : > { %v977_v1 = vadd.f32 %v1397_v63, %v973_v0 }
 0x6eb   : > { %1298 = vmatmul.msk.f32.vlgmr.msra.gmra.mxu1 %vm547_vm0, %v977_v1  ;;  %1299 = vmatmul.msk.f32.vlgmr.msra.gmra.mxu3 %vm547_vm0, %v977_v1 }
 0x768   : > { %v1012_v12 = vpop.f32.mrf.mxu1 }
 0x769   : > { %v1013_v13 = vadd.f32 %v1012_v12, %v988_v11 }
 0x76b   : > { %v1035_v14 = vmax.f32 %v1013_v13, 0.0 }
 0x76d   : > { %1080 = vmatmul.f32.vlgmr.msrb.gmra.mxu0 %v1035_v14 }
 0x76e   : > { %v1032_v16 = vpop.f32.mrf.mxu3 }
 0x76f   : > { %v1033_v17 = vadd.f32 %v1032_v16, %v989_v15 }
 0x771   : > { %v1036_v18 = vmax.f32 %v1033_v17, 0.0 }
 0x773   : > { %1300 = vmatmul.msk.f32.vlgmr.msra.gmra.mxu2 %vm547_vm0, %v1036_v18 }
 0x7ea   : > { %v1081_v20 = vpop.f32.mrf.mxu0 }
 0x7eb   : > { %v1082_v21 = vadd.f32 %v1398_v19, %v1081_v20 }
 0x7f6   : > { %v1101_v22 = vpop.f32.mrf.mxu2 }
 0x7f7   : > { %v1102_v23 = vadd.f32 %v1101_v22, %v1082_v21 }
 0x7f9   : > { %v1104_v24 = vadd.f32 %v1102_v23, %v977_v1 }
 0x7fb   : > { %v1107_v26 = vsel %vm547_vm0, %v1104_v24, 0.0 }
 0x7fc   : > { %1108 = vadd.xlane.f32.xlu2 %v1107_v26 }
 0x86f   : > { %v1109_v27 = vpop.xlane.xlu2 %1108 }
 0x870   : > { %v1110_v28 = vmul.f32 %v1109_v27, %v1903_v25 }
 0x872   : > { %v1111_v29 = vsub.f32 %v1104_v24, %v1110_v28 }
 0x874   : > { %v1112_v4 = vmul.f32 %v1111_v29, %v1111_v29 }
 0x876   : > { %v1113_v30 = vsel %vm547_vm0, %v1112_v4, 0.0 }
 0x877   : > { %1114 = vadd.xlane.f32.xlu0 %v1113_v30 }
 0x8ea   : > { %v1115_v31 = vpop.xlane.xlu0 %1114 }
 0x8eb   : > { %v1116_v32 = vmul.f32 %v1115_v31, %v1903_v25 }
 0x8ed   : > { %v1117_v33 = vadd.f32 1e-05, %v1116_v32 }
 0x8ef   : > { %1421 = vrsqrt.f32 %v1117_v33  ;;  %vm1124_vm7 = vweird.f32 %v1117_v33 }
 0x8f5   : > { %v1422_v34 = vpop.eup %1421 }
 0x8f6   : > { %v1119_v35 = vmul.f32 %v1422_v34, %v1117_v33  ;;  %vm1125_vm6 = vweird.f32 %v1422_v34 }
 0x8f7   : > { %vm1126_vm8 = vmor %vm1124_vm7, %vm1125_vm6 }
 0x8f8   : > { %v1120_v36 = vmul.f32 %v1422_v34, %v1119_v35 }
 0x8fa   : > { %v1121_v37 = vmul.f32 0.5, %v1120_v36 }
 0x8fc   : > { %v1122_v38 = vsub.f32 1.5, %v1121_v37 }
 0x8fe   : > { %v1123_v39 = vmul.f32 %v1422_v34, %v1122_v38 }
 0x900   : > { %v1127_v41 = vsel %vm1126_vm8, %v1422_v34, %v1123_v39 }
 0x901   : > { %v1128_v43 = vmul.f32 %v1127_v41, %v1111_v29 }
 0x903   : > { %v1132_v44 = vmul.f32 %v1399_v40, %v1128_v43 }
 0x905   : > { %v1136_v25 = vadd.f32 %v1400_v42, %v1132_v44 }
 0x907   : > { %1137 = vst.msk [vmem:[%s537_s22] sm:$0xff] %vm547_vm0, %v1136_v25 }
 0x908 PF: > { %s27_s25 = sadd.s32 1, %s1655_s25  }
 0x909   : > { %p24_p7 = scmp.ge.s32.totalorder %s27_s25, 4  }
 0x90b   :  { %26 = sbr.rel (!%p24_p7) target bundleno = 6 (0x6), region = 131 }
 0x910   :  { %1157 = vsyncpa [#allocation3], 1 }
 0x911   :  { %1159 = vsyncpa [#allocation3 + $0x1], 1 }
 0x912   :  { %1160 = vsyncpa [#allocation5], 1 }
 0x913   :  { %1161 = vsyncpa [#allocation8], 1 }
 0x914   :  { %1162 = vsyncpa [#allocation11], 1 }

// kernel: transformer_forward.13
= control target key start
LH: loop header
LB: loop body
LE: loop exit
PB: predicated region body
PF: predicated region fallthrough
CT: control target
= control target key end

     0   :  { %s1865_s0 = inlined_call_operand.vmem [shape: f32[16,32], index: 0, kind: input, shape index: {}]   ;;  %s1866_s1 = inlined_call_operand.vmem [shape: f32[32,96], index: 1, kind: input, shape index: {}]   ;;  %s1867_s2 = inlined_call_operand.vmem [shape: f32[1,96], index: 2, kind: input, shape index: {}]   ;;  %s1868_s3 = inlined_call_operand.vmem [shape: f32[32,32], index: 3, kind: input, shape index: {}]   ;;  %s1869_s4 = inlined_call_operand.vmem [shape: f32[1,32], index: 4, kind: input, shape index: {}]   ;;  %s1870_s5 = inlined_call_operand.hbm [shape: f32[1,32], index: 5, kind: input, shape index: {}]   ;;  %s1871_s6 = inlined_call_operand.hbm [shape: f32[1,32], index: 6, kind: input, shape index: {}]   ;;  %s1872_s7 = inlined_call_operand.vmem [shape: f32[32,160], index: 7, kind: input, shape index: {}]   ;;  %s1873_s8 = inlined_call_operand.vmem [shape: f32[1,160], index: 8, kind: input, shape index: {}]   ;;  %s1874_s9 = inlined_call_operand.vmem [shape: f32[160,32], index: 9, kind: input, shape index: {}]   ;;  %s1875_s10 = inlined_call_operand.hbm [shape: f32[1,32], index: 10, kind: input, shape index: {}]   ;;  %s1876_s11 = inlined_call_operand.hbm [shape: f32[1,32], index: 11, kind: input, shape index: {}]   ;;  %s1877_s12 = inlined_call_operand.hbm [shape: f32[1,32], index: 12, kind: input, shape index: {}]   ;;  %s1878_s13 = inlined_call_operand.vmem [shape: f32[16,32], index: 13, kind: output, shape index: {}]  }
   0x1   :  { %1879 = sst [smem:[#allocation13_spill]] %s1870_s5 }
   0x2   :  { %1880 = sst [smem:[#allocation14_spill]] %s1871_s6 }
   0x3   :  { %18 = vsyncpa [#allocation3], 0 }
   0x4   :  { %19 = vsyncpa [#allocation5], 0 }
   0x5   :  { %20 = vsyncpa [#allocation8], 0  ;;  %s1608_s25 = smov 0  }
   0x6 LB: > { %s1881_s6 = sld [smem:[#allocation14_spill]]  ;;  %s1617_s29 = sadd.s32 4294967295, %s1519_s25   ;;  %s1519_s25 = sphi %s1608_s25, %s26_s25  }
   0x7   : > { %p1214_p0 = scmp.ge.s32.totalorder %s1519_s25, 1  ;;  %p335_p1 = scmp.lt.s32.totalorder %s1519_s25, 3 }
   0x8   : > { %p1287_p2 = scmp.eq.s32.totalorder %s1617_s29, 0  ;;  %s1521_s14 = smov [#allocation4]  }
   0x9   : > { %p1622_p3 = pnand %p1214_p0, %p335_p1  ;;  %s373_s15 = sshll.u32 %s1521_s14, 4  ;;  %s374_s15 = int_to_ptr.vmem [resolvable:$true] %s373_s15 }
   0xa   : > { %s404_s18 = sshll.u32 %s1876_s11, 4  ;;  %s1883_s5 = sld [smem:[#allocation13_spill]]  ;;  %s405_s18 = int_to_ptr.hbm [resolvable:$true] %s404_s18 }
   0xb   : > { %p1271_p4 = pneg %p1622_p3  ;;  %s1522_s23 = smov [#allocation7]  }
   0xc   : > { %s371_s28 = sshll.u32 %s1881_s6, 4  ;;  %s406_s24 = sshll.u32 %s1522_s23, 4  ;;  %s372_s28 = int_to_ptr.hbm [resolvable:$true] %s371_s28  ;;  %s407_s24 = int_to_ptr.vmem [resolvable:$true] %s406_s24 }
   0xd   : > { %p1636_p5 = pnand %p1287_p2, %p1271_p4  ;;  %s1523_s26 = smov [#allocation2]  }
   0xe   : > { %s361_s27 = sshll.u32 %s1523_s26, 4  ;;  %s392_s17 = sshll.u32 %s1875_s10, 4  ;;  %s362_s27 = int_to_ptr.vmem [resolvable:$true] %s361_s27  ;;  %s393_s17 = int_to_ptr.hbm [resolvable:$true] %s392_s17 }
   0xf   : > { %1277 = dma.hbm_to_vmem [thread:$0]  (!%p1636_p5), %s372_s28, 16, %s374_s15, [#allocation5]  }
  0x10   : > { %s359_s21 = sshll.u32 %s1883_s5, 4  ;;  %s416_s23 = sshll.u32 %s1877_s12, 4  ;;  %s360_s21 = int_to_ptr.hbm [resolvable:$true] %s359_s21  ;;  %s417_s23 = int_to_ptr.hbm [resolvable:$true] %s416_s23 }
  0x11   : > { %1283 = dma.hbm_to_vmem [thread:$0]  (!%p1636_p5), %s405_s18, 16, %s407_s24, [#allocation8]  }
  0x12   : > { %1274 = dma.hbm_to_vmem [thread:$0]  (!%p1636_p5), %s360_s21, 16, %s362_s27, [#allocation3]  }
  0x13   : > { %s1524_s5 = smov [#allocation6]   ;;  %s1525_s28 = smov [#allocation9]  }
  0x14   : > { %s394_s6 = sshll.u32 %s1524_s5, 4  ;;  %s418_s15 = sshll.u32 %s1525_s28, 4  ;;  %s395_s6 = int_to_ptr.vmem [resolvable:$true] %s394_s6  ;;  %s419_s15 = int_to_ptr.vmem [resolvable:$true] %s418_s15 }
  0x15   : > { %1280 = dma.hbm_to_vmem [thread:$0]  (!%p1636_p5), %s393_s17, 16, %s395_s6, [#allocation5]  }
  0x16   : > { %1286 = dma.hbm_to_vmem [thread:$0]  (!%p1636_p5), %s417_s23, 16, %s419_s15, [#allocation8]  }
  0x17   : > { %438 = sbr.rel (%p1622_p3) target bundleno = 2307 (0x903), region = 72 }
  0x1c   : > { %1506 = dma.done.wait (%p1287_p2), [#allocation3], 16  }
  0x1d   : > { %1508 = vsyncadd (%p1287_p2), [#allocation3], 4294967280 }
  0x1e   : > { %1510 = dma.done.wait (%p1287_p2), [#allocation5], 32  }
  0x1f   : > { %1512 = vsyncadd (%p1287_p2), [#allocation5], 4294967264 }
  0x20   : > { %1514 = dma.done.wait (%p1287_p2), [#allocation8], 32  }
  0x21   : > { %1516 = vsyncadd (%p1287_p2), [#allocation8], 4294967264  ;;  %p501_p6 = scmp.lt.s32.totalorder %s1617_s29, 1  ;;  %v513_v0 = vld [vmem:[%s1866_s1 + $0x18] sm:$0xff]  ;;  %v512_v1 = vld [vmem:[%s1866_s1 + $0x10] sm:$0xff]  ;;  %vm518_vm0 = vcmask 261120  }
  0x22   : > { %534 = vmatpush.msra.mxu1 %v513_v0  ;;  %v511_v2 = vld [vmem:[%s1866_s1 + $0x8] sm:$0xff]  ;;  %v510_v3 = vld [vmem:[%s1866_s1] sm:$0xff]  ;;  %s1526_s23 = smov 88   ;;  %s1527_s28 = smov 96   ;;  %vm550_vm1 = vcmask 64512  }
  0x23   : > { %s1886_s29 = smov (!%p501_p6, %s1617_s29), 1  ;;  %v1322_v5 = vld [vmem:[%s1867_s2] ss:$0 sm:$0xff]  ;;  %s1528_s15 = smov 120  }
  0x24   : > { %s1227_s5 = sshll.u32 %s1886_s29, 3  ;;  %535 = vmatpush.msra.mxu1 %v512_v1  ;;  %s1529_s6 = smov 80   ;;  %v542_v8 = vld [vmem:[%s1868_s3] sm:$0xff] }
  0x25   : > { %s504_s14 = scalar_lea.vmem %s1865_s0, %s1227_s5  ;;  %s1530_s30 = smov 112  }
  0x26   : > { %536 = vmatpush.msra.mxu1 %v511_v2  ;;  %v1692_v4 = vld [vmem:[%s504_s14] sm:$0xff]  ;;  %s1531_s18 = smov 72   ;;  %s1532_s24 = smov 64   ;;  %v545_v2 = vld [vmem:[%s1868_s3 + $0x18] sm:$0xff] }
  0x27   : > { %s1533_s26 = smov 104   ;;  %s1534_s27 = smov 48  }
  0x28   : > { %537 = vmatpush.msra.mxu1 %v510_v3  ;;  %s1535_s14 = smov 56   ;;  %s1536_s16 = smov 40   ;;  %v543_v3 = vld [vmem:[%s1868_s3 + $0x8] sm:$0xff] }
  0x29   : > { %1229 = vmatmul.msk.f32.vlgmr.msra.gmra.mxu1 %vm518_vm0, %v1692_v4 }
  0xa6   : > { %v539_v6 = vpop.f32.mrf.mxu1 }
  0xa7   : > { %v1699_v7 = vadd.f32 %v1322_v5, %v539_v6  ;;  %v544_v5 = vld [vmem:[%s1868_s3 + $0x10] sm:$0xff] }
  0xa9   : > { %615 = vrot.lane.b32.xlu2 %v1699_v7, %s1526_s23  ;;  %548 = vrot.lane.b32.xlu0 %v1699_v7, %s1527_s28  ;;  %s508_s28 = scalar_lea.vmem %s1878_s13, %s1227_s5 }
  0xb1   : > { %613 = vrot.lane.b32.xlu2 %v1699_v7, %s1528_s15 }
  0xb9   : > { %727 = vrot.lane.b32.xlu2 %v1699_v7, %s1529_s6 }
  0xc1   : > { %725 = vrot.lane.b32.xlu2 %v1699_v7, %s1530_s30 }
  0xc9   : > { %817 = vrot.lane.b32.xlu2 %v1699_v7, %s1531_s18 }
 0x103   : > { %v616_v9 = vpop.permute.xlu2 %615 }
 0x104   : > { %1233 = vmatpush.xpose.msk.msra.mxu3 %vm550_vm1, %v616_v9 }
 0x108   : > { %720 = vmatpush.msrb.mxu3 %v542_v8 }
 0x10b   : > { %v614_v10 = vpop.permute.xlu2 %613 }
 0x10c   : > { %1234 = vmatmul.msk.f32.vlgmr.msra.gmra.mxu3 %vm550_vm1, %v614_v10 }
 0x113   : > { %v728_v11 = vpop.permute.xlu2 %727 }
 0x114   : > { %1238 = vmatpush.xpose.msk.msra.mxu3 %vm550_vm1, %v728_v11 }
 0x11b   : > { %v549_v12 = vpop.permute.xlu0 %548  ;;  %v726_v28 = vpop.permute.xlu2 %725 }
 0x11c   : > { %1230 = vmatpush.xpose.msk.msrb.mxu1 %vm550_vm1, %v549_v12 }
 0x11f   : > { %1231 = vmatmul.msk.f32.vlgmr.msrb.gmra.mxu1 %vm550_vm1, %v1699_v7 }
 0x120   : > { %697 = vmatpush.msra.mxu1 %v543_v3  ;;  %v1009_v3 = vld [vmem:[%s1874_s9 + $0x8] sm:$0xff] }
 0x122   : > { %809 = vmatpush.msrb.mxu1 %v544_v5  ;;  %v1008_v5 = vld [vmem:[%s1874_s9] sm:$0xff] }
 0x123   : > { %v818_v30 = vpop.permute.xlu2 %817 }
 0x18f   : > { %v638_v13 = vpop.f32.mrf.mxu3 }
 0x190   : > { %v641_v14 = vmul.f32 0.35355338, %v638_v13  ;;  %v1323_v13 = vld [vmem:[%s1869_s4] ss:$0 sm:$0xff] }
 0x192   : > { %v642_v15 = vsel %vm550_vm1, %v641_v14, -inf }
 0x193   : > { %643 = vmax.xlane.f32.xlu2 %v642_v15 }
 0x19c   : > { %v572_v16 = vpop.f32.mrf.mxu1 }
 0x19d   : > { %v575_v17 = vmul.f32 0.35355338, %v572_v16 }
 0x19f   : > { %v576_v18 = vsel %vm550_vm1, %v575_v17, -inf }
 0x1a0   : > { %577 = vmax.xlane.f32.xlu0 %v576_v18 }
 0x206   : > { %v644_v33 = vpop.xlane.xlu2 %643 }
 0x207   : > { %v645_v36 = vsub.f32 %v641_v14, %v644_v33  ;;  %v954_v33 = vld [vmem:[%s1872_s7 + $0x28] sm:$0xff] }
 0x209   : > { %v646_v38 = vmul.f32 1.442695, %v645_v36  ;;  %v949_v36 = vld [vmem:[%s1872_s7] sm:$0xff] }
 0x213   : > { %v578_v19 = vpop.xlane.xlu0 %577 }
 0x214   : > { %v579_v20 = vsub.f32 %v575_v17, %v578_v19  ;;  %v1537_v19 = vmov 32.0  }
 0x216   : > { %v580_v21 = vmul.f32 1.442695, %v579_v20 }
 0x218   : > { %1329 = vpow2.f32 %v580_v21 }
 0x21e   : > { %v1330_v22 = vpop.eup %1329 }
 0x21f   : > { %v582_v23 = vsel %vm550_vm1, %v1330_v22, 0.0 }
 0x220   : > { %583 = vadd.xlane.f32.xlu1 %v582_v23 }
 0x239   : > { %587 = vrot.lane.b32.xlu1 %v1699_v7, %s1532_s24 }
 0x241   : > { %815 = vrot.lane.b32.xlu1 %v1699_v7, %s1533_s26 }
 0x293   : > { %v584_v24 = vpop.xlane.xlu1 %583 }
 0x294   : > { %1331 = vrcp.f32 %v584_v24 }
 0x295   : > { %1333 = vpow2.f32 %v646_v38  ;;  %v1023_v38 = vld [vmem:[%s1874_s9 + $0x78] sm:$0xff] }
 0x29a   : > { %v1332_v25 = vpop.eup %1331 }
 0x29b   : > { %v586_v27 = vmul.f32 %v1332_v25, %v1330_v22  ;;  %v1334_v42 = vpop.eup %1333 }
 0x29c   : > { %v648_v43 = vsel %vm550_vm1, %v1334_v42, 0.0 }
 0x2ab   : > { %v588_v26 = vpop.permute.xlu1 %587 }
 0x2ac   : > { %608 = vmatpush.msra.mxu2 %v588_v26 }
 0x2ad   : > { %1232 = vmatmul.msk.f32.vlgmr.msra.gmra.mxu2 %vm550_vm1, %v586_v27 }
 0x2b3   : > { %v816_v31 = vpop.permute.xlu1 %815 }
 0x330   : > { %v610_v29 = vpop.f32.mrf.mxu2 }
 0x331   : > { %1237 = vmatmul.msk.f32.vlgmr.msrb.gmra.mxu3 %vm550_vm1, %v610_v29 }
 0x332   : > { %1242 = vmatpush.xpose.msk.msrb.mxu3 %vm550_vm1, %v818_v30  ;;  %v955_v30 = vld [vmem:[%s1872_s7 + $0x30] sm:$0xff] }
 0x339   : > { %1239 = vmatmul.msk.f32.vlgmr.msra.gmra.mxu3 %vm550_vm1, %v726_v28 }
 0x341   : > { %1243 = vmatmul.msk.f32.vlgmr.msrb.gmra.mxu3 %vm550_vm1, %v816_v31  ;;  %v956_v31 = vld [vmem:[%s1872_s7 + $0x38] sm:$0xff] }
 0x342   : > { %998 = vmatpush.msra.mxu3 %v956_v31 }
 0x344   : > { %999 = vmatpush.msra.mxu3 %v954_v33 }
 0x3b4   : > { %v1726_v32 = vpop.f32.mrf.mxu3 }
 0x3bc   : > { %v750_v34 = vpop.f32.mrf.mxu3 }
 0x3bd   : > { %v753_v35 = vmul.f32 0.35355338, %v750_v34  ;;  %v951_v34 = vld [vmem:[%s1872_s7 + $0x10] sm:$0xff] }
 0x3bf   : > { %v754_v37 = vsel %vm550_vm1, %v753_v35, -inf }
 0x3c0   : > { %755 = vmax.xlane.f32.xlu1 %v754_v37  ;;  %v950_v37 = vld [vmem:[%s1872_s7 + $0x8] sm:$0xff] }
 0x3c4   : > { %v840_v39 = vpop.f32.mrf.mxu3 }
 0x3c5   : > { %v843_v40 = vmul.f32 0.35355338, %v840_v39  ;;  %v1022_v39 = vld [vmem:[%s1874_s9 + $0x70] sm:$0xff] }
 0x3c7   : > { %v844_v41 = vsel %vm550_vm1, %v843_v40, -inf }
 0x3c8   : > { %845 = vmax.xlane.f32.xlu0 %v844_v41 }
 0x3d0   : > { %649 = vadd.xlane.f32.xlu0 %v648_v43  ;;  %v1020_v43 = vld [vmem:[%s1874_s9 + $0x60] sm:$0xff] }
 0x3d9   : > { %765 = vrot.lane.b32.xlu1 %v1699_v7, %s1534_s27 }
 0x433   : > { %v756_v44 = vpop.xlane.xlu1 %755 }
 0x434   : > { %v757_v45 = vsub.f32 %v753_v35, %v756_v44  ;;  %v952_v35 = vld [vmem:[%s1872_s7 + $0x18] sm:$0xff] }
 0x435   : > { %1000 = vmatpush.msra.mxu3 %v952_v35 }
 0x436   : > { %v758_v46 = vmul.f32 1.442695, %v757_v45  ;;  %v1019_v45 = vld [vmem:[%s1874_s9 + $0x58] sm:$0xff] }
 0x437   : > { %1001 = vmatpush.msra.mxu3 %v950_v37 }
 0x438   : > { %1335 = vpow2.f32 %v758_v46  ;;  %v1018_v46 = vld [vmem:[%s1874_s9 + $0x50] sm:$0xff] }
 0x43b   : > { %v846_v47 = vpop.xlane.xlu0 %845 }
 0x43c   : > { %v847_v48 = vsub.f32 %v843_v40, %v846_v47  ;;  %v1021_v40 = vld [vmem:[%s1874_s9 + $0x68] sm:$0xff] }
 0x43d   : > { %v1017_v47 = vld [vmem:[%s1874_s9 + $0x48] sm:$0xff] }
 0x43e   : > { %v1336_v49 = vpop.eup %1335  ;;  %v848_v50 = vmul.f32 1.442695, %v847_v48  ;;  %v1016_v48 = vld [vmem:[%s1874_s9 + $0x40] sm:$0xff] }
 0x43f   : > { %v760_v51 = vsel %vm550_vm1, %v1336_v49, 0.0 }
 0x440   : > { %1337 = vpow2.f32 %v848_v50  ;;  %761 = vadd.xlane.f32.xlu0 %v760_v51  ;;  %v1015_v50 = vld [vmem:[%s1874_s9 + $0x38] sm:$0xff] }
 0x443   : > { %v650_v54 = vpop.xlane.xlu0 %649 }
 0x446   : > { %v1338_v52 = vpop.eup %1337 }
 0x447   : > { %v850_v53 = vsel %vm550_vm1, %v1338_v52, 0.0 }
 0x448   : > { %851 = vadd.xlane.f32.xlu2 %v850_v53 }
 0x44b   : > { %v766_v63 = vpop.permute.xlu1 %765 }
 0x454   : > { %653 = vrot.lane.b32.xlu0 %v1699_v7, %s1535_s14 }
 0x460   : > { %855 = vrot.lane.b32.xlu2 %v1699_v7, %s1536_s16 }
 0x4b3   : > { %v762_v56 = vpop.xlane.xlu0 %761 }
 0x4bb   : > { %v852_v55 = vpop.xlane.xlu2 %851 }
 0x4bc   : > { %1339 = vrcp.f32 %v852_v55 }
 0x4bd   : > { %1341 = vrcp.f32 %v650_v54  ;;  %v1013_v54 = vld [vmem:[%s1874_s9 + $0x28] sm:$0xff] }
 0x4be   : > { %1343 = vrcp.f32 %v762_v56  ;;  %v1012_v56 = vld [vmem:[%s1874_s9 + $0x20] sm:$0xff] }
 0x4bf   : > { %1345 = vrcp.f32 %v1537_v19  ;;  %v1326_v19 = vld [vmem:[#allocation6] ss:$0 sm:$0xff] }
 0x4c2   : > { %v1340_v57 = vpop.eup %1339 }
 0x4c3   : > { %v1342_v58 = vpop.eup %1341  ;;  %v856_v59 = vpop.permute.xlu2 %855  ;;  %v854_v60 = vmul.f32 %v1340_v57, %v1338_v52  ;;  %v1014_v52 = vld [vmem:[%s1874_s9 + $0x30] sm:$0xff] }
 0x4c4   : > { %876 = vmatpush.msra.mxu0 %v856_v59  ;;  %v652_v62 = vmul.f32 %v1342_v58, %v1334_v42  ;;  %v1344_v0 = vpop.eup %1343  ;;  %v1011_v58 = vld [vmem:[%s1874_s9 + $0x18] sm:$0xff] }
 0x4c5   : > { %1244 = vmatmul.msk.f32.vlgmr.msra.gmra.mxu0 %vm550_vm1, %v854_v60  ;;  %v764_v1 = vmul.f32 %v1344_v0, %v1336_v49  ;;  %v1346_v20 = vpop.eup %1345  ;;  %v1324_v60 = vld [vmem:[#allocation2] ss:$0 sm:$0xff] }
 0x4c6   : > { %v654_v61 = vpop.permute.xlu0 %653  ;;  %v916_v21 = vmul.f32 32.0, %v1346_v20  ;;  %vm920_vm2 = vweird.f32 %v1346_v20  ;;  %1035 = vmatpush.msrb.mxu0 %v1023_v38 }
 0x4c7   : > { %674 = vmatpush.msrb.mxu2 %v654_v61 }
 0x4c8   : > { %1235 = vmatmul.msk.f32.vlgmr.msrb.gmra.mxu2 %vm550_vm1, %v652_v62  ;;  %v917_v22 = vsub.f32 1.0, %v916_v21  ;;  %1036 = vmatpush.msrb.mxu0 %v1022_v39 }
 0x4c9   : > { %786 = vmatpush.msra.mxu2 %v766_v63  ;;  %v1325_v63 = vld [vmem:[#allocation4] ss:$0 sm:$0xff] }
 0x4ca   : > { %v918_v23 = vmul.f32 %v1346_v20, %v917_v22  ;;  %1037 = vmatpush.msrb.mxu0 %v1021_v40  ;;  %v1327_v40 = vld [vmem:[#allocation7] ss:$0 sm:$0xff] }
 0x4cb   : > { %899 = vmatpush.msrb.mxu2 %v545_v2  ;;  %v1010_v2 = vld [vmem:[%s1874_s9 + $0x10] sm:$0xff] }
 0x4cc   : > { %v919_v24 = vadd.f32 %v1346_v20, %v918_v23  ;;  %1038 = vmatpush.msrb.mxu0 %v1020_v43 }
 0x4ce   : > { %v1757_v25 = vsel %vm920_vm2, %v1346_v20, %v919_v24  ;;  %1039 = vmatpush.msrb.mxu0 %v1019_v45 }
 0x4d0   : > { %1240 = vmatmul.msk.f32.vlgmr.msra.gmra.mxu2 %vm550_vm1, %v764_v1  ;;  %1040 = vmatpush.msrb.mxu0 %v1018_v46 }
 0x4d2   : > { %1041 = vmatpush.msrb.mxu0 %v1017_v47 }
 0x4d4   : > { %1042 = vmatpush.msrb.mxu0 %v1016_v48 }
 0x4d6   : > { %1043 = vmatpush.msrb.mxu0 %v1015_v50 }
 0x4d8   : > { %1044 = vmatpush.msrb.mxu0 %v1014_v52 }
 0x4da   : > { %1045 = vmatpush.msrb.mxu0 %v1013_v54 }
 0x4dc   : > { %1046 = vmatpush.msrb.mxu0 %v1012_v56 }
 0x4de   : > { %1047 = vmatpush.msrb.mxu0 %v1011_v58 }
 0x4e0   : > { %1048 = vmatpush.msrb.mxu0 %v1010_v2 }
 0x4e2   : > { %1049 = vmatpush.msrb.mxu0 %v1009_v3 }
 0x4e4   : > { %1050 = vmatpush.msrb.mxu0 %v1008_v5 }
 0x542   : > { %v878_v6 = vpop.f32.mrf.mxu0 }
 0x543   : > { %1245 = vmatmul.msk.f32.vlgmr.msrb.gmra.mxu2 %vm550_vm1, %v878_v6  ;;  %v1027_v6 = vld [vmem:[%s1874_s9 + $0x98] sm:$0xff] }
 0x544   : > { %1067 = vmatpush.msra.mxu2 %v1027_v6 }
 0x54b   : > { %v676_v7 = vpop.f32.mrf.mxu2 }
 0x54c   : > { %1236 = vmatmul.msk.f32.vlgmr.msra.gmra.mxu1 %vm550_vm1, %v676_v7  ;;  %v1026_v7 = vld [vmem:[%s1874_s9 + $0x90] sm:$0xff] }
 0x54d   : > { %978 = vmatpush.msra.mxu1 %v955_v30  ;;  %1068 = vmatpush.msra.mxu2 %v1026_v7 }
 0x553   : > { %v788_v8 = vpop.f32.mrf.mxu2 }
 0x554   : > { %1241 = vmatmul.msk.f32.vlgmr.msrb.gmra.mxu1 %vm550_vm1, %v788_v8  ;;  %v1025_v8 = vld [vmem:[%s1874_s9 + $0x88] sm:$0xff] }
 0x555   : > { %1069 = vmatpush.msra.mxu2 %v1025_v8 }
 0x5c6   : > { %v901_v14 = vpop.f32.mrf.mxu2 }
 0x5c9   : > { %v699_v9 = vpop.f32.mrf.mxu1 }
 0x5ca   : > { %v723_v10 = vadd.f32 %v1726_v32, %v699_v9  ;;  %v953_v32 = vld [vmem:[%s1872_s7 + $0x20] sm:$0xff] }
 0x5cb   : > { %979 = vmatpush.msra.mxu1 %v953_v32  ;;  %v1024_v9 = vld [vmem:[%s1874_s9 + $0x80] sm:$0xff] }
 0x5cc   : > { %1070 = vmatpush.msra.mxu2 %v1024_v9 }
 0x5cd   : > { %980 = vmatpush.msra.mxu1 %v951_v34 }
 0x5cf   : > { %981 = vmatpush.msra.mxu1 %v949_v36 }
 0x5d1   : > { %v811_v11 = vpop.f32.mrf.mxu1 }
 0x5d2   : > { %v814_v12 = vadd.f32 %v811_v11, %v723_v10  ;;  %v957_v10 = vld [vmem:[%s1873_s8] sm:$0x3] }
 0x5d3   : > { %v959_v11 = vperm.slane %v957_v10, 0 }
 0x5d4   : > { %v904_v15 = vadd.f32 %v901_v14, %v814_v12 }
 0x5d6   : > { %v908_v16 = vadd.f32 %v1323_v13, %v904_v15  ;;  %v960_v15 = vperm.slane %v957_v10, 1 }
 0x5d8   : > { %v909_v17 = vadd.f32 %v908_v16, %v1692_v4 }
 0x5da   : > { %v912_v18 = vsel %vm518_vm0, %v909_v17, 0.0 }
 0x5db   : > { %913 = vadd.xlane.f32.xlu0 %v912_v18 }
 0x64e   : > { %v914_v26 = vpop.xlane.xlu0 %913 }
 0x64f   : > { %v922_v27 = vmul.f32 %v1757_v25, %v914_v26 }
 0x651   : > { %v923_v28 = vsub.f32 %v909_v17, %v922_v27 }
 0x653   : > { %v924_v29 = vmul.f32 %v923_v28, %v923_v28 }
 0x655   : > { %v925_v4 = vsel %vm518_vm0, %v924_v29, 0.0 }
 0x656   : > { %926 = vadd.xlane.f32.xlu1 %v925_v4 }
 0x6c9   : > { %v927_v41 = vpop.xlane.xlu1 %926 }
 0x6ca   : > { %v928_v42 = vmul.f32 %v927_v41, %v1757_v25 }
 0x6cc   : > { %v929_v44 = vadd.f32 1e-05, %v928_v42  ;;  %v1328_v42 = vld [vmem:[#allocation9] ss:$0 sm:$0xff] }
 0x6ce   : > { %1347 = vrsqrt.f32 %v929_v44  ;;  %vm936_vm4 = vweird.f32 %v929_v44 }
 0x6d4   : > { %v1348_v49 = vpop.eup %1347 }
 0x6d5   : > { %v931_v51 = vmul.f32 %v1348_v49, %v929_v44  ;;  %vm937_vm3 = vweird.f32 %v1348_v49 }
 0x6d6   : > { %vm938_vm5 = vmor %vm936_vm4, %vm937_vm3 }
 0x6d7   : > { %v932_v53 = vmul.f32 %v1348_v49, %v931_v51 }
 0x6d9   : > { %v933_v55 = vmul.f32 0.5, %v932_v53 }
 0x6db   : > { %v934_v57 = vsub.f32 1.5, %v933_v55 }
 0x6dd   : > { %v935_v59 = vmul.f32 %v1348_v49, %v934_v57 }
 0x6df   : > { %v939_v61 = vsel %vm938_vm5, %v1348_v49, %v935_v59 }
 0x6e0   : > { %v940_v62 = vmul.f32 %v939_v61, %v923_v28 }
 0x6e2   : > { %v944_v0 = vmul.f32 %v1324_v60, %v940_v62 }
 0x6e4   : > { %v948_v1 = vadd.f32 %v1325_v63, %v944_v0 }
 0x6e6   : > { %1246 = vmatmul.msk.f32.vlgmr.msra.gmra.mxu1 %vm518_vm0, %v948_v1  ;;  %1247 = vmatmul.msk.f32.vlgmr.msra.gmra.mxu3 %vm518_vm0, %v948_v1 }
 0x763   : > { %v983_v12 = vpop.f32.mrf.mxu1 }
 0x764   : > { %v984_v13 = vadd.f32 %v983_v12, %v959_v11 }
 0x766   : > { %v1006_v14 = vmax.f32 %v984_v13, 0.0 }
 0x768   : > { %1051 = vmatmul.f32.vlgmr.msrb.gmra.mxu0 %v1006_v14 }
 0x769   : > { %v1003_v16 = vpop.f32.mrf.mxu3 }
 0x76a   : > { %v1004_v17 = vadd.f32 %v1003_v16, %v960_v15 }
 0x76c   : > { %v1007_v18 = vmax.f32 %v1004_v17, 0.0 }
 0x76e   : > { %1248 = vmatmul.msk.f32.vlgmr.msra.gmra.mxu2 %vm518_vm0, %v1007_v18 }
 0x7e5   : > { %v1052_v20 = vpop.f32.mrf.mxu0 }
 0x7e6   : > { %v1053_v21 = vadd.f32 %v1326_v19, %v1052_v20 }
 0x7f1   : > { %v1072_v22 = vpop.f32.mrf.mxu2 }
 0x7f2   : > { %v1073_v23 = vadd.f32 %v1072_v22, %v1053_v21 }
 0x7f4   : > { %v1075_v24 = vadd.f32 %v1073_v23, %v948_v1 }
 0x7f6   : > { %v1078_v26 = vsel %vm518_vm0, %v1075_v24, 0.0 }
 0x7f7   : > { %1079 = vadd.xlane.f32.xlu2 %v1078_v26 }
 0x86a   : > { %v1080_v27 = vpop.xlane.xlu2 %1079 }
 0x86b   : > { %v1081_v28 = vmul.f32 %v1080_v27, %v1757_v25 }
 0x86d   : > { %v1082_v29 = vsub.f32 %v1075_v24, %v1081_v28 }
 0x86f   : > { %v1083_v4 = vmul.f32 %v1082_v29, %v1082_v29 }
 0x871   : > { %v1084_v30 = vsel %vm518_vm0, %v1083_v4, 0.0 }
 0x872   : > { %1085 = vadd.xlane.f32.xlu0 %v1084_v30 }
 0x8e5   : > { %v1086_v31 = vpop.xlane.xlu0 %1085 }
 0x8e6   : > { %v1087_v32 = vmul.f32 %v1086_v31, %v1757_v25 }
 0x8e8   : > { %v1088_v33 = vadd.f32 1e-05, %v1087_v32 }
 0x8ea   : > { %1349 = vrsqrt.f32 %v1088_v33  ;;  %vm1095_vm7 = vweird.f32 %v1088_v33 }
 0x8f0   : > { %v1350_v34 = vpop.eup %1349 }
 0x8f1   : > { %v1090_v35 = vmul.f32 %v1350_v34, %v1088_v33  ;;  %vm1096_vm6 = vweird.f32 %v1350_v34 }
 0x8f2   : > { %vm1097_vm8 = vmor %vm1095_vm7, %vm1096_vm6 }
 0x8f3   : > { %v1091_v36 = vmul.f32 %v1350_v34, %v1090_v35 }
 0x8f5   : > { %v1092_v37 = vmul.f32 0.5, %v1091_v36 }
 0x8f7   : > { %v1093_v38 = vsub.f32 1.5, %v1092_v37 }
 0x8f9   : > { %v1094_v39 = vmul.f32 %v1350_v34, %v1093_v38 }
 0x8fb   : > { %v1098_v41 = vsel %vm1097_vm8, %v1350_v34, %v1094_v39 }
 0x8fc   : > { %v1099_v43 = vmul.f32 %v1098_v41, %v1082_v29 }
 0x8fe   : > { %v1103_v44 = vmul.f32 %v1327_v40, %v1099_v43 }
 0x900   : > { %v1107_v25 = vadd.f32 %v1328_v42, %v1103_v44 }
 0x902   : > { %1108 = vst.msk [vmem:[%s508_s28] sm:$0xff] %vm518_vm0, %v1107_v25 }
 0x903 PF: > { %s26_s25 = sadd.s32 1, %s1519_s25  }
 0x904   : > { %p23_p7 = scmp.ge.s32.totalorder %s26_s25, 4  }
 0x906   :  { %25 = sbr.rel (!%p23_p7) target bundleno = 6 (0x6), region = 123 }
 0x90b   :  { %1128 = vsyncpa [#allocation3], 1 }
 0x90c   :  { %1130 = vsyncpa [#allocation3 + $0x1], 1 }
 0x90d   :  { %1131 = vsyncpa [#allocation5], 1 }
 0x90e   :  { %1132 = vsyncpa [#allocation8], 1 }

// kernel: transformer_forward.11
= control target key start
LH: loop header
LB: loop body
LE: loop exit
PB: predicated region body
PF: predicated region fallthrough
CT: control target
= control target key end

     0   :  { %s1257_s25 = smov 0   ;;  %s1473_s0 = inlined_call_operand.vmem [shape: f32[16,32], index: 0, kind: input, shape index: {}]   ;;  %s1474_s1 = inlined_call_operand.vmem [shape: f32[32,96], index: 1, kind: input, shape index: {}]   ;;  %s1475_s2 = inlined_call_operand.vmem [shape: f32[1,96], index: 2, kind: input, shape index: {}]   ;;  %s1476_s3 = inlined_call_operand.vmem [shape: f32[32,32], index: 3, kind: input, shape index: {}]   ;;  %s1477_s4 = inlined_call_operand.vmem [shape: f32[1,32], index: 4, kind: input, shape index: {}]   ;;  %s1478_s5 = inlined_call_operand.vmem [shape: f32[1,32], index: 5, kind: input, shape index: {}]   ;;  %s1479_s6 = inlined_call_operand.vmem [shape: f32[1,32], index: 6, kind: input, shape index: {}]   ;;  %s1480_s7 = inlined_call_operand.vmem [shape: f32[32,160], index: 7, kind: input, shape index: {}]   ;;  %s1481_s8 = inlined_call_operand.vmem [shape: f32[1,160], index: 8, kind: input, shape index: {}]   ;;  %s1482_s9 = inlined_call_operand.vmem [shape: f32[160,32], index: 9, kind: input, shape index: {}]   ;;  %s1483_s10 = inlined_call_operand.vmem [shape: f32[1,32], index: 10, kind: input, shape index: {}]   ;;  %s1484_s11 = inlined_call_operand.vmem [shape: f32[1,32], index: 11, kind: input, shape index: {}]   ;;  %s1485_s12 = inlined_call_operand.vmem [shape: f32[1,32], index: 12, kind: input, shape index: {}]   ;;  %s1486_s13 = inlined_call_operand.vmem [shape: f32[16,32], index: 13, kind: output, shape index: {}]  }
   0x1 LB: > { %s1089_s26 = sadd.s32 4294967295, %s1173_s25   ;;  %p1093_p0 = scmp.ge.s32.totalorder %s1173_s25, 1  ;;  %s1173_s25 = sphi %s1257_s25, %s23_s25  }
   0x2   : > { %p386_p1 = scmp.lt.s32.totalorder %s1173_s25, 3 }
   0x4   : > { %p387_p2 = pnand %p1093_p0, %p386_p1 }
   0x5   : > { %p428_p3 = scmp.lt.s32.totalorder (!%p387_p2), %s1089_s26, 1  ;;  %s1175_s24 = smov (!%p387_p2), 88  }
   0x6   : > { %390 = sbr.rel (%p387_p2) target bundleno = 2285 (0x8ed), region = 72  ;;  %s1176_s27 = smov (!%p387_p2), 96  }
   0x7   : > { %s1177_s28 = smov (!%p387_p2), 120   ;;  %s1178_s29 = smov (!%p387_p2), 80  }
   0x8   : > { %s1179_s30 = smov (!%p387_p2), 112   ;;  %s1180_s14 = smov (!%p387_p2), 72  }
   0x9   : > { %s1181_s17 = smov (!%p387_p2), 64   ;;  %s1182_s19 = smov (!%p387_p2), 104  }
   0xa   : > { %s1183_s20 = smov (!%p387_p2), 48   ;;  %s1185_s22 = smov (!%p387_p2), 40  }
   0xb   : > { %v440_v0 = vld [vmem:[%s1474_s1 + $0x18] sm:$0xff]  ;;  %v439_v1 = vld [vmem:[%s1474_s1 + $0x10] sm:$0xff]  ;;  %v438_v2 = vld [vmem:[%s1474_s1 + $0x8] sm:$0xff]  ;;  %s1488_s26 = smov (!%p428_p3, %s1089_s26), 1  ;;  %vm445_vm0 = vcmask 261120   ;;  %vm477_vm1 = vcmask 64512  }
   0xc   : > { %461 = vmatpush.msra.mxu1 %v440_v0  ;;  %v437_v3 = vld [vmem:[%s1474_s1] sm:$0xff]  ;;  %s1094_s18 = sshll.u32 %s1488_s26, 3 }
   0xd   : > { %s431_s21 = scalar_lea.vmem %s1473_s0, %s1094_s18  ;;  %v1138_v5 = vld [vmem:[%s1475_s2] ss:$0 sm:$0xff]  ;;  %s435_s16 = scalar_lea.vmem %s1486_s13, %s1094_s18 }
   0xe   : > { %462 = vmatpush.msra.mxu1 %v439_v1  ;;  %v1285_v4 = vld [vmem:[%s431_s21] sm:$0xff]  ;;  %s1184_s21 = smov 56  }
   0xf   : > { %v469_v8 = vld [vmem:[%s1476_s3] sm:$0xff] }
  0x10   : > { %463 = vmatpush.msra.mxu1 %v438_v2  ;;  %v472_v2 = vld [vmem:[%s1476_s3 + $0x18] sm:$0xff] }
  0x12   : > { %464 = vmatpush.msra.mxu1 %v437_v3  ;;  %v470_v3 = vld [vmem:[%s1476_s3 + $0x8] sm:$0xff] }
  0x13   : > { %1096 = vmatmul.msk.f32.vlgmr.msra.gmra.mxu1 %vm445_vm0, %v1285_v4 }
  0x90   : > { %v466_v6 = vpop.f32.mrf.mxu1 }
  0x91   : > { %v1292_v7 = vadd.f32 %v1138_v5, %v466_v6  ;;  %v471_v5 = vld [vmem:[%s1476_s3 + $0x10] sm:$0xff] }
  0x93   : > { %542 = vrot.lane.b32.xlu2 %v1292_v7, %s1175_s24  ;;  %475 = vrot.lane.b32.xlu0 %v1292_v7, %s1176_s27 }
  0x9b   : > { %540 = vrot.lane.b32.xlu2 %v1292_v7, %s1177_s28 }
  0xa3   : > { %654 = vrot.lane.b32.xlu2 %v1292_v7, %s1178_s29 }
  0xab   : > { %652 = vrot.lane.b32.xlu2 %v1292_v7, %s1179_s30 }
  0xb3   : > { %744 = vrot.lane.b32.xlu2 %v1292_v7, %s1180_s14 }
  0xed   : > { %v543_v9 = vpop.permute.xlu2 %542 }
  0xee   : > { %1100 = vmatpush.xpose.msk.msra.mxu3 %vm477_vm1, %v543_v9 }
  0xf2   : > { %647 = vmatpush.msrb.mxu3 %v469_v8 }
  0xf5   : > { %v541_v10 = vpop.permute.xlu2 %540 }
  0xf6   : > { %1101 = vmatmul.msk.f32.vlgmr.msra.gmra.mxu3 %vm477_vm1, %v541_v10 }
  0xfd   : > { %v655_v11 = vpop.permute.xlu2 %654 }
  0xfe   : > { %1105 = vmatpush.xpose.msk.msra.mxu3 %vm477_vm1, %v655_v11 }
 0x105   : > { %v476_v12 = vpop.permute.xlu0 %475  ;;  %v653_v28 = vpop.permute.xlu2 %652 }
 0x106   : > { %1097 = vmatpush.xpose.msk.msrb.mxu1 %vm477_vm1, %v476_v12 }
 0x109   : > { %1098 = vmatmul.msk.f32.vlgmr.msrb.gmra.mxu1 %vm477_vm1, %v1292_v7 }
 0x10a   : > { %624 = vmatpush.msra.mxu1 %v470_v3  ;;  %v936_v3 = vld [vmem:[%s1482_s9 + $0x8] sm:$0xff] }
 0x10c   : > { %736 = vmatpush.msrb.mxu1 %v471_v5  ;;  %v935_v5 = vld [vmem:[%s1482_s9] sm:$0xff] }
 0x10d   : > { %v745_v30 = vpop.permute.xlu2 %744 }
 0x179   : > { %v565_v13 = vpop.f32.mrf.mxu3 }
 0x17a   : > { %v568_v14 = vmul.f32 0.35355338, %v565_v13  ;;  %v1139_v13 = vld [vmem:[%s1477_s4] ss:$0 sm:$0xff] }
 0x17c   : > { %v569_v15 = vsel %vm477_vm1, %v568_v14, -inf }
 0x17d   : > { %570 = vmax.xlane.f32.xlu2 %v569_v15 }
 0x186   : > { %v499_v16 = vpop.f32.mrf.mxu1 }
 0x187   : > { %v502_v17 = vmul.f32 0.35355338, %v499_v16 }
 0x189   : > { %v503_v18 = vsel %vm477_vm1, %v502_v17, -inf }
 0x18a   : > { %504 = vmax.xlane.f32.xlu0 %v503_v18 }
 0x1f0   : > { %v571_v33 = vpop.xlane.xlu2 %570 }
 0x1f1   : > { %v572_v36 = vsub.f32 %v568_v14, %v571_v33  ;;  %v881_v33 = vld [vmem:[%s1480_s7 + $0x28] sm:$0xff] }
 0x1f3   : > { %v573_v38 = vmul.f32 1.442695, %v572_v36  ;;  %v876_v36 = vld [vmem:[%s1480_s7] sm:$0xff] }
 0x1fd   : > { %v505_v19 = vpop.xlane.xlu0 %504 }
 0x1fe   : > { %v506_v20 = vsub.f32 %v502_v17, %v505_v19  ;;  %v1186_v19 = vmov 32.0  }
 0x200   : > { %v507_v21 = vmul.f32 1.442695, %v506_v20 }
 0x202   : > { %1145 = vpow2.f32 %v507_v21 }
 0x208   : > { %v1146_v22 = vpop.eup %1145 }
 0x209   : > { %v509_v23 = vsel %vm477_vm1, %v1146_v22, 0.0 }
 0x20a   : > { %510 = vadd.xlane.f32.xlu1 %v509_v23 }
 0x223   : > { %514 = vrot.lane.b32.xlu1 %v1292_v7, %s1181_s17 }
 0x22b   : > { %742 = vrot.lane.b32.xlu1 %v1292_v7, %s1182_s19 }
 0x27d   : > { %v511_v24 = vpop.xlane.xlu1 %510 }
 0x27e   : > { %1147 = vrcp.f32 %v511_v24 }
 0x27f   : > { %1149 = vpow2.f32 %v573_v38  ;;  %v950_v38 = vld [vmem:[%s1482_s9 + $0x78] sm:$0xff] }
 0x284   : > { %v1148_v25 = vpop.eup %1147 }
 0x285   : > { %v513_v27 = vmul.f32 %v1148_v25, %v1146_v22  ;;  %v1150_v42 = vpop.eup %1149 }
 0x286   : > { %v575_v43 = vsel %vm477_vm1, %v1150_v42, 0.0 }
 0x295   : > { %v515_v26 = vpop.permute.xlu1 %514 }
 0x296   : > { %535 = vmatpush.msra.mxu2 %v515_v26 }
 0x297   : > { %1099 = vmatmul.msk.f32.vlgmr.msra.gmra.mxu2 %vm477_vm1, %v513_v27 }
 0x29d   : > { %v743_v31 = vpop.permute.xlu1 %742 }
 0x31a   : > { %v537_v29 = vpop.f32.mrf.mxu2 }
 0x31b   : > { %1104 = vmatmul.msk.f32.vlgmr.msrb.gmra.mxu3 %vm477_vm1, %v537_v29 }
 0x31c   : > { %1109 = vmatpush.xpose.msk.msrb.mxu3 %vm477_vm1, %v745_v30  ;;  %v882_v30 = vld [vmem:[%s1480_s7 + $0x30] sm:$0xff] }
 0x323   : > { %1106 = vmatmul.msk.f32.vlgmr.msra.gmra.mxu3 %vm477_vm1, %v653_v28 }
 0x32b   : > { %1110 = vmatmul.msk.f32.vlgmr.msrb.gmra.mxu3 %vm477_vm1, %v743_v31  ;;  %v883_v31 = vld [vmem:[%s1480_s7 + $0x38] sm:$0xff] }
 0x32c   : > { %925 = vmatpush.msra.mxu3 %v883_v31 }
 0x32e   : > { %926 = vmatpush.msra.mxu3 %v881_v33 }
 0x39e   : > { %v1319_v32 = vpop.f32.mrf.mxu3 }
 0x3a6   : > { %v677_v34 = vpop.f32.mrf.mxu3 }
 0x3a7   : > { %v680_v35 = vmul.f32 0.35355338, %v677_v34  ;;  %v878_v34 = vld [vmem:[%s1480_s7 + $0x10] sm:$0xff] }
 0x3a9   : > { %v681_v37 = vsel %vm477_vm1, %v680_v35, -inf }
 0x3aa   : > { %682 = vmax.xlane.f32.xlu1 %v681_v37  ;;  %v877_v37 = vld [vmem:[%s1480_s7 + $0x8] sm:$0xff] }
 0x3ae   : > { %v767_v39 = vpop.f32.mrf.mxu3 }
 0x3af   : > { %v770_v40 = vmul.f32 0.35355338, %v767_v39  ;;  %v949_v39 = vld [vmem:[%s1482_s9 + $0x70] sm:$0xff] }
 0x3b1   : > { %v771_v41 = vsel %vm477_vm1, %v770_v40, -inf }
 0x3b2   : > { %772 = vmax.xlane.f32.xlu0 %v771_v41 }
 0x3ba   : > { %576 = vadd.xlane.f32.xlu0 %v575_v43  ;;  %v947_v43 = vld [vmem:[%s1482_s9 + $0x60] sm:$0xff] }
 0x3c3   : > { %692 = vrot.lane.b32.xlu1 %v1292_v7, %s1183_s20 }
 0x41d   : > { %v683_v44 = vpop.xlane.xlu1 %682 }
 0x41e   : > { %v684_v45 = vsub.f32 %v680_v35, %v683_v44  ;;  %v879_v35 = vld [vmem:[%s1480_s7 + $0x18] sm:$0xff] }
 0x41f   : > { %927 = vmatpush.msra.mxu3 %v879_v35 }
 0x420   : > { %v685_v46 = vmul.f32 1.442695, %v684_v45  ;;  %v946_v45 = vld [vmem:[%s1482_s9 + $0x58] sm:$0xff] }
 0x421   : > { %928 = vmatpush.msra.mxu3 %v877_v37 }
 0x422   : > { %1151 = vpow2.f32 %v685_v46  ;;  %v945_v46 = vld [vmem:[%s1482_s9 + $0x50] sm:$0xff] }
 0x425   : > { %v773_v47 = vpop.xlane.xlu0 %772 }
 0x426   : > { %v774_v48 = vsub.f32 %v770_v40, %v773_v47  ;;  %v948_v40 = vld [vmem:[%s1482_s9 + $0x68] sm:$0xff] }
 0x427   : > { %v944_v47 = vld [vmem:[%s1482_s9 + $0x48] sm:$0xff] }
 0x428   : > { %v1152_v49 = vpop.eup %1151  ;;  %v775_v50 = vmul.f32 1.442695, %v774_v48  ;;  %v943_v48 = vld [vmem:[%s1482_s9 + $0x40] sm:$0xff] }
 0x429   : > { %v687_v51 = vsel %vm477_vm1, %v1152_v49, 0.0 }
 0x42a   : > { %1153 = vpow2.f32 %v775_v50  ;;  %688 = vadd.xlane.f32.xlu0 %v687_v51  ;;  %v942_v50 = vld [vmem:[%s1482_s9 + $0x38] sm:$0xff] }
 0x42d   : > { %v577_v54 = vpop.xlane.xlu0 %576 }
 0x430   : > { %v1154_v52 = vpop.eup %1153 }
 0x431   : > { %v777_v53 = vsel %vm477_vm1, %v1154_v52, 0.0 }
 0x432   : > { %778 = vadd.xlane.f32.xlu2 %v777_v53 }
 0x435   : > { %v693_v63 = vpop.permute.xlu1 %692 }
 0x43e   : > { %580 = vrot.lane.b32.xlu0 %v1292_v7, %s1184_s21 }
 0x44a   : > { %782 = vrot.lane.b32.xlu2 %v1292_v7, %s1185_s22 }
 0x49d   : > { %v689_v56 = vpop.xlane.xlu0 %688 }
 0x4a5   : > { %v779_v55 = vpop.xlane.xlu2 %778 }
 0x4a6   : > { %1155 = vrcp.f32 %v779_v55 }
 0x4a7   : > { %1157 = vrcp.f32 %v577_v54  ;;  %v940_v54 = vld [vmem:[%s1482_s9 + $0x28] sm:$0xff] }
 0x4a8   : > { %1159 = vrcp.f32 %v689_v56  ;;  %v939_v56 = vld [vmem:[%s1482_s9 + $0x20] sm:$0xff] }
 0x4a9   : > { %1161 = vrcp.f32 %v1186_v19  ;;  %v1142_v19 = vld [vmem:[%s1483_s10] ss:$0 sm:$0xff] }
 0x4ac   : > { %v1156_v57 = vpop.eup %1155 }
 0x4ad   : > { %v1158_v58 = vpop.eup %1157  ;;  %v783_v59 = vpop.permute.xlu2 %782  ;;  %v781_v60 = vmul.f32 %v1156_v57, %v1154_v52  ;;  %v941_v52 = vld [vmem:[%s1482_s9 + $0x30] sm:$0xff] }
 0x4ae   : > { %803 = vmatpush.msra.mxu0 %v783_v59  ;;  %v579_v62 = vmul.f32 %v1158_v58, %v1150_v42  ;;  %v1160_v0 = vpop.eup %1159  ;;  %v938_v58 = vld [vmem:[%s1482_s9 + $0x18] sm:$0xff] }
 0x4af   : > { %1111 = vmatmul.msk.f32.vlgmr.msra.gmra.mxu0 %vm477_vm1, %v781_v60  ;;  %v691_v1 = vmul.f32 %v1160_v0, %v1152_v49  ;;  %v1162_v20 = vpop.eup %1161  ;;  %v1140_v60 = vld [vmem:[%s1478_s5] ss:$0 sm:$0xff] }
 0x4b0   : > { %v581_v61 = vpop.permute.xlu0 %580  ;;  %v843_v21 = vmul.f32 32.0, %v1162_v20  ;;  %vm847_vm2 = vweird.f32 %v1162_v20  ;;  %962 = vmatpush.msrb.mxu0 %v950_v38 }
 0x4b1   : > { %601 = vmatpush.msrb.mxu2 %v581_v61 }
 0x4b2   : > { %1102 = vmatmul.msk.f32.vlgmr.msrb.gmra.mxu2 %vm477_vm1, %v579_v62  ;;  %v844_v22 = vsub.f32 1.0, %v843_v21  ;;  %963 = vmatpush.msrb.mxu0 %v949_v39 }
 0x4b3   : > { %713 = vmatpush.msra.mxu2 %v693_v63  ;;  %v1141_v63 = vld [vmem:[%s1479_s6] ss:$0 sm:$0xff] }
 0x4b4   : > { %v845_v23 = vmul.f32 %v1162_v20, %v844_v22  ;;  %964 = vmatpush.msrb.mxu0 %v948_v40  ;;  %v1143_v40 = vld [vmem:[%s1484_s11] ss:$0 sm:$0xff] }
 0x4b5   : > { %826 = vmatpush.msrb.mxu2 %v472_v2  ;;  %v937_v2 = vld [vmem:[%s1482_s9 + $0x10] sm:$0xff] }
 0x4b6   : > { %v846_v24 = vadd.f32 %v1162_v20, %v845_v23  ;;  %965 = vmatpush.msrb.mxu0 %v947_v43 }
 0x4b8   : > { %v1350_v25 = vsel %vm847_vm2, %v1162_v20, %v846_v24  ;;  %966 = vmatpush.msrb.mxu0 %v946_v45 }
 0x4ba   : > { %1107 = vmatmul.msk.f32.vlgmr.msra.gmra.mxu2 %vm477_vm1, %v691_v1  ;;  %967 = vmatpush.msrb.mxu0 %v945_v46 }
 0x4bc   : > { %968 = vmatpush.msrb.mxu0 %v944_v47 }
 0x4be   : > { %969 = vmatpush.msrb.mxu0 %v943_v48 }
 0x4c0   : > { %970 = vmatpush.msrb.mxu0 %v942_v50 }
 0x4c2   : > { %971 = vmatpush.msrb.mxu0 %v941_v52 }
 0x4c4   : > { %972 = vmatpush.msrb.mxu0 %v940_v54 }
 0x4c6   : > { %973 = vmatpush.msrb.mxu0 %v939_v56 }
 0x4c8   : > { %974 = vmatpush.msrb.mxu0 %v938_v58 }
 0x4ca   : > { %975 = vmatpush.msrb.mxu0 %v937_v2 }
 0x4cc   : > { %976 = vmatpush.msrb.mxu0 %v936_v3 }
 0x4ce   : > { %977 = vmatpush.msrb.mxu0 %v935_v5 }
 0x52c   : > { %v805_v6 = vpop.f32.mrf.mxu0 }
 0x52d   : > { %1112 = vmatmul.msk.f32.vlgmr.msrb.gmra.mxu2 %vm477_vm1, %v805_v6  ;;  %v954_v6 = vld [vmem:[%s1482_s9 + $0x98] sm:$0xff] }
 0x52e   : > { %994 = vmatpush.msra.mxu2 %v954_v6 }
 0x535   : > { %v603_v7 = vpop.f32.mrf.mxu2 }
 0x536   : > { %1103 = vmatmul.msk.f32.vlgmr.msra.gmra.mxu1 %vm477_vm1, %v603_v7  ;;  %v953_v7 = vld [vmem:[%s1482_s9 + $0x90] sm:$0xff] }
 0x537   : > { %905 = vmatpush.msra.mxu1 %v882_v30  ;;  %995 = vmatpush.msra.mxu2 %v953_v7 }
 0x53d   : > { %v715_v8 = vpop.f32.mrf.mxu2 }
 0x53e   : > { %1108 = vmatmul.msk.f32.vlgmr.msrb.gmra.mxu1 %vm477_vm1, %v715_v8  ;;  %v952_v8 = vld [vmem:[%s1482_s9 + $0x88] sm:$0xff] }
 0x53f   : > { %996 = vmatpush.msra.mxu2 %v952_v8 }
 0x5b0   : > { %v828_v14 = vpop.f32.mrf.mxu2 }
 0x5b3   : > { %v626_v9 = vpop.f32.mrf.mxu1 }
 0x5b4   : > { %v650_v10 = vadd.f32 %v1319_v32, %v626_v9  ;;  %v880_v32 = vld [vmem:[%s1480_s7 + $0x20] sm:$0xff] }
 0x5b5   : > { %906 = vmatpush.msra.mxu1 %v880_v32  ;;  %v951_v9 = vld [vmem:[%s1482_s9 + $0x80] sm:$0xff] }
 0x5b6   : > { %997 = vmatpush.msra.mxu2 %v951_v9 }
 0x5b7   : > { %907 = vmatpush.msra.mxu1 %v878_v34 }
 0x5b9   : > { %908 = vmatpush.msra.mxu1 %v876_v36 }
 0x5bb   : > { %v738_v11 = vpop.f32.mrf.mxu1 }
 0x5bc   : > { %v741_v12 = vadd.f32 %v738_v11, %v650_v10  ;;  %v884_v10 = vld [vmem:[%s1481_s8] sm:$0x3] }
 0x5bd   : > { %v886_v11 = vperm.slane %v884_v10, 0 }
 0x5be   : > { %v831_v15 = vadd.f32 %v828_v14, %v741_v12 }
 0x5c0   : > { %v835_v16 = vadd.f32 %v1139_v13, %v831_v15  ;;  %v887_v15 = vperm.slane %v884_v10, 1 }
 0x5c2   : > { %v836_v17 = vadd.f32 %v835_v16, %v1285_v4 }
 0x5c4   : > { %v839_v18 = vsel %vm445_vm0, %v836_v17, 0.0 }
 0x5c5   : > { %840 = vadd.xlane.f32.xlu0 %v839_v18 }
 0x638   : > { %v841_v26 = vpop.xlane.xlu0 %840 }
 0x639   : > { %v849_v27 = vmul.f32 %v1350_v25, %v841_v26 }
 0x63b   : > { %v850_v28 = vsub.f32 %v836_v17, %v849_v27 }
 0x63d   : > { %v851_v29 = vmul.f32 %v850_v28, %v850_v28 }
 0x63f   : > { %v852_v4 = vsel %vm445_vm0, %v851_v29, 0.0 }
 0x640   : > { %853 = vadd.xlane.f32.xlu1 %v852_v4 }
 0x6b3   : > { %v854_v41 = vpop.xlane.xlu1 %853 }
 0x6b4   : > { %v855_v42 = vmul.f32 %v854_v41, %v1350_v25 }
 0x6b6   : > { %v856_v44 = vadd.f32 1e-05, %v855_v42 }
 0x6b8   : > { %1163 = vrsqrt.f32 %v856_v44  ;;  %vm863_vm4 = vweird.f32 %v856_v44 }
 0x6be   : > { %v1164_v49 = vpop.eup %1163 }
 0x6bf   : > { %v858_v51 = vmul.f32 %v1164_v49, %v856_v44  ;;  %vm864_vm3 = vweird.f32 %v1164_v49 }
 0x6c0   : > { %vm865_vm5 = vmor %vm863_vm4, %vm864_vm3 }
 0x6c1   : > { %v859_v53 = vmul.f32 %v1164_v49, %v858_v51 }
 0x6c3   : > { %v860_v55 = vmul.f32 0.5, %v859_v53 }
 0x6c5   : > { %v861_v57 = vsub.f32 1.5, %v860_v55 }
 0x6c7   : > { %v862_v59 = vmul.f32 %v1164_v49, %v861_v57 }
 0x6c9   : > { %v866_v61 = vsel %vm865_vm5, %v1164_v49, %v862_v59 }
 0x6ca   : > { %v867_v62 = vmul.f32 %v866_v61, %v850_v28 }
 0x6cc   : > { %v871_v0 = vmul.f32 %v1140_v60, %v867_v62 }
 0x6ce   : > { %v875_v1 = vadd.f32 %v1141_v63, %v871_v0 }
 0x6d0   : > { %1113 = vmatmul.msk.f32.vlgmr.msra.gmra.mxu1 %vm445_vm0, %v875_v1  ;;  %1114 = vmatmul.msk.f32.vlgmr.msra.gmra.mxu3 %vm445_vm0, %v875_v1 }
 0x74d   : > { %v910_v12 = vpop.f32.mrf.mxu1 }
 0x74e   : > { %v911_v13 = vadd.f32 %v910_v12, %v886_v11 }
 0x750   : > { %v933_v14 = vmax.f32 %v911_v13, 0.0 }
 0x752   : > { %978 = vmatmul.f32.vlgmr.msrb.gmra.mxu0 %v933_v14 }
 0x753   : > { %v930_v16 = vpop.f32.mrf.mxu3 }
 0x754   : > { %v931_v17 = vadd.f32 %v930_v16, %v887_v15 }
 0x756   : > { %v934_v18 = vmax.f32 %v931_v17, 0.0 }
 0x758   : > { %1115 = vmatmul.msk.f32.vlgmr.msra.gmra.mxu2 %vm445_vm0, %v934_v18 }
 0x7cf   : > { %v979_v20 = vpop.f32.mrf.mxu0 }
 0x7d0   : > { %v980_v21 = vadd.f32 %v1142_v19, %v979_v20 }
 0x7db   : > { %v999_v22 = vpop.f32.mrf.mxu2 }
 0x7dc   : > { %v1000_v23 = vadd.f32 %v999_v22, %v980_v21 }
 0x7de   : > { %v1002_v24 = vadd.f32 %v1000_v23, %v875_v1 }
 0x7e0   : > { %v1005_v26 = vsel %vm445_vm0, %v1002_v24, 0.0 }
 0x7e1   : > { %1006 = vadd.xlane.f32.xlu2 %v1005_v26 }
 0x854   : > { %v1007_v27 = vpop.xlane.xlu2 %1006 }
 0x855   : > { %v1008_v28 = vmul.f32 %v1007_v27, %v1350_v25 }
 0x857   : > { %v1009_v29 = vsub.f32 %v1002_v24, %v1008_v28 }
 0x859   : > { %v1010_v4 = vmul.f32 %v1009_v29, %v1009_v29 }
 0x85b   : > { %v1011_v30 = vsel %vm445_vm0, %v1010_v4, 0.0 }
 0x85c   : > { %1012 = vadd.xlane.f32.xlu0 %v1011_v30 }
 0x8cf   : > { %v1013_v31 = vpop.xlane.xlu0 %1012 }
 0x8d0   : > { %v1014_v32 = vmul.f32 %v1013_v31, %v1350_v25  ;;  %v1144_v25 = vld [vmem:[%s1485_s12] ss:$0 sm:$0xff] }
 0x8d2   : > { %v1015_v33 = vadd.f32 1e-05, %v1014_v32 }
 0x8d4   : > { %1165 = vrsqrt.f32 %v1015_v33  ;;  %vm1022_vm7 = vweird.f32 %v1015_v33 }
 0x8da   : > { %v1166_v34 = vpop.eup %1165 }
 0x8db   : > { %v1017_v35 = vmul.f32 %v1166_v34, %v1015_v33  ;;  %vm1023_vm6 = vweird.f32 %v1166_v34 }
 0x8dc   : > { %vm1024_vm8 = vmor %vm1022_vm7, %vm1023_vm6 }
 0x8dd   : > { %v1018_v36 = vmul.f32 %v1166_v34, %v1017_v35 }
 0x8df   : > { %v1019_v37 = vmul.f32 0.5, %v1018_v36 }
 0x8e1   : > { %v1020_v38 = vsub.f32 1.5, %v1019_v37 }
 0x8e3   : > { %v1021_v39 = vmul.f32 %v1166_v34, %v1020_v38 }
 0x8e5   : > { %v1025_v41 = vsel %vm1024_vm8, %v1166_v34, %v1021_v39 }
 0x8e6   : > { %v1026_v42 = vmul.f32 %v1025_v41, %v1009_v29 }
 0x8e8   : > { %v1030_v43 = vmul.f32 %v1143_v40, %v1026_v42 }
 0x8ea   : > { %v1034_v44 = vadd.f32 %v1144_v25, %v1030_v43 }
 0x8ec   : > { %1035 = vst.msk [vmem:[%s435_s16] sm:$0xff] %vm445_vm0, %v1034_v44 }
 0x8ed PF: > { %s23_s25 = sadd.s32 1, %s1173_s25  }
 0x8ee   : > { %p20_p4 = scmp.ge.s32.totalorder %s23_s25, 4  }
 0x8f0   :  { %22 = sbr.rel (!%p20_p4) target bundleno = 1 (0x1), region = 102 }

// kernel: transformer_forward.15
= control target key start
LH: loop header
LB: loop body
LE: loop exit
PB: predicated region body
PF: predicated region fallthrough
CT: control target
= control target key end

     0   :  { %11 = vsyncpa [#allocation3], 0  ;;  %s489_s18 = smov 0   ;;  %s518_s0 = inlined_call_operand.vmem [shape: f32[16,4], index: 0, kind: input, shape index: {}]   ;;  %s519_s1 = inlined_call_operand.vmem [shape: f32[4,32], index: 1, kind: input, shape index: {}]   ;;  %s520_s2 = inlined_call_operand.hbm [shape: f32[1,32], index: 2, kind: input, shape index: {}]   ;;  %s521_s3 = inlined_call_operand.vmem [shape: f32[8,32], index: 3, kind: input, shape index: {}]   ;;  %s522_s4 = inlined_call_operand.vmem [shape: f32[16,32], index: 4, kind: output, shape index: {0}]   ;;  %s523_s5 = inlined_call_operand.vmem [shape: f32[16,32], index: 5, kind: output, shape index: {1}]  }
   0x1 LB: > { %s382_s19 = sadd.s32 4294967295, %s456_s18   ;;  %p384_p0 = scmp.ge.s32.totalorder %s456_s18, 1  ;;  %s456_s18 = sphi %s489_s18, %s17_s18  }
   0x2   : > { %p163_p1 = scmp.lt.s32.totalorder %s456_s18, 3  ;;  %s178_s22 = sshll.u32 %s520_s2, 4  ;;  %s179_s22 = int_to_ptr.hbm [resolvable:$true] %s178_s22 }
   0x3   : > { %p404_p3 = scmp.eq.s32.totalorder %s382_s19, 0  ;;  %s458_s23 = smov [#allocation2]  }
   0x4   : > { %p164_p2 = pnand %p384_p0, %p163_p1  ;;  %s180_s24 = sshll.u32 %s458_s23, 4  ;;  %s181_s24 = int_to_ptr.vmem [resolvable:$true] %s180_s24 }
   0x6   : > { %p400_p4 = pneg %p164_p2  ;;  %203 = sbr.rel (%p164_p2) target bundleno = 151 (0x97), region = 36 }
   0x8   : > { %p401_p5 = pnand %p404_p3, %p400_p4 }
   0xa   : > { %403 = dma.hbm_to_vmem [thread:$0]  (!%p401_p5), %s179_s22, 16, %s181_s24, [#allocation3]  }
   0xb   : > { %451 = dma.done.wait (%p404_p3), [#allocation3], 16  }
   0xc   : > { %453 = vsyncadd (%p404_p3), [#allocation3], 4294967280  ;;  %p234_p6 = scmp.lt.s32.totalorder %s382_s19, 1  ;;  %vm256_vm0 = vcmask 1043456   ;;  %vm252_vm1 = vcmask 31744   ;;  %vm280_vm2 = vcmask 261120  }
   0xd   : > { %v247_v0 = vld [vmem:[%s519_s1] sm:$0xf] }
   0xe   : > { %s525_s19 = smov (!%p234_p6, %s382_s19), 1  ;;  %392 = vmatpush.msk.msra.mxu0 %vm256_vm0, %v247_v0  ;;  %v415_v2 = vld [vmem:[#allocation2] ss:$0 sm:$0xff] }
   0xf   : > { %s389_s25 = sshll.u32 %s525_s19, 3  ;;  %v283_v5 = vld [vmem:[%s521_s3] sm:$0xff] }
  0x10   : > { %s237_s28 = scalar_lea.vmem %s518_s0, %s389_s25  ;;  %s241_s8 = scalar_lea.vmem %s522_s4, %s389_s25 }
  0x11   : > { %v246_v1 = vld [vmem:[%s237_s28] sm:$0xff]  ;;  %s245_s13 = scalar_lea.vmem %s523_s5, %s389_s25 }
  0x12   : > { %393 = vmatmul.msk.f32.vlgmr.msra.gmra.mxu0 %vm252_vm1, %v246_v1 }
  0x8f   : > { %v277_v3 = vpop.f32.mrf.mxu0 }
  0x90   : > { %v278_v4 = vadd.f32 %v415_v2, %v277_v3 }
  0x92   : > { %281 = vst.msk [vmem:[%s241_s8] sm:$0xff] %vm280_vm2, %v278_v4  ;;  %v282_v6 = vmul.f32 2.0, %v278_v4 }
  0x94   : > { %v284_v7 = vadd.f32 %v283_v5, %v282_v6 }
  0x96   : > { %285 = vst.msk [vmem:[%s245_s13] sm:$0xff] %vm280_vm2, %v284_v7 }
  0x97 PF: > { %s17_s18 = sadd.s32 1, %s456_s18  }
  0x98   : > { %p14_p7 = scmp.ge.s32.totalorder %s17_s18, 4  }
  0x9a   :  { %16 = sbr.rel (!%p14_p7) target bundleno = 1 (0x1), region = 83 }
  0x9f   :  { %319 = vsyncpa [#allocation3], 1 }
  0xa0   :  { %321 = vsyncpa [#allocation3 + $0x1], 1 }

// kernel: transformer_forward.16
= control target key start
LH: loop header
LB: loop body
LE: loop exit
PB: predicated region body
PF: predicated region fallthrough
CT: control target
= control target key end

     0   :  { %s3311_s0 = inlined_call_operand.vmem [shape: f32[16,32], index: 0, kind: input, shape index: {}]   ;;  %s3312_s1 = inlined_call_operand.vmem [shape: f32[16,32], index: 1, kind: input, shape index: {}]   ;;  %s3313_s2 = inlined_call_operand.vmem [shape: f32[32,96], index: 2, kind: input, shape index: {}]   ;;  %s3314_s3 = inlined_call_operand.hbm [shape: f32[1,96], index: 3, kind: input, shape index: {}]   ;;  %s3315_s4 = inlined_call_operand.vmem [shape: f32[32,32], index: 4, kind: input, shape index: {}]   ;;  %s3316_s5 = inlined_call_operand.hbm [shape: f32[1,32], index: 5, kind: input, shape index: {}]   ;;  %s3317_s6 = inlined_call_operand.hbm [shape: f32[1,32], index: 6, kind: input, shape index: {}]   ;;  %s3318_s7 = inlined_call_operand.hbm [shape: f32[1,32], index: 7, kind: input, shape index: {}]   ;;  %s3319_s8 = inlined_call_operand.vmem [shape: f32[32,32], index: 8, kind: input, shape index: {}]   ;;  %s3320_s9 = inlined_call_operand.hbm [shape: f32[1,32], index: 9, kind: input, shape index: {}]   ;;  %s3321_s10 = inlined_call_operand.vmem [shape: f32[32,64], index: 10, kind: input, shape index: {}]   ;;  %s3322_s11 = inlined_call_operand.hbm [shape: f32[1,64], index: 11, kind: input, shape index: {}]   ;;  %s3323_s12 = inlined_call_operand.vmem [shape: f32[32,32], index: 12, kind: input, shape index: {}]   ;;  %s3324_s13 = inlined_call_operand.hbm [shape: f32[1,32], index: 13, kind: input, shape index: {}]   ;;  %s3325_s14 = inlined_call_operand.hbm [shape: f32[1,32], index: 14, kind: input, shape index: {}]   ;;  %s3326_s15 = inlined_call_operand.hbm [shape: f32[1,32], index: 15, kind: input, shape index: {}]   ;;  %s3327_s16 = inlined_call_operand.vmem [shape: f32[32,160], index: 16, kind: input, shape index: {}]   ;;  %s3328_s17 = inlined_call_operand.vmem [shape: f32[1,160], index: 17, kind: input, shape index: {}]   ;;  %s3329_s18 = inlined_call_operand.vmem [shape: f32[160,32], index: 18, kind: input, shape index: {}]   ;;  %s3330_s19 = inlined_call_operand.hbm [shape: f32[1,32], index: 19, kind: input, shape index: {}]   ;;  %s3331_s20 = inlined_call_operand.hbm [shape: f32[1,32], index: 20, kind: input, shape index: {}]   ;;  %s3332_s21 = inlined_call_operand.hbm [shape: f32[1,32], index: 21, kind: input, shape index: {}]   ;;  %s3333_s22 = inlined_call_operand.vmem [shape: f32[16,32], index: 22, kind: output, shape index: {}]  }
   0x1   :  { %3342 = sst [smem:[#allocation29_spill]] %s3311_s0 }
   0x2   :  { %3343 = sst [smem:[#allocation30_spill]] %s3312_s1 }
   0x3   :  { %3344 = sst [smem:[#allocation31_spill]] %s3313_s2 }
   0x4   :  { %3345 = sst [smem:[#allocation32_spill]] %s3314_s3 }
   0x5   :  { %3346 = sst [smem:[#allocation33_spill]] %s3315_s4 }
   0x6   :  { %3347 = sst [smem:[#allocation34_spill]] %s3316_s5 }
   0x7   :  { %3348 = sst [smem:[#allocation35_spill]] %s3317_s6 }
   0x8   :  { %3349 = sst [smem:[#allocation36_spill]] %s3318_s7 }
   0x9   :  { %3350 = sst [smem:[#allocation37_spill]] %s3322_s11 }
   0xa   :  { %3351 = sst [smem:[#allocation38_spill]] %s3325_s14 }
   0xb   :  { %27 = vsyncpa [#allocation3], 0 }
   0xc   :  { %28 = vsyncpa [#allocation5], 0 }
   0xd   :  { %29 = vsyncpa [#allocation8], 0 }
   0xe   :  { %30 = vsyncpa [#allocation11], 0 }
   0xf   :  { %31 = vsyncpa [#allocation14], 0 }
  0x10   :  { %32 = vsyncpa [#allocation17], 0 }
  0x11   :  { %33 = vsyncpa [#allocation20], 0  ;;  %s2914_s3 = smov 0  }
  0x12 LB: > { %3352 = sst [smem:[#allocation28_spill]] %s2773_s3  ;;  %s2923_s0 = sadd.s32 4294967295, %s2773_s3   ;;  %s2773_s3 = sphi %s2914_s3, %s39_s3  }
  0x13   : > { %s3353_s30 = sld [smem:[#allocation34_spill]]  ;;  %p2116_p0 = scmp.ge.s32.totalorder %s2773_s3, 1 }
  0x14   : > { %p542_p1 = scmp.lt.s32.totalorder %s2773_s3, 3  ;;  %p2271_p2 = scmp.eq.s32.totalorder %s2923_s0, 0 }
  0x15   : > { %s2775_s1 = smov [#allocation4]   ;;  %s3355_s7 = sld [smem:[#allocation36_spill]] }
  0x16   : > { %p2928_p3 = pnand %p2116_p0, %p542_p1  ;;  %s574_s5 = sshll.u32 %s2775_s1, 4  ;;  %s575_s5 = int_to_ptr.vmem [resolvable:$true] %s574_s5 }
  0x17   : > { %s3356_s11 = sld [smem:[#allocation37_spill]]  ;;  %s2776_s29 = smov [#allocation7]  }
  0x18   : > { %p2234_p4 = pneg %p2928_p3  ;;  %s2777_s1 = smov [#allocation10]  }
  0x19   : > { %s572_s4 = sshll.u32 %s3353_s30, 4  ;;  %s598_s30 = sshll.u32 %s2776_s29, 4  ;;  %s573_s4 = int_to_ptr.hbm [resolvable:$true] %s572_s4  ;;  %s599_s30 = int_to_ptr.vmem [resolvable:$true] %s598_s30 }
  0x1a   : > { %p2942_p5 = pnand %p2271_p2, %p2234_p4  ;;  %s628_s24 = sshll.u32 %s2777_s1, 4  ;;  %s629_s24 = int_to_ptr.vmem [resolvable:$true] %s628_s24 }
  0x1b   : > { %s596_s25 = sshll.u32 %s3355_s7, 4  ;;  %s3358_s14 = sld [smem:[#allocation38_spill]]  ;;  %s597_s25 = int_to_ptr.hbm [resolvable:$true] %s596_s25 }
  0x1c   : > { %2240 = dma.hbm_to_vmem [thread:$0]  (!%p2942_p5), %s573_s4, 16, %s575_s5, [#allocation5]  }
  0x1d   : > { %s626_s27 = sshll.u32 %s3356_s11, 4  ;;  %s686_s11 = sshll.u32 %s3330_s19, 4  ;;  %s627_s27 = int_to_ptr.hbm [resolvable:$true] %s626_s27  ;;  %s687_s11 = int_to_ptr.hbm [resolvable:$true] %s686_s11 }
  0x1e   : > { %2246 = dma.hbm_to_vmem [thread:$0]  (!%p2942_p5), %s597_s25, 16, %s599_s30, [#allocation8]  }
  0x1f   : > { %2252 = dma.hbm_to_vmem [thread:$0]  (!%p2942_p5), %s627_s27, 16, %s629_s24, [#allocation11]  }
  0x20   : > { %s2778_s3 = smov [#allocation13]   ;;  %s2779_s5 = smov [#allocation16]  }
  0x21   : > { %s653_s2 = sshll.u32 %s3358_s14, 4  ;;  %s655_s4 = sshll.u32 %s2778_s3, 4  ;;  %s654_s2 = int_to_ptr.hbm [resolvable:$true] %s653_s2  ;;  %s656_s4 = int_to_ptr.vmem [resolvable:$true] %s655_s4 }
  0x22   : > { %2258 = dma.hbm_to_vmem [thread:$0]  (!%p2942_p5), %s654_s2, 16, %s656_s4, [#allocation14]  }
  0x23   : > { %s688_s25 = sshll.u32 %s2779_s5, 4  ;;  %s3359_s6 = sld [smem:[#allocation32_spill]]  ;;  %s689_s25 = int_to_ptr.vmem [resolvable:$true] %s688_s25 }
  0x24   : > { %2264 = dma.hbm_to_vmem [thread:$0]  (!%p2942_p5), %s687_s11, 16, %s689_s25, [#allocation17]  }
  0x25   : > { %s3360_s24 = sld [smem:[#allocation35_spill]]  ;;  %s2780_s3 = smov [#allocation2]  }
  0x26   : > { %s559_s14 = sshll.u32 %s2780_s3, 4  ;;  %s2781_s2 = smov [#allocation6]   ;;  %s560_s14 = int_to_ptr.vmem [resolvable:$true] %s559_s14 }
  0x27   : > { %s586_s4 = sshll.u32 %s2781_s2, 4  ;;  %s611_s1 = sshll.u32 %s3320_s9, 4  ;;  %s587_s4 = int_to_ptr.vmem [resolvable:$true] %s586_s4  ;;  %s612_s1 = int_to_ptr.hbm [resolvable:$true] %s611_s1 }
  0x28   : > { %s2782_s7 = smov [#allocation9]   ;;  %s665_s2 = sshll.u32 %s3326_s15, 4  ;;  %s666_s2 = int_to_ptr.hbm [resolvable:$true] %s665_s2 }
  0x29   : > { %s557_s26 = sshll.u32 %s3359_s6, 4  ;;  %s641_s6 = sshll.u32 %s3324_s13, 4  ;;  %s558_s26 = int_to_ptr.hbm [resolvable:$true] %s557_s26  ;;  %s642_s6 = int_to_ptr.hbm [resolvable:$true] %s641_s6 }
  0x2a   : > { %2237 = dma.hbm_to_vmem [thread:$0]  (!%p2942_p5), %s558_s26, 16, %s560_s14, [#allocation3]  }
  0x2b   : > { %s584_s29 = sshll.u32 %s3360_s24, 4  ;;  %s613_s27 = sshll.u32 %s2782_s7, 4  ;;  %s585_s29 = int_to_ptr.hbm [resolvable:$true] %s584_s29  ;;  %s614_s27 = int_to_ptr.vmem [resolvable:$true] %s613_s27 }
  0x2c   : > { %2243 = dma.hbm_to_vmem [thread:$0]  (!%p2942_p5), %s585_s29, 16, %s587_s4, [#allocation5]  }
  0x2d   : > { %2249 = dma.hbm_to_vmem [thread:$0]  (!%p2942_p5), %s612_s1, 16, %s614_s27, [#allocation8]  }
  0x2e   : > { %s2783_s14 = smov [#allocation12]   ;;  %s698_s5 = sshll.u32 %s3331_s20, 4  ;;  %s699_s5 = int_to_ptr.hbm [resolvable:$true] %s698_s5 }
  0x2f   : > { %s643_s26 = sshll.u32 %s2783_s14, 4  ;;  %s2784_s30 = smov [#allocation15]   ;;  %s644_s26 = int_to_ptr.vmem [resolvable:$true] %s643_s26 }
  0x30   : > { %2255 = dma.hbm_to_vmem [thread:$0]  (!%p2942_p5), %s642_s6, 16, %s644_s26, [#allocation11]  }
  0x31   : > { %s667_s11 = sshll.u32 %s2784_s30, 4  ;;  %s2785_s1 = smov [#allocation18]   ;;  %s668_s11 = int_to_ptr.vmem [resolvable:$true] %s667_s11 }
  0x32   : > { %2261 = dma.hbm_to_vmem [thread:$0]  (!%p2942_p5), %s666_s2, 16, %s668_s11, [#allocation14]  }
  0x33   : > { %s700_s25 = sshll.u32 %s2785_s1, 4  ;;  %s710_s14 = sshll.u32 %s3332_s21, 4  ;;  %s701_s25 = int_to_ptr.vmem [resolvable:$true] %s700_s25  ;;  %s711_s14 = int_to_ptr.hbm [resolvable:$true] %s710_s14 }
  0x34   : > { %2267 = dma.hbm_to_vmem [thread:$0]  (!%p2942_p5), %s699_s5, 16, %s701_s25, [#allocation17]  }
  0x35   : > { %s2786_s6 = smov [#allocation19]   ;;  %739 = sbr.rel (%p2928_p3) target bundleno = 3915 (0xf4b), region = 108 }
  0x36   : > { %s712_s26 = sshll.u32 %s2786_s6, 4  ;;  %s713_s26 = int_to_ptr.vmem [resolvable:$true] %s712_s26 }
  0x37   : > { %2270 = dma.hbm_to_vmem [thread:$0]  (!%p2942_p5), %s711_s14, 16, %s713_s26, [#allocation20]  }
  0x3a   : > { %2744 = dma.done.wait (%p2271_p2), [#allocation3], 16  }
  0x3b   : > { %2746 = vsyncadd (%p2271_p2), [#allocation3], 4294967280 }
  0x3c   : > { %2748 = dma.done.wait (%p2271_p2), [#allocation5], 32  }
  0x3d   : > { %2750 = vsyncadd (%p2271_p2), [#allocation5], 4294967264 }
  0x3e   : > { %2752 = dma.done.wait (%p2271_p2), [#allocation8], 32  }
  0x3f   : > { %2754 = vsyncadd (%p2271_p2), [#allocation8], 4294967264 }
  0x40   : > { %2756 = dma.done.wait (%p2271_p2), [#allocation11], 32  }
  0x41   : > { %2758 = vsyncadd (%p2271_p2), [#allocation11], 4294967264 }
  0x42   : > { %2760 = dma.done.wait (%p2271_p2), [#allocation14], 32  }
  0x43   : > { %2762 = vsyncadd (%p2271_p2), [#allocation14], 4294967264 }
  0x44   : > { %2764 = dma.done.wait (%p2271_p2), [#allocation17], 32  }
  0x45   : > { %2766 = vsyncadd (%p2271_p2), [#allocation17], 4294967264 }
  0x46   : > { %2768 = dma.done.wait (%p2271_p2), [#allocation20], 16  }
  0x47   : > { %2770 = vsyncadd (%p2271_p2), [#allocation20], 4294967280  ;;  %p859_p6 = scmp.lt.s32.totalorder %s2923_s0, 1  ;;  %s3361_s3 = sld [smem:[#allocation31_spill]]  ;;  %vm881_vm0 = vcmask 261120   ;;  %vm913_vm1 = vcmask 64512  }
  0x48   : > { %s3363_s11 = sld [smem:[#allocation29_spill]]  ;;  %v2327_v5 = vld [vmem:[#allocation2] ss:$0 sm:$0xff]  ;;  %s2787_s14 = smov 120  }
  0x49   : > { %s3372_s0 = smov (!%p859_p6, %s2923_s0), 1  ;;  %s2788_s6 = smov 96  }
  0x4a   : > { %s3029_s23 = sshll.u32 %s3372_s0, 3  ;;  %s2789_s26 = smov 64  }
  0x4b   : > { %s3337_s28 = smov 72   ;;  %s2791_s24 = smov 104  }
  0x4c   : > { %s2793_s29 = smov 56   ;;  %s3338_s4 = smov 88  }
  0x4d   : > { %s3362_s2 = smov %s3361_s3  ;;  %v876_v0 = vld [vmem:[%s3361_s3 + $0x18] sm:$0xff]  ;;  %s3339_s3 = smov 80  }
  0x4e   : > { %v875_v1 = vld [vmem:[%s3362_s2 + $0x10] sm:$0xff]  ;;  %s862_s1 = scalar_lea.vmem %s3363_s11, %s3029_s23  ;;  %897 = vmatpush.msra.mxu0 %v876_v0  ;;  %v874_v2 = vld [vmem:[%s3362_s2 + $0x8] sm:$0xff]  ;;  %v873_v3 = vld [vmem:[%s3362_s2] sm:$0xff]  ;;  %s3340_s5 = smov 112  }
  0x4f   : > { %v3047_v4 = vld [vmem:[%s862_s1] sm:$0xff]  ;;  %s3364_s1 = sld [smem:[#allocation33_spill]]  ;;  %s2796_s25 = smov 48  }
  0x50   : > { %898 = vmatpush.msra.mxu0 %v875_v1  ;;  %s2797_s27 = smov 40   ;;  %s3369_s30 = smov 72  }
  0x52   : > { %899 = vmatpush.msra.mxu0 %v874_v2 }
  0x54   : > { %900 = vmatpush.msra.mxu0 %v873_v3 }
  0x55   : > { %2146 = vmatmul.msk.f32.vlgmr.msra.gmra.mxu0 %vm881_vm0, %v3047_v4  ;;  %v905_v26 = vld [vmem:[%s3364_s1] sm:$0xff]  ;;  %v906_v53 = vld [vmem:[%s3364_s1 + $0x8] sm:$0xff] }
  0xd2   : > { %v902_v6 = vpop.f32.mrf.mxu0 }
  0xd3   : > { %v3051_v7 = vadd.f32 %v2327_v5, %v902_v6  ;;  %v908_v5 = vld [vmem:[%s3364_s1 + $0x18] sm:$0xff]  ;;  %v907_v6 = vld [vmem:[%s3364_s1 + $0x10] sm:$0xff] }
  0xd4   : > { %1172 = vmatpush.msra.mxu1 %v907_v6 }
  0xd5   : > { %976 = vrot.lane.b32.xlu2 %v3051_v7, %s2787_s14  ;;  %911 = vrot.lane.b32.xlu0 %v3051_v7, %s2788_s6 }
  0xdd   : > { %950 = vrot.lane.b32.xlu2 %v3051_v7, %s2789_s26 }
  0xe5   : > { %1180 = vrot.lane.b32.xlu2 %v3051_v7, %s3337_s28  ;;  %s3365_s28 = sld [smem:[#allocation30_spill]] }
  0xed   : > { %1178 = vrot.lane.b32.xlu2 %v3051_v7, %s2791_s24 }
  0xf5   : > { %1090 = vrot.lane.b32.xlu2 %v3051_v7, %s3339_s3 }
 0x12f   : > { %v977_v8 = vpop.permute.xlu2 %976 }
 0x137   : > { %v951_v9 = vpop.permute.xlu2 %950 }
 0x138   : > { %971 = vmatpush.msra.mxu2 %v951_v9 }
 0x13f   : > { %v1181_v10 = vpop.permute.xlu2 %1180 }
 0x147   : > { %v1179_v11 = vpop.permute.xlu2 %1178  ;;  %v912_v12 = vpop.permute.xlu0 %911 }
 0x148   : > { %2147 = vmatpush.xpose.msk.msrb.mxu0 %vm913_vm1, %v912_v12 }
 0x14b   : > { %2148 = vmatmul.msk.f32.vlgmr.msrb.gmra.mxu0 %vm913_vm1, %v3051_v7 }
 0x14f   : > { %v1091_v13 = vpop.permute.xlu2 %1090 }
 0x150   : > { %2155 = vmatpush.xpose.msk.msra.mxu0 %vm913_vm1, %v1091_v13  ;;  %v2328_v13 = vld [vmem:[#allocation4] ss:$0 sm:$0xff] }
 0x1c8   : > { %v935_v14 = vpop.f32.mrf.mxu0 }
 0x1c9   : > { %v938_v15 = vmul.f32 0.35355338, %v935_v14 }
 0x1cb   : > { %v939_v16 = vsel %vm913_vm1, %v938_v15, -inf }
 0x1cc   : > { %940 = vmax.xlane.f32.xlu0 %v939_v16 }
 0x1e0   : > { %1016 = vrot.lane.b32.xlu0 %v3051_v7, %s2793_s29  ;;  %s3368_s29 = smov 88  }
 0x23f   : > { %v941_v17 = vpop.xlane.xlu0 %940 }
 0x240   : > { %v942_v18 = vsub.f32 %v938_v15, %v941_v17 }
 0x242   : > { %v943_v19 = vmul.f32 1.442695, %v942_v18 }
 0x244   : > { %2339 = vpow2.f32 %v943_v19  ;;  %v2798_v19 = vmov 32.0  }
 0x24a   : > { %v2340_v20 = vpop.eup %2339 }
 0x24b   : > { %v945_v21 = vsel %vm913_vm1, %v2340_v20, 0.0 }
 0x24c   : > { %946 = vadd.xlane.f32.xlu1 %v945_v21 }
 0x252   : > { %v1017_v22 = vpop.permute.xlu0 %1016 }
 0x253   : > { %1037 = vmatpush.msrb.mxu2 %v1017_v22 }
 0x265   : > { %978 = vrot.lane.b32.xlu1 %v3051_v7, %s3338_s4  ;;  %s866_s4 = scalar_lea.vmem %s3365_s28, %s3029_s23  ;;  %s870_s28 = scalar_lea.vmem %s3333_s22, %s3029_s23 }
 0x26d   : > { %1088 = vrot.lane.b32.xlu1 %v3051_v7, %s3340_s5 }
 0x2bf   : > { %v947_v23 = vpop.xlane.xlu1 %946 }
 0x2c0   : > { %2341 = vrcp.f32 %v947_v23 }
 0x2c6   : > { %v2342_v24 = vpop.eup %2341 }
 0x2c7   : > { %v949_v25 = vmul.f32 %v2342_v24, %v2340_v20 }
 0x2c9   : > { %2149 = vmatmul.msk.f32.vlgmr.msra.gmra.mxu2 %vm913_vm1, %v949_v25 }
 0x2ca   : > { %1060 = vmatpush.msra.mxu2 %v906_v53 }
 0x2d7   : > { %v979_v27 = vpop.permute.xlu1 %978 }
 0x2d8   : > { %2150 = vmatpush.xpose.msk.msra.mxu3 %vm913_vm1, %v979_v27 }
 0x2db   : > { %2151 = vmatmul.msk.f32.vlgmr.msra.gmra.mxu3 %vm913_vm1, %v977_v8 }
 0x2dc   : > { %1083 = vmatpush.msrb.mxu3 %v905_v26 }
 0x2de   : > { %2159 = vmatpush.xpose.msk.msra.mxu3 %vm913_vm1, %v1181_v10 }
 0x2df   : > { %v1089_v28 = vpop.permute.xlu1 %1088 }
 0x2e0   : > { %2156 = vmatmul.msk.f32.vlgmr.msra.gmra.mxu0 %vm913_vm1, %v1089_v28 }
 0x34c   : > { %v973_v29 = vpop.f32.mrf.mxu2 }
 0x34d   : > { %2154 = vmatmul.msk.f32.vlgmr.msrb.gmra.mxu3 %vm913_vm1, %v973_v29 }
 0x355   : > { %2160 = vmatmul.msk.f32.vlgmr.msra.gmra.mxu3 %vm913_vm1, %v1179_v11 }
 0x35d   : > { %v1113_v30 = vpop.f32.mrf.mxu0 }
 0x35e   : > { %v1116_v31 = vmul.f32 0.35355338, %v1113_v30  ;;  %v1001_v32 = vpop.f32.mrf.mxu3  ;;  %v1346_v30 = vld [vmem:[%s3321_s10 + $0x18] sm:$0xff] }
 0x35f   : > { %v1004_v33 = vmul.f32 0.35355338, %v1001_v32  ;;  %1366 = vmatpush.msrb.mxu3 %v1346_v30  ;;  %v1344_v32 = vld [vmem:[%s3321_s10 + $0x8] sm:$0xff] }
 0x360   : > { %v1117_v34 = vsel %vm913_vm1, %v1116_v31, -inf }
 0x361   : > { %1118 = vmax.xlane.f32.xlu0 %v1117_v34  ;;  %v1005_v35 = vsel %vm913_vm1, %v1004_v33, -inf  ;;  %v872_v34 = vld [vmem:[%s866_s4] sm:$0xff]  ;;  %s3366_s4 = smov 112  }
 0x362   : > { %1006 = vmax.xlane.f32.xlu2 %v1005_v35  ;;  %v1315_v35 = vld [vmem:[%s3319_s8 + $0x18] sm:$0xff] }
 0x363   : > { %1335 = vmatpush.msrb.mxu1 %v1315_v35 }
 0x3d0   : > { %v1085_v36 = vpop.f32.mrf.mxu3 }
 0x3d4   : > { %v1119_v37 = vpop.xlane.xlu0 %1118 }
 0x3d5   : > { %v1007_v38 = vpop.xlane.xlu2 %1006  ;;  %v1120_v40 = vsub.f32 %v1116_v31, %v1119_v37  ;;  %v1345_v31 = vld [vmem:[%s3321_s10 + $0x10] sm:$0xff]  ;;  %v1313_v37 = vld [vmem:[%s3319_s8 + $0x8] sm:$0xff] }
 0x3d6   : > { %v1008_v39 = vsub.f32 %v1004_v33, %v1007_v38  ;;  %1367 = vmatpush.msrb.mxu3 %v1345_v31  ;;  %v1343_v33 = vld [vmem:[%s3321_s10] sm:$0xff] }
 0x3d7   : > { %v1121_v45 = vmul.f32 1.442695, %v1120_v40  ;;  %v1312_v38 = vld [vmem:[%s3319_s8] sm:$0xff] }
 0x3d8   : > { %v1009_v41 = vmul.f32 1.442695, %v1008_v39  ;;  %v1203_v42 = vpop.f32.mrf.mxu3  ;;  %1368 = vmatpush.msrb.mxu3 %v1344_v32 }
 0x3d9   : > { %v1206_v43 = vmul.f32 0.35355338, %v1203_v42 }
 0x3da   : > { %2343 = vpow2.f32 %v1009_v41  ;;  %1369 = vmatpush.msrb.mxu3 %v1343_v33 }
 0x3db   : > { %v1207_v44 = vsel %vm913_vm1, %v1206_v43, -inf  ;;  %2345 = vpow2.f32 %v1121_v45  ;;  %2164 = vmatmul.msk.f32.vlgmr.msrb.gmra.mxu3 %vm881_vm0, %v872_v34 }
 0x3dc   : > { %1208 = vmax.xlane.f32.xlu2 %v1207_v44 }
 0x3e0   : > { %v2344_v46 = vpop.eup %2343 }
 0x3e1   : > { %v1011_v47 = vsel %vm913_vm1, %v2344_v46, 0.0  ;;  %v2346_v48 = vpop.eup %2345 }
 0x3e2   : > { %1012 = vadd.xlane.f32.xlu1 %v1011_v47  ;;  %v1123_v49 = vsel %vm913_vm1, %v2346_v48, 0.0 }
 0x3ea   : > { %1124 = vadd.xlane.f32.xlu1 %v1123_v49 }
 0x403   : > { %1128 = vrot.lane.b32.xlu1 %v3051_v7, %s2796_s25 }
 0x44f   : > { %v1209_v50 = vpop.xlane.xlu2 %1208 }
 0x450   : > { %v1210_v51 = vsub.f32 %v1206_v43, %v1209_v50 }
 0x452   : > { %v1211_v52 = vmul.f32 1.442695, %v1210_v51  ;;  %v2330_v51 = vld [vmem:[#allocation7] ss:$0 sm:$0xff] }
 0x454   : > { %2347 = vpow2.f32 %v1211_v52 }
 0x455   : > { %v1013_v54 = vpop.xlane.xlu1 %1012 }
 0x456   : > { %2349 = vrcp.f32 %v1013_v54  ;;  %v2331_v54 = vld [vmem:[#allocation10] ss:$0 sm:$0xff] }
 0x45a   : > { %v2348_v55 = vpop.eup %2347 }
 0x45b   : > { %v1213_v56 = vsel %vm913_vm1, %v2348_v55, 0.0 }
 0x45c   : > { %v2350_v57 = vpop.eup %2349  ;;  %1214 = vadd.xlane.f32.xlu2 %v1213_v56 }
 0x45d   : > { %v1015_v58 = vmul.f32 %v2350_v57, %v2344_v46  ;;  %v1125_v59 = vpop.xlane.xlu1 %1124  ;;  %v2332_v57 = vld [vmem:[#allocation9] ss:$0 sm:$0xff] }
 0x45f   : > { %2152 = vmatmul.msk.f32.vlgmr.msrb.gmra.mxu2 %vm913_vm1, %v1015_v58 }
 0x474   : > { %1218 = vrot.lane.b32.xlu2 %v3051_v7, %s2797_s27 }
 0x475   : > { %v1129_v60 = vpop.permute.xlu1 %1128 }
 0x476   : > { %1149 = vmatpush.msrb.mxu2 %v1129_v60 }
 0x4cf   : > { %v1215_v61 = vpop.xlane.xlu2 %1214 }
 0x4d0   : > { %2351 = vrcp.f32 %v1215_v61 }
 0x4d1   : > { %2353 = vrcp.f32 %v1125_v59 }
 0x4d2   : > { %2355 = vrcp.f32 %v2798_v19 }
 0x4d6   : > { %v2352_v62 = vpop.eup %2351 }
 0x4d7   : > { %v1217_v63 = vmul.f32 %v2352_v62, %v2348_v55  ;;  %v1219_v0 = vpop.permute.xlu2 %1218  ;;  %v2354_v2 = vpop.eup %2353 }
 0x4d8   : > { %1239 = vmatpush.msrb.mxu0 %v1219_v0  ;;  %v1127_v3 = vmul.f32 %v2354_v2, %v2346_v48  ;;  %v2356_v20 = vpop.eup %2355  ;;  %v2329_v48 = vld [vmem:[#allocation6] ss:$0 sm:$0xff]  ;;  %v1371_v55 = vpop.f32.mrf.mxu3 }
 0x4d9   : > { %2161 = vmatmul.msk.f32.vlgmr.msrb.gmra.mxu0 %vm913_vm1, %v1217_v63  ;;  %v1279_v21 = vmul.f32 32.0, %v2356_v20  ;;  %vm1283_vm2 = vweird.f32 %v2356_v20  ;;  %v3148_v56 = vadd.f32 %v2331_v54, %v1371_v55 }
 0x4db   : > { %v1280_v22 = vsub.f32 1.0, %v1279_v21  ;;  %2165 = vmatpush.xpose.msk.msra.mxu0 %vm913_vm1, %v3148_v56 }
 0x4dd   : > { %v1281_v23 = vmul.f32 %v2356_v20, %v1280_v22 }
 0x4df   : > { %v1282_v24 = vadd.f32 %v2356_v20, %v1281_v23 }
 0x4e1   : > { %v3110_v25 = vsel %vm1283_vm2, %v2356_v20, %v1282_v24 }
 0x4e2   : > { %v1039_v1 = vpop.f32.mrf.mxu2 }
 0x4e3   : > { %2153 = vmatmul.msk.f32.vlgmr.msra.gmra.mxu2 %vm913_vm1, %v1039_v1 }
 0x4e4   : > { %1262 = vmatpush.msra.mxu2 %v908_v5 }
 0x4eb   : > { %2157 = vmatmul.msk.f32.vlgmr.msrb.gmra.mxu2 %vm913_vm1, %v1127_v3 }
 0x556   : > { %v1241_v7 = vpop.f32.mrf.mxu0 }
 0x557   : > { %2162 = vmatmul.msk.f32.vlgmr.msra.gmra.mxu2 %vm913_vm1, %v1241_v7 }
 0x566   : > { %v1062_v8 = vpop.f32.mrf.mxu2 }
 0x567   : > { %v1086_v10 = vadd.f32 %v1085_v36, %v1062_v8  ;;  %v1314_v36 = vld [vmem:[%s3319_s8 + $0x10] sm:$0xff] }
 0x568   : > { %1336 = vmatpush.msrb.mxu1 %v1314_v36 }
 0x56a   : > { %1337 = vmatpush.msrb.mxu1 %v1313_v37 }
 0x56c   : > { %1338 = vmatpush.msrb.mxu1 %v1312_v38 }
 0x56e   : > { %v1151_v9 = vpop.f32.mrf.mxu2 }
 0x56f   : > { %2158 = vmatmul.msk.f32.vlgmr.msra.gmra.mxu1 %vm913_vm1, %v1151_v9 }
 0x5da   : > { %v1264_v14 = vpop.f32.mrf.mxu2 }
 0x5ec   : > { %v1174_v11 = vpop.f32.mrf.mxu1 }
 0x5ed   : > { %v1177_v12 = vadd.f32 %v1174_v11, %v1086_v10  ;;  %v1374_v10 = vld [vmem:[%s3323_s12] sm:$0xff] }
 0x5ef   : > { %v1267_v15 = vadd.f32 %v1264_v14, %v1177_v12 }
 0x5f1   : > { %v1271_v16 = vadd.f32 %v2328_v13, %v1267_v15 }
 0x5f3   : > { %v1272_v17 = vadd.f32 %v1271_v16, %v3047_v4 }
 0x5f5   : > { %v1275_v18 = vsel %vm881_vm0, %v1272_v17, 0.0 }
 0x5f6   : > { %1276 = vadd.xlane.f32.xlu0 %v1275_v18 }
 0x669   : > { %v1277_v26 = vpop.xlane.xlu0 %1276 }
 0x66a   : > { %v1285_v27 = vmul.f32 %v3110_v25, %v1277_v26 }
 0x66c   : > { %v1286_v28 = vsub.f32 %v1272_v17, %v1285_v27 }
 0x66e   : > { %v1287_v29 = vmul.f32 %v1286_v28, %v1286_v28 }
 0x670   : > { %v1288_v4 = vsel %vm881_vm0, %v1287_v29, 0.0 }
 0x671   : > { %1289 = vadd.xlane.f32.xlu1 %v1288_v4 }
 0x68a   : > { %1647 = vrot.lane.b32.xlu1 %v3148_v56, %s2791_s24 }
 0x6e4   : > { %v1290_v39 = vpop.xlane.xlu1 %1289 }
 0x6e5   : > { %v1291_v40 = vmul.f32 %v1290_v39, %v3110_v25 }
 0x6e7   : > { %v1292_v41 = vadd.f32 1e-05, %v1291_v40 }
 0x6e9   : > { %2357 = vrsqrt.f32 %v1292_v41  ;;  %vm1299_vm4 = vweird.f32 %v1292_v41 }
 0x6ef   : > { %v2358_v42 = vpop.eup %2357 }
 0x6f0   : > { %v1294_v43 = vmul.f32 %v2358_v42, %v1292_v41  ;;  %vm1300_vm3 = vweird.f32 %v2358_v42 }
 0x6f1   : > { %vm1301_vm5 = vmor %vm1299_vm4, %vm1300_vm3 }
 0x6f2   : > { %v1295_v44 = vmul.f32 %v2358_v42, %v1294_v43 }
 0x6f4   : > { %v1296_v45 = vmul.f32 0.5, %v1295_v44 }
 0x6f6   : > { %v1297_v46 = vsub.f32 1.5, %v1296_v45 }
 0x6f8   : > { %v1298_v47 = vmul.f32 %v2358_v42, %v1297_v46 }
 0x6fa   : > { %v1302_v49 = vsel %vm1301_vm5, %v2358_v42, %v1298_v47 }
 0x6fb   : > { %v1303_v50 = vmul.f32 %v1302_v49, %v1286_v28 }
 0x6fc   : > { %v1648_v14 = vpop.permute.xlu1 %1647 }
 0x6fd   : > { %v1307_v52 = vmul.f32 %v2329_v48, %v1303_v50  ;;  %v1375_v50 = vld [vmem:[%s3323_s12 + $0x8] sm:$0xff] }
 0x6fe   : > { %1527 = vmatpush.msrb.mxu0 %v1375_v50  ;;  %v1831_v50 = vld [vmem:[%s3329_s18] sm:$0xff] }
 0x6ff   : > { %v3144_v53 = vadd.f32 %v2330_v51, %v1307_v52  ;;  %v1376_v51 = vld [vmem:[%s3323_s12 + $0x10] sm:$0xff] }
 0x701   : > { %2163 = vmatmul.msk.f32.vlgmr.msrb.gmra.mxu1 %vm881_vm0, %v3144_v53 }
 0x77e   : > { %v1340_v58 = vpop.f32.mrf.mxu1 }
 0x77f   : > { %v1341_v59 = vadd.f32 %v2332_v57, %v1340_v58 }
 0x781   : > { %2166 = vmatmul.msk.f32.vlgmr.msra.gmra.mxu0 %vm913_vm1, %v1341_v59 }
 0x782   : > { %1639 = vmatpush.msra.mxu0 %v1376_v51  ;;  %v1850_v51 = vld [vmem:[%s3329_s18 + $0x98] sm:$0xff] }
 0x7fe   : > { %v1402_v60 = vpop.f32.mrf.mxu0 }
 0x7ff   : > { %v1405_v61 = vmul.f32 0.35355338, %v1402_v60 }
 0x801   : > { %v1406_v62 = vsel %vm913_vm1, %v1405_v61, -inf }
 0x802   : > { %1407 = vmax.xlane.f32.xlu0 %v1406_v62 }
 0x816   : > { %1417 = vrot.lane.b32.xlu0 %v3148_v56, %s2788_s6 }
 0x81e   : > { %1445 = vrot.lane.b32.xlu0 %v3148_v56, %s2787_s14 }
 0x826   : > { %1443 = vrot.lane.b32.xlu0 %v1341_v59, %s2787_s14 }
 0x82e   : > { %1557 = vrot.lane.b32.xlu0 %v3148_v56, %s3366_s4 }
 0x836   : > { %1555 = vrot.lane.b32.xlu0 %v1341_v59, %s3366_s4 }
 0x875   : > { %v1408_v63 = vpop.xlane.xlu0 %1407 }
 0x876   : > { %v1409_v0 = vsub.f32 %v1405_v61, %v1408_v63 }
 0x878   : > { %v1410_v1 = vmul.f32 1.442695, %v1409_v0 }
 0x87a   : > { %2359 = vpow2.f32 %v1410_v1  ;;  %v2333_v1 = vld [vmem:[#allocation12] ss:$0 sm:$0xff] }
 0x880   : > { %v2360_v2 = vpop.eup %2359 }
 0x881   : > { %v1412_v3 = vsel %vm913_vm1, %v2360_v2, 0.0 }
 0x882   : > { %1413 = vadd.xlane.f32.xlu2 %v1412_v3 }
 0x888   : > { %v1418_v5 = vpop.permute.xlu0 %1417 }
 0x889   : > { %1438 = vmatpush.msrb.mxu2 %v1418_v5 }
 0x88b   : > { %1550 = vmatpush.msra.mxu2 %v1374_v10 }
 0x890   : > { %v1446_v6 = vpop.permute.xlu0 %1445 }
 0x891   : > { %2168 = vmatpush.xpose.msk.msra.mxu1 %vm913_vm1, %v1446_v6 }
 0x898   : > { %v1444_v7 = vpop.permute.xlu0 %1443 }
 0x899   : > { %2169 = vmatmul.msk.f32.vlgmr.msra.gmra.mxu1 %vm913_vm1, %v1444_v7 }
 0x89a   : > { %1645 = vrot.lane.b32.xlu2 %v1341_v59, %s2791_s24  ;;  %s3367_s24 = smov 80   ;;  %v1377_v59 = vld [vmem:[%s3323_s12 + $0x18] sm:$0xff] }
 0x8a0   : > { %v1558_v8 = vpop.permute.xlu0 %1557 }
 0x8a1   : > { %2173 = vmatpush.xpose.msk.msrb.mxu1 %vm913_vm1, %v1558_v8 }
 0x8a8   : > { %v1556_v9 = vpop.permute.xlu0 %1555 }
 0x8a9   : > { %2174 = vmatmul.msk.f32.vlgmr.msrb.gmra.mxu1 %vm913_vm1, %v1556_v9 }
 0x8f5   : > { %v1414_v11 = vpop.xlane.xlu2 %1413 }
 0x8f6   : > { %2361 = vrcp.f32 %v1414_v11 }
 0x8fc   : > { %v2362_v12 = vpop.eup %2361 }
 0x8fd   : > { %v1416_v13 = vmul.f32 %v2362_v12, %v2360_v2  ;;  %v1646_v22 = vpop.permute.xlu2 %1645 }
 0x8ff   : > { %2167 = vmatmul.msk.f32.vlgmr.msrb.gmra.mxu2 %vm913_vm1, %v1416_v13  ;;  %v1778_v13 = vld [vmem:[%s3327_s16 + $0x30] sm:$0xff] }
 0x900   : > { %2177 = vmatpush.xpose.msk.msrb.mxu2 %vm913_vm1, %v1648_v14  ;;  %v1779_v14 = vld [vmem:[%s3327_s16 + $0x38] sm:$0xff] }
 0x916   : > { %v1468_v15 = vpop.f32.mrf.mxu1 }
 0x917   : > { %v1471_v16 = vmul.f32 0.35355338, %v1468_v15  ;;  %v1777_v15 = vld [vmem:[%s3327_s16 + $0x28] sm:$0xff] }
 0x919   : > { %v1472_v17 = vsel %vm913_vm1, %v1471_v16, -inf }
 0x91a   : > { %1473 = vmax.xlane.f32.xlu0 %v1472_v17  ;;  %v1775_v17 = vld [vmem:[%s3327_s16 + $0x18] sm:$0xff] }
 0x926   : > { %v1580_v18 = vpop.f32.mrf.mxu1 }
 0x927   : > { %v1583_v19 = vmul.f32 0.35355338, %v1580_v18  ;;  %v1772_v18 = vld [vmem:[%s3327_s16] sm:$0xff] }
 0x929   : > { %v1584_v20 = vsel %vm913_vm1, %v1583_v19, -inf }
 0x92a   : > { %1585 = vmax.xlane.f32.xlu1 %v1584_v20  ;;  %v1846_v20 = vld [vmem:[%s3329_s18 + $0x78] sm:$0xff] }
 0x982   : > { %v1440_v21 = vpop.f32.mrf.mxu2 }
 0x983   : > { %2172 = vmatmul.msk.f32.vlgmr.msra.gmra.mxu2 %vm913_vm1, %v1440_v21  ;;  %v1845_v21 = vld [vmem:[%s3329_s18 + $0x70] sm:$0xff] }
 0x984   : > { %1821 = vmatpush.msra.mxu2 %v1779_v14 }
 0x986   : > { %1822 = vmatpush.msra.mxu2 %v1777_v15 }
 0x988   : > { %1823 = vmatpush.msra.mxu2 %v1775_v17 }
 0x98b   : > { %2178 = vmatmul.msk.f32.vlgmr.msrb.gmra.mxu2 %vm913_vm1, %v1646_v22  ;;  %v1844_v22 = vld [vmem:[%s3329_s18 + $0x68] sm:$0xff] }
 0x98d   : > { %v1474_v23 = vpop.xlane.xlu0 %1473 }
 0x98e   : > { %v1475_v24 = vsub.f32 %v1471_v16, %v1474_v23  ;;  %v1774_v16 = vld [vmem:[%s3327_s16 + $0x10] sm:$0xff] }
 0x990   : > { %v1476_v26 = vmul.f32 1.442695, %v1475_v24 }
 0x992   : > { %2363 = vpow2.f32 %v1476_v26  ;;  %v1843_v26 = vld [vmem:[%s3329_s18 + $0x60] sm:$0xff] }
 0x998   : > { %v2364_v27 = vpop.eup %2363 }
 0x999   : > { %v1478_v28 = vsel %vm913_vm1, %v2364_v27, 0.0 }
 0x99a   : > { %1479 = vadd.xlane.f32.xlu0 %v1478_v28  ;;  %v1842_v28 = vld [vmem:[%s3329_s18 + $0x58] sm:$0xff] }
 0x99d   : > { %v1586_v29 = vpop.xlane.xlu1 %1585 }
 0x99e   : > { %v1587_v4 = vsub.f32 %v1583_v19, %v1586_v29  ;;  %v1773_v19 = vld [vmem:[%s3327_s16 + $0x8] sm:$0xff]  ;;  %v1841_v29 = vld [vmem:[%s3329_s18 + $0x50] sm:$0xff] }
 0x99f   : > { %1824 = vmatpush.msra.mxu2 %v1773_v19 }
 0x9a0   : > { %v1588_v30 = vmul.f32 1.442695, %v1587_v4  ;;  %v1840_v4 = vld [vmem:[%s3329_s18 + $0x48] sm:$0xff] }
 0x9a2   : > { %2365 = vpow2.f32 %v1588_v30  ;;  %v1839_v30 = vld [vmem:[%s3329_s18 + $0x40] sm:$0xff] }
 0x9a8   : > { %v2366_v31 = vpop.eup %2365 }
 0x9a9   : > { %v1590_v32 = vsel %vm913_vm1, %v2366_v31, 0.0 }
 0x9aa   : > { %1591 = vadd.xlane.f32.xlu1 %v1590_v32  ;;  %v1838_v32 = vld [vmem:[%s3329_s18 + $0x38] sm:$0xff] }
 0x9c3   : > { %1595 = vrot.lane.b32.xlu1 %v3148_v56, %s3367_s24 }
 0xa06   : > { %v1552_v33 = vpop.f32.mrf.mxu2 }
 0xa0d   : > { %v1480_v37 = vpop.xlane.xlu0 %1479 }
 0xa0e   : > { %v1670_v34 = vpop.f32.mrf.mxu2  ;;  %2367 = vrcp.f32 %v1480_v37 }
 0xa0f   : > { %v1673_v35 = vmul.f32 0.35355338, %v1670_v34  ;;  %v1837_v34 = vld [vmem:[%s3329_s18 + $0x30] sm:$0xff] }
 0xa11   : > { %v1674_v36 = vsel %vm913_vm1, %v1673_v35, -inf }
 0xa12   : > { %1675 = vmax.xlane.f32.xlu2 %v1674_v36  ;;  %v1836_v36 = vld [vmem:[%s3329_s18 + $0x28] sm:$0xff] }
 0xa14   : > { %v2368_v42 = vpop.eup %2367 }
 0xa15   : > { %v1482_v43 = vmul.f32 %v2368_v42, %v2364_v27  ;;  %v2334_v42 = vld [vmem:[#allocation13] ss:$0 sm:$0xff] }
 0xa1d   : > { %v1592_v40 = vpop.xlane.xlu1 %1591 }
 0xa2a   : > { %1483 = vrot.lane.b32.xlu2 %v3148_v56, %s3368_s29 }
 0xa35   : > { %v1596_v45 = vpop.permute.xlu1 %1595 }
 0xa85   : > { %v1676_v38 = vpop.xlane.xlu2 %1675 }
 0xa86   : > { %v1677_v39 = vsub.f32 %v1673_v35, %v1676_v38  ;;  %v1835_v38 = vld [vmem:[%s3329_s18 + $0x20] sm:$0xff] }
 0xa88   : > { %v1678_v41 = vmul.f32 1.442695, %v1677_v39 }
 0xa8a   : > { %2369 = vpow2.f32 %v1678_v41 }
 0xa8b   : > { %2371 = vrcp.f32 %v1592_v40  ;;  %v1834_v40 = vld [vmem:[%s3329_s18 + $0x18] sm:$0xff] }
 0xa8d   : > { %v1484_v44 = vpop.permute.xlu2 %1483 }
 0xa8e   : > { %1504 = vmatpush.msra.mxu3 %v1484_v44 }
 0xa8f   : > { %2170 = vmatmul.msk.f32.vlgmr.msra.gmra.mxu3 %vm913_vm1, %v1482_v43 }
 0xa90   : > { %v2370_v46 = vpop.eup %2369  ;;  %1616 = vmatpush.msrb.mxu3 %v1596_v45  ;;  %v2335_v45 = vld [vmem:[#allocation15] ss:$0 sm:$0xff] }
 0xa91   : > { %v1680_v47 = vsel %vm913_vm1, %v2370_v46, 0.0  ;;  %v2372_v48 = vpop.eup %2371 }
 0xa92   : > { %1681 = vadd.xlane.f32.xlu0 %v1680_v47  ;;  %v1594_v49 = vmul.f32 %v2372_v48, %v2366_v31  ;;  %1729 = vmatpush.msra.mxu3 %v1377_v59  ;;  %v1833_v48 = vld [vmem:[%s3329_s18 + $0x10] sm:$0xff] }
 0xa97   : > { %2175 = vmatmul.msk.f32.vlgmr.msrb.gmra.mxu3 %vm913_vm1, %v1594_v49  ;;  %v1832_v49 = vld [vmem:[%s3329_s18 + $0x8] sm:$0xff] }
 0xa98   : > { %1890 = vmatpush.msrb.mxu3 %v1850_v51 }
 0xaa6   : > { %1685 = vrot.lane.b32.xlu0 %v3148_v56, %s3369_s30 }
 0xb05   : > { %v1682_v52 = vpop.xlane.xlu0 %1681 }
 0xb06   : > { %2373 = vrcp.f32 %v1682_v52  ;;  %v1849_v52 = vld [vmem:[%s3329_s18 + $0x90] sm:$0xff] }
 0xb07   : > { %1891 = vmatpush.msrb.mxu3 %v1849_v52 }
 0xb0c   : > { %v2374_v55 = vpop.eup %2373 }
 0xb0d   : > { %v1684_v57 = vmul.f32 %v2374_v55, %v2370_v46  ;;  %v1847_v55 = vld [vmem:[%s3329_s18 + $0x80] sm:$0xff] }
 0xb12   : > { %v1506_v54 = vpop.f32.mrf.mxu3 }
 0xb13   : > { %2171 = vmatmul.msk.f32.vlgmr.msrb.gmra.mxu0 %vm913_vm1, %v1506_v54  ;;  %v1848_v54 = vld [vmem:[%s3329_s18 + $0x88] sm:$0xff] }
 0xb14   : > { %1801 = vmatpush.msrb.mxu0 %v1778_v13  ;;  %1892 = vmatpush.msrb.mxu3 %v1848_v54 }
 0xb16   : > { %1893 = vmatpush.msrb.mxu3 %v1847_v55 }
 0xb18   : > { %v1686_v58 = vpop.permute.xlu0 %1685 }
 0xb19   : > { %1706 = vmatpush.msra.mxu1 %v1686_v58 }
 0xb1a   : > { %v1618_v56 = vpop.f32.mrf.mxu3  ;;  %2179 = vmatmul.msk.f32.vlgmr.msra.gmra.mxu1 %vm913_vm1, %v1684_v57  ;;  %v1780_v57 = vld [vmem:[%s3328_s17] sm:$0x3] }
 0xb1b   : > { %2176 = vmatmul.msk.f32.vlgmr.msra.gmra.mxu0 %vm913_vm1, %v1618_v56  ;;  %1858 = vmatpush.msrb.mxu1 %v1846_v20  ;;  %v1782_v58 = vperm.slane %v1780_v57, 0 }
 0xb1d   : > { %1859 = vmatpush.msrb.mxu1 %v1845_v21 }
 0xb1f   : > { %1860 = vmatpush.msrb.mxu1 %v1844_v22  ;;  %v2337_v22 = vld [vmem:[#allocation18] ss:$0 sm:$0xff] }
 0xb21   : > { %1861 = vmatpush.msrb.mxu1 %v1843_v26 }
 0xb23   : > { %1862 = vmatpush.msrb.mxu1 %v1842_v28 }
 0xb25   : > { %1863 = vmatpush.msrb.mxu1 %v1841_v29 }
 0xb27   : > { %1864 = vmatpush.msrb.mxu1 %v1840_v4 }
 0xb29   : > { %1865 = vmatpush.msrb.mxu1 %v1839_v30 }
 0xb2b   : > { %1866 = vmatpush.msrb.mxu1 %v1838_v32 }
 0xb2d   : > { %1867 = vmatpush.msrb.mxu1 %v1837_v34 }
 0xb2f   : > { %1868 = vmatpush.msrb.mxu1 %v1836_v36 }
 0xb31   : > { %1869 = vmatpush.msrb.mxu1 %v1835_v38 }
 0xb33   : > { %1870 = vmatpush.msrb.mxu1 %v1834_v40 }
 0xb35   : > { %1871 = vmatpush.msrb.mxu1 %v1833_v48 }
 0xb37   : > { %1872 = vmatpush.msrb.mxu1 %v1832_v49 }
 0xb39   : > { %1873 = vmatpush.msrb.mxu1 %v1831_v50 }
 0xb90   : > { %v1529_v61 = vpop.f32.mrf.mxu0 }
 0xb91   : > { %v1553_v63 = vadd.f32 %v1552_v33, %v1529_v61  ;;  %v1783_v61 = vperm.slane %v1780_v57, 1 }
 0xb97   : > { %v1708_v60 = vpop.f32.mrf.mxu1 }
 0xb98   : > { %2180 = vmatmul.msk.f32.vlgmr.msra.gmra.mxu3 %vm913_vm1, %v1708_v60  ;;  %v1641_v62 = vpop.f32.mrf.mxu0 }
 0xb99   : > { %v1644_v0 = vadd.f32 %v1641_v62, %v1553_v63 }
 0xc1b   : > { %v1731_v2 = vpop.f32.mrf.mxu3 }
 0xc1c   : > { %v1734_v3 = vadd.f32 %v1731_v2, %v1644_v0 }
 0xc1e   : > { %v1738_v5 = vadd.f32 %v2333_v1, %v1734_v3  ;;  %v2336_v1 = vld [vmem:[#allocation16] ss:$0 sm:$0xff] }
 0xc20   : > { %v1739_v6 = vadd.f32 %v1738_v5, %v3144_v53  ;;  %v1776_v53 = vld [vmem:[%s3327_s16 + $0x20] sm:$0xff] }
 0xc21   : > { %1802 = vmatpush.msrb.mxu0 %v1776_v53 }
 0xc22   : > { %v1742_v7 = vsel %vm881_vm0, %v1739_v6, 0.0 }
 0xc23   : > { %1743 = vadd.xlane.f32.xlu2 %v1742_v7  ;;  %1803 = vmatpush.msrb.mxu0 %v1774_v16 }
 0xc25   : > { %1804 = vmatpush.msrb.mxu0 %v1772_v18 }
 0xc96   : > { %v1744_v8 = vpop.xlane.xlu2 %1743 }
 0xc97   : > { %v1745_v9 = vmul.f32 %v1744_v8, %v3110_v25 }
 0xc99   : > { %v1746_v10 = vsub.f32 %v1739_v6, %v1745_v9 }
 0xc9b   : > { %v1747_v11 = vmul.f32 %v1746_v10, %v1746_v10 }
 0xc9d   : > { %v1748_v12 = vsel %vm881_vm0, %v1747_v11, 0.0 }
 0xc9e   : > { %1749 = vadd.xlane.f32.xlu0 %v1748_v12 }
 0xd11   : > { %v1750_v23 = vpop.xlane.xlu0 %1749 }
 0xd12   : > { %v1751_v24 = vmul.f32 %v1750_v23, %v3110_v25 }
 0xd14   : > { %v1752_v27 = vadd.f32 1e-05, %v1751_v24  ;;  %v2338_v24 = vld [vmem:[#allocation19] ss:$0 sm:$0xff] }
 0xd16   : > { %2375 = vrsqrt.f32 %v1752_v27  ;;  %vm1759_vm7 = vweird.f32 %v1752_v27 }
 0xd1c   : > { %v2376_v31 = vpop.eup %2375 }
 0xd1d   : > { %v1754_v33 = vmul.f32 %v2376_v31, %v1752_v27  ;;  %vm1760_vm6 = vweird.f32 %v2376_v31 }
 0xd1e   : > { %vm1761_vm8 = vmor %vm1759_vm7, %vm1760_vm6 }
 0xd1f   : > { %v1755_v35 = vmul.f32 %v2376_v31, %v1754_v33 }
 0xd21   : > { %v1756_v37 = vmul.f32 0.5, %v1755_v35 }
 0xd23   : > { %v1757_v39 = vsub.f32 1.5, %v1756_v37 }
 0xd25   : > { %v1758_v41 = vmul.f32 %v2376_v31, %v1757_v39 }
 0xd27   : > { %v1762_v43 = vsel %vm1761_vm8, %v2376_v31, %v1758_v41 }
 0xd28   : > { %v1763_v44 = vmul.f32 %v1762_v43, %v1746_v10 }
 0xd2a   : > { %v1767_v46 = vmul.f32 %v2334_v42, %v1763_v44 }
 0xd2c   : > { %v1771_v47 = vadd.f32 %v2335_v45, %v1767_v46 }
 0xd2e   : > { %2181 = vmatmul.msk.f32.vlgmr.msrb.gmra.mxu0 %vm881_vm0, %v1771_v47  ;;  %2182 = vmatmul.msk.f32.vlgmr.msra.gmra.mxu2 %vm881_vm0, %v1771_v47 }
 0xdab   : > { %v1806_v56 = vpop.f32.mrf.mxu0 }
 0xdac   : > { %v1807_v59 = vadd.f32 %v1806_v56, %v1782_v58 }
 0xdae   : > { %v1829_v60 = vmax.f32 %v1807_v59, 0.0 }
 0xdb0   : > { %1874 = vmatmul.f32.vlgmr.msrb.gmra.mxu1 %v1829_v60 }
 0xdb1   : > { %v1826_v62 = vpop.f32.mrf.mxu2 }
 0xdb2   : > { %v1827_v63 = vadd.f32 %v1826_v62, %v1783_v61 }
 0xdb4   : > { %v1830_v0 = vmax.f32 %v1827_v63, 0.0 }
 0xdb6   : > { %2183 = vmatmul.msk.f32.vlgmr.msrb.gmra.mxu3 %vm881_vm0, %v1830_v0 }
 0xe2d   : > { %v1875_v2 = vpop.f32.mrf.mxu1 }
 0xe2e   : > { %v1876_v3 = vadd.f32 %v2336_v1, %v1875_v2 }
 0xe39   : > { %v1895_v5 = vpop.f32.mrf.mxu3 }
 0xe3a   : > { %v1896_v6 = vadd.f32 %v1895_v5, %v1876_v3 }
 0xe3c   : > { %v1898_v7 = vadd.f32 %v1896_v6, %v1771_v47 }
 0xe3e   : > { %v1901_v8 = vsel %vm881_vm0, %v1898_v7, 0.0 }
 0xe3f   : > { %1902 = vadd.xlane.f32.xlu1 %v1901_v8 }
 0xeb2   : > { %v1903_v9 = vpop.xlane.xlu1 %1902 }
 0xeb3   : > { %v1904_v10 = vmul.f32 %v1903_v9, %v3110_v25 }
 0xeb5   : > { %v1905_v11 = vsub.f32 %v1898_v7, %v1904_v10 }
 0xeb7   : > { %v1906_v12 = vmul.f32 %v1905_v11, %v1905_v11 }
 0xeb9   : > { %v1907_v13 = vsel %vm881_vm0, %v1906_v12, 0.0 }
 0xeba   : > { %1908 = vadd.xlane.f32.xlu2 %v1907_v13 }
 0xf2d   : > { %v1909_v14 = vpop.xlane.xlu2 %1908 }
 0xf2e   : > { %v1910_v53 = vmul.f32 %v1909_v14, %v3110_v25 }
 0xf30   : > { %v1911_v15 = vadd.f32 1e-05, %v1910_v53 }
 0xf32   : > { %2377 = vrsqrt.f32 %v1911_v15  ;;  %vm1918_vm10 = vweird.f32 %v1911_v15 }
 0xf38   : > { %v2378_v16 = vpop.eup %2377 }
 0xf39   : > { %v1913_v17 = vmul.f32 %v2378_v16, %v1911_v15  ;;  %vm1919_vm9 = vweird.f32 %v2378_v16 }
 0xf3a   : > { %vm1920_vm11 = vmor %vm1918_vm10, %vm1919_vm9 }
 0xf3b   : > { %v1914_v18 = vmul.f32 %v2378_v16, %v1913_v17 }
 0xf3d   : > { %v1915_v19 = vmul.f32 0.5, %v1914_v18 }
 0xf3f   : > { %v1916_v20 = vsub.f32 1.5, %v1915_v19 }
 0xf41   : > { %v1917_v21 = vmul.f32 %v2378_v16, %v1916_v20 }
 0xf43   : > { %v1921_v23 = vsel %vm1920_vm11, %v2378_v16, %v1917_v21 }
 0xf44   : > { %v1922_v26 = vmul.f32 %v1921_v23, %v1905_v11 }
 0xf46   : > { %v1926_v27 = vmul.f32 %v2337_v22, %v1922_v26 }
 0xf48   : > { %v1930_v25 = vadd.f32 %v2338_v24, %v1926_v27 }
 0xf4a   : > { %1931 = vst.msk [vmem:[%s870_s28] sm:$0xff] %vm881_vm0, %v1930_v25 }
 0xf4b PF: > { %s3370_s3 = sld [smem:[#allocation28_spill]] }
 0xf51   : > { %s39_s3 = sadd.s32 1, %s3370_s3  }
 0xf52   : > { %p36_p7 = scmp.ge.s32.totalorder %s39_s3, 4  }
 0xf54   :  { %38 = sbr.rel (!%p36_p7) target bundleno = 18 (0x12), region = 190 }
 0xf59   :  { %1951 = vsyncpa [#allocation3], 1 }
 0xf5a   :  { %1953 = vsyncpa [#allocation3 + $0x1], 1 }
 0xf5b   :  { %1954 = vsyncpa [#allocation5], 1 }
 0xf5c   :  { %1955 = vsyncpa [#allocation8], 1 }
 0xf5d   :  { %1956 = vsyncpa [#allocation11], 1 }
 0xf5e   :  { %1957 = vsyncpa [#allocation14], 1 }
 0xf5f   :  { %1958 = vsyncpa [#allocation17], 1 }
 0xf60   :  { %1959 = vsyncpa [#allocation20], 1 }

// kernel: transformer_forward.17
= control target key start
LH: loop header
LB: loop body
LE: loop exit
PB: predicated region body
PF: predicated region fallthrough
CT: control target
= control target key end

     0   :  { %s3379_s0 = inlined_call_operand.vmem [shape: f32[16,32], index: 0, kind: input, shape index: {}]   ;;  %s3380_s1 = inlined_call_operand.vmem [shape: f32[16,32], index: 1, kind: input, shape index: {}]   ;;  %s3381_s2 = inlined_call_operand.vmem [shape: f32[32,96], index: 2, kind: input, shape index: {}]   ;;  %s3382_s3 = inlined_call_operand.hbm [shape: f32[1,96], index: 3, kind: input, shape index: {}]   ;;  %s3383_s4 = inlined_call_operand.vmem [shape: f32[32,32], index: 4, kind: input, shape index: {}]   ;;  %s3384_s5 = inlined_call_operand.hbm [shape: f32[1,32], index: 5, kind: input, shape index: {}]   ;;  %s3385_s6 = inlined_call_operand.hbm [shape: f32[1,32], index: 6, kind: input, shape index: {}]   ;;  %s3386_s7 = inlined_call_operand.hbm [shape: f32[1,32], index: 7, kind: input, shape index: {}]   ;;  %s3387_s8 = inlined_call_operand.vmem [shape: f32[32,32], index: 8, kind: input, shape index: {}]   ;;  %s3388_s9 = inlined_call_operand.hbm [shape: f32[1,32], index: 9, kind: input, shape index: {}]   ;;  %s3389_s10 = inlined_call_operand.vmem [shape: f32[32,64], index: 10, kind: input, shape index: {}]   ;;  %s3390_s11 = inlined_call_operand.hbm [shape: f32[1,64], index: 11, kind: input, shape index: {}]   ;;  %s3391_s12 = inlined_call_operand.vmem [shape: f32[32,32], index: 12, kind: input, shape index: {}]   ;;  %s3392_s13 = inlined_call_operand.hbm [shape: f32[1,32], index: 13, kind: input, shape index: {}]   ;;  %s3393_s14 = inlined_call_operand.hbm [shape: f32[1,32], index: 14, kind: input, shape index: {}]   ;;  %s3394_s15 = inlined_call_operand.hbm [shape: f32[1,32], index: 15, kind: input, shape index: {}]   ;;  %s3395_s16 = inlined_call_operand.vmem [shape: f32[32,160], index: 16, kind: input, shape index: {}]   ;;  %s3396_s17 = inlined_call_operand.hbm [shape: f32[1,160], index: 17, kind: input, shape index: {}]   ;;  %s3397_s18 = inlined_call_operand.vmem [shape: f32[160,32], index: 18, kind: input, shape index: {}]   ;;  %s3398_s19 = inlined_call_operand.hbm [shape: f32[1,32], index: 19, kind: input, shape index: {}]   ;;  %s3399_s20 = inlined_call_operand.hbm [shape: f32[1,32], index: 20, kind: input, shape index: {}]   ;;  %s3400_s21 = inlined_call_operand.hbm [shape: f32[1,32], index: 21, kind: input, shape index: {}]   ;;  %s3401_s22 = inlined_call_operand.vmem [shape: f32[16,32], index: 22, kind: output, shape index: {}]  }
   0x1   :  { %3410 = sst [smem:[#allocation30_spill]] %s3379_s0 }
   0x2   :  { %3411 = sst [smem:[#allocation31_spill]] %s3380_s1 }
   0x3   :  { %3412 = sst [smem:[#allocation32_spill]] %s3381_s2 }
   0x4   :  { %3413 = sst [smem:[#allocation33_spill]] %s3382_s3 }
   0x5   :  { %3414 = sst [smem:[#allocation34_spill]] %s3383_s4 }
   0x6   :  { %3415 = sst [smem:[#allocation35_spill]] %s3384_s5 }
   0x7   :  { %3416 = sst [smem:[#allocation36_spill]] %s3385_s6 }
   0x8   :  { %3417 = sst [smem:[#allocation37_spill]] %s3386_s7 }
   0x9   :  { %3418 = sst [smem:[#allocation38_spill]] %s3390_s11 }
   0xa   :  { %3419 = sst [smem:[#allocation39_spill]] %s3393_s14 }
   0xb   :  { %27 = vsyncpa [#allocation3], 0 }
   0xc   :  { %28 = vsyncpa [#allocation5], 0 }
   0xd   :  { %29 = vsyncpa [#allocation8], 0 }
   0xe   :  { %30 = vsyncpa [#allocation11], 0 }
   0xf   :  { %31 = vsyncpa [#allocation14], 0 }
  0x10   :  { %32 = vsyncpa [#allocation17], 0 }
  0x11   :  { %33 = vsyncpa [#allocation20], 0  ;;  %s2980_s3 = smov 0  }
  0x12 LB: > { %3420 = sst [smem:[#allocation29_spill]] %s2838_s3  ;;  %s2989_s0 = sadd.s32 4294967295, %s2838_s3   ;;  %s2838_s3 = sphi %s2980_s3, %s39_s3  }
  0x13   : > { %s3421_s30 = sld [smem:[#allocation35_spill]]  ;;  %p2139_p0 = scmp.ge.s32.totalorder %s2838_s3, 1 }
  0x14   : > { %p542_p1 = scmp.lt.s32.totalorder %s2838_s3, 3  ;;  %p2303_p2 = scmp.eq.s32.totalorder %s2989_s0, 0 }
  0x15   : > { %s2840_s1 = smov [#allocation4]   ;;  %s3423_s7 = sld [smem:[#allocation37_spill]] }
  0x16   : > { %p2994_p3 = pnand %p2139_p0, %p542_p1  ;;  %s574_s5 = sshll.u32 %s2840_s1, 4  ;;  %s575_s5 = int_to_ptr.vmem [resolvable:$true] %s574_s5 }
  0x17   : > { %s3424_s11 = sld [smem:[#allocation38_spill]]  ;;  %s2841_s29 = smov [#allocation7]  }
  0x18   : > { %p2263_p4 = pneg %p2994_p3  ;;  %s2842_s1 = smov [#allocation10]  }
  0x19   : > { %s572_s4 = sshll.u32 %s3421_s30, 4  ;;  %s598_s30 = sshll.u32 %s2841_s29, 4  ;;  %s573_s4 = int_to_ptr.hbm [resolvable:$true] %s572_s4  ;;  %s599_s30 = int_to_ptr.vmem [resolvable:$true] %s598_s30 }
  0x1a   : > { %p3008_p5 = pnand %p2303_p2, %p2263_p4  ;;  %s628_s24 = sshll.u32 %s2842_s1, 4  ;;  %s629_s24 = int_to_ptr.vmem [resolvable:$true] %s628_s24 }
  0x1b   : > { %s596_s25 = sshll.u32 %s3423_s7, 4  ;;  %s3426_s14 = sld [smem:[#allocation39_spill]]  ;;  %s597_s25 = int_to_ptr.hbm [resolvable:$true] %s596_s25 }
  0x1c   : > { %2269 = dma.hbm_to_vmem [thread:$0]  (!%p3008_p5), %s573_s4, 16, %s575_s5, [#allocation5]  }
  0x1d   : > { %s626_s27 = sshll.u32 %s3424_s11, 4  ;;  %s680_s11 = sshll.u32 %s3396_s17, 4  ;;  %s627_s27 = int_to_ptr.hbm [resolvable:$true] %s626_s27  ;;  %s681_s11 = int_to_ptr.hbm [resolvable:$true] %s680_s11 }
  0x1e   : > { %2275 = dma.hbm_to_vmem [thread:$0]  (!%p3008_p5), %s597_s25, 16, %s599_s30, [#allocation8]  }
  0x1f   : > { %2281 = dma.hbm_to_vmem [thread:$0]  (!%p3008_p5), %s627_s27, 16, %s629_s24, [#allocation11]  }
  0x20   : > { %s2843_s3 = smov [#allocation13]   ;;  %s2844_s5 = smov [#allocation16]  }
  0x21   : > { %s653_s2 = sshll.u32 %s3426_s14, 4  ;;  %s655_s4 = sshll.u32 %s2843_s3, 4  ;;  %s654_s2 = int_to_ptr.hbm [resolvable:$true] %s653_s2  ;;  %s656_s4 = int_to_ptr.vmem [resolvable:$true] %s655_s4 }
  0x22   : > { %2287 = dma.hbm_to_vmem [thread:$0]  (!%p3008_p5), %s654_s2, 16, %s656_s4, [#allocation14]  }
  0x23   : > { %s682_s25 = sshll.u32 %s2844_s5, 4  ;;  %s707_s6 = sshll.u32 %s3399_s20, 4  ;;  %s683_s25 = int_to_ptr.vmem [resolvable:$true] %s682_s25  ;;  %s708_s6 = int_to_ptr.hbm [resolvable:$true] %s707_s6 }
  0x24   : > { %2293 = dma.hbm_to_vmem [thread:$0]  (!%p3008_p5), %s681_s11, 32, %s683_s25, [#allocation17]  }
  0x25   : > { %s3427_s24 = sld [smem:[#allocation33_spill]]  ;;  %s2845_s3 = smov [#allocation19]  }
  0x26   : > { %s709_s29 = sshll.u32 %s2845_s3, 4  ;;  %s2846_s2 = smov [#allocation2]   ;;  %s710_s29 = int_to_ptr.vmem [resolvable:$true] %s709_s29 }
  0x27   : > { %2299 = dma.hbm_to_vmem [thread:$0]  (!%p3008_p5), %s708_s6, 16, %s710_s29, [#allocation20]  }
  0x28   : > { %s559_s4 = sshll.u32 %s2846_s2, 4  ;;  %s3428_s1 = sld [smem:[#allocation36_spill]]  ;;  %s560_s4 = int_to_ptr.vmem [resolvable:$true] %s559_s4 }
  0x29   : > { %s611_s7 = sshll.u32 %s3388_s9, 4  ;;  %s2847_s27 = smov [#allocation6]   ;;  %s612_s7 = int_to_ptr.hbm [resolvable:$true] %s611_s7 }
  0x2a   : > { %s2848_s6 = smov [#allocation9]   ;;  %s641_s5 = sshll.u32 %s3392_s13, 4  ;;  %s642_s5 = int_to_ptr.hbm [resolvable:$true] %s641_s5 }
  0x2b   : > { %s557_s26 = sshll.u32 %s3427_s24, 4  ;;  %s586_s24 = sshll.u32 %s2847_s27, 4  ;;  %s558_s26 = int_to_ptr.hbm [resolvable:$true] %s557_s26  ;;  %s587_s24 = int_to_ptr.vmem [resolvable:$true] %s586_s24 }
  0x2c   : > { %2266 = dma.hbm_to_vmem [thread:$0]  (!%p3008_p5), %s558_s26, 16, %s560_s4, [#allocation3]  }
  0x2d   : > { %s613_s3 = sshll.u32 %s2848_s6, 4  ;;  %s665_s30 = sshll.u32 %s3394_s15, 4  ;;  %s614_s3 = int_to_ptr.vmem [resolvable:$true] %s613_s3  ;;  %s666_s30 = int_to_ptr.hbm [resolvable:$true] %s665_s30 }
  0x2e   : > { %s584_s14 = sshll.u32 %s3428_s1, 4  ;;  %s2849_s1 = smov [#allocation12]   ;;  %s585_s14 = int_to_ptr.hbm [resolvable:$true] %s584_s14 }
  0x2f   : > { %2272 = dma.hbm_to_vmem [thread:$0]  (!%p3008_p5), %s585_s14, 16, %s587_s24, [#allocation5]  }
  0x30   : > { %2278 = dma.hbm_to_vmem [thread:$0]  (!%p3008_p5), %s612_s7, 16, %s614_s3, [#allocation8]  }
  0x31   : > { %s643_s11 = sshll.u32 %s2849_s1, 4  ;;  %s2850_s14 = smov [#allocation15]   ;;  %s644_s11 = int_to_ptr.vmem [resolvable:$true] %s643_s11 }
  0x32   : > { %2284 = dma.hbm_to_vmem [thread:$0]  (!%p3008_p5), %s642_s5, 16, %s644_s11, [#allocation11]  }
  0x33   : > { %s667_s25 = sshll.u32 %s2850_s14, 4  ;;  %s695_s6 = sshll.u32 %s3398_s19, 4  ;;  %s668_s25 = int_to_ptr.vmem [resolvable:$true] %s667_s25  ;;  %s696_s6 = int_to_ptr.hbm [resolvable:$true] %s695_s6 }
  0x34   : > { %2290 = dma.hbm_to_vmem [thread:$0]  (!%p3008_p5), %s666_s30, 16, %s668_s25, [#allocation14]  }
  0x35   : > { %s719_s29 = sshll.u32 %s3400_s21, 4  ;;  %s2851_s2 = smov [#allocation18]   ;;  %s720_s29 = int_to_ptr.hbm [resolvable:$true] %s719_s29 }
  0x36   : > { %s697_s26 = sshll.u32 %s2851_s2, 4  ;;  %s2852_s5 = smov [#allocation21]   ;;  %s698_s26 = int_to_ptr.vmem [resolvable:$true] %s697_s26 }
  0x37   : > { %2296 = dma.hbm_to_vmem [thread:$0]  (!%p3008_p5), %s696_s6, 16, %s698_s26, [#allocation17]  }
  0x38   : > { %s721_s4 = sshll.u32 %s2852_s5, 4  ;;  %748 = sbr.rel (%p2994_p3) target bundleno = 3918 (0xf4e), region = 108  ;;  %s722_s4 = int_to_ptr.vmem [resolvable:$true] %s721_s4 }
  0x39   : > { %2302 = dma.hbm_to_vmem [thread:$0]  (!%p3008_p5), %s720_s29, 16, %s722_s4, [#allocation20]  }
  0x3d   : > { %2809 = dma.done.wait (%p2303_p2), [#allocation3], 16  }
  0x3e   : > { %2811 = vsyncadd (%p2303_p2), [#allocation3], 4294967280 }
  0x3f   : > { %2813 = dma.done.wait (%p2303_p2), [#allocation5], 32  }
  0x40   : > { %2815 = vsyncadd (%p2303_p2), [#allocation5], 4294967264 }
  0x41   : > { %2817 = dma.done.wait (%p2303_p2), [#allocation8], 32  }
  0x42   : > { %2819 = vsyncadd (%p2303_p2), [#allocation8], 4294967264 }
  0x43   : > { %2821 = dma.done.wait (%p2303_p2), [#allocation11], 32  }
  0x44   : > { %2823 = vsyncadd (%p2303_p2), [#allocation11], 4294967264 }
  0x45   : > { %2825 = dma.done.wait (%p2303_p2), [#allocation14], 32  }
  0x46   : > { %2827 = vsyncadd (%p2303_p2), [#allocation14], 4294967264 }
  0x47   : > { %2829 = dma.done.wait (%p2303_p2), [#allocation17], 48  }
  0x48   : > { %2831 = vsyncadd (%p2303_p2), [#allocation17], 4294967248 }
  0x49   : > { %2833 = dma.done.wait (%p2303_p2), [#allocation20], 32  }
  0x4a   : > { %2835 = vsyncadd (%p2303_p2), [#allocation20], 4294967264  ;;  %p873_p6 = scmp.lt.s32.totalorder %s2989_s0, 1  ;;  %s3429_s1 = sld [smem:[#allocation32_spill]]  ;;  %vm895_vm0 = vcmask 261120   ;;  %vm927_vm1 = vcmask 64512  }
  0x4b   : > { %s3430_s24 = sld [smem:[#allocation30_spill]]  ;;  %v2362_v5 = vld [vmem:[#allocation2] ss:$0 sm:$0xff]  ;;  %s2853_s2 = smov 120  }
  0x4c   : > { %s3439_s0 = smov (!%p873_p6, %s2989_s0), 1  ;;  %s2854_s26 = smov 96  }
  0x4d   : > { %s3100_s23 = sshll.u32 %s3439_s0, 3  ;;  %s2855_s5 = smov 64  }
  0x4e   : > { %s3405_s4 = smov 72   ;;  %s2857_s28 = smov 104  }
  0x4f   : > { %s3407_s30 = smov 80   ;;  %s2859_s11 = smov 56  }
  0x50   : > { %v890_v0 = vld [vmem:[%s3429_s1 + $0x18] sm:$0xff]  ;;  %v889_v1 = vld [vmem:[%s3429_s1 + $0x10] sm:$0xff]  ;;  %v888_v2 = vld [vmem:[%s3429_s1 + $0x8] sm:$0xff]  ;;  %s3406_s14 = smov 88   ;;  %s3408_s25 = smov 112  }
  0x51   : > { %s876_s6 = scalar_lea.vmem %s3430_s24, %s3100_s23  ;;  %911 = vmatpush.msra.mxu0 %v890_v0  ;;  %v887_v3 = vld [vmem:[%s3429_s1] sm:$0xff]  ;;  %s2862_s7 = smov 48  }
  0x52   : > { %v3118_v4 = vld [vmem:[%s876_s6] sm:$0xff]  ;;  %s3431_s6 = sld [smem:[#allocation34_spill]]  ;;  %s2863_s29 = smov 40  }
  0x53   : > { %912 = vmatpush.msra.mxu0 %v889_v1  ;;  %s3436_s27 = smov 72  }
  0x55   : > { %913 = vmatpush.msra.mxu0 %v888_v2 }
  0x57   : > { %914 = vmatpush.msra.mxu0 %v887_v3 }
  0x58   : > { %2171 = vmatmul.msk.f32.vlgmr.msra.gmra.mxu0 %vm895_vm0, %v3118_v4  ;;  %v919_v26 = vld [vmem:[%s3431_s6] sm:$0xff]  ;;  %v920_v53 = vld [vmem:[%s3431_s6 + $0x8] sm:$0xff] }
  0xd5   : > { %v916_v6 = vpop.f32.mrf.mxu0 }
  0xd6   : > { %v3122_v7 = vadd.f32 %v2362_v5, %v916_v6  ;;  %v922_v5 = vld [vmem:[%s3431_s6 + $0x18] sm:$0xff]  ;;  %v921_v6 = vld [vmem:[%s3431_s6 + $0x10] sm:$0xff] }
  0xd7   : > { %1186 = vmatpush.msra.mxu1 %v921_v6 }
  0xd8   : > { %990 = vrot.lane.b32.xlu2 %v3122_v7, %s2853_s2  ;;  %925 = vrot.lane.b32.xlu0 %v3122_v7, %s2854_s26 }
  0xe0   : > { %964 = vrot.lane.b32.xlu2 %v3122_v7, %s2855_s5 }
  0xe8   : > { %1194 = vrot.lane.b32.xlu2 %v3122_v7, %s3405_s4  ;;  %s3432_s4 = sld [smem:[#allocation31_spill]] }
  0xf0   : > { %1192 = vrot.lane.b32.xlu2 %v3122_v7, %s2857_s28 }
  0xf8   : > { %1104 = vrot.lane.b32.xlu2 %v3122_v7, %s3407_s30 }
 0x132   : > { %v991_v8 = vpop.permute.xlu2 %990 }
 0x13a   : > { %v965_v9 = vpop.permute.xlu2 %964 }
 0x13b   : > { %985 = vmatpush.msra.mxu2 %v965_v9 }
 0x142   : > { %v1195_v10 = vpop.permute.xlu2 %1194 }
 0x14a   : > { %v1193_v11 = vpop.permute.xlu2 %1192  ;;  %v926_v12 = vpop.permute.xlu0 %925 }
 0x14b   : > { %2172 = vmatpush.xpose.msk.msrb.mxu0 %vm927_vm1, %v926_v12 }
 0x14e   : > { %2173 = vmatmul.msk.f32.vlgmr.msrb.gmra.mxu0 %vm927_vm1, %v3122_v7 }
 0x152   : > { %v1105_v13 = vpop.permute.xlu2 %1104 }
 0x153   : > { %2180 = vmatpush.xpose.msk.msra.mxu0 %vm927_vm1, %v1105_v13  ;;  %v2363_v13 = vld [vmem:[#allocation4] ss:$0 sm:$0xff] }
 0x1cb   : > { %v949_v14 = vpop.f32.mrf.mxu0 }
 0x1cc   : > { %v952_v15 = vmul.f32 0.35355338, %v949_v14 }
 0x1ce   : > { %v953_v16 = vsel %vm927_vm1, %v952_v15, -inf }
 0x1cf   : > { %954 = vmax.xlane.f32.xlu0 %v953_v16 }
 0x1e3   : > { %1030 = vrot.lane.b32.xlu0 %v3122_v7, %s2859_s11  ;;  %s3435_s11 = smov 88  }
 0x242   : > { %v955_v17 = vpop.xlane.xlu0 %954 }
 0x243   : > { %v956_v18 = vsub.f32 %v952_v15, %v955_v17 }
 0x245   : > { %v957_v19 = vmul.f32 1.442695, %v956_v18 }
 0x247   : > { %2374 = vpow2.f32 %v957_v19  ;;  %v2864_v19 = vmov 32.0  }
 0x24d   : > { %v2375_v20 = vpop.eup %2374 }
 0x24e   : > { %v959_v21 = vsel %vm927_vm1, %v2375_v20, 0.0 }
 0x24f   : > { %960 = vadd.xlane.f32.xlu1 %v959_v21 }
 0x255   : > { %v1031_v22 = vpop.permute.xlu0 %1030 }
 0x256   : > { %1051 = vmatpush.msrb.mxu2 %v1031_v22 }
 0x268   : > { %992 = vrot.lane.b32.xlu1 %v3122_v7, %s3406_s14  ;;  %s880_s14 = scalar_lea.vmem %s3432_s4, %s3100_s23 }
 0x270   : > { %1102 = vrot.lane.b32.xlu1 %v3122_v7, %s3408_s25 }
 0x2c2   : > { %v961_v23 = vpop.xlane.xlu1 %960 }
 0x2c3   : > { %2376 = vrcp.f32 %v961_v23 }
 0x2c9   : > { %v2377_v24 = vpop.eup %2376 }
 0x2ca   : > { %v963_v25 = vmul.f32 %v2377_v24, %v2375_v20 }
 0x2cc   : > { %2174 = vmatmul.msk.f32.vlgmr.msra.gmra.mxu2 %vm927_vm1, %v963_v25 }
 0x2cd   : > { %1074 = vmatpush.msra.mxu2 %v920_v53 }
 0x2da   : > { %v993_v27 = vpop.permute.xlu1 %992 }
 0x2db   : > { %2175 = vmatpush.xpose.msk.msra.mxu3 %vm927_vm1, %v993_v27 }
 0x2de   : > { %2176 = vmatmul.msk.f32.vlgmr.msra.gmra.mxu3 %vm927_vm1, %v991_v8 }
 0x2df   : > { %1097 = vmatpush.msrb.mxu3 %v919_v26 }
 0x2e1   : > { %2184 = vmatpush.xpose.msk.msra.mxu3 %vm927_vm1, %v1195_v10 }
 0x2e2   : > { %v1103_v28 = vpop.permute.xlu1 %1102 }
 0x2e3   : > { %2181 = vmatmul.msk.f32.vlgmr.msra.gmra.mxu0 %vm927_vm1, %v1103_v28 }
 0x34f   : > { %v987_v29 = vpop.f32.mrf.mxu2 }
 0x350   : > { %2179 = vmatmul.msk.f32.vlgmr.msrb.gmra.mxu3 %vm927_vm1, %v987_v29 }
 0x358   : > { %2185 = vmatmul.msk.f32.vlgmr.msra.gmra.mxu3 %vm927_vm1, %v1193_v11 }
 0x360   : > { %v1127_v30 = vpop.f32.mrf.mxu0 }
 0x361   : > { %v1130_v31 = vmul.f32 0.35355338, %v1127_v30  ;;  %v1015_v32 = vpop.f32.mrf.mxu3  ;;  %v1360_v30 = vld [vmem:[%s3389_s10 + $0x18] sm:$0xff] }
 0x362   : > { %v1018_v33 = vmul.f32 0.35355338, %v1015_v32  ;;  %1380 = vmatpush.msrb.mxu3 %v1360_v30  ;;  %v1358_v32 = vld [vmem:[%s3389_s10 + $0x8] sm:$0xff] }
 0x363   : > { %v1131_v34 = vsel %vm927_vm1, %v1130_v31, -inf }
 0x364   : > { %1132 = vmax.xlane.f32.xlu0 %v1131_v34  ;;  %v1019_v35 = vsel %vm927_vm1, %v1018_v33, -inf  ;;  %v886_v34 = vld [vmem:[%s880_s14] sm:$0xff]  ;;  %s3433_s14 = smov 112  }
 0x365   : > { %1020 = vmax.xlane.f32.xlu2 %v1019_v35  ;;  %v1329_v35 = vld [vmem:[%s3387_s8 + $0x18] sm:$0xff] }
 0x366   : > { %1349 = vmatpush.msrb.mxu1 %v1329_v35 }
 0x3d3   : > { %v1099_v36 = vpop.f32.mrf.mxu3 }
 0x3d7   : > { %v1133_v37 = vpop.xlane.xlu0 %1132 }
 0x3d8   : > { %v1021_v38 = vpop.xlane.xlu2 %1020  ;;  %v1134_v40 = vsub.f32 %v1130_v31, %v1133_v37  ;;  %v1359_v31 = vld [vmem:[%s3389_s10 + $0x10] sm:$0xff]  ;;  %v1327_v37 = vld [vmem:[%s3387_s8 + $0x8] sm:$0xff] }
 0x3d9   : > { %v1022_v39 = vsub.f32 %v1018_v33, %v1021_v38  ;;  %1381 = vmatpush.msrb.mxu3 %v1359_v31  ;;  %v1357_v33 = vld [vmem:[%s3389_s10] sm:$0xff] }
 0x3da   : > { %v1135_v45 = vmul.f32 1.442695, %v1134_v40  ;;  %v1326_v38 = vld [vmem:[%s3387_s8] sm:$0xff] }
 0x3db   : > { %v1023_v41 = vmul.f32 1.442695, %v1022_v39  ;;  %v1217_v42 = vpop.f32.mrf.mxu3  ;;  %1382 = vmatpush.msrb.mxu3 %v1358_v32 }
 0x3dc   : > { %v1220_v43 = vmul.f32 0.35355338, %v1217_v42 }
 0x3dd   : > { %2378 = vpow2.f32 %v1023_v41  ;;  %1383 = vmatpush.msrb.mxu3 %v1357_v33 }
 0x3de   : > { %v1221_v44 = vsel %vm927_vm1, %v1220_v43, -inf  ;;  %2380 = vpow2.f32 %v1135_v45  ;;  %2189 = vmatmul.msk.f32.vlgmr.msrb.gmra.mxu3 %vm895_vm0, %v886_v34 }
 0x3df   : > { %1222 = vmax.xlane.f32.xlu2 %v1221_v44 }
 0x3e3   : > { %v2379_v46 = vpop.eup %2378 }
 0x3e4   : > { %v1025_v47 = vsel %vm927_vm1, %v2379_v46, 0.0  ;;  %v2381_v48 = vpop.eup %2380 }
 0x3e5   : > { %1026 = vadd.xlane.f32.xlu1 %v1025_v47  ;;  %v1137_v49 = vsel %vm927_vm1, %v2381_v48, 0.0 }
 0x3ed   : > { %1138 = vadd.xlane.f32.xlu1 %v1137_v49 }
 0x406   : > { %1142 = vrot.lane.b32.xlu1 %v3122_v7, %s2862_s7 }
 0x452   : > { %v1223_v50 = vpop.xlane.xlu2 %1222 }
 0x453   : > { %v1224_v51 = vsub.f32 %v1220_v43, %v1223_v50 }
 0x455   : > { %v1225_v52 = vmul.f32 1.442695, %v1224_v51  ;;  %v2365_v51 = vld [vmem:[#allocation7] ss:$0 sm:$0xff] }
 0x457   : > { %2382 = vpow2.f32 %v1225_v52 }
 0x458   : > { %v1027_v54 = vpop.xlane.xlu1 %1026 }
 0x459   : > { %2384 = vrcp.f32 %v1027_v54  ;;  %v2366_v54 = vld [vmem:[#allocation10] ss:$0 sm:$0xff] }
 0x45d   : > { %v2383_v55 = vpop.eup %2382 }
 0x45e   : > { %v1227_v56 = vsel %vm927_vm1, %v2383_v55, 0.0 }
 0x45f   : > { %v2385_v57 = vpop.eup %2384  ;;  %1228 = vadd.xlane.f32.xlu2 %v1227_v56 }
 0x460   : > { %v1029_v58 = vmul.f32 %v2385_v57, %v2379_v46  ;;  %v1139_v59 = vpop.xlane.xlu1 %1138  ;;  %v2367_v57 = vld [vmem:[#allocation9] ss:$0 sm:$0xff] }
 0x462   : > { %2177 = vmatmul.msk.f32.vlgmr.msrb.gmra.mxu2 %vm927_vm1, %v1029_v58 }
 0x477   : > { %1232 = vrot.lane.b32.xlu2 %v3122_v7, %s2863_s29  ;;  %s884_s29 = scalar_lea.vmem %s3401_s22, %s3100_s23 }
 0x478   : > { %v1143_v60 = vpop.permute.xlu1 %1142 }
 0x479   : > { %1163 = vmatpush.msrb.mxu2 %v1143_v60 }
 0x4d2   : > { %v1229_v61 = vpop.xlane.xlu2 %1228 }
 0x4d3   : > { %2386 = vrcp.f32 %v1229_v61 }
 0x4d4   : > { %2388 = vrcp.f32 %v1139_v59 }
 0x4d5   : > { %2390 = vrcp.f32 %v2864_v19 }
 0x4d9   : > { %v2387_v62 = vpop.eup %2386 }
 0x4da   : > { %v1231_v63 = vmul.f32 %v2387_v62, %v2383_v55  ;;  %v1233_v0 = vpop.permute.xlu2 %1232  ;;  %v2389_v2 = vpop.eup %2388 }
 0x4db   : > { %1253 = vmatpush.msrb.mxu0 %v1233_v0  ;;  %v1141_v3 = vmul.f32 %v2389_v2, %v2381_v48  ;;  %v2391_v20 = vpop.eup %2390  ;;  %v2364_v48 = vld [vmem:[#allocation6] ss:$0 sm:$0xff]  ;;  %v1385_v55 = vpop.f32.mrf.mxu3 }
 0x4dc   : > { %2186 = vmatmul.msk.f32.vlgmr.msrb.gmra.mxu0 %vm927_vm1, %v1231_v63  ;;  %v1293_v21 = vmul.f32 32.0, %v2391_v20  ;;  %vm1297_vm2 = vweird.f32 %v2391_v20  ;;  %v3219_v56 = vadd.f32 %v2366_v54, %v1385_v55 }
 0x4de   : > { %v1294_v22 = vsub.f32 1.0, %v1293_v21  ;;  %2190 = vmatpush.xpose.msk.msra.mxu0 %vm927_vm1, %v3219_v56 }
 0x4e0   : > { %v1295_v23 = vmul.f32 %v2391_v20, %v1294_v22 }
 0x4e2   : > { %v1296_v24 = vadd.f32 %v2391_v20, %v1295_v23 }
 0x4e4   : > { %v3181_v25 = vsel %vm1297_vm2, %v2391_v20, %v1296_v24 }
 0x4e5   : > { %v1053_v1 = vpop.f32.mrf.mxu2 }
 0x4e6   : > { %2178 = vmatmul.msk.f32.vlgmr.msra.gmra.mxu2 %vm927_vm1, %v1053_v1 }
 0x4e7   : > { %1276 = vmatpush.msra.mxu2 %v922_v5 }
 0x4ee   : > { %2182 = vmatmul.msk.f32.vlgmr.msrb.gmra.mxu2 %vm927_vm1, %v1141_v3 }
 0x559   : > { %v1255_v7 = vpop.f32.mrf.mxu0 }
 0x55a   : > { %2187 = vmatmul.msk.f32.vlgmr.msra.gmra.mxu2 %vm927_vm1, %v1255_v7 }
 0x569   : > { %v1076_v8 = vpop.f32.mrf.mxu2 }
 0x56a   : > { %v1100_v10 = vadd.f32 %v1099_v36, %v1076_v8  ;;  %v1328_v36 = vld [vmem:[%s3387_s8 + $0x10] sm:$0xff] }
 0x56b   : > { %1350 = vmatpush.msrb.mxu1 %v1328_v36 }
 0x56d   : > { %1351 = vmatpush.msrb.mxu1 %v1327_v37 }
 0x56f   : > { %1352 = vmatpush.msrb.mxu1 %v1326_v38 }
 0x571   : > { %v1165_v9 = vpop.f32.mrf.mxu2 }
 0x572   : > { %2183 = vmatmul.msk.f32.vlgmr.msra.gmra.mxu1 %vm927_vm1, %v1165_v9 }
 0x5dd   : > { %v1278_v14 = vpop.f32.mrf.mxu2 }
 0x5ef   : > { %v1188_v11 = vpop.f32.mrf.mxu1 }
 0x5f0   : > { %v1191_v12 = vadd.f32 %v1188_v11, %v1100_v10  ;;  %v1388_v10 = vld [vmem:[%s3391_s12] sm:$0xff] }
 0x5f2   : > { %v1281_v15 = vadd.f32 %v1278_v14, %v1191_v12 }
 0x5f4   : > { %v1285_v16 = vadd.f32 %v2363_v13, %v1281_v15 }
 0x5f6   : > { %v1286_v17 = vadd.f32 %v1285_v16, %v3118_v4 }
 0x5f8   : > { %v1289_v18 = vsel %vm895_vm0, %v1286_v17, 0.0 }
 0x5f9   : > { %1290 = vadd.xlane.f32.xlu0 %v1289_v18 }
 0x66c   : > { %v1291_v26 = vpop.xlane.xlu0 %1290 }
 0x66d   : > { %v1299_v27 = vmul.f32 %v3181_v25, %v1291_v26 }
 0x66f   : > { %v1300_v28 = vsub.f32 %v1286_v17, %v1299_v27 }
 0x671   : > { %v1301_v29 = vmul.f32 %v1300_v28, %v1300_v28 }
 0x673   : > { %v1302_v4 = vsel %vm895_vm0, %v1301_v29, 0.0 }
 0x674   : > { %1303 = vadd.xlane.f32.xlu1 %v1302_v4 }
 0x68d   : > { %1661 = vrot.lane.b32.xlu1 %v3219_v56, %s2857_s28 }
 0x6e7   : > { %v1304_v39 = vpop.xlane.xlu1 %1303 }
 0x6e8   : > { %v1305_v40 = vmul.f32 %v1304_v39, %v3181_v25 }
 0x6ea   : > { %v1306_v41 = vadd.f32 1e-05, %v1305_v40 }
 0x6ec   : > { %2392 = vrsqrt.f32 %v1306_v41  ;;  %vm1313_vm4 = vweird.f32 %v1306_v41 }
 0x6f2   : > { %v2393_v42 = vpop.eup %2392 }
 0x6f3   : > { %v1308_v43 = vmul.f32 %v2393_v42, %v1306_v41  ;;  %vm1314_vm3 = vweird.f32 %v2393_v42 }
 0x6f4   : > { %vm1315_vm5 = vmor %vm1313_vm4, %vm1314_vm3 }
 0x6f5   : > { %v1309_v44 = vmul.f32 %v2393_v42, %v1308_v43 }
 0x6f7   : > { %v1310_v45 = vmul.f32 0.5, %v1309_v44 }
 0x6f9   : > { %v1311_v46 = vsub.f32 1.5, %v1310_v45 }
 0x6fb   : > { %v1312_v47 = vmul.f32 %v2393_v42, %v1311_v46 }
 0x6fd   : > { %v1316_v49 = vsel %vm1315_vm5, %v2393_v42, %v1312_v47 }
 0x6fe   : > { %v1317_v50 = vmul.f32 %v1316_v49, %v1300_v28 }
 0x6ff   : > { %v1662_v14 = vpop.permute.xlu1 %1661 }
 0x700   : > { %v1321_v52 = vmul.f32 %v2364_v48, %v1317_v50  ;;  %v1389_v50 = vld [vmem:[%s3391_s12 + $0x8] sm:$0xff] }
 0x701   : > { %1541 = vmatpush.msrb.mxu0 %v1389_v50  ;;  %v1845_v50 = vld [vmem:[%s3397_s18] sm:$0xff] }
 0x702   : > { %v3215_v53 = vadd.f32 %v2365_v51, %v1321_v52  ;;  %v1390_v51 = vld [vmem:[%s3391_s12 + $0x10] sm:$0xff] }
 0x704   : > { %2188 = vmatmul.msk.f32.vlgmr.msrb.gmra.mxu1 %vm895_vm0, %v3215_v53 }
 0x781   : > { %v1354_v58 = vpop.f32.mrf.mxu1 }
 0x782   : > { %v1355_v59 = vadd.f32 %v2367_v57, %v1354_v58 }
 0x784   : > { %2191 = vmatmul.msk.f32.vlgmr.msra.gmra.mxu0 %vm927_vm1, %v1355_v59 }
 0x785   : > { %1653 = vmatpush.msra.mxu0 %v1390_v51  ;;  %v1864_v51 = vld [vmem:[%s3397_s18 + $0x98] sm:$0xff] }
 0x801   : > { %v1416_v60 = vpop.f32.mrf.mxu0 }
 0x802   : > { %v1419_v61 = vmul.f32 0.35355338, %v1416_v60 }
 0x804   : > { %v1420_v62 = vsel %vm927_vm1, %v1419_v61, -inf }
 0x805   : > { %1421 = vmax.xlane.f32.xlu0 %v1420_v62 }
 0x819   : > { %1431 = vrot.lane.b32.xlu0 %v3219_v56, %s2854_s26 }
 0x821   : > { %1459 = vrot.lane.b32.xlu0 %v3219_v56, %s2853_s2 }
 0x829   : > { %1457 = vrot.lane.b32.xlu0 %v1355_v59, %s2853_s2 }
 0x831   : > { %1571 = vrot.lane.b32.xlu0 %v3219_v56, %s3433_s14 }
 0x839   : > { %1569 = vrot.lane.b32.xlu0 %v1355_v59, %s3433_s14 }
 0x878   : > { %v1422_v63 = vpop.xlane.xlu0 %1421 }
 0x879   : > { %v1423_v0 = vsub.f32 %v1419_v61, %v1422_v63 }
 0x87b   : > { %v1424_v1 = vmul.f32 1.442695, %v1423_v0 }
 0x87d   : > { %2394 = vpow2.f32 %v1424_v1  ;;  %v2368_v1 = vld [vmem:[#allocation12] ss:$0 sm:$0xff] }
 0x883   : > { %v2395_v2 = vpop.eup %2394 }
 0x884   : > { %v1426_v3 = vsel %vm927_vm1, %v2395_v2, 0.0 }
 0x885   : > { %1427 = vadd.xlane.f32.xlu2 %v1426_v3 }
 0x88b   : > { %v1432_v5 = vpop.permute.xlu0 %1431 }
 0x88c   : > { %1452 = vmatpush.msrb.mxu2 %v1432_v5 }
 0x88e   : > { %1564 = vmatpush.msra.mxu2 %v1388_v10 }
 0x893   : > { %v1460_v6 = vpop.permute.xlu0 %1459 }
 0x894   : > { %2193 = vmatpush.xpose.msk.msra.mxu1 %vm927_vm1, %v1460_v6 }
 0x89b   : > { %v1458_v7 = vpop.permute.xlu0 %1457 }
 0x89c   : > { %2194 = vmatmul.msk.f32.vlgmr.msra.gmra.mxu1 %vm927_vm1, %v1458_v7 }
 0x89d   : > { %1659 = vrot.lane.b32.xlu2 %v1355_v59, %s2857_s28  ;;  %s3434_s28 = smov 80   ;;  %v1391_v59 = vld [vmem:[%s3391_s12 + $0x18] sm:$0xff] }
 0x8a3   : > { %v1572_v8 = vpop.permute.xlu0 %1571 }
 0x8a4   : > { %2198 = vmatpush.xpose.msk.msrb.mxu1 %vm927_vm1, %v1572_v8 }
 0x8ab   : > { %v1570_v9 = vpop.permute.xlu0 %1569 }
 0x8ac   : > { %2199 = vmatmul.msk.f32.vlgmr.msrb.gmra.mxu1 %vm927_vm1, %v1570_v9 }
 0x8f8   : > { %v1428_v11 = vpop.xlane.xlu2 %1427 }
 0x8f9   : > { %2396 = vrcp.f32 %v1428_v11 }
 0x8ff   : > { %v2397_v12 = vpop.eup %2396 }
 0x900   : > { %v1430_v13 = vmul.f32 %v2397_v12, %v2395_v2  ;;  %v1660_v22 = vpop.permute.xlu2 %1659 }
 0x902   : > { %2192 = vmatmul.msk.f32.vlgmr.msrb.gmra.mxu2 %vm927_vm1, %v1430_v13  ;;  %v1792_v13 = vld [vmem:[%s3395_s16 + $0x30] sm:$0xff] }
 0x903   : > { %2202 = vmatpush.xpose.msk.msrb.mxu2 %vm927_vm1, %v1662_v14  ;;  %v1793_v14 = vld [vmem:[%s3395_s16 + $0x38] sm:$0xff] }
 0x919   : > { %v1482_v15 = vpop.f32.mrf.mxu1 }
 0x91a   : > { %v1485_v16 = vmul.f32 0.35355338, %v1482_v15  ;;  %v1791_v15 = vld [vmem:[%s3395_s16 + $0x28] sm:$0xff] }
 0x91c   : > { %v1486_v17 = vsel %vm927_vm1, %v1485_v16, -inf }
 0x91d   : > { %1487 = vmax.xlane.f32.xlu0 %v1486_v17  ;;  %v1789_v17 = vld [vmem:[%s3395_s16 + $0x18] sm:$0xff] }
 0x929   : > { %v1594_v18 = vpop.f32.mrf.mxu1 }
 0x92a   : > { %v1597_v19 = vmul.f32 0.35355338, %v1594_v18  ;;  %v1786_v18 = vld [vmem:[%s3395_s16] sm:$0xff] }
 0x92c   : > { %v1598_v20 = vsel %vm927_vm1, %v1597_v19, -inf }
 0x92d   : > { %1599 = vmax.xlane.f32.xlu1 %v1598_v20  ;;  %v1860_v20 = vld [vmem:[%s3397_s18 + $0x78] sm:$0xff] }
 0x985   : > { %v1454_v21 = vpop.f32.mrf.mxu2 }
 0x986   : > { %2197 = vmatmul.msk.f32.vlgmr.msra.gmra.mxu2 %vm927_vm1, %v1454_v21  ;;  %v1859_v21 = vld [vmem:[%s3397_s18 + $0x70] sm:$0xff] }
 0x987   : > { %1835 = vmatpush.msra.mxu2 %v1793_v14 }
 0x989   : > { %1836 = vmatpush.msra.mxu2 %v1791_v15 }
 0x98b   : > { %1837 = vmatpush.msra.mxu2 %v1789_v17 }
 0x98e   : > { %2203 = vmatmul.msk.f32.vlgmr.msrb.gmra.mxu2 %vm927_vm1, %v1660_v22  ;;  %v1858_v22 = vld [vmem:[%s3397_s18 + $0x68] sm:$0xff] }
 0x990   : > { %v1488_v23 = vpop.xlane.xlu0 %1487 }
 0x991   : > { %v1489_v24 = vsub.f32 %v1485_v16, %v1488_v23  ;;  %v1788_v16 = vld [vmem:[%s3395_s16 + $0x10] sm:$0xff] }
 0x993   : > { %v1490_v26 = vmul.f32 1.442695, %v1489_v24 }
 0x995   : > { %2398 = vpow2.f32 %v1490_v26  ;;  %v1857_v26 = vld [vmem:[%s3397_s18 + $0x60] sm:$0xff] }
 0x99b   : > { %v2399_v27 = vpop.eup %2398 }
 0x99c   : > { %v1492_v28 = vsel %vm927_vm1, %v2399_v27, 0.0 }
 0x99d   : > { %1493 = vadd.xlane.f32.xlu0 %v1492_v28  ;;  %v1856_v28 = vld [vmem:[%s3397_s18 + $0x58] sm:$0xff] }
 0x9a0   : > { %v1600_v29 = vpop.xlane.xlu1 %1599 }
 0x9a1   : > { %v1601_v4 = vsub.f32 %v1597_v19, %v1600_v29  ;;  %v1787_v19 = vld [vmem:[%s3395_s16 + $0x8] sm:$0xff]  ;;  %v1855_v29 = vld [vmem:[%s3397_s18 + $0x50] sm:$0xff] }
 0x9a2   : > { %1838 = vmatpush.msra.mxu2 %v1787_v19 }
 0x9a3   : > { %v1602_v30 = vmul.f32 1.442695, %v1601_v4  ;;  %v1854_v4 = vld [vmem:[%s3397_s18 + $0x48] sm:$0xff] }
 0x9a5   : > { %2400 = vpow2.f32 %v1602_v30  ;;  %v1853_v30 = vld [vmem:[%s3397_s18 + $0x40] sm:$0xff] }
 0x9ab   : > { %v2401_v31 = vpop.eup %2400 }
 0x9ac   : > { %v1604_v32 = vsel %vm927_vm1, %v2401_v31, 0.0 }
 0x9ad   : > { %1605 = vadd.xlane.f32.xlu1 %v1604_v32  ;;  %v1852_v32 = vld [vmem:[%s3397_s18 + $0x38] sm:$0xff] }
 0x9c6   : > { %1609 = vrot.lane.b32.xlu1 %v3219_v56, %s3434_s28 }
 0xa09   : > { %v1566_v33 = vpop.f32.mrf.mxu2 }
 0xa10   : > { %v1494_v37 = vpop.xlane.xlu0 %1493 }
 0xa11   : > { %v1684_v34 = vpop.f32.mrf.mxu2  ;;  %2402 = vrcp.f32 %v1494_v37 }
 0xa12   : > { %v1687_v35 = vmul.f32 0.35355338, %v1684_v34  ;;  %v1851_v34 = vld [vmem:[%s3397_s18 + $0x30] sm:$0xff] }
 0xa14   : > { %v1688_v36 = vsel %vm927_vm1, %v1687_v35, -inf }
 0xa15   : > { %1689 = vmax.xlane.f32.xlu2 %v1688_v36  ;;  %v1850_v36 = vld [vmem:[%s3397_s18 + $0x28] sm:$0xff] }
 0xa17   : > { %v2403_v42 = vpop.eup %2402 }
 0xa18   : > { %v1496_v43 = vmul.f32 %v2403_v42, %v2399_v27  ;;  %v2369_v42 = vld [vmem:[#allocation13] ss:$0 sm:$0xff] }
 0xa20   : > { %v1606_v40 = vpop.xlane.xlu1 %1605 }
 0xa2d   : > { %1497 = vrot.lane.b32.xlu2 %v3219_v56, %s3435_s11 }
 0xa38   : > { %v1610_v45 = vpop.permute.xlu1 %1609 }
 0xa88   : > { %v1690_v38 = vpop.xlane.xlu2 %1689 }
 0xa89   : > { %v1691_v39 = vsub.f32 %v1687_v35, %v1690_v38  ;;  %v1849_v38 = vld [vmem:[%s3397_s18 + $0x20] sm:$0xff] }
 0xa8b   : > { %v1692_v41 = vmul.f32 1.442695, %v1691_v39 }
 0xa8d   : > { %2404 = vpow2.f32 %v1692_v41 }
 0xa8e   : > { %2406 = vrcp.f32 %v1606_v40  ;;  %v1848_v40 = vld [vmem:[%s3397_s18 + $0x18] sm:$0xff] }
 0xa90   : > { %v1498_v44 = vpop.permute.xlu2 %1497 }
 0xa91   : > { %1518 = vmatpush.msra.mxu3 %v1498_v44 }
 0xa92   : > { %2195 = vmatmul.msk.f32.vlgmr.msra.gmra.mxu3 %vm927_vm1, %v1496_v43 }
 0xa93   : > { %v2405_v46 = vpop.eup %2404  ;;  %1630 = vmatpush.msrb.mxu3 %v1610_v45  ;;  %v2370_v45 = vld [vmem:[#allocation15] ss:$0 sm:$0xff] }
 0xa94   : > { %v1694_v47 = vsel %vm927_vm1, %v2405_v46, 0.0  ;;  %v2407_v48 = vpop.eup %2406 }
 0xa95   : > { %1695 = vadd.xlane.f32.xlu0 %v1694_v47  ;;  %v1608_v49 = vmul.f32 %v2407_v48, %v2401_v31  ;;  %1743 = vmatpush.msra.mxu3 %v1391_v59  ;;  %v1847_v48 = vld [vmem:[%s3397_s18 + $0x10] sm:$0xff] }
 0xa9a   : > { %2200 = vmatmul.msk.f32.vlgmr.msrb.gmra.mxu3 %vm927_vm1, %v1608_v49  ;;  %v1846_v49 = vld [vmem:[%s3397_s18 + $0x8] sm:$0xff] }
 0xa9b   : > { %1904 = vmatpush.msrb.mxu3 %v1864_v51 }
 0xaa9   : > { %1699 = vrot.lane.b32.xlu0 %v3219_v56, %s3436_s27 }
 0xb08   : > { %v1696_v52 = vpop.xlane.xlu0 %1695 }
 0xb09   : > { %2408 = vrcp.f32 %v1696_v52  ;;  %v1863_v52 = vld [vmem:[%s3397_s18 + $0x90] sm:$0xff] }
 0xb0a   : > { %1905 = vmatpush.msrb.mxu3 %v1863_v52 }
 0xb0f   : > { %v2409_v55 = vpop.eup %2408 }
 0xb10   : > { %v1698_v57 = vmul.f32 %v2409_v55, %v2405_v46  ;;  %v1861_v55 = vld [vmem:[%s3397_s18 + $0x80] sm:$0xff] }
 0xb15   : > { %v1520_v54 = vpop.f32.mrf.mxu3 }
 0xb16   : > { %2196 = vmatmul.msk.f32.vlgmr.msrb.gmra.mxu0 %vm927_vm1, %v1520_v54  ;;  %v1862_v54 = vld [vmem:[%s3397_s18 + $0x88] sm:$0xff] }
 0xb17   : > { %1815 = vmatpush.msrb.mxu0 %v1792_v13  ;;  %1906 = vmatpush.msrb.mxu3 %v1862_v54 }
 0xb19   : > { %1907 = vmatpush.msrb.mxu3 %v1861_v55 }
 0xb1b   : > { %v1700_v58 = vpop.permute.xlu0 %1699 }
 0xb1c   : > { %1720 = vmatpush.msra.mxu1 %v1700_v58 }
 0xb1d   : > { %v1632_v56 = vpop.f32.mrf.mxu3  ;;  %2204 = vmatmul.msk.f32.vlgmr.msra.gmra.mxu1 %vm927_vm1, %v1698_v57  ;;  %v1794_v57 = vld [vmem:[#allocation16] sm:$0x3] }
 0xb1e   : > { %2201 = vmatmul.msk.f32.vlgmr.msra.gmra.mxu0 %vm927_vm1, %v1632_v56  ;;  %1872 = vmatpush.msrb.mxu1 %v1860_v20  ;;  %v1796_v58 = vperm.slane %v1794_v57, 0 }
 0xb20   : > { %1873 = vmatpush.msrb.mxu1 %v1859_v21 }
 0xb22   : > { %1874 = vmatpush.msrb.mxu1 %v1858_v22  ;;  %v2372_v22 = vld [vmem:[#allocation19] ss:$0 sm:$0xff] }
 0xb24   : > { %1875 = vmatpush.msrb.mxu1 %v1857_v26 }
 0xb26   : > { %1876 = vmatpush.msrb.mxu1 %v1856_v28 }
 0xb28   : > { %1877 = vmatpush.msrb.mxu1 %v1855_v29 }
 0xb2a   : > { %1878 = vmatpush.msrb.mxu1 %v1854_v4 }
 0xb2c   : > { %1879 = vmatpush.msrb.mxu1 %v1853_v30 }
 0xb2e   : > { %1880 = vmatpush.msrb.mxu1 %v1852_v32 }
 0xb30   : > { %1881 = vmatpush.msrb.mxu1 %v1851_v34 }
 0xb32   : > { %1882 = vmatpush.msrb.mxu1 %v1850_v36 }
 0xb34   : > { %1883 = vmatpush.msrb.mxu1 %v1849_v38 }
 0xb36   : > { %1884 = vmatpush.msrb.mxu1 %v1848_v40 }
 0xb38   : > { %1885 = vmatpush.msrb.mxu1 %v1847_v48 }
 0xb3a   : > { %1886 = vmatpush.msrb.mxu1 %v1846_v49 }
 0xb3c   : > { %1887 = vmatpush.msrb.mxu1 %v1845_v50 }
 0xb93   : > { %v1543_v61 = vpop.f32.mrf.mxu0 }
 0xb94   : > { %v1567_v63 = vadd.f32 %v1566_v33, %v1543_v61  ;;  %v1797_v61 = vperm.slane %v1794_v57, 1 }
 0xb9a   : > { %v1722_v60 = vpop.f32.mrf.mxu1 }
 0xb9b   : > { %2205 = vmatmul.msk.f32.vlgmr.msra.gmra.mxu3 %vm927_vm1, %v1722_v60  ;;  %v1655_v62 = vpop.f32.mrf.mxu0 }
 0xb9c   : > { %v1658_v0 = vadd.f32 %v1655_v62, %v1567_v63 }
 0xc1e   : > { %v1745_v2 = vpop.f32.mrf.mxu3 }
 0xc1f   : > { %v1748_v3 = vadd.f32 %v1745_v2, %v1658_v0 }
 0xc21   : > { %v1752_v5 = vadd.f32 %v2368_v1, %v1748_v3  ;;  %v2371_v1 = vld [vmem:[#allocation18] ss:$0 sm:$0xff] }
 0xc23   : > { %v1753_v6 = vadd.f32 %v1752_v5, %v3215_v53  ;;  %v1790_v53 = vld [vmem:[%s3395_s16 + $0x20] sm:$0xff] }
 0xc24   : > { %1816 = vmatpush.msrb.mxu0 %v1790_v53 }
 0xc25   : > { %v1756_v7 = vsel %vm895_vm0, %v1753_v6, 0.0 }
 0xc26   : > { %1757 = vadd.xlane.f32.xlu2 %v1756_v7  ;;  %1817 = vmatpush.msrb.mxu0 %v1788_v16 }
 0xc28   : > { %1818 = vmatpush.msrb.mxu0 %v1786_v18 }
 0xc99   : > { %v1758_v8 = vpop.xlane.xlu2 %1757 }
 0xc9a   : > { %v1759_v9 = vmul.f32 %v1758_v8, %v3181_v25 }
 0xc9c   : > { %v1760_v10 = vsub.f32 %v1753_v6, %v1759_v9 }
 0xc9e   : > { %v1761_v11 = vmul.f32 %v1760_v10, %v1760_v10 }
 0xca0   : > { %v1762_v12 = vsel %vm895_vm0, %v1761_v11, 0.0 }
 0xca1   : > { %1763 = vadd.xlane.f32.xlu0 %v1762_v12 }
 0xd14   : > { %v1764_v23 = vpop.xlane.xlu0 %1763 }
 0xd15   : > { %v1765_v24 = vmul.f32 %v1764_v23, %v3181_v25 }
 0xd17   : > { %v1766_v27 = vadd.f32 1e-05, %v1765_v24  ;;  %v2373_v24 = vld [vmem:[#allocation21] ss:$0 sm:$0xff] }
 0xd19   : > { %2410 = vrsqrt.f32 %v1766_v27  ;;  %vm1773_vm7 = vweird.f32 %v1766_v27 }
 0xd1f   : > { %v2411_v31 = vpop.eup %2410 }
 0xd20   : > { %v1768_v33 = vmul.f32 %v2411_v31, %v1766_v27  ;;  %vm1774_vm6 = vweird.f32 %v2411_v31 }
 0xd21   : > { %vm1775_vm8 = vmor %vm1773_vm7, %vm1774_vm6 }
 0xd22   : > { %v1769_v35 = vmul.f32 %v2411_v31, %v1768_v33 }
 0xd24   : > { %v1770_v37 = vmul.f32 0.5, %v1769_v35 }
 0xd26   : > { %v1771_v39 = vsub.f32 1.5, %v1770_v37 }
 0xd28   : > { %v1772_v41 = vmul.f32 %v2411_v31, %v1771_v39 }
 0xd2a   : > { %v1776_v43 = vsel %vm1775_vm8, %v2411_v31, %v1772_v41 }
 0xd2b   : > { %v1777_v44 = vmul.f32 %v1776_v43, %v1760_v10 }
 0xd2d   : > { %v1781_v46 = vmul.f32 %v2369_v42, %v1777_v44 }
 0xd2f   : > { %v1785_v47 = vadd.f32 %v2370_v45, %v1781_v46 }
 0xd31   : > { %2206 = vmatmul.msk.f32.vlgmr.msrb.gmra.mxu0 %vm895_vm0, %v1785_v47  ;;  %2207 = vmatmul.msk.f32.vlgmr.msra.gmra.mxu2 %vm895_vm0, %v1785_v47 }
 0xdae   : > { %v1820_v56 = vpop.f32.mrf.mxu0 }
 0xdaf   : > { %v1821_v59 = vadd.f32 %v1820_v56, %v1796_v58 }
 0xdb1   : > { %v1843_v60 = vmax.f32 %v1821_v59, 0.0 }
 0xdb3   : > { %1888 = vmatmul.f32.vlgmr.msrb.gmra.mxu1 %v1843_v60 }
 0xdb4   : > { %v1840_v62 = vpop.f32.mrf.mxu2 }
 0xdb5   : > { %v1841_v63 = vadd.f32 %v1840_v62, %v1797_v61 }
 0xdb7   : > { %v1844_v0 = vmax.f32 %v1841_v63, 0.0 }
 0xdb9   : > { %2208 = vmatmul.msk.f32.vlgmr.msrb.gmra.mxu3 %vm895_vm0, %v1844_v0 }
 0xe30   : > { %v1889_v2 = vpop.f32.mrf.mxu1 }
 0xe31   : > { %v1890_v3 = vadd.f32 %v2371_v1, %v1889_v2 }
 0xe3c   : > { %v1909_v5 = vpop.f32.mrf.mxu3 }
 0xe3d   : > { %v1910_v6 = vadd.f32 %v1909_v5, %v1890_v3 }
 0xe3f   : > { %v1912_v7 = vadd.f32 %v1910_v6, %v1785_v47 }
 0xe41   : > { %v1915_v8 = vsel %vm895_vm0, %v1912_v7, 0.0 }
 0xe42   : > { %1916 = vadd.xlane.f32.xlu1 %v1915_v8 }
 0xeb5   : > { %v1917_v9 = vpop.xlane.xlu1 %1916 }
 0xeb6   : > { %v1918_v10 = vmul.f32 %v1917_v9, %v3181_v25 }
 0xeb8   : > { %v1919_v11 = vsub.f32 %v1912_v7, %v1918_v10 }
 0xeba   : > { %v1920_v12 = vmul.f32 %v1919_v11, %v1919_v11 }
 0xebc   : > { %v1921_v13 = vsel %vm895_vm0, %v1920_v12, 0.0 }
 0xebd   : > { %1922 = vadd.xlane.f32.xlu2 %v1921_v13 }
 0xf30   : > { %v1923_v14 = vpop.xlane.xlu2 %1922 }
 0xf31   : > { %v1924_v53 = vmul.f32 %v1923_v14, %v3181_v25 }
 0xf33   : > { %v1925_v15 = vadd.f32 1e-05, %v1924_v53 }
 0xf35   : > { %2412 = vrsqrt.f32 %v1925_v15  ;;  %vm1932_vm10 = vweird.f32 %v1925_v15 }
 0xf3b   : > { %v2413_v16 = vpop.eup %2412 }
 0xf3c   : > { %v1927_v17 = vmul.f32 %v2413_v16, %v1925_v15  ;;  %vm1933_vm9 = vweird.f32 %v2413_v16 }
 0xf3d   : > { %vm1934_vm11 = vmor %vm1932_vm10, %vm1933_vm9 }
 0xf3e   : > { %v1928_v18 = vmul.f32 %v2413_v16, %v1927_v17 }
 0xf40   : > { %v1929_v19 = vmul.f32 0.5, %v1928_v18 }
 0xf42   : > { %v1930_v20 = vsub.f32 1.5, %v1929_v19 }
 0xf44   : > { %v1931_v21 = vmul.f32 %v2413_v16, %v1930_v20 }
 0xf46   : > { %v1935_v23 = vsel %vm1934_vm11, %v2413_v16, %v1931_v21 }
 0xf47   : > { %v1936_v26 = vmul.f32 %v1935_v23, %v1919_v11 }
 0xf49   : > { %v1940_v27 = vmul.f32 %v2372_v22, %v1936_v26 }
 0xf4b   : > { %v1944_v25 = vadd.f32 %v2373_v24, %v1940_v27 }
 0xf4d   : > { %1945 = vst.msk [vmem:[%s884_s29] sm:$0xff] %vm895_vm0, %v1944_v25 }
 0xf4e PF: > { %s3437_s5 = sld [smem:[#allocation29_spill]] }
 0xf54   : > { %s39_s3 = sadd.s32 1, %s3437_s5  }
 0xf55   : > { %p36_p7 = scmp.ge.s32.totalorder %s39_s3, 4  }
 0xf57   :  { %38 = sbr.rel (!%p36_p7) target bundleno = 18 (0x12), region = 194 }
 0xf5c   :  { %1965 = vsyncpa [#allocation3], 1 }
 0xf5d   :  { %1967 = vsyncpa [#allocation3 + $0x1], 1 }
 0xf5e   :  { %1968 = vsyncpa [#allocation5], 1 }
 0xf5f   :  { %1969 = vsyncpa [#allocation8], 1 }
 0xf60   :  { %1970 = vsyncpa [#allocation11], 1 }
 0xf61   :  { %1971 = vsyncpa [#allocation14], 1 }
 0xf62   :  { %1972 = vsyncpa [#allocation17], 1 }
 0xf63   :  { %1973 = vsyncpa [#allocation20], 1 }

</bundles_post_ra>
